<compile_context>
chip_gen: v7x
topology: tpu7x:2x2x1
jax: 0.10.0
libtpu: 0.0.40
codegen_flags: <defaults>
</compile_context>

<pallas_src>
import math

import jax
import jax.numpy as jnp
from jax.experimental import pallas as pl
from jax.experimental.pallas import tpu as pltpu


def _make_encoder_kernel(L, S, B, H, ND):
    """Builds the fused encoder kernel (all layers, all steps, both dirs)."""
    G = 4 * H          # gate width per direction (128 lanes for H=32)

    def kernel(*refs):
        x_ref = refs[0]                       # (S*B, E) embedded tokens
        w_refs = refs[1:1 + 3 * L]            # per layer: wih, whh, b
        out_ref = refs[1 + 3 * L]             # (ND, S*B, H)
        xg_scr = refs[2 + 3 * L]              # (S*B, ND*4H) hoisted projection
        act_a = refs[3 + 3 * L]               # (ND, S*B, H) inter-layer act
        act_b = refs[4 + 3 * L]               # (ND, S*B, H) inter-layer act

        for l in range(L):
            wih_ref = w_refs[3 * l + 0]       # (Din, ND*4H)
            whh_ref = w_refs[3 * l + 1]       # (ND*H, 4H)
            b_ref = w_refs[3 * l + 2]         # (1, ND*4H)
            src = None if l == 0 else (act_a if l % 2 == 1 else act_b)
            dst = out_ref if l == L - 1 else (act_a if l % 2 == 0 else act_b)

            # Hoisted, time-invariant half of the gate computation: one big
            # MXU matmul (M = S*B rows, N = ND*4H lanes) per layer for both
            # directions over the un-flipped input.
            wih = wih_ref[...]
            if l == 0:
                xg = jnp.dot(x_ref[...], wih,
                             preferred_element_type=jnp.float32)
            else:
                xg = jnp.dot(src[0], wih[:H, :],
                             preferred_element_type=jnp.float32)
                if ND == 2:
                    xg = xg + jnp.dot(src[1], wih[H:, :],
                                      preferred_element_type=jnp.float32)
            xg_scr[...] = xg + b_ref[...]

            whh = whh_ref[...]                 # loaded once; stays resident
            whh_f = whh[:H, :]
            h_f = jnp.zeros((B, H), jnp.float32)
            c_f = jnp.zeros((B, H), jnp.float32)
            if ND == 2:
                whh_b = whh[H:, :]
                h_b = jnp.zeros((B, H), jnp.float32)
                c_b = jnp.zeros((B, H), jnp.float32)

            # Statically unrolled recurrence; gate order is [i, f, o, g] so a
            # single sigmoid covers the contiguous [0:3H] slice.
            for t in range(S):
                g_f = xg_scr[t * B:(t + 1) * B, 0:G] + jnp.dot(
                    h_f, whh_f, preferred_element_type=jnp.float32)
                sg = jax.nn.sigmoid(g_f[:, :3 * H])
                gg = jnp.tanh(g_f[:, 3 * H:])
                c_f = sg[:, H:2 * H] * c_f + sg[:, 0:H] * gg
                h_f = sg[:, 2 * H:3 * H] * jnp.tanh(c_f)
                dst[0, t * B:(t + 1) * B, :] = h_f

                if ND == 2:
                    tb = S - 1 - t             # backward chain consumes time tb
                    g_b = xg_scr[tb * B:(tb + 1) * B, G:2 * G] + jnp.dot(
                        h_b, whh_b, preferred_element_type=jnp.float32)
                    sgb = jax.nn.sigmoid(g_b[:, :3 * H])
                    ggb = jnp.tanh(g_b[:, 3 * H:])
                    c_b = sgb[:, H:2 * H] * c_b + sgb[:, 0:H] * ggb
                    h_b = sgb[:, 2 * H:3 * H] * jnp.tanh(c_b)
                    dst[1, tb * B:(tb + 1) * B, :] = h_b

    return kernel


def encoder_lstm_forward(src_batch, kparams):
    """src_batch: (S, B) int32 token ids -> (S, B, ND*H) f32 (nn.LSTM output)."""
    emb = kparams['embedding']
    layers = kparams['layers']
    L = len(layers)
    H = layers[0]['whh'].shape[1] // 4
    ND = layers[0]['whh'].shape[0] // H

    # Embedding lookup stays as a (tiny) XLA gather.
    # TODO(synk): could be folded into the kernel via scalar-prefetched ids.
    x = emb[src_batch].astype(jnp.float32)               # (S, B, E)
    S, B, E = x.shape
    x_flat = x.reshape(S * B, E)                          # time-major row blocks

    kernel = _make_encoder_kernel(L, S, B, H, ND)
    flat_w = []
    for lyr in layers:
        flat_w += [lyr['wih'], lyr['whh'], lyr['b']]

    out = pl.pallas_call(
        kernel,
        out_shape=jax.ShapeDtypeStruct((ND, S * B, H), jnp.float32),
        scratch_shapes=[
            pltpu.VMEM((S * B, ND * 4 * H), jnp.float32),  # hoisted projection
            pltpu.VMEM((ND, S * B, H), jnp.float32),       # inter-layer act A
            pltpu.VMEM((ND, S * B, H), jnp.float32),       # inter-layer act B
        ],
    )(x_flat, *flat_w)

    out = out.reshape(ND, S, B, H)
    if ND == 2:
        # [fwd | bwd] concatenation at each time step (PyTorch layout).
        return jnp.concatenate([out[0], out[1]], axis=-1)
    return out[0]


# ----------------- parameter construction / layout preparation ----------------
def make_params(key, vocab_size, enc_embed_size, enc_hidden_size,
                enc_num_layers, enc_bidirectional):
    """PyTorch-convention params (gate order i,f,g,o; W shapes (4H, in))."""
    ND = 2 if enc_bidirectional else 1
    H = enc_hidden_size
    bound = 1.0 / math.sqrt(H)
    keys = jax.random.split(key, 1 + enc_num_layers)
    params = {'embedding': jax.random.normal(
        keys[0], (vocab_size, enc_embed_size), jnp.float32)}
    layers = []
    d_in = enc_embed_size
    for l in range(enc_num_layers):
        ks = jax.random.split(keys[1 + l], 4)
        u = lambda k, shape: jax.random.uniform(k, shape, jnp.float32,
                                                -bound, bound)
        layers.append({
            'w_ih': u(ks[0], (ND, 4 * H, d_in)),
            'w_hh': u(ks[1], (ND, 4 * H, H)),
            'b_ih': u(ks[2], (ND, 4 * H)),
            'b_hh': u(ks[3], (ND, 4 * H)),
        })
        d_in = ND * H
    params['layers'] = layers
    return params


def prepare_kernel_params(params):
    """PyTorch layout -> kernel layout.

    Per layer: wih (Din, ND*4H) merged [fwd | bwd] x-projection (y = x @ W),
    whh (ND*H, 4H) per-direction recurrent weights stacked along rows,
    b (1, ND*4H) = b_ih + b_hh folded.  Gate columns reordered i,f,g,o ->
    i,f,o,g so one sigmoid covers a contiguous 3H slice in the kernel.
    """
    layers = params['layers']
    H = layers[0]['w_hh'].shape[-1]
    ND = layers[0]['w_hh'].shape[0]
    perm = jnp.concatenate([jnp.arange(0, 2 * H),        # i, f
                            jnp.arange(3 * H, 4 * H),    # o
                            jnp.arange(2 * H, 3 * H)])   # g
    klayers = []
    for lyr in layers:
        wihs, whhs, bs = [], [], []
        for d in range(ND):
            wihs.append(lyr['w_ih'][d][perm].T)           # (Din, 4H)
            whhs.append(lyr['w_hh'][d][perm].T)           # (H, 4H)
            bs.append((lyr['b_ih'][d] + lyr['b_hh'][d])[perm][None, :])
        klayers.append({
            'wih': jnp.concatenate(wihs, axis=1),         # (Din, ND*4H)
            'whh': jnp.concatenate(whhs, axis=0),         # (ND*H, 4H)
            'b': jnp.concatenate(bs, axis=1),             # (1, ND*4H)
        })
    return {'embedding': params['embedding'], 'layers': klayers}


# ---------------- pure-JAX reference (PyTorch semantics, eval mode) -----------
def reference_forward(src_batch, params):
    x = params['embedding'][src_batch]
    for lyr in params['layers']:
        ND, _, H = lyr['w_hh'].shape
        S, B, _ = x.shape
        dir_outs = []
        for d in range(ND):
            w_ih, w_hh = lyr['w_ih'][d], lyr['w_hh'][d]
            b = lyr['b_ih'][d] + lyr['b_hh'][d]
            seq = x if d == 0 else x[::-1]
            h = jnp.zeros((B, H), jnp.float32)
            c = jnp.zeros((B, H), jnp.float32)
            hs = []
            for t in range(S):
                g = seq[t] @ w_ih.T + h @ w_hh.T + b
                i = jax.nn.sigmoid(g[:, 0 * H:1 * H])
                f = jax.nn.sigmoid(g[:, 1 * H:2 * H])
                gg = jnp.tanh(g[:, 2 * H:3 * H])
                o = jax.nn.sigmoid(g[:, 3 * H:4 * H])
                c = f * c + i * gg
                h = o * jnp.tanh(c)
                hs.append(h)
            out_d = jnp.stack(hs, axis=0)
            if d == 1:
                out_d = out_d[::-1]
            dir_outs.append(out_d)
        x = jnp.concatenate(dir_outs, axis=-1)
    return x


if __name__ == "__main__":
    key = jax.random.PRNGKey(0)
    # vocab=50, enc_embed_size=16, enc_hidden_size=32, enc_num_layers=2,
    # enc_bidirectional=True, dropout (eval) = identity; src: S=16, B=8.
    V, E, H, L = 50, 16, 32, 2
    S, B = 16, 8
    bidirectional = True

    k_tok, k_par = jax.random.split(key)
    src_batch = jax.random.randint(k_tok, (S, B), 0, V, dtype=jnp.int32)
    params = make_params(k_par, V, E, H, L, bidirectional)
    kparams = prepare_kernel_params(params)

    fwd = jax.jit(encoder_lstm_forward)
    out = jax.block_until_ready(fwd(src_batch, kparams))

    ref = reference_forward(src_batch, params)
    ND = 2 if bidirectional else 1
    assert out.shape == (S, B, ND * H), out.shape
    err = float(jnp.max(jnp.abs(out - ref)))
    assert jnp.allclose(out, ref, rtol=1e-4, atol=1e-4), err
    print("KERNEL_OK")
</pallas_src>

<mosaic_0001>
module attributes {stable_mosaic.version = 11 : i64} {
  func.func @kernel(%arg0: memref<128x16xf32, #tpu.memory_space<vmem>>, %arg1: memref<16x256xf32, #tpu.memory_space<vmem>>, %arg2: memref<64x128xf32, #tpu.memory_space<vmem>>, %arg3: memref<1x256xf32, #tpu.memory_space<vmem>>, %arg4: memref<64x256xf32, #tpu.memory_space<vmem>>, %arg5: memref<64x128xf32, #tpu.memory_space<vmem>>, %arg6: memref<1x256xf32, #tpu.memory_space<vmem>>, %arg7: memref<2x128x32xf32, #tpu.memory_space<vmem>>, %arg8: memref<128x256xf32, #tpu.memory_space<vmem>>, %arg9: memref<2x128x32xf32, #tpu.memory_space<vmem>>, %arg10: memref<2x128x32xf32, #tpu.memory_space<vmem>>) attributes {dimension_semantics = [], scalar_prefetch = 0 : i64, scratch_operands = 3 : i64, tpu.core_type = #tpu.core_type<tc>} {
    %c0 = arith.constant 0 : index
    %c0_0 = arith.constant 0 : index
    %0 = vector.load %arg1[%c0, %c0_0] : memref<16x256xf32, #tpu.memory_space<vmem>>, vector<16x256xf32>
    %c0_1 = arith.constant 0 : index
    %c0_2 = arith.constant 0 : index
    %1 = vector.load %arg0[%c0_1, %c0_2] : memref<128x16xf32, #tpu.memory_space<vmem>>, vector<128x16xf32>
    %cst = arith.constant dense<0.000000e+00> : vector<128x256xf32>
    %2 = tpu.matmul %1, %0, %cst {dimension_numbers = #tpu.dot_dimension_numbers<[1], [0], [0], [1], [0, 0, 1, 1], [], []>} : vector<128x16xf32>, vector<16x256xf32>, vector<128x256xf32> -> vector<128x256xf32>
    %c0_3 = arith.constant 0 : index
    %c0_4 = arith.constant 0 : index
    %3 = vector.load %arg3[%c0_3, %c0_4] : memref<1x256xf32, #tpu.memory_space<vmem>>, vector<1x256xf32>
    %4 = vector.broadcast %3 : vector<1x256xf32> to vector<128x256xf32>
    %5 = arith.addf %2, %4 : vector<128x256xf32>
    %c0_5 = arith.constant 0 : index
    %c0_6 = arith.constant 0 : index
    %6 = vector.load %arg8[%c0_5, %c0_6] : memref<128x256xf32, #tpu.memory_space<vmem>>, vector<128x256xf32>
    tpu.vector_store %arg8[%c0_5, %c0_6], %5 {strides = array<i32>} : memref<128x256xf32, #tpu.memory_space<vmem>>, vector<128x256xf32>,
    %c0_7 = arith.constant 0 : index
    %c0_8 = arith.constant 0 : index
    %7 = vector.load %arg2[%c0_7, %c0_8] : memref<64x128xf32, #tpu.memory_space<vmem>>, vector<64x128xf32>
    %8 = vector.extract_strided_slice %7 {offsets = [0, 0], sizes = [32, 128], strides = [1, 1]} : vector<64x128xf32> to vector<32x128xf32>
    %cst_9 = arith.constant 0.000000e+00 : f32
    %9 = vector.broadcast %cst_9 : f32 to vector<8x32xf32>
    %cst_10 = arith.constant 0.000000e+00 : f32
    %10 = vector.broadcast %cst_10 : f32 to vector<8x32xf32>
    %11 = vector.extract_strided_slice %7 {offsets = [32, 0], sizes = [32, 128], strides = [1, 1]} : vector<64x128xf32> to vector<32x128xf32>
    %cst_11 = arith.constant 0.000000e+00 : f32
    %12 = vector.broadcast %cst_11 : f32 to vector<8x32xf32>
    %cst_12 = arith.constant 0.000000e+00 : f32
    %13 = vector.broadcast %cst_12 : f32 to vector<8x32xf32>
    %c0_13 = arith.constant 0 : index
    %c0_14 = arith.constant 0 : index
    %14 = vector.load %arg8[%c0_13, %c0_14] : memref<128x256xf32, #tpu.memory_space<vmem>>, vector<8x128xf32>
    %cst_15 = arith.constant dense<0.000000e+00> : vector<8x128xf32>
    %15 = tpu.matmul %9, %8, %cst_15 {dimension_numbers = #tpu.dot_dimension_numbers<[1], [0], [0], [1], [0, 0, 1, 1], [], []>} : vector<8x32xf32>, vector<32x128xf32>, vector<8x128xf32> -> vector<8x128xf32>
    %16 = arith.addf %14, %15 : vector<8x128xf32>
    %17 = vector.extract_strided_slice %16 {offsets = [0, 0], sizes = [8, 96], strides = [1, 1]} : vector<8x128xf32> to vector<8x96xf32>
    %18 = arith.negf %17 : vector<8x96xf32>
    %19 = math.exp %18 : vector<8x96xf32>
    %cst_16 = arith.constant 1.000000e+00 : f32
    %20 = vector.broadcast %cst_16 : f32 to vector<8x96xf32>
    %21 = arith.addf %20, %19 : vector<8x96xf32>
    %22 = arith.divf %20, %21 : vector<8x96xf32>
    %23 = vector.extract_strided_slice %16 {offsets = [0, 96], sizes = [8, 32], strides = [1, 1]} : vector<8x128xf32> to vector<8x32xf32>
    %24 = math.tanh %23 : vector<8x32xf32>
    %25 = vector.extract_strided_slice %22 {offsets = [0, 32], sizes = [8, 32], strides = [1, 1]} : vector<8x96xf32> to vector<8x32xf32>
    %26 = arith.mulf %25, %10 : vector<8x32xf32>
    %27 = vector.extract_strided_slice %22 {offsets = [0, 0], sizes = [8, 32], strides = [1, 1]} : vector<8x96xf32> to vector<8x32xf32>
    %28 = arith.mulf %27, %24 : vector<8x32xf32>
    %29 = arith.addf %26, %28 : vector<8x32xf32>
    %30 = vector.extract_strided_slice %22 {offsets = [0, 64], sizes = [8, 32], strides = [1, 1]} : vector<8x96xf32> to vector<8x32xf32>
    %31 = math.tanh %29 : vector<8x32xf32>
    %32 = arith.mulf %30, %31 : vector<8x32xf32>
    %c0_17 = arith.constant 0 : index
    %c0_18 = arith.constant 0 : index
    %c0_19 = arith.constant 0 : index
    %33 = vector.load %arg9[%c0_17, %c0_18, %c0_19] : memref<2x128x32xf32, #tpu.memory_space<vmem>>, vector<1x8x32xf32>
    %34 = vector.shape_cast %33 : vector<1x8x32xf32> to vector<8x32xf32>
    %35 = vector.shape_cast %32 : vector<8x32xf32> to vector<1x8x32xf32>
    tpu.vector_store %arg9[%c0_17, %c0_18, %c0_19], %35 {strides = array<i32>} : memref<2x128x32xf32, #tpu.memory_space<vmem>>, vector<1x8x32xf32>,
    %c120 = arith.constant 120 : index
    %c128 = arith.constant 128 : index
    %36 = vector.load %arg8[%c120, %c128] : memref<128x256xf32, #tpu.memory_space<vmem>>, vector<8x128xf32>
    %cst_20 = arith.constant dense<0.000000e+00> : vector<8x128xf32>
    %37 = tpu.matmul %12, %11, %cst_20 {dimension_numbers = #tpu.dot_dimension_numbers<[1], [0], [0], [1], [0, 0, 1, 1], [], []>} : vector<8x32xf32>, vector<32x128xf32>, vector<8x128xf32> -> vector<8x128xf32>
    %38 = arith.addf %36, %37 : vector<8x128xf32>
    %39 = vector.extract_strided_slice %38 {offsets = [0, 0], sizes = [8, 96], strides = [1, 1]} : vector<8x128xf32> to vector<8x96xf32>
    %40 = arith.negf %39 : vector<8x96xf32>
    %41 = math.exp %40 : vector<8x96xf32>
    %cst_21 = arith.constant 1.000000e+00 : f32
    %42 = vector.broadcast %cst_21 : f32 to vector<8x96xf32>
    %43 = arith.addf %42, %41 : vector<8x96xf32>
    %44 = arith.divf %42, %43 : vector<8x96xf32>
    %45 = vector.extract_strided_slice %38 {offsets = [0, 96], sizes = [8, 32], strides = [1, 1]} : vector<8x128xf32> to vector<8x32xf32>
    %46 = math.tanh %45 : vector<8x32xf32>
    %47 = vector.extract_strided_slice %44 {offsets = [0, 32], sizes = [8, 32], strides = [1, 1]} : vector<8x96xf32> to vector<8x32xf32>
    %48 = arith.mulf %47, %13 : vector<8x32xf32>
    %49 = vector.extract_strided_slice %44 {offsets = [0, 0], sizes = [8, 32], strides = [1, 1]} : vector<8x96xf32> to vector<8x32xf32>
    %50 = arith.mulf %49, %46 : vector<8x32xf32>
    %51 = arith.addf %48, %50 : vector<8x32xf32>
    %52 = vector.extract_strided_slice %44 {offsets = [0, 64], sizes = [8, 32], strides = [1, 1]} : vector<8x96xf32> to vector<8x32xf32>
    %53 = math.tanh %51 : vector<8x32xf32>
    %54 = arith.mulf %52, %53 : vector<8x32xf32>
    %c1 = arith.constant 1 : index
    %c120_22 = arith.constant 120 : index
    %c0_23 = arith.constant 0 : index
    %55 = vector.load %arg9[%c1, %c120_22, %c0_23] : memref<2x128x32xf32, #tpu.memory_space<vmem>>, vector<1x8x32xf32>
    %56 = vector.shape_cast %55 : vector<1x8x32xf32> to vector<8x32xf32>
    %57 = vector.shape_cast %54 : vector<8x32xf32> to vector<1x8x32xf32>
    tpu.vector_store %arg9[%c1, %c120_22, %c0_23], %57 {strides = array<i32>} : memref<2x128x32xf32, #tpu.memory_space<vmem>>, vector<1x8x32xf32>,
    %c8 = arith.constant 8 : index
    %c0_24 = arith.constant 0 : index
    %58 = vector.load %arg8[%c8, %c0_24] : memref<128x256xf32, #tpu.memory_space<vmem>>, vector<8x128xf32>
    %cst_25 = arith.constant dense<0.000000e+00> : vector<8x128xf32>
    %59 = tpu.matmul %32, %8, %cst_25 {dimension_numbers = #tpu.dot_dimension_numbers<[1], [0], [0], [1], [0, 0, 1, 1], [], []>} : vector<8x32xf32>, vector<32x128xf32>, vector<8x128xf32> -> vector<8x128xf32>
    %60 = arith.addf %58, %59 : vector<8x128xf32>
    %61 = vector.extract_strided_slice %60 {offsets = [0, 0], sizes = [8, 96], strides = [1, 1]} : vector<8x128xf32> to vector<8x96xf32>
    %62 = arith.negf %61 : vector<8x96xf32>
    %63 = math.exp %62 : vector<8x96xf32>
    %cst_26 = arith.constant 1.000000e+00 : f32
    %64 = vector.broadcast %cst_26 : f32 to vector<8x96xf32>
    %65 = arith.addf %64, %63 : vector<8x96xf32>
    %66 = arith.divf %64, %65 : vector<8x96xf32>
    %67 = vector.extract_strided_slice %60 {offsets = [0, 96], sizes = [8, 32], strides = [1, 1]} : vector<8x128xf32> to vector<8x32xf32>
    %68 = math.tanh %67 : vector<8x32xf32>
    %69 = vector.extract_strided_slice %66 {offsets = [0, 32], sizes = [8, 32], strides = [1, 1]} : vector<8x96xf32> to vector<8x32xf32>
    %70 = arith.mulf %69, %29 : vector<8x32xf32>
    %71 = vector.extract_strided_slice %66 {offsets = [0, 0], sizes = [8, 32], strides = [1, 1]} : vector<8x96xf32> to vector<8x32xf32>
    %72 = arith.mulf %71, %68 : vector<8x32xf32>
    %73 = arith.addf %70, %72 : vector<8x32xf32>
    %74 = vector.extract_strided_slice %66 {offsets = [0, 64], sizes = [8, 32], strides = [1, 1]} : vector<8x96xf32> to vector<8x32xf32>
    %75 = math.tanh %73 : vector<8x32xf32>
    %76 = arith.mulf %74, %75 : vector<8x32xf32>
    %c0_27 = arith.constant 0 : index
    %c8_28 = arith.constant 8 : index
    %c0_29 = arith.constant 0 : index
    %77 = vector.load %arg9[%c0_27, %c8_28, %c0_29] : memref<2x128x32xf32, #tpu.memory_space<vmem>>, vector<1x8x32xf32>
    %78 = vector.shape_cast %77 : vector<1x8x32xf32> to vector<8x32xf32>
    %79 = vector.shape_cast %76 : vector<8x32xf32> to vector<1x8x32xf32>
    tpu.vector_store %arg9[%c0_27, %c8_28, %c0_29], %79 {strides = array<i32>} : memref<2x128x32xf32, #tpu.memory_space<vmem>>, vector<1x8x32xf32>,
    %c112 = arith.constant 112 : index
    %c128_30 = arith.constant 128 : index
    %80 = vector.load %arg8[%c112, %c128_30] : memref<128x256xf32, #tpu.memory_space<vmem>>, vector<8x128xf32>
    %cst_31 = arith.constant dense<0.000000e+00> : vector<8x128xf32>
    %81 = tpu.matmul %54, %11, %cst_31 {dimension_numbers = #tpu.dot_dimension_numbers<[1], [0], [0], [1], [0, 0, 1, 1], [], []>} : vector<8x32xf32>, vector<32x128xf32>, vector<8x128xf32> -> vector<8x128xf32>
    %82 = arith.addf %80, %81 : vector<8x128xf32>
    %83 = vector.extract_strided_slice %82 {offsets = [0, 0], sizes = [8, 96], strides = [1, 1]} : vector<8x128xf32> to vector<8x96xf32>
    %84 = arith.negf %83 : vector<8x96xf32>
    %85 = math.exp %84 : vector<8x96xf32>
    %cst_32 = arith.constant 1.000000e+00 : f32
    %86 = vector.broadcast %cst_32 : f32 to vector<8x96xf32>
    %87 = arith.addf %86, %85 : vector<8x96xf32>
    %88 = arith.divf %86, %87 : vector<8x96xf32>
    %89 = vector.extract_strided_slice %82 {offsets = [0, 96], sizes = [8, 32], strides = [1, 1]} : vector<8x128xf32> to vector<8x32xf32>
    %90 = math.tanh %89 : vector<8x32xf32>
    %91 = vector.extract_strided_slice %88 {offsets = [0, 32], sizes = [8, 32], strides = [1, 1]} : vector<8x96xf32> to vector<8x32xf32>
    %92 = arith.mulf %91, %51 : vector<8x32xf32>
    %93 = vector.extract_strided_slice %88 {offsets = [0, 0], sizes = [8, 32], strides = [1, 1]} : vector<8x96xf32> to vector<8x32xf32>
    %94 = arith.mulf %93, %90 : vector<8x32xf32>
    %95 = arith.addf %92, %94 : vector<8x32xf32>
    %96 = vector.extract_strided_slice %88 {offsets = [0, 64], sizes = [8, 32], strides = [1, 1]} : vector<8x96xf32> to vector<8x32xf32>
    %97 = math.tanh %95 : vector<8x32xf32>
    %98 = arith.mulf %96, %97 : vector<8x32xf32>
    %c1_33 = arith.constant 1 : index
    %c112_34 = arith.constant 112 : index
    %c0_35 = arith.constant 0 : index
    %99 = vector.load %arg9[%c1_33, %c112_34, %c0_35] : memref<2x128x32xf32, #tpu.memory_space<vmem>>, vector<1x8x32xf32>
    %100 = vector.shape_cast %99 : vector<1x8x32xf32> to vector<8x32xf32>
    %101 = vector.shape_cast %98 : vector<8x32xf32> to vector<1x8x32xf32>
    tpu.vector_store %arg9[%c1_33, %c112_34, %c0_35], %101 {strides = array<i32>} : memref<2x128x32xf32, #tpu.memory_space<vmem>>, vector<1x8x32xf32>,
    %c16 = arith.constant 16 : index
    %c0_36 = arith.constant 0 : index
    %102 = vector.load %arg8[%c16, %c0_36] : memref<128x256xf32, #tpu.memory_space<vmem>>, vector<8x128xf32>
    %cst_37 = arith.constant dense<0.000000e+00> : vector<8x128xf32>
    %103 = tpu.matmul %76, %8, %cst_37 {dimension_numbers = #tpu.dot_dimension_numbers<[1], [0], [0], [1], [0, 0, 1, 1], [], []>} : vector<8x32xf32>, vector<32x128xf32>, vector<8x128xf32> -> vector<8x128xf32>
    %104 = arith.addf %102, %103 : vector<8x128xf32>
    %105 = vector.extract_strided_slice %104 {offsets = [0, 0], sizes = [8, 96], strides = [1, 1]} : vector<8x128xf32> to vector<8x96xf32>
    %106 = arith.negf %105 : vector<8x96xf32>
    %107 = math.exp %106 : vector<8x96xf32>
    %cst_38 = arith.constant 1.000000e+00 : f32
    %108 = vector.broadcast %cst_38 : f32 to vector<8x96xf32>
    %109 = arith.addf %108, %107 : vector<8x96xf32>
    %110 = arith.divf %108, %109 : vector<8x96xf32>
    %111 = vector.extract_strided_slice %104 {offsets = [0, 96], sizes = [8, 32], strides = [1, 1]} : vector<8x128xf32> to vector<8x32xf32>
    %112 = math.tanh %111 : vector<8x32xf32>
    %113 = vector.extract_strided_slice %110 {offsets = [0, 32], sizes = [8, 32], strides = [1, 1]} : vector<8x96xf32> to vector<8x32xf32>
    %114 = arith.mulf %113, %73 : vector<8x32xf32>
    %115 = vector.extract_strided_slice %110 {offsets = [0, 0], sizes = [8, 32], strides = [1, 1]} : vector<8x96xf32> to vector<8x32xf32>
    %116 = arith.mulf %115, %112 : vector<8x32xf32>
    %117 = arith.addf %114, %116 : vector<8x32xf32>
    %118 = vector.extract_strided_slice %110 {offsets = [0, 64], sizes = [8, 32], strides = [1, 1]} : vector<8x96xf32> to vector<8x32xf32>
    %119 = math.tanh %117 : vector<8x32xf32>
    %120 = arith.mulf %118, %119 : vector<8x32xf32>
    %c0_39 = arith.constant 0 : index
    %c16_40 = arith.constant 16 : index
    %c0_41 = arith.constant 0 : index
    %121 = vector.load %arg9[%c0_39, %c16_40, %c0_41] : memref<2x128x32xf32, #tpu.memory_space<vmem>>, vector<1x8x32xf32>
    %122 = vector.shape_cast %121 : vector<1x8x32xf32> to vector<8x32xf32>
    %123 = vector.shape_cast %120 : vector<8x32xf32> to vector<1x8x32xf32>
    tpu.vector_store %arg9[%c0_39, %c16_40, %c0_41], %123 {strides = array<i32>} : memref<2x128x32xf32, #tpu.memory_space<vmem>>, vector<1x8x32xf32>,
    %c104 = arith.constant 104 : index
    %c128_42 = arith.constant 128 : index
    %124 = vector.load %arg8[%c104, %c128_42] : memref<128x256xf32, #tpu.memory_space<vmem>>, vector<8x128xf32>
    %cst_43 = arith.constant dense<0.000000e+00> : vector<8x128xf32>
    %125 = tpu.matmul %98, %11, %cst_43 {dimension_numbers = #tpu.dot_dimension_numbers<[1], [0], [0], [1], [0, 0, 1, 1], [], []>} : vector<8x32xf32>, vector<32x128xf32>, vector<8x128xf32> -> vector<8x128xf32>
    %126 = arith.addf %124, %125 : vector<8x128xf32>
    %127 = vector.extract_strided_slice %126 {offsets = [0, 0], sizes = [8, 96], strides = [1, 1]} : vector<8x128xf32> to vector<8x96xf32>
    %128 = arith.negf %127 : vector<8x96xf32>
    %129 = math.exp %128 : vector<8x96xf32>
    %cst_44 = arith.constant 1.000000e+00 : f32
    %130 = vector.broadcast %cst_44 : f32 to vector<8x96xf32>
    %131 = arith.addf %130, %129 : vector<8x96xf32>
    %132 = arith.divf %130, %131 : vector<8x96xf32>
    %133 = vector.extract_strided_slice %126 {offsets = [0, 96], sizes = [8, 32], strides = [1, 1]} : vector<8x128xf32> to vector<8x32xf32>
    %134 = math.tanh %133 : vector<8x32xf32>
    %135 = vector.extract_strided_slice %132 {offsets = [0, 32], sizes = [8, 32], strides = [1, 1]} : vector<8x96xf32> to vector<8x32xf32>
    %136 = arith.mulf %135, %95 : vector<8x32xf32>
    %137 = vector.extract_strided_slice %132 {offsets = [0, 0], sizes = [8, 32], strides = [1, 1]} : vector<8x96xf32> to vector<8x32xf32>
    %138 = arith.mulf %137, %134 : vector<8x32xf32>
    %139 = arith.addf %136, %138 : vector<8x32xf32>
    %140 = vector.extract_strided_slice %132 {offsets = [0, 64], sizes = [8, 32], strides = [1, 1]} : vector<8x96xf32> to vector<8x32xf32>
    %141 = math.tanh %139 : vector<8x32xf32>
    %142 = arith.mulf %140, %141 : vector<8x32xf32>
    %c1_45 = arith.constant 1 : index
    %c104_46 = arith.constant 104 : index
    %c0_47 = arith.constant 0 : index
    %143 = vector.load %arg9[%c1_45, %c104_46, %c0_47] : memref<2x128x32xf32, #tpu.memory_space<vmem>>, vector<1x8x32xf32>
    %144 = vector.shape_cast %143 : vector<1x8x32xf32> to vector<8x32xf32>
    %145 = vector.shape_cast %142 : vector<8x32xf32> to vector<1x8x32xf32>
    tpu.vector_store %arg9[%c1_45, %c104_46, %c0_47], %145 {strides = array<i32>} : memref<2x128x32xf32, #tpu.memory_space<vmem>>, vector<1x8x32xf32>,
    %c24 = arith.constant 24 : index
    %c0_48 = arith.constant 0 : index
    %146 = vector.load %arg8[%c24, %c0_48] : memref<128x256xf32, #tpu.memory_space<vmem>>, vector<8x128xf32>
    %cst_49 = arith.constant dense<0.000000e+00> : vector<8x128xf32>
    %147 = tpu.matmul %120, %8, %cst_49 {dimension_numbers = #tpu.dot_dimension_numbers<[1], [0], [0], [1], [0, 0, 1, 1], [], []>} : vector<8x32xf32>, vector<32x128xf32>, vector<8x128xf32> -> vector<8x128xf32>
    %148 = arith.addf %146, %147 : vector<8x128xf32>
    %149 = vector.extract_strided_slice %148 {offsets = [0, 0], sizes = [8, 96], strides = [1, 1]} : vector<8x128xf32> to vector<8x96xf32>
    %150 = arith.negf %149 : vector<8x96xf32>
    %151 = math.exp %150 : vector<8x96xf32>
    %cst_50 = arith.constant 1.000000e+00 : f32
    %152 = vector.broadcast %cst_50 : f32 to vector<8x96xf32>
    %153 = arith.addf %152, %151 : vector<8x96xf32>
    %154 = arith.divf %152, %153 : vector<8x96xf32>
    %155 = vector.extract_strided_slice %148 {offsets = [0, 96], sizes = [8, 32], strides = [1, 1]} : vector<8x128xf32> to vector<8x32xf32>
    %156 = math.tanh %155 : vector<8x32xf32>
    %157 = vector.extract_strided_slice %154 {offsets = [0, 32], sizes = [8, 32], strides = [1, 1]} : vector<8x96xf32> to vector<8x32xf32>
    %158 = arith.mulf %157, %117 : vector<8x32xf32>
    %159 = vector.extract_strided_slice %154 {offsets = [0, 0], sizes = [8, 32], strides = [1, 1]} : vector<8x96xf32> to vector<8x32xf32>
    %160 = arith.mulf %159, %156 : vector<8x32xf32>
    %161 = arith.addf %158, %160 : vector<8x32xf32>
    %162 = vector.extract_strided_slice %154 {offsets = [0, 64], sizes = [8, 32], strides = [1, 1]} : vector<8x96xf32> to vector<8x32xf32>
    %163 = math.tanh %161 : vector<8x32xf32>
    %164 = arith.mulf %162, %163 : vector<8x32xf32>
    %c0_51 = arith.constant 0 : index
    %c24_52 = arith.constant 24 : index
    %c0_53 = arith.constant 0 : index
    %165 = vector.load %arg9[%c0_51, %c24_52, %c0_53] : memref<2x128x32xf32, #tpu.memory_space<vmem>>, vector<1x8x32xf32>
    %166 = vector.shape_cast %165 : vector<1x8x32xf32> to vector<8x32xf32>
    %167 = vector.shape_cast %164 : vector<8x32xf32> to vector<1x8x32xf32>
    tpu.vector_store %arg9[%c0_51, %c24_52, %c0_53], %167 {strides = array<i32>} : memref<2x128x32xf32, #tpu.memory_space<vmem>>, vector<1x8x32xf32>,
    %c96 = arith.constant 96 : index
    %c128_54 = arith.constant 128 : index
    %168 = vector.load %arg8[%c96, %c128_54] : memref<128x256xf32, #tpu.memory_space<vmem>>, vector<8x128xf32>
    %cst_55 = arith.constant dense<0.000000e+00> : vector<8x128xf32>
    %169 = tpu.matmul %142, %11, %cst_55 {dimension_numbers = #tpu.dot_dimension_numbers<[1], [0], [0], [1], [0, 0, 1, 1], [], []>} : vector<8x32xf32>, vector<32x128xf32>, vector<8x128xf32> -> vector<8x128xf32>
    %170 = arith.addf %168, %169 : vector<8x128xf32>
    %171 = vector.extract_strided_slice %170 {offsets = [0, 0], sizes = [8, 96], strides = [1, 1]} : vector<8x128xf32> to vector<8x96xf32>
    %172 = arith.negf %171 : vector<8x96xf32>
    %173 = math.exp %172 : vector<8x96xf32>
    %cst_56 = arith.constant 1.000000e+00 : f32
    %174 = vector.broadcast %cst_56 : f32 to vector<8x96xf32>
    %175 = arith.addf %174, %173 : vector<8x96xf32>
    %176 = arith.divf %174, %175 : vector<8x96xf32>
    %177 = vector.extract_strided_slice %170 {offsets = [0, 96], sizes = [8, 32], strides = [1, 1]} : vector<8x128xf32> to vector<8x32xf32>
    %178 = math.tanh %177 : vector<8x32xf32>
    %179 = vector.extract_strided_slice %176 {offsets = [0, 32], sizes = [8, 32], strides = [1, 1]} : vector<8x96xf32> to vector<8x32xf32>
    %180 = arith.mulf %179, %139 : vector<8x32xf32>
    %181 = vector.extract_strided_slice %176 {offsets = [0, 0], sizes = [8, 32], strides = [1, 1]} : vector<8x96xf32> to vector<8x32xf32>
    %182 = arith.mulf %181, %178 : vector<8x32xf32>
    %183 = arith.addf %180, %182 : vector<8x32xf32>
    %184 = vector.extract_strided_slice %176 {offsets = [0, 64], sizes = [8, 32], strides = [1, 1]} : vector<8x96xf32> to vector<8x32xf32>
    %185 = math.tanh %183 : vector<8x32xf32>
    %186 = arith.mulf %184, %185 : vector<8x32xf32>
    %c1_57 = arith.constant 1 : index
    %c96_58 = arith.constant 96 : index
    %c0_59 = arith.constant 0 : index
    %187 = vector.load %arg9[%c1_57, %c96_58, %c0_59] : memref<2x128x32xf32, #tpu.memory_space<vmem>>, vector<1x8x32xf32>
    %188 = vector.shape_cast %187 : vector<1x8x32xf32> to vector<8x32xf32>
    %189 = vector.shape_cast %186 : vector<8x32xf32> to vector<1x8x32xf32>
    tpu.vector_store %arg9[%c1_57, %c96_58, %c0_59], %189 {strides = array<i32>} : memref<2x128x32xf32, #tpu.memory_space<vmem>>, vector<1x8x32xf32>,
    %c32 = arith.constant 32 : index
    %c0_60 = arith.constant 0 : index
    %190 = vector.load %arg8[%c32, %c0_60] : memref<128x256xf32, #tpu.memory_space<vmem>>, vector<8x128xf32>
    %cst_61 = arith.constant dense<0.000000e+00> : vector<8x128xf32>
    %191 = tpu.matmul %164, %8, %cst_61 {dimension_numbers = #tpu.dot_dimension_numbers<[1], [0], [0], [1], [0, 0, 1, 1], [], []>} : vector<8x32xf32>, vector<32x128xf32>, vector<8x128xf32> -> vector<8x128xf32>
    %192 = arith.addf %190, %191 : vector<8x128xf32>
    %193 = vector.extract_strided_slice %192 {offsets = [0, 0], sizes = [8, 96], strides = [1, 1]} : vector<8x128xf32> to vector<8x96xf32>
    %194 = arith.negf %193 : vector<8x96xf32>
    %195 = math.exp %194 : vector<8x96xf32>
    %cst_62 = arith.constant 1.000000e+00 : f32
    %196 = vector.broadcast %cst_62 : f32 to vector<8x96xf32>
    %197 = arith.addf %196, %195 : vector<8x96xf32>
    %198 = arith.divf %196, %197 : vector<8x96xf32>
    %199 = vector.extract_strided_slice %192 {offsets = [0, 96], sizes = [8, 32], strides = [1, 1]} : vector<8x128xf32> to vector<8x32xf32>
    %200 = math.tanh %199 : vector<8x32xf32>
    %201 = vector.extract_strided_slice %198 {offsets = [0, 32], sizes = [8, 32], strides = [1, 1]} : vector<8x96xf32> to vector<8x32xf32>
    %202 = arith.mulf %201, %161 : vector<8x32xf32>
    %203 = vector.extract_strided_slice %198 {offsets = [0, 0], sizes = [8, 32], strides = [1, 1]} : vector<8x96xf32> to vector<8x32xf32>
    %204 = arith.mulf %203, %200 : vector<8x32xf32>
    %205 = arith.addf %202, %204 : vector<8x32xf32>
    %206 = vector.extract_strided_slice %198 {offsets = [0, 64], sizes = [8, 32], strides = [1, 1]} : vector<8x96xf32> to vector<8x32xf32>
    %207 = math.tanh %205 : vector<8x32xf32>
    %208 = arith.mulf %206, %207 : vector<8x32xf32>
    %c0_63 = arith.constant 0 : index
    %c32_64 = arith.constant 32 : index
    %c0_65 = arith.constant 0 : index
    %209 = vector.load %arg9[%c0_63, %c32_64, %c0_65] : memref<2x128x32xf32, #tpu.memory_space<vmem>>, vector<1x8x32xf32>
    %210 = vector.shape_cast %209 : vector<1x8x32xf32> to vector<8x32xf32>
    %211 = vector.shape_cast %208 : vector<8x32xf32> to vector<1x8x32xf32>
    tpu.vector_store %arg9[%c0_63, %c32_64, %c0_65], %211 {strides = array<i32>} : memref<2x128x32xf32, #tpu.memory_space<vmem>>, vector<1x8x32xf32>,
    %c88 = arith.constant 88 : index
    %c128_66 = arith.constant 128 : index
    %212 = vector.load %arg8[%c88, %c128_66] : memref<128x256xf32, #tpu.memory_space<vmem>>, vector<8x128xf32>
    %cst_67 = arith.constant dense<0.000000e+00> : vector<8x128xf32>
    %213 = tpu.matmul %186, %11, %cst_67 {dimension_numbers = #tpu.dot_dimension_numbers<[1], [0], [0], [1], [0, 0, 1, 1], [], []>} : vector<8x32xf32>, vector<32x128xf32>, vector<8x128xf32> -> vector<8x128xf32>
    %214 = arith.addf %212, %213 : vector<8x128xf32>
    %215 = vector.extract_strided_slice %214 {offsets = [0, 0], sizes = [8, 96], strides = [1, 1]} : vector<8x128xf32> to vector<8x96xf32>
    %216 = arith.negf %215 : vector<8x96xf32>
    %217 = math.exp %216 : vector<8x96xf32>
    %cst_68 = arith.constant 1.000000e+00 : f32
    %218 = vector.broadcast %cst_68 : f32 to vector<8x96xf32>
    %219 = arith.addf %218, %217 : vector<8x96xf32>
    %220 = arith.divf %218, %219 : vector<8x96xf32>
    %221 = vector.extract_strided_slice %214 {offsets = [0, 96], sizes = [8, 32], strides = [1, 1]} : vector<8x128xf32> to vector<8x32xf32>
    %222 = math.tanh %221 : vector<8x32xf32>
    %223 = vector.extract_strided_slice %220 {offsets = [0, 32], sizes = [8, 32], strides = [1, 1]} : vector<8x96xf32> to vector<8x32xf32>
    %224 = arith.mulf %223, %183 : vector<8x32xf32>
    %225 = vector.extract_strided_slice %220 {offsets = [0, 0], sizes = [8, 32], strides = [1, 1]} : vector<8x96xf32> to vector<8x32xf32>
    %226 = arith.mulf %225, %222 : vector<8x32xf32>
    %227 = arith.addf %224, %226 : vector<8x32xf32>
    %228 = vector.extract_strided_slice %220 {offsets = [0, 64], sizes = [8, 32], strides = [1, 1]} : vector<8x96xf32> to vector<8x32xf32>
    %229 = math.tanh %227 : vector<8x32xf32>
    %230 = arith.mulf %228, %229 : vector<8x32xf32>
    %c1_69 = arith.constant 1 : index
    %c88_70 = arith.constant 88 : index
    %c0_71 = arith.constant 0 : index
    %231 = vector.load %arg9[%c1_69, %c88_70, %c0_71] : memref<2x128x32xf32, #tpu.memory_space<vmem>>, vector<1x8x32xf32>
    %232 = vector.shape_cast %231 : vector<1x8x32xf32> to vector<8x32xf32>
    %233 = vector.shape_cast %230 : vector<8x32xf32> to vector<1x8x32xf32>
    tpu.vector_store %arg9[%c1_69, %c88_70, %c0_71], %233 {strides = array<i32>} : memref<2x128x32xf32, #tpu.memory_space<vmem>>, vector<1x8x32xf32>,
    %c40 = arith.constant 40 : index
    %c0_72 = arith.constant 0 : index
    %234 = vector.load %arg8[%c40, %c0_72] : memref<128x256xf32, #tpu.memory_space<vmem>>, vector<8x128xf32>
    %cst_73 = arith.constant dense<0.000000e+00> : vector<8x128xf32>
    %235 = tpu.matmul %208, %8, %cst_73 {dimension_numbers = #tpu.dot_dimension_numbers<[1], [0], [0], [1], [0, 0, 1, 1], [], []>} : vector<8x32xf32>, vector<32x128xf32>, vector<8x128xf32> -> vector<8x128xf32>
    %236 = arith.addf %234, %235 : vector<8x128xf32>
    %237 = vector.extract_strided_slice %236 {offsets = [0, 0], sizes = [8, 96], strides = [1, 1]} : vector<8x128xf32> to vector<8x96xf32>
    %238 = arith.negf %237 : vector<8x96xf32>
    %239 = math.exp %238 : vector<8x96xf32>
    %cst_74 = arith.constant 1.000000e+00 : f32
    %240 = vector.broadcast %cst_74 : f32 to vector<8x96xf32>
    %241 = arith.addf %240, %239 : vector<8x96xf32>
    %242 = arith.divf %240, %241 : vector<8x96xf32>
    %243 = vector.extract_strided_slice %236 {offsets = [0, 96], sizes = [8, 32], strides = [1, 1]} : vector<8x128xf32> to vector<8x32xf32>
    %244 = math.tanh %243 : vector<8x32xf32>
    %245 = vector.extract_strided_slice %242 {offsets = [0, 32], sizes = [8, 32], strides = [1, 1]} : vector<8x96xf32> to vector<8x32xf32>
    %246 = arith.mulf %245, %205 : vector<8x32xf32>
    %247 = vector.extract_strided_slice %242 {offsets = [0, 0], sizes = [8, 32], strides = [1, 1]} : vector<8x96xf32> to vector<8x32xf32>
    %248 = arith.mulf %247, %244 : vector<8x32xf32>
    %249 = arith.addf %246, %248 : vector<8x32xf32>
    %250 = vector.extract_strided_slice %242 {offsets = [0, 64], sizes = [8, 32], strides = [1, 1]} : vector<8x96xf32> to vector<8x32xf32>
    %251 = math.tanh %249 : vector<8x32xf32>
    %252 = arith.mulf %250, %251 : vector<8x32xf32>
    %c0_75 = arith.constant 0 : index
    %c40_76 = arith.constant 40 : index
    %c0_77 = arith.constant 0 : index
    %253 = vector.load %arg9[%c0_75, %c40_76, %c0_77] : memref<2x128x32xf32, #tpu.memory_space<vmem>>, vector<1x8x32xf32>
    %254 = vector.shape_cast %253 : vector<1x8x32xf32> to vector<8x32xf32>
    %255 = vector.shape_cast %252 : vector<8x32xf32> to vector<1x8x32xf32>
    tpu.vector_store %arg9[%c0_75, %c40_76, %c0_77], %255 {strides = array<i32>} : memref<2x128x32xf32, #tpu.memory_space<vmem>>, vector<1x8x32xf32>,
    %c80 = arith.constant 80 : index
    %c128_78 = arith.constant 128 : index
    %256 = vector.load %arg8[%c80, %c128_78] : memref<128x256xf32, #tpu.memory_space<vmem>>, vector<8x128xf32>
    %cst_79 = arith.constant dense<0.000000e+00> : vector<8x128xf32>
    %257 = tpu.matmul %230, %11, %cst_79 {dimension_numbers = #tpu.dot_dimension_numbers<[1], [0], [0], [1], [0, 0, 1, 1], [], []>} : vector<8x32xf32>, vector<32x128xf32>, vector<8x128xf32> -> vector<8x128xf32>
    %258 = arith.addf %256, %257 : vector<8x128xf32>
    %259 = vector.extract_strided_slice %258 {offsets = [0, 0], sizes = [8, 96], strides = [1, 1]} : vector<8x128xf32> to vector<8x96xf32>
    %260 = arith.negf %259 : vector<8x96xf32>
    %261 = math.exp %260 : vector<8x96xf32>
    %cst_80 = arith.constant 1.000000e+00 : f32
    %262 = vector.broadcast %cst_80 : f32 to vector<8x96xf32>
    %263 = arith.addf %262, %261 : vector<8x96xf32>
    %264 = arith.divf %262, %263 : vector<8x96xf32>
    %265 = vector.extract_strided_slice %258 {offsets = [0, 96], sizes = [8, 32], strides = [1, 1]} : vector<8x128xf32> to vector<8x32xf32>
    %266 = math.tanh %265 : vector<8x32xf32>
    %267 = vector.extract_strided_slice %264 {offsets = [0, 32], sizes = [8, 32], strides = [1, 1]} : vector<8x96xf32> to vector<8x32xf32>
    %268 = arith.mulf %267, %227 : vector<8x32xf32>
    %269 = vector.extract_strided_slice %264 {offsets = [0, 0], sizes = [8, 32], strides = [1, 1]} : vector<8x96xf32> to vector<8x32xf32>
    %270 = arith.mulf %269, %266 : vector<8x32xf32>
    %271 = arith.addf %268, %270 : vector<8x32xf32>
    %272 = vector.extract_strided_slice %264 {offsets = [0, 64], sizes = [8, 32], strides = [1, 1]} : vector<8x96xf32> to vector<8x32xf32>
    %273 = math.tanh %271 : vector<8x32xf32>
    %274 = arith.mulf %272, %273 : vector<8x32xf32>
    %c1_81 = arith.constant 1 : index
    %c80_82 = arith.constant 80 : index
    %c0_83 = arith.constant 0 : index
    %275 = vector.load %arg9[%c1_81, %c80_82, %c0_83] : memref<2x128x32xf32, #tpu.memory_space<vmem>>, vector<1x8x32xf32>
    %276 = vector.shape_cast %275 : vector<1x8x32xf32> to vector<8x32xf32>
    %277 = vector.shape_cast %274 : vector<8x32xf32> to vector<1x8x32xf32>
    tpu.vector_store %arg9[%c1_81, %c80_82, %c0_83], %277 {strides = array<i32>} : memref<2x128x32xf32, #tpu.memory_space<vmem>>, vector<1x8x32xf32>,
    %c48 = arith.constant 48 : index
    %c0_84 = arith.constant 0 : index
    %278 = vector.load %arg8[%c48, %c0_84] : memref<128x256xf32, #tpu.memory_space<vmem>>, vector<8x128xf32>
    %cst_85 = arith.constant dense<0.000000e+00> : vector<8x128xf32>
    %279 = tpu.matmul %252, %8, %cst_85 {dimension_numbers = #tpu.dot_dimension_numbers<[1], [0], [0], [1], [0, 0, 1, 1], [], []>} : vector<8x32xf32>, vector<32x128xf32>, vector<8x128xf32> -> vector<8x128xf32>
    %280 = arith.addf %278, %279 : vector<8x128xf32>
    %281 = vector.extract_strided_slice %280 {offsets = [0, 0], sizes = [8, 96], strides = [1, 1]} : vector<8x128xf32> to vector<8x96xf32>
    %282 = arith.negf %281 : vector<8x96xf32>
    %283 = math.exp %282 : vector<8x96xf32>
    %cst_86 = arith.constant 1.000000e+00 : f32
    %284 = vector.broadcast %cst_86 : f32 to vector<8x96xf32>
    %285 = arith.addf %284, %283 : vector<8x96xf32>
    %286 = arith.divf %284, %285 : vector<8x96xf32>
    %287 = vector.extract_strided_slice %280 {offsets = [0, 96], sizes = [8, 32], strides = [1, 1]} : vector<8x128xf32> to vector<8x32xf32>
    %288 = math.tanh %287 : vector<8x32xf32>
    %289 = vector.extract_strided_slice %286 {offsets = [0, 32], sizes = [8, 32], strides = [1, 1]} : vector<8x96xf32> to vector<8x32xf32>
    %290 = arith.mulf %289, %249 : vector<8x32xf32>
    %291 = vector.extract_strided_slice %286 {offsets = [0, 0], sizes = [8, 32], strides = [1, 1]} : vector<8x96xf32> to vector<8x32xf32>
    %292 = arith.mulf %291, %288 : vector<8x32xf32>
    %293 = arith.addf %290, %292 : vector<8x32xf32>
    %294 = vector.extract_strided_slice %286 {offsets = [0, 64], sizes = [8, 32], strides = [1, 1]} : vector<8x96xf32> to vector<8x32xf32>
    %295 = math.tanh %293 : vector<8x32xf32>
    %296 = arith.mulf %294, %295 : vector<8x32xf32>
    %c0_87 = arith.constant 0 : index
    %c48_88 = arith.constant 48 : index
    %c0_89 = arith.constant 0 : index
    %297 = vector.load %arg9[%c0_87, %c48_88, %c0_89] : memref<2x128x32xf32, #tpu.memory_space<vmem>>, vector<1x8x32xf32>
    %298 = vector.shape_cast %297 : vector<1x8x32xf32> to vector<8x32xf32>
    %299 = vector.shape_cast %296 : vector<8x32xf32> to vector<1x8x32xf32>
    tpu.vector_store %arg9[%c0_87, %c48_88, %c0_89], %299 {strides = array<i32>} : memref<2x128x32xf32, #tpu.memory_space<vmem>>, vector<1x8x32xf32>,
    %c72 = arith.constant 72 : index
    %c128_90 = arith.constant 128 : index
    %300 = vector.load %arg8[%c72, %c128_90] : memref<128x256xf32, #tpu.memory_space<vmem>>, vector<8x128xf32>
    %cst_91 = arith.constant dense<0.000000e+00> : vector<8x128xf32>
    %301 = tpu.matmul %274, %11, %cst_91 {dimension_numbers = #tpu.dot_dimension_numbers<[1], [0], [0], [1], [0, 0, 1, 1], [], []>} : vector<8x32xf32>, vector<32x128xf32>, vector<8x128xf32> -> vector<8x128xf32>
    %302 = arith.addf %300, %301 : vector<8x128xf32>
    %303 = vector.extract_strided_slice %302 {offsets = [0, 0], sizes = [8, 96], strides = [1, 1]} : vector<8x128xf32> to vector<8x96xf32>
    %304 = arith.negf %303 : vector<8x96xf32>
    %305 = math.exp %304 : vector<8x96xf32>
    %cst_92 = arith.constant 1.000000e+00 : f32
    %306 = vector.broadcast %cst_92 : f32 to vector<8x96xf32>
    %307 = arith.addf %306, %305 : vector<8x96xf32>
    %308 = arith.divf %306, %307 : vector<8x96xf32>
    %309 = vector.extract_strided_slice %302 {offsets = [0, 96], sizes = [8, 32], strides = [1, 1]} : vector<8x128xf32> to vector<8x32xf32>
    %310 = math.tanh %309 : vector<8x32xf32>
    %311 = vector.extract_strided_slice %308 {offsets = [0, 32], sizes = [8, 32], strides = [1, 1]} : vector<8x96xf32> to vector<8x32xf32>
    %312 = arith.mulf %311, %271 : vector<8x32xf32>
    %313 = vector.extract_strided_slice %308 {offsets = [0, 0], sizes = [8, 32], strides = [1, 1]} : vector<8x96xf32> to vector<8x32xf32>
    %314 = arith.mulf %313, %310 : vector<8x32xf32>
    %315 = arith.addf %312, %314 : vector<8x32xf32>
    %316 = vector.extract_strided_slice %308 {offsets = [0, 64], sizes = [8, 32], strides = [1, 1]} : vector<8x96xf32> to vector<8x32xf32>
    %317 = math.tanh %315 : vector<8x32xf32>
    %318 = arith.mulf %316, %317 : vector<8x32xf32>
    %c1_93 = arith.constant 1 : index
    %c72_94 = arith.constant 72 : index
    %c0_95 = arith.constant 0 : index
    %319 = vector.load %arg9[%c1_93, %c72_94, %c0_95] : memref<2x128x32xf32, #tpu.memory_space<vmem>>, vector<1x8x32xf32>
    %320 = vector.shape_cast %319 : vector<1x8x32xf32> to vector<8x32xf32>
    %321 = vector.shape_cast %318 : vector<8x32xf32> to vector<1x8x32xf32>
    tpu.vector_store %arg9[%c1_93, %c72_94, %c0_95], %321 {strides = array<i32>} : memref<2x128x32xf32, #tpu.memory_space<vmem>>, vector<1x8x32xf32>,
    %c56 = arith.constant 56 : index
    %c0_96 = arith.constant 0 : index
    %322 = vector.load %arg8[%c56, %c0_96] : memref<128x256xf32, #tpu.memory_space<vmem>>, vector<8x128xf32>
    %cst_97 = arith.constant dense<0.000000e+00> : vector<8x128xf32>
    %323 = tpu.matmul %296, %8, %cst_97 {dimension_numbers = #tpu.dot_dimension_numbers<[1], [0], [0], [1], [0, 0, 1, 1], [], []>} : vector<8x32xf32>, vector<32x128xf32>, vector<8x128xf32> -> vector<8x128xf32>
    %324 = arith.addf %322, %323 : vector<8x128xf32>
    %325 = vector.extract_strided_slice %324 {offsets = [0, 0], sizes = [8, 96], strides = [1, 1]} : vector<8x128xf32> to vector<8x96xf32>
    %326 = arith.negf %325 : vector<8x96xf32>
    %327 = math.exp %326 : vector<8x96xf32>
    %cst_98 = arith.constant 1.000000e+00 : f32
    %328 = vector.broadcast %cst_98 : f32 to vector<8x96xf32>
    %329 = arith.addf %328, %327 : vector<8x96xf32>
    %330 = arith.divf %328, %329 : vector<8x96xf32>
    %331 = vector.extract_strided_slice %324 {offsets = [0, 96], sizes = [8, 32], strides = [1, 1]} : vector<8x128xf32> to vector<8x32xf32>
    %332 = math.tanh %331 : vector<8x32xf32>
    %333 = vector.extract_strided_slice %330 {offsets = [0, 32], sizes = [8, 32], strides = [1, 1]} : vector<8x96xf32> to vector<8x32xf32>
    %334 = arith.mulf %333, %293 : vector<8x32xf32>
    %335 = vector.extract_strided_slice %330 {offsets = [0, 0], sizes = [8, 32], strides = [1, 1]} : vector<8x96xf32> to vector<8x32xf32>
    %336 = arith.mulf %335, %332 : vector<8x32xf32>
    %337 = arith.addf %334, %336 : vector<8x32xf32>
    %338 = vector.extract_strided_slice %330 {offsets = [0, 64], sizes = [8, 32], strides = [1, 1]} : vector<8x96xf32> to vector<8x32xf32>
    %339 = math.tanh %337 : vector<8x32xf32>
    %340 = arith.mulf %338, %339 : vector<8x32xf32>
    %c0_99 = arith.constant 0 : index
    %c56_100 = arith.constant 56 : index
    %c0_101 = arith.constant 0 : index
    %341 = vector.load %arg9[%c0_99, %c56_100, %c0_101] : memref<2x128x32xf32, #tpu.memory_space<vmem>>, vector<1x8x32xf32>
    %342 = vector.shape_cast %341 : vector<1x8x32xf32> to vector<8x32xf32>
    %343 = vector.shape_cast %340 : vector<8x32xf32> to vector<1x8x32xf32>
    tpu.vector_store %arg9[%c0_99, %c56_100, %c0_101], %343 {strides = array<i32>} : memref<2x128x32xf32, #tpu.memory_space<vmem>>, vector<1x8x32xf32>,
    %c64 = arith.constant 64 : index
    %c128_102 = arith.constant 128 : index
    %344 = vector.load %arg8[%c64, %c128_102] : memref<128x256xf32, #tpu.memory_space<vmem>>, vector<8x128xf32>
    %cst_103 = arith.constant dense<0.000000e+00> : vector<8x128xf32>
    %345 = tpu.matmul %318, %11, %cst_103 {dimension_numbers = #tpu.dot_dimension_numbers<[1], [0], [0], [1], [0, 0, 1, 1], [], []>} : vector<8x32xf32>, vector<32x128xf32>, vector<8x128xf32> -> vector<8x128xf32>
    %346 = arith.addf %344, %345 : vector<8x128xf32>
    %347 = vector.extract_strided_slice %346 {offsets = [0, 0], sizes = [8, 96], strides = [1, 1]} : vector<8x128xf32> to vector<8x96xf32>
    %348 = arith.negf %347 : vector<8x96xf32>
    %349 = math.exp %348 : vector<8x96xf32>
    %cst_104 = arith.constant 1.000000e+00 : f32
    %350 = vector.broadcast %cst_104 : f32 to vector<8x96xf32>
    %351 = arith.addf %350, %349 : vector<8x96xf32>
    %352 = arith.divf %350, %351 : vector<8x96xf32>
    %353 = vector.extract_strided_slice %346 {offsets = [0, 96], sizes = [8, 32], strides = [1, 1]} : vector<8x128xf32> to vector<8x32xf32>
    %354 = math.tanh %353 : vector<8x32xf32>
    %355 = vector.extract_strided_slice %352 {offsets = [0, 32], sizes = [8, 32], strides = [1, 1]} : vector<8x96xf32> to vector<8x32xf32>
    %356 = arith.mulf %355, %315 : vector<8x32xf32>
    %357 = vector.extract_strided_slice %352 {offsets = [0, 0], sizes = [8, 32], strides = [1, 1]} : vector<8x96xf32> to vector<8x32xf32>
    %358 = arith.mulf %357, %354 : vector<8x32xf32>
    %359 = arith.addf %356, %358 : vector<8x32xf32>
    %360 = vector.extract_strided_slice %352 {offsets = [0, 64], sizes = [8, 32], strides = [1, 1]} : vector<8x96xf32> to vector<8x32xf32>
    %361 = math.tanh %359 : vector<8x32xf32>
    %362 = arith.mulf %360, %361 : vector<8x32xf32>
    %c1_105 = arith.constant 1 : index
    %c64_106 = arith.constant 64 : index
    %c0_107 = arith.constant 0 : index
    %363 = vector.load %arg9[%c1_105, %c64_106, %c0_107] : memref<2x128x32xf32, #tpu.memory_space<vmem>>, vector<1x8x32xf32>
    %364 = vector.shape_cast %363 : vector<1x8x32xf32> to vector<8x32xf32>
    %365 = vector.shape_cast %362 : vector<8x32xf32> to vector<1x8x32xf32>
    tpu.vector_store %arg9[%c1_105, %c64_106, %c0_107], %365 {strides = array<i32>} : memref<2x128x32xf32, #tpu.memory_space<vmem>>, vector<1x8x32xf32>,
    %c64_108 = arith.constant 64 : index
    %c0_109 = arith.constant 0 : index
    %366 = vector.load %arg8[%c64_108, %c0_109] : memref<128x256xf32, #tpu.memory_space<vmem>>, vector<8x128xf32>
    %cst_110 = arith.constant dense<0.000000e+00> : vector<8x128xf32>
    %367 = tpu.matmul %340, %8, %cst_110 {dimension_numbers = #tpu.dot_dimension_numbers<[1], [0], [0], [1], [0, 0, 1, 1], [], []>} : vector<8x32xf32>, vector<32x128xf32>, vector<8x128xf32> -> vector<8x128xf32>
    %368 = arith.addf %366, %367 : vector<8x128xf32>
    %369 = vector.extract_strided_slice %368 {offsets = [0, 0], sizes = [8, 96], strides = [1, 1]} : vector<8x128xf32> to vector<8x96xf32>
    %370 = arith.negf %369 : vector<8x96xf32>
    %371 = math.exp %370 : vector<8x96xf32>
    %cst_111 = arith.constant 1.000000e+00 : f32
    %372 = vector.broadcast %cst_111 : f32 to vector<8x96xf32>
    %373 = arith.addf %372, %371 : vector<8x96xf32>
    %374 = arith.divf %372, %373 : vector<8x96xf32>
    %375 = vector.extract_strided_slice %368 {offsets = [0, 96], sizes = [8, 32], strides = [1, 1]} : vector<8x128xf32> to vector<8x32xf32>
    %376 = math.tanh %375 : vector<8x32xf32>
    %377 = vector.extract_strided_slice %374 {offsets = [0, 32], sizes = [8, 32], strides = [1, 1]} : vector<8x96xf32> to vector<8x32xf32>
    %378 = arith.mulf %377, %337 : vector<8x32xf32>
    %379 = vector.extract_strided_slice %374 {offsets = [0, 0], sizes = [8, 32], strides = [1, 1]} : vector<8x96xf32> to vector<8x32xf32>
    %380 = arith.mulf %379, %376 : vector<8x32xf32>
    %381 = arith.addf %378, %380 : vector<8x32xf32>
    %382 = vector.extract_strided_slice %374 {offsets = [0, 64], sizes = [8, 32], strides = [1, 1]} : vector<8x96xf32> to vector<8x32xf32>
    %383 = math.tanh %381 : vector<8x32xf32>
    %384 = arith.mulf %382, %383 : vector<8x32xf32>
    %c0_112 = arith.constant 0 : index
    %c64_113 = arith.constant 64 : index
    %c0_114 = arith.constant 0 : index
    %385 = vector.load %arg9[%c0_112, %c64_113, %c0_114] : memref<2x128x32xf32, #tpu.memory_space<vmem>>, vector<1x8x32xf32>
    %386 = vector.shape_cast %385 : vector<1x8x32xf32> to vector<8x32xf32>
    %387 = vector.shape_cast %384 : vector<8x32xf32> to vector<1x8x32xf32>
    tpu.vector_store %arg9[%c0_112, %c64_113, %c0_114], %387 {strides = array<i32>} : memref<2x128x32xf32, #tpu.memory_space<vmem>>, vector<1x8x32xf32>,
    %c56_115 = arith.constant 56 : index
    %c128_116 = arith.constant 128 : index
    %388 = vector.load %arg8[%c56_115, %c128_116] : memref<128x256xf32, #tpu.memory_space<vmem>>, vector<8x128xf32>
    %cst_117 = arith.constant dense<0.000000e+00> : vector<8x128xf32>
    %389 = tpu.matmul %362, %11, %cst_117 {dimension_numbers = #tpu.dot_dimension_numbers<[1], [0], [0], [1], [0, 0, 1, 1], [], []>} : vector<8x32xf32>, vector<32x128xf32>, vector<8x128xf32> -> vector<8x128xf32>
    %390 = arith.addf %388, %389 : vector<8x128xf32>
    %391 = vector.extract_strided_slice %390 {offsets = [0, 0], sizes = [8, 96], strides = [1, 1]} : vector<8x128xf32> to vector<8x96xf32>
    %392 = arith.negf %391 : vector<8x96xf32>
    %393 = math.exp %392 : vector<8x96xf32>
    %cst_118 = arith.constant 1.000000e+00 : f32
    %394 = vector.broadcast %cst_118 : f32 to vector<8x96xf32>
    %395 = arith.addf %394, %393 : vector<8x96xf32>
    %396 = arith.divf %394, %395 : vector<8x96xf32>
    %397 = vector.extract_strided_slice %390 {offsets = [0, 96], sizes = [8, 32], strides = [1, 1]} : vector<8x128xf32> to vector<8x32xf32>
    %398 = math.tanh %397 : vector<8x32xf32>
    %399 = vector.extract_strided_slice %396 {offsets = [0, 32], sizes = [8, 32], strides = [1, 1]} : vector<8x96xf32> to vector<8x32xf32>
    %400 = arith.mulf %399, %359 : vector<8x32xf32>
    %401 = vector.extract_strided_slice %396 {offsets = [0, 0], sizes = [8, 32], strides = [1, 1]} : vector<8x96xf32> to vector<8x32xf32>
    %402 = arith.mulf %401, %398 : vector<8x32xf32>
    %403 = arith.addf %400, %402 : vector<8x32xf32>
    %404 = vector.extract_strided_slice %396 {offsets = [0, 64], sizes = [8, 32], strides = [1, 1]} : vector<8x96xf32> to vector<8x32xf32>
    %405 = math.tanh %403 : vector<8x32xf32>
    %406 = arith.mulf %404, %405 : vector<8x32xf32>
    %c1_119 = arith.constant 1 : index
    %c56_120 = arith.constant 56 : index
    %c0_121 = arith.constant 0 : index
    %407 = vector.load %arg9[%c1_119, %c56_120, %c0_121] : memref<2x128x32xf32, #tpu.memory_space<vmem>>, vector<1x8x32xf32>
    %408 = vector.shape_cast %407 : vector<1x8x32xf32> to vector<8x32xf32>
    %409 = vector.shape_cast %406 : vector<8x32xf32> to vector<1x8x32xf32>
    tpu.vector_store %arg9[%c1_119, %c56_120, %c0_121], %409 {strides = array<i32>} : memref<2x128x32xf32, #tpu.memory_space<vmem>>, vector<1x8x32xf32>,
    %c72_122 = arith.constant 72 : index
    %c0_123 = arith.constant 0 : index
    %410 = vector.load %arg8[%c72_122, %c0_123] : memref<128x256xf32, #tpu.memory_space<vmem>>, vector<8x128xf32>
    %cst_124 = arith.constant dense<0.000000e+00> : vector<8x128xf32>
    %411 = tpu.matmul %384, %8, %cst_124 {dimension_numbers = #tpu.dot_dimension_numbers<[1], [0], [0], [1], [0, 0, 1, 1], [], []>} : vector<8x32xf32>, vector<32x128xf32>, vector<8x128xf32> -> vector<8x128xf32>
    %412 = arith.addf %410, %411 : vector<8x128xf32>
    %413 = vector.extract_strided_slice %412 {offsets = [0, 0], sizes = [8, 96], strides = [1, 1]} : vector<8x128xf32> to vector<8x96xf32>
    %414 = arith.negf %413 : vector<8x96xf32>
    %415 = math.exp %414 : vector<8x96xf32>
    %cst_125 = arith.constant 1.000000e+00 : f32
    %416 = vector.broadcast %cst_125 : f32 to vector<8x96xf32>
    %417 = arith.addf %416, %415 : vector<8x96xf32>
    %418 = arith.divf %416, %417 : vector<8x96xf32>
    %419 = vector.extract_strided_slice %412 {offsets = [0, 96], sizes = [8, 32], strides = [1, 1]} : vector<8x128xf32> to vector<8x32xf32>
    %420 = math.tanh %419 : vector<8x32xf32>
    %421 = vector.extract_strided_slice %418 {offsets = [0, 32], sizes = [8, 32], strides = [1, 1]} : vector<8x96xf32> to vector<8x32xf32>
    %422 = arith.mulf %421, %381 : vector<8x32xf32>
    %423 = vector.extract_strided_slice %418 {offsets = [0, 0], sizes = [8, 32], strides = [1, 1]} : vector<8x96xf32> to vector<8x32xf32>
    %424 = arith.mulf %423, %420 : vector<8x32xf32>
    %425 = arith.addf %422, %424 : vector<8x32xf32>
    %426 = vector.extract_strided_slice %418 {offsets = [0, 64], sizes = [8, 32], strides = [1, 1]} : vector<8x96xf32> to vector<8x32xf32>
    %427 = math.tanh %425 : vector<8x32xf32>
    %428 = arith.mulf %426, %427 : vector<8x32xf32>
    %c0_126 = arith.constant 0 : index
    %c72_127 = arith.constant 72 : index
    %c0_128 = arith.constant 0 : index
    %429 = vector.load %arg9[%c0_126, %c72_127, %c0_128] : memref<2x128x32xf32, #tpu.memory_space<vmem>>, vector<1x8x32xf32>
    %430 = vector.shape_cast %429 : vector<1x8x32xf32> to vector<8x32xf32>
    %431 = vector.shape_cast %428 : vector<8x32xf32> to vector<1x8x32xf32>
    tpu.vector_store %arg9[%c0_126, %c72_127, %c0_128], %431 {strides = array<i32>} : memref<2x128x32xf32, #tpu.memory_space<vmem>>, vector<1x8x32xf32>,
    %c48_129 = arith.constant 48 : index
    %c128_130 = arith.constant 128 : index
    %432 = vector.load %arg8[%c48_129, %c128_130] : memref<128x256xf32, #tpu.memory_space<vmem>>, vector<8x128xf32>
    %cst_131 = arith.constant dense<0.000000e+00> : vector<8x128xf32>
    %433 = tpu.matmul %406, %11, %cst_131 {dimension_numbers = #tpu.dot_dimension_numbers<[1], [0], [0], [1], [0, 0, 1, 1], [], []>} : vector<8x32xf32>, vector<32x128xf32>, vector<8x128xf32> -> vector<8x128xf32>
    %434 = arith.addf %432, %433 : vector<8x128xf32>
    %435 = vector.extract_strided_slice %434 {offsets = [0, 0], sizes = [8, 96], strides = [1, 1]} : vector<8x128xf32> to vector<8x96xf32>
    %436 = arith.negf %435 : vector<8x96xf32>
    %437 = math.exp %436 : vector<8x96xf32>
    %cst_132 = arith.constant 1.000000e+00 : f32
    %438 = vector.broadcast %cst_132 : f32 to vector<8x96xf32>
    %439 = arith.addf %438, %437 : vector<8x96xf32>
    %440 = arith.divf %438, %439 : vector<8x96xf32>
    %441 = vector.extract_strided_slice %434 {offsets = [0, 96], sizes = [8, 32], strides = [1, 1]} : vector<8x128xf32> to vector<8x32xf32>
    %442 = math.tanh %441 : vector<8x32xf32>
    %443 = vector.extract_strided_slice %440 {offsets = [0, 32], sizes = [8, 32], strides = [1, 1]} : vector<8x96xf32> to vector<8x32xf32>
    %444 = arith.mulf %443, %403 : vector<8x32xf32>
    %445 = vector.extract_strided_slice %440 {offsets = [0, 0], sizes = [8, 32], strides = [1, 1]} : vector<8x96xf32> to vector<8x32xf32>
    %446 = arith.mulf %445, %442 : vector<8x32xf32>
    %447 = arith.addf %444, %446 : vector<8x32xf32>
    %448 = vector.extract_strided_slice %440 {offsets = [0, 64], sizes = [8, 32], strides = [1, 1]} : vector<8x96xf32> to vector<8x32xf32>
    %449 = math.tanh %447 : vector<8x32xf32>
    %450 = arith.mulf %448, %449 : vector<8x32xf32>
    %c1_133 = arith.constant 1 : index
    %c48_134 = arith.constant 48 : index
    %c0_135 = arith.constant 0 : index
    %451 = vector.load %arg9[%c1_133, %c48_134, %c0_135] : memref<2x128x32xf32, #tpu.memory_space<vmem>>, vector<1x8x32xf32>
    %452 = vector.shape_cast %451 : vector<1x8x32xf32> to vector<8x32xf32>
    %453 = vector.shape_cast %450 : vector<8x32xf32> to vector<1x8x32xf32>
    tpu.vector_store %arg9[%c1_133, %c48_134, %c0_135], %453 {strides = array<i32>} : memref<2x128x32xf32, #tpu.memory_space<vmem>>, vector<1x8x32xf32>,
    %c80_136 = arith.constant 80 : index
    %c0_137 = arith.constant 0 : index
    %454 = vector.load %arg8[%c80_136, %c0_137] : memref<128x256xf32, #tpu.memory_space<vmem>>, vector<8x128xf32>
    %cst_138 = arith.constant dense<0.000000e+00> : vector<8x128xf32>
    %455 = tpu.matmul %428, %8, %cst_138 {dimension_numbers = #tpu.dot_dimension_numbers<[1], [0], [0], [1], [0, 0, 1, 1], [], []>} : vector<8x32xf32>, vector<32x128xf32>, vector<8x128xf32> -> vector<8x128xf32>
    %456 = arith.addf %454, %455 : vector<8x128xf32>
    %457 = vector.extract_strided_slice %456 {offsets = [0, 0], sizes = [8, 96], strides = [1, 1]} : vector<8x128xf32> to vector<8x96xf32>
    %458 = arith.negf %457 : vector<8x96xf32>
    %459 = math.exp %458 : vector<8x96xf32>
    %cst_139 = arith.constant 1.000000e+00 : f32
    %460 = vector.broadcast %cst_139 : f32 to vector<8x96xf32>
    %461 = arith.addf %460, %459 : vector<8x96xf32>
    %462 = arith.divf %460, %461 : vector<8x96xf32>
    %463 = vector.extract_strided_slice %456 {offsets = [0, 96], sizes = [8, 32], strides = [1, 1]} : vector<8x128xf32> to vector<8x32xf32>
    %464 = math.tanh %463 : vector<8x32xf32>
    %465 = vector.extract_strided_slice %462 {offsets = [0, 32], sizes = [8, 32], strides = [1, 1]} : vector<8x96xf32> to vector<8x32xf32>
    %466 = arith.mulf %465, %425 : vector<8x32xf32>
    %467 = vector.extract_strided_slice %462 {offsets = [0, 0], sizes = [8, 32], strides = [1, 1]} : vector<8x96xf32> to vector<8x32xf32>
    %468 = arith.mulf %467, %464 : vector<8x32xf32>
    %469 = arith.addf %466, %468 : vector<8x32xf32>
    %470 = vector.extract_strided_slice %462 {offsets = [0, 64], sizes = [8, 32], strides = [1, 1]} : vector<8x96xf32> to vector<8x32xf32>
    %471 = math.tanh %469 : vector<8x32xf32>
    %472 = arith.mulf %470, %471 : vector<8x32xf32>
    %c0_140 = arith.constant 0 : index
    %c80_141 = arith.constant 80 : index
    %c0_142 = arith.constant 0 : index
    %473 = vector.load %arg9[%c0_140, %c80_141, %c0_142] : memref<2x128x32xf32, #tpu.memory_space<vmem>>, vector<1x8x32xf32>
    %474 = vector.shape_cast %473 : vector<1x8x32xf32> to vector<8x32xf32>
    %475 = vector.shape_cast %472 : vector<8x32xf32> to vector<1x8x32xf32>
    tpu.vector_store %arg9[%c0_140, %c80_141, %c0_142], %475 {strides = array<i32>} : memref<2x128x32xf32, #tpu.memory_space<vmem>>, vector<1x8x32xf32>,
    %c40_143 = arith.constant 40 : index
    %c128_144 = arith.constant 128 : index
    %476 = vector.load %arg8[%c40_143, %c128_144] : memref<128x256xf32, #tpu.memory_space<vmem>>, vector<8x128xf32>
    %cst_145 = arith.constant dense<0.000000e+00> : vector<8x128xf32>
    %477 = tpu.matmul %450, %11, %cst_145 {dimension_numbers = #tpu.dot_dimension_numbers<[1], [0], [0], [1], [0, 0, 1, 1], [], []>} : vector<8x32xf32>, vector<32x128xf32>, vector<8x128xf32> -> vector<8x128xf32>
    %478 = arith.addf %476, %477 : vector<8x128xf32>
    %479 = vector.extract_strided_slice %478 {offsets = [0, 0], sizes = [8, 96], strides = [1, 1]} : vector<8x128xf32> to vector<8x96xf32>
    %480 = arith.negf %479 : vector<8x96xf32>
    %481 = math.exp %480 : vector<8x96xf32>
    %cst_146 = arith.constant 1.000000e+00 : f32
    %482 = vector.broadcast %cst_146 : f32 to vector<8x96xf32>
    %483 = arith.addf %482, %481 : vector<8x96xf32>
    %484 = arith.divf %482, %483 : vector<8x96xf32>
    %485 = vector.extract_strided_slice %478 {offsets = [0, 96], sizes = [8, 32], strides = [1, 1]} : vector<8x128xf32> to vector<8x32xf32>
    %486 = math.tanh %485 : vector<8x32xf32>
    %487 = vector.extract_strided_slice %484 {offsets = [0, 32], sizes = [8, 32], strides = [1, 1]} : vector<8x96xf32> to vector<8x32xf32>
    %488 = arith.mulf %487, %447 : vector<8x32xf32>
    %489 = vector.extract_strided_slice %484 {offsets = [0, 0], sizes = [8, 32], strides = [1, 1]} : vector<8x96xf32> to vector<8x32xf32>
    %490 = arith.mulf %489, %486 : vector<8x32xf32>
    %491 = arith.addf %488, %490 : vector<8x32xf32>
    %492 = vector.extract_strided_slice %484 {offsets = [0, 64], sizes = [8, 32], strides = [1, 1]} : vector<8x96xf32> to vector<8x32xf32>
    %493 = math.tanh %491 : vector<8x32xf32>
    %494 = arith.mulf %492, %493 : vector<8x32xf32>
    %c1_147 = arith.constant 1 : index
    %c40_148 = arith.constant 40 : index
    %c0_149 = arith.constant 0 : index
    %495 = vector.load %arg9[%c1_147, %c40_148, %c0_149] : memref<2x128x32xf32, #tpu.memory_space<vmem>>, vector<1x8x32xf32>
    %496 = vector.shape_cast %495 : vector<1x8x32xf32> to vector<8x32xf32>
    %497 = vector.shape_cast %494 : vector<8x32xf32> to vector<1x8x32xf32>
    tpu.vector_store %arg9[%c1_147, %c40_148, %c0_149], %497 {strides = array<i32>} : memref<2x128x32xf32, #tpu.memory_space<vmem>>, vector<1x8x32xf32>,
    %c88_150 = arith.constant 88 : index
    %c0_151 = arith.constant 0 : index
    %498 = vector.load %arg8[%c88_150, %c0_151] : memref<128x256xf32, #tpu.memory_space<vmem>>, vector<8x128xf32>
    %cst_152 = arith.constant dense<0.000000e+00> : vector<8x128xf32>
    %499 = tpu.matmul %472, %8, %cst_152 {dimension_numbers = #tpu.dot_dimension_numbers<[1], [0], [0], [1], [0, 0, 1, 1], [], []>} : vector<8x32xf32>, vector<32x128xf32>, vector<8x128xf32> -> vector<8x128xf32>
    %500 = arith.addf %498, %499 : vector<8x128xf32>
    %501 = vector.extract_strided_slice %500 {offsets = [0, 0], sizes = [8, 96], strides = [1, 1]} : vector<8x128xf32> to vector<8x96xf32>
    %502 = arith.negf %501 : vector<8x96xf32>
    %503 = math.exp %502 : vector<8x96xf32>
    %cst_153 = arith.constant 1.000000e+00 : f32
    %504 = vector.broadcast %cst_153 : f32 to vector<8x96xf32>
    %505 = arith.addf %504, %503 : vector<8x96xf32>
    %506 = arith.divf %504, %505 : vector<8x96xf32>
    %507 = vector.extract_strided_slice %500 {offsets = [0, 96], sizes = [8, 32], strides = [1, 1]} : vector<8x128xf32> to vector<8x32xf32>
    %508 = math.tanh %507 : vector<8x32xf32>
    %509 = vector.extract_strided_slice %506 {offsets = [0, 32], sizes = [8, 32], strides = [1, 1]} : vector<8x96xf32> to vector<8x32xf32>
    %510 = arith.mulf %509, %469 : vector<8x32xf32>
    %511 = vector.extract_strided_slice %506 {offsets = [0, 0], sizes = [8, 32], strides = [1, 1]} : vector<8x96xf32> to vector<8x32xf32>
    %512 = arith.mulf %511, %508 : vector<8x32xf32>
    %513 = arith.addf %510, %512 : vector<8x32xf32>
    %514 = vector.extract_strided_slice %506 {offsets = [0, 64], sizes = [8, 32], strides = [1, 1]} : vector<8x96xf32> to vector<8x32xf32>
    %515 = math.tanh %513 : vector<8x32xf32>
    %516 = arith.mulf %514, %515 : vector<8x32xf32>
    %c0_154 = arith.constant 0 : index
    %c88_155 = arith.constant 88 : index
    %c0_156 = arith.constant 0 : index
    %517 = vector.load %arg9[%c0_154, %c88_155, %c0_156] : memref<2x128x32xf32, #tpu.memory_space<vmem>>, vector<1x8x32xf32>
    %518 = vector.shape_cast %517 : vector<1x8x32xf32> to vector<8x32xf32>
    %519 = vector.shape_cast %516 : vector<8x32xf32> to vector<1x8x32xf32>
    tpu.vector_store %arg9[%c0_154, %c88_155, %c0_156], %519 {strides = array<i32>} : memref<2x128x32xf32, #tpu.memory_space<vmem>>, vector<1x8x32xf32>,
    %c32_157 = arith.constant 32 : index
    %c128_158 = arith.constant 128 : index
    %520 = vector.load %arg8[%c32_157, %c128_158] : memref<128x256xf32, #tpu.memory_space<vmem>>, vector<8x128xf32>
    %cst_159 = arith.constant dense<0.000000e+00> : vector<8x128xf32>
    %521 = tpu.matmul %494, %11, %cst_159 {dimension_numbers = #tpu.dot_dimension_numbers<[1], [0], [0], [1], [0, 0, 1, 1], [], []>} : vector<8x32xf32>, vector<32x128xf32>, vector<8x128xf32> -> vector<8x128xf32>
    %522 = arith.addf %520, %521 : vector<8x128xf32>
    %523 = vector.extract_strided_slice %522 {offsets = [0, 0], sizes = [8, 96], strides = [1, 1]} : vector<8x128xf32> to vector<8x96xf32>
    %524 = arith.negf %523 : vector<8x96xf32>
    %525 = math.exp %524 : vector<8x96xf32>
    %cst_160 = arith.constant 1.000000e+00 : f32
    %526 = vector.broadcast %cst_160 : f32 to vector<8x96xf32>
    %527 = arith.addf %526, %525 : vector<8x96xf32>
    %528 = arith.divf %526, %527 : vector<8x96xf32>
    %529 = vector.extract_strided_slice %522 {offsets = [0, 96], sizes = [8, 32], strides = [1, 1]} : vector<8x128xf32> to vector<8x32xf32>
    %530 = math.tanh %529 : vector<8x32xf32>
    %531 = vector.extract_strided_slice %528 {offsets = [0, 32], sizes = [8, 32], strides = [1, 1]} : vector<8x96xf32> to vector<8x32xf32>
    %532 = arith.mulf %531, %491 : vector<8x32xf32>
    %533 = vector.extract_strided_slice %528 {offsets = [0, 0], sizes = [8, 32], strides = [1, 1]} : vector<8x96xf32> to vector<8x32xf32>
    %534 = arith.mulf %533, %530 : vector<8x32xf32>
    %535 = arith.addf %532, %534 : vector<8x32xf32>
    %536 = vector.extract_strided_slice %528 {offsets = [0, 64], sizes = [8, 32], strides = [1, 1]} : vector<8x96xf32> to vector<8x32xf32>
    %537 = math.tanh %535 : vector<8x32xf32>
    %538 = arith.mulf %536, %537 : vector<8x32xf32>
    %c1_161 = arith.constant 1 : index
    %c32_162 = arith.constant 32 : index
    %c0_163 = arith.constant 0 : index
    %539 = vector.load %arg9[%c1_161, %c32_162, %c0_163] : memref<2x128x32xf32, #tpu.memory_space<vmem>>, vector<1x8x32xf32>
    %540 = vector.shape_cast %539 : vector<1x8x32xf32> to vector<8x32xf32>
    %541 = vector.shape_cast %538 : vector<8x32xf32> to vector<1x8x32xf32>
    tpu.vector_store %arg9[%c1_161, %c32_162, %c0_163], %541 {strides = array<i32>} : memref<2x128x32xf32, #tpu.memory_space<vmem>>, vector<1x8x32xf32>,
    %c96_164 = arith.constant 96 : index
    %c0_165 = arith.constant 0 : index
    %542 = vector.load %arg8[%c96_164, %c0_165] : memref<128x256xf32, #tpu.memory_space<vmem>>, vector<8x128xf32>
    %cst_166 = arith.constant dense<0.000000e+00> : vector<8x128xf32>
    %543 = tpu.matmul %516, %8, %cst_166 {dimension_numbers = #tpu.dot_dimension_numbers<[1], [0], [0], [1], [0, 0, 1, 1], [], []>} : vector<8x32xf32>, vector<32x128xf32>, vector<8x128xf32> -> vector<8x128xf32>
    %544 = arith.addf %542, %543 : vector<8x128xf32>
    %545 = vector.extract_strided_slice %544 {offsets = [0, 0], sizes = [8, 96], strides = [1, 1]} : vector<8x128xf32> to vector<8x96xf32>
    %546 = arith.negf %545 : vector<8x96xf32>
    %547 = math.exp %546 : vector<8x96xf32>
    %cst_167 = arith.constant 1.000000e+00 : f32
    %548 = vector.broadcast %cst_167 : f32 to vector<8x96xf32>
    %549 = arith.addf %548, %547 : vector<8x96xf32>
    %550 = arith.divf %548, %549 : vector<8x96xf32>
    %551 = vector.extract_strided_slice %544 {offsets = [0, 96], sizes = [8, 32], strides = [1, 1]} : vector<8x128xf32> to vector<8x32xf32>
    %552 = math.tanh %551 : vector<8x32xf32>
    %553 = vector.extract_strided_slice %550 {offsets = [0, 32], sizes = [8, 32], strides = [1, 1]} : vector<8x96xf32> to vector<8x32xf32>
    %554 = arith.mulf %553, %513 : vector<8x32xf32>
    %555 = vector.extract_strided_slice %550 {offsets = [0, 0], sizes = [8, 32], strides = [1, 1]} : vector<8x96xf32> to vector<8x32xf32>
    %556 = arith.mulf %555, %552 : vector<8x32xf32>
    %557 = arith.addf %554, %556 : vector<8x32xf32>
    %558 = vector.extract_strided_slice %550 {offsets = [0, 64], sizes = [8, 32], strides = [1, 1]} : vector<8x96xf32> to vector<8x32xf32>
    %559 = math.tanh %557 : vector<8x32xf32>
    %560 = arith.mulf %558, %559 : vector<8x32xf32>
    %c0_168 = arith.constant 0 : index
    %c96_169 = arith.constant 96 : index
    %c0_170 = arith.constant 0 : index
    %561 = vector.load %arg9[%c0_168, %c96_169, %c0_170] : memref<2x128x32xf32, #tpu.memory_space<vmem>>, vector<1x8x32xf32>
    %562 = vector.shape_cast %561 : vector<1x8x32xf32> to vector<8x32xf32>
    %563 = vector.shape_cast %560 : vector<8x32xf32> to vector<1x8x32xf32>
    tpu.vector_store %arg9[%c0_168, %c96_169, %c0_170], %563 {strides = array<i32>} : memref<2x128x32xf32, #tpu.memory_space<vmem>>, vector<1x8x32xf32>,
    %c24_171 = arith.constant 24 : index
    %c128_172 = arith.constant 128 : index
    %564 = vector.load %arg8[%c24_171, %c128_172] : memref<128x256xf32, #tpu.memory_space<vmem>>, vector<8x128xf32>
    %cst_173 = arith.constant dense<0.000000e+00> : vector<8x128xf32>
    %565 = tpu.matmul %538, %11, %cst_173 {dimension_numbers = #tpu.dot_dimension_numbers<[1], [0], [0], [1], [0, 0, 1, 1], [], []>} : vector<8x32xf32>, vector<32x128xf32>, vector<8x128xf32> -> vector<8x128xf32>
    %566 = arith.addf %564, %565 : vector<8x128xf32>
    %567 = vector.extract_strided_slice %566 {offsets = [0, 0], sizes = [8, 96], strides = [1, 1]} : vector<8x128xf32> to vector<8x96xf32>
    %568 = arith.negf %567 : vector<8x96xf32>
    %569 = math.exp %568 : vector<8x96xf32>
    %cst_174 = arith.constant 1.000000e+00 : f32
    %570 = vector.broadcast %cst_174 : f32 to vector<8x96xf32>
    %571 = arith.addf %570, %569 : vector<8x96xf32>
    %572 = arith.divf %570, %571 : vector<8x96xf32>
    %573 = vector.extract_strided_slice %566 {offsets = [0, 96], sizes = [8, 32], strides = [1, 1]} : vector<8x128xf32> to vector<8x32xf32>
    %574 = math.tanh %573 : vector<8x32xf32>
    %575 = vector.extract_strided_slice %572 {offsets = [0, 32], sizes = [8, 32], strides = [1, 1]} : vector<8x96xf32> to vector<8x32xf32>
    %576 = arith.mulf %575, %535 : vector<8x32xf32>
    %577 = vector.extract_strided_slice %572 {offsets = [0, 0], sizes = [8, 32], strides = [1, 1]} : vector<8x96xf32> to vector<8x32xf32>
    %578 = arith.mulf %577, %574 : vector<8x32xf32>
    %579 = arith.addf %576, %578 : vector<8x32xf32>
    %580 = vector.extract_strided_slice %572 {offsets = [0, 64], sizes = [8, 32], strides = [1, 1]} : vector<8x96xf32> to vector<8x32xf32>
    %581 = math.tanh %579 : vector<8x32xf32>
    %582 = arith.mulf %580, %581 : vector<8x32xf32>
    %c1_175 = arith.constant 1 : index
    %c24_176 = arith.constant 24 : index
    %c0_177 = arith.constant 0 : index
    %583 = vector.load %arg9[%c1_175, %c24_176, %c0_177] : memref<2x128x32xf32, #tpu.memory_space<vmem>>, vector<1x8x32xf32>
    %584 = vector.shape_cast %583 : vector<1x8x32xf32> to vector<8x32xf32>
    %585 = vector.shape_cast %582 : vector<8x32xf32> to vector<1x8x32xf32>
    tpu.vector_store %arg9[%c1_175, %c24_176, %c0_177], %585 {strides = array<i32>} : memref<2x128x32xf32, #tpu.memory_space<vmem>>, vector<1x8x32xf32>,
    %c104_178 = arith.constant 104 : index
    %c0_179 = arith.constant 0 : index
    %586 = vector.load %arg8[%c104_178, %c0_179] : memref<128x256xf32, #tpu.memory_space<vmem>>, vector<8x128xf32>
    %cst_180 = arith.constant dense<0.000000e+00> : vector<8x128xf32>
    %587 = tpu.matmul %560, %8, %cst_180 {dimension_numbers = #tpu.dot_dimension_numbers<[1], [0], [0], [1], [0, 0, 1, 1], [], []>} : vector<8x32xf32>, vector<32x128xf32>, vector<8x128xf32> -> vector<8x128xf32>
    %588 = arith.addf %586, %587 : vector<8x128xf32>
    %589 = vector.extract_strided_slice %588 {offsets = [0, 0], sizes = [8, 96], strides = [1, 1]} : vector<8x128xf32> to vector<8x96xf32>
    %590 = arith.negf %589 : vector<8x96xf32>
    %591 = math.exp %590 : vector<8x96xf32>
    %cst_181 = arith.constant 1.000000e+00 : f32
    %592 = vector.broadcast %cst_181 : f32 to vector<8x96xf32>
    %593 = arith.addf %592, %591 : vector<8x96xf32>
    %594 = arith.divf %592, %593 : vector<8x96xf32>
    %595 = vector.extract_strided_slice %588 {offsets = [0, 96], sizes = [8, 32], strides = [1, 1]} : vector<8x128xf32> to vector<8x32xf32>
    %596 = math.tanh %595 : vector<8x32xf32>
    %597 = vector.extract_strided_slice %594 {offsets = [0, 32], sizes = [8, 32], strides = [1, 1]} : vector<8x96xf32> to vector<8x32xf32>
    %598 = arith.mulf %597, %557 : vector<8x32xf32>
    %599 = vector.extract_strided_slice %594 {offsets = [0, 0], sizes = [8, 32], strides = [1, 1]} : vector<8x96xf32> to vector<8x32xf32>
    %600 = arith.mulf %599, %596 : vector<8x32xf32>
    %601 = arith.addf %598, %600 : vector<8x32xf32>
    %602 = vector.extract_strided_slice %594 {offsets = [0, 64], sizes = [8, 32], strides = [1, 1]} : vector<8x96xf32> to vector<8x32xf32>
    %603 = math.tanh %601 : vector<8x32xf32>
    %604 = arith.mulf %602, %603 : vector<8x32xf32>
    %c0_182 = arith.constant 0 : index
    %c104_183 = arith.constant 104 : index
    %c0_184 = arith.constant 0 : index
    %605 = vector.load %arg9[%c0_182, %c104_183, %c0_184] : memref<2x128x32xf32, #tpu.memory_space<vmem>>, vector<1x8x32xf32>
    %606 = vector.shape_cast %605 : vector<1x8x32xf32> to vector<8x32xf32>
    %607 = vector.shape_cast %604 : vector<8x32xf32> to vector<1x8x32xf32>
    tpu.vector_store %arg9[%c0_182, %c104_183, %c0_184], %607 {strides = array<i32>} : memref<2x128x32xf32, #tpu.memory_space<vmem>>, vector<1x8x32xf32>,
    %c16_185 = arith.constant 16 : index
    %c128_186 = arith.constant 128 : index
    %608 = vector.load %arg8[%c16_185, %c128_186] : memref<128x256xf32, #tpu.memory_space<vmem>>, vector<8x128xf32>
    %cst_187 = arith.constant dense<0.000000e+00> : vector<8x128xf32>
    %609 = tpu.matmul %582, %11, %cst_187 {dimension_numbers = #tpu.dot_dimension_numbers<[1], [0], [0], [1], [0, 0, 1, 1], [], []>} : vector<8x32xf32>, vector<32x128xf32>, vector<8x128xf32> -> vector<8x128xf32>
    %610 = arith.addf %608, %609 : vector<8x128xf32>
    %611 = vector.extract_strided_slice %610 {offsets = [0, 0], sizes = [8, 96], strides = [1, 1]} : vector<8x128xf32> to vector<8x96xf32>
    %612 = arith.negf %611 : vector<8x96xf32>
    %613 = math.exp %612 : vector<8x96xf32>
    %cst_188 = arith.constant 1.000000e+00 : f32
    %614 = vector.broadcast %cst_188 : f32 to vector<8x96xf32>
    %615 = arith.addf %614, %613 : vector<8x96xf32>
    %616 = arith.divf %614, %615 : vector<8x96xf32>
    %617 = vector.extract_strided_slice %610 {offsets = [0, 96], sizes = [8, 32], strides = [1, 1]} : vector<8x128xf32> to vector<8x32xf32>
    %618 = math.tanh %617 : vector<8x32xf32>
    %619 = vector.extract_strided_slice %616 {offsets = [0, 32], sizes = [8, 32], strides = [1, 1]} : vector<8x96xf32> to vector<8x32xf32>
    %620 = arith.mulf %619, %579 : vector<8x32xf32>
    %621 = vector.extract_strided_slice %616 {offsets = [0, 0], sizes = [8, 32], strides = [1, 1]} : vector<8x96xf32> to vector<8x32xf32>
    %622 = arith.mulf %621, %618 : vector<8x32xf32>
    %623 = arith.addf %620, %622 : vector<8x32xf32>
    %624 = vector.extract_strided_slice %616 {offsets = [0, 64], sizes = [8, 32], strides = [1, 1]} : vector<8x96xf32> to vector<8x32xf32>
    %625 = math.tanh %623 : vector<8x32xf32>
    %626 = arith.mulf %624, %625 : vector<8x32xf32>
    %c1_189 = arith.constant 1 : index
    %c16_190 = arith.constant 16 : index
    %c0_191 = arith.constant 0 : index
    %627 = vector.load %arg9[%c1_189, %c16_190, %c0_191] : memref<2x128x32xf32, #tpu.memory_space<vmem>>, vector<1x8x32xf32>
    %628 = vector.shape_cast %627 : vector<1x8x32xf32> to vector<8x32xf32>
    %629 = vector.shape_cast %626 : vector<8x32xf32> to vector<1x8x32xf32>
    tpu.vector_store %arg9[%c1_189, %c16_190, %c0_191], %629 {strides = array<i32>} : memref<2x128x32xf32, #tpu.memory_space<vmem>>, vector<1x8x32xf32>,
    %c112_192 = arith.constant 112 : index
    %c0_193 = arith.constant 0 : index
    %630 = vector.load %arg8[%c112_192, %c0_193] : memref<128x256xf32, #tpu.memory_space<vmem>>, vector<8x128xf32>
    %cst_194 = arith.constant dense<0.000000e+00> : vector<8x128xf32>
    %631 = tpu.matmul %604, %8, %cst_194 {dimension_numbers = #tpu.dot_dimension_numbers<[1], [0], [0], [1], [0, 0, 1, 1], [], []>} : vector<8x32xf32>, vector<32x128xf32>, vector<8x128xf32> -> vector<8x128xf32>
    %632 = arith.addf %630, %631 : vector<8x128xf32>
    %633 = vector.extract_strided_slice %632 {offsets = [0, 0], sizes = [8, 96], strides = [1, 1]} : vector<8x128xf32> to vector<8x96xf32>
    %634 = arith.negf %633 : vector<8x96xf32>
    %635 = math.exp %634 : vector<8x96xf32>
    %cst_195 = arith.constant 1.000000e+00 : f32
    %636 = vector.broadcast %cst_195 : f32 to vector<8x96xf32>
    %637 = arith.addf %636, %635 : vector<8x96xf32>
    %638 = arith.divf %636, %637 : vector<8x96xf32>
    %639 = vector.extract_strided_slice %632 {offsets = [0, 96], sizes = [8, 32], strides = [1, 1]} : vector<8x128xf32> to vector<8x32xf32>
    %640 = math.tanh %639 : vector<8x32xf32>
    %641 = vector.extract_strided_slice %638 {offsets = [0, 32], sizes = [8, 32], strides = [1, 1]} : vector<8x96xf32> to vector<8x32xf32>
    %642 = arith.mulf %641, %601 : vector<8x32xf32>
    %643 = vector.extract_strided_slice %638 {offsets = [0, 0], sizes = [8, 32], strides = [1, 1]} : vector<8x96xf32> to vector<8x32xf32>
    %644 = arith.mulf %643, %640 : vector<8x32xf32>
    %645 = arith.addf %642, %644 : vector<8x32xf32>
    %646 = vector.extract_strided_slice %638 {offsets = [0, 64], sizes = [8, 32], strides = [1, 1]} : vector<8x96xf32> to vector<8x32xf32>
    %647 = math.tanh %645 : vector<8x32xf32>
    %648 = arith.mulf %646, %647 : vector<8x32xf32>
    %c0_196 = arith.constant 0 : index
    %c112_197 = arith.constant 112 : index
    %c0_198 = arith.constant 0 : index
    %649 = vector.load %arg9[%c0_196, %c112_197, %c0_198] : memref<2x128x32xf32, #tpu.memory_space<vmem>>, vector<1x8x32xf32>
    %650 = vector.shape_cast %649 : vector<1x8x32xf32> to vector<8x32xf32>
    %651 = vector.shape_cast %648 : vector<8x32xf32> to vector<1x8x32xf32>
    tpu.vector_store %arg9[%c0_196, %c112_197, %c0_198], %651 {strides = array<i32>} : memref<2x128x32xf32, #tpu.memory_space<vmem>>, vector<1x8x32xf32>,
    %c8_199 = arith.constant 8 : index
    %c128_200 = arith.constant 128 : index
    %652 = vector.load %arg8[%c8_199, %c128_200] : memref<128x256xf32, #tpu.memory_space<vmem>>, vector<8x128xf32>
    %cst_201 = arith.constant dense<0.000000e+00> : vector<8x128xf32>
    %653 = tpu.matmul %626, %11, %cst_201 {dimension_numbers = #tpu.dot_dimension_numbers<[1], [0], [0], [1], [0, 0, 1, 1], [], []>} : vector<8x32xf32>, vector<32x128xf32>, vector<8x128xf32> -> vector<8x128xf32>
    %654 = arith.addf %652, %653 : vector<8x128xf32>
    %655 = vector.extract_strided_slice %654 {offsets = [0, 0], sizes = [8, 96], strides = [1, 1]} : vector<8x128xf32> to vector<8x96xf32>
    %656 = arith.negf %655 : vector<8x96xf32>
    %657 = math.exp %656 : vector<8x96xf32>
    %cst_202 = arith.constant 1.000000e+00 : f32
    %658 = vector.broadcast %cst_202 : f32 to vector<8x96xf32>
    %659 = arith.addf %658, %657 : vector<8x96xf32>
    %660 = arith.divf %658, %659 : vector<8x96xf32>
    %661 = vector.extract_strided_slice %654 {offsets = [0, 96], sizes = [8, 32], strides = [1, 1]} : vector<8x128xf32> to vector<8x32xf32>
    %662 = math.tanh %661 : vector<8x32xf32>
    %663 = vector.extract_strided_slice %660 {offsets = [0, 32], sizes = [8, 32], strides = [1, 1]} : vector<8x96xf32> to vector<8x32xf32>
    %664 = arith.mulf %663, %623 : vector<8x32xf32>
    %665 = vector.extract_strided_slice %660 {offsets = [0, 0], sizes = [8, 32], strides = [1, 1]} : vector<8x96xf32> to vector<8x32xf32>
    %666 = arith.mulf %665, %662 : vector<8x32xf32>
    %667 = arith.addf %664, %666 : vector<8x32xf32>
    %668 = vector.extract_strided_slice %660 {offsets = [0, 64], sizes = [8, 32], strides = [1, 1]} : vector<8x96xf32> to vector<8x32xf32>
    %669 = math.tanh %667 : vector<8x32xf32>
    %670 = arith.mulf %668, %669 : vector<8x32xf32>
    %c1_203 = arith.constant 1 : index
    %c8_204 = arith.constant 8 : index
    %c0_205 = arith.constant 0 : index
    %671 = vector.load %arg9[%c1_203, %c8_204, %c0_205] : memref<2x128x32xf32, #tpu.memory_space<vmem>>, vector<1x8x32xf32>
    %672 = vector.shape_cast %671 : vector<1x8x32xf32> to vector<8x32xf32>
    %673 = vector.shape_cast %670 : vector<8x32xf32> to vector<1x8x32xf32>
    tpu.vector_store %arg9[%c1_203, %c8_204, %c0_205], %673 {strides = array<i32>} : memref<2x128x32xf32, #tpu.memory_space<vmem>>, vector<1x8x32xf32>,
    %c120_206 = arith.constant 120 : index
    %c0_207 = arith.constant 0 : index
    %674 = vector.load %arg8[%c120_206, %c0_207] : memref<128x256xf32, #tpu.memory_space<vmem>>, vector<8x128xf32>
    %cst_208 = arith.constant dense<0.000000e+00> : vector<8x128xf32>
    %675 = tpu.matmul %648, %8, %cst_208 {dimension_numbers = #tpu.dot_dimension_numbers<[1], [0], [0], [1], [0, 0, 1, 1], [], []>} : vector<8x32xf32>, vector<32x128xf32>, vector<8x128xf32> -> vector<8x128xf32>
    %676 = arith.addf %674, %675 : vector<8x128xf32>
    %677 = vector.extract_strided_slice %676 {offsets = [0, 0], sizes = [8, 96], strides = [1, 1]} : vector<8x128xf32> to vector<8x96xf32>
    %678 = arith.negf %677 : vector<8x96xf32>
    %679 = math.exp %678 : vector<8x96xf32>
    %cst_209 = arith.constant 1.000000e+00 : f32
    %680 = vector.broadcast %cst_209 : f32 to vector<8x96xf32>
    %681 = arith.addf %680, %679 : vector<8x96xf32>
    %682 = arith.divf %680, %681 : vector<8x96xf32>
    %683 = vector.extract_strided_slice %676 {offsets = [0, 96], sizes = [8, 32], strides = [1, 1]} : vector<8x128xf32> to vector<8x32xf32>
    %684 = math.tanh %683 : vector<8x32xf32>
    %685 = vector.extract_strided_slice %682 {offsets = [0, 32], sizes = [8, 32], strides = [1, 1]} : vector<8x96xf32> to vector<8x32xf32>
    %686 = arith.mulf %685, %645 : vector<8x32xf32>
    %687 = vector.extract_strided_slice %682 {offsets = [0, 0], sizes = [8, 32], strides = [1, 1]} : vector<8x96xf32> to vector<8x32xf32>
    %688 = arith.mulf %687, %684 : vector<8x32xf32>
    %689 = arith.addf %686, %688 : vector<8x32xf32>
    %690 = vector.extract_strided_slice %682 {offsets = [0, 64], sizes = [8, 32], strides = [1, 1]} : vector<8x96xf32> to vector<8x32xf32>
    %691 = math.tanh %689 : vector<8x32xf32>
    %692 = arith.mulf %690, %691 : vector<8x32xf32>
    %c0_210 = arith.constant 0 : index
    %c120_211 = arith.constant 120 : index
    %c0_212 = arith.constant 0 : index
    %693 = vector.load %arg9[%c0_210, %c120_211, %c0_212] : memref<2x128x32xf32, #tpu.memory_space<vmem>>, vector<1x8x32xf32>
    %694 = vector.shape_cast %693 : vector<1x8x32xf32> to vector<8x32xf32>
    %695 = vector.shape_cast %692 : vector<8x32xf32> to vector<1x8x32xf32>
    tpu.vector_store %arg9[%c0_210, %c120_211, %c0_212], %695 {strides = array<i32>} : memref<2x128x32xf32, #tpu.memory_space<vmem>>, vector<1x8x32xf32>,
    %c0_213 = arith.constant 0 : index
    %c128_214 = arith.constant 128 : index
    %696 = vector.load %arg8[%c0_213, %c128_214] : memref<128x256xf32, #tpu.memory_space<vmem>>, vector<8x128xf32>
    %cst_215 = arith.constant dense<0.000000e+00> : vector<8x128xf32>
    %697 = tpu.matmul %670, %11, %cst_215 {dimension_numbers = #tpu.dot_dimension_numbers<[1], [0], [0], [1], [0, 0, 1, 1], [], []>} : vector<8x32xf32>, vector<32x128xf32>, vector<8x128xf32> -> vector<8x128xf32>
    %698 = arith.addf %696, %697 : vector<8x128xf32>
    %699 = vector.extract_strided_slice %698 {offsets = [0, 0], sizes = [8, 96], strides = [1, 1]} : vector<8x128xf32> to vector<8x96xf32>
    %700 = arith.negf %699 : vector<8x96xf32>
    %701 = math.exp %700 : vector<8x96xf32>
    %cst_216 = arith.constant 1.000000e+00 : f32
    %702 = vector.broadcast %cst_216 : f32 to vector<8x96xf32>
    %703 = arith.addf %702, %701 : vector<8x96xf32>
    %704 = arith.divf %702, %703 : vector<8x96xf32>
    %705 = vector.extract_strided_slice %698 {offsets = [0, 96], sizes = [8, 32], strides = [1, 1]} : vector<8x128xf32> to vector<8x32xf32>
    %706 = math.tanh %705 : vector<8x32xf32>
    %707 = vector.extract_strided_slice %704 {offsets = [0, 32], sizes = [8, 32], strides = [1, 1]} : vector<8x96xf32> to vector<8x32xf32>
    %708 = arith.mulf %707, %667 : vector<8x32xf32>
    %709 = vector.extract_strided_slice %704 {offsets = [0, 0], sizes = [8, 32], strides = [1, 1]} : vector<8x96xf32> to vector<8x32xf32>
    %710 = arith.mulf %709, %706 : vector<8x32xf32>
    %711 = arith.addf %708, %710 : vector<8x32xf32>
    %712 = vector.extract_strided_slice %704 {offsets = [0, 64], sizes = [8, 32], strides = [1, 1]} : vector<8x96xf32> to vector<8x32xf32>
    %713 = math.tanh %711 : vector<8x32xf32>
    %714 = arith.mulf %712, %713 : vector<8x32xf32>
    %c1_217 = arith.constant 1 : index
    %c0_218 = arith.constant 0 : index
    %c0_219 = arith.constant 0 : index
    %715 = vector.load %arg9[%c1_217, %c0_218, %c0_219] : memref<2x128x32xf32, #tpu.memory_space<vmem>>, vector<1x8x32xf32>
    %716 = vector.shape_cast %715 : vector<1x8x32xf32> to vector<8x32xf32>
    %717 = vector.shape_cast %714 : vector<8x32xf32> to vector<1x8x32xf32>
    tpu.vector_store %arg9[%c1_217, %c0_218, %c0_219], %717 {strides = array<i32>} : memref<2x128x32xf32, #tpu.memory_space<vmem>>, vector<1x8x32xf32>,
    %c0_220 = arith.constant 0 : index
    %c0_221 = arith.constant 0 : index
    %718 = vector.load %arg4[%c0_220, %c0_221] : memref<64x256xf32, #tpu.memory_space<vmem>>, vector<64x256xf32>
    %c0_222 = arith.constant 0 : index
    %c0_223 = arith.constant 0 : index
    %c0_224 = arith.constant 0 : index
    %719 = vector.load %arg9[%c0_222, %c0_223, %c0_224] : memref<2x128x32xf32, #tpu.memory_space<vmem>>, vector<1x128x32xf32>
    %720 = vector.shape_cast %719 : vector<1x128x32xf32> to vector<128x32xf32>
    %721 = vector.extract_strided_slice %718 {offsets = [0, 0], sizes = [32, 256], strides = [1, 1]} : vector<64x256xf32> to vector<32x256xf32>
    %cst_225 = arith.constant dense<0.000000e+00> : vector<128x256xf32>
    %722 = tpu.matmul %720, %721, %cst_225 {dimension_numbers = #tpu.dot_dimension_numbers<[1], [0], [0], [1], [0, 0, 1, 1], [], []>} : vector<128x32xf32>, vector<32x256xf32>, vector<128x256xf32> -> vector<128x256xf32>
    %c1_226 = arith.constant 1 : index
    %c0_227 = arith.constant 0 : index
    %c0_228 = arith.constant 0 : index
    %723 = vector.load %arg9[%c1_226, %c0_227, %c0_228] : memref<2x128x32xf32, #tpu.memory_space<vmem>>, vector<1x128x32xf32>
    %724 = vector.shape_cast %723 : vector<1x128x32xf32> to vector<128x32xf32>
    %725 = vector.extract_strided_slice %718 {offsets = [32, 0], sizes = [32, 256], strides = [1, 1]} : vector<64x256xf32> to vector<32x256xf32>
    %cst_229 = arith.constant dense<0.000000e+00> : vector<128x256xf32>
    %726 = tpu.matmul %724, %725, %cst_229 {dimension_numbers = #tpu.dot_dimension_numbers<[1], [0], [0], [1], [0, 0, 1, 1], [], []>} : vector<128x32xf32>, vector<32x256xf32>, vector<128x256xf32> -> vector<128x256xf32>
    %727 = arith.addf %722, %726 : vector<128x256xf32>
    %c0_230 = arith.constant 0 : index
    %c0_231 = arith.constant 0 : index
    %728 = vector.load %arg6[%c0_230, %c0_231] : memref<1x256xf32, #tpu.memory_space<vmem>>, vector<1x256xf32>
    %729 = vector.broadcast %728 : vector<1x256xf32> to vector<128x256xf32>
    %730 = arith.addf %727, %729 : vector<128x256xf32>
    %c0_232 = arith.constant 0 : index
    %c0_233 = arith.constant 0 : index
    %731 = vector.load %arg8[%c0_232, %c0_233] : memref<128x256xf32, #tpu.memory_space<vmem>>, vector<128x256xf32>
    tpu.vector_store %arg8[%c0_232, %c0_233], %730 {strides = array<i32>} : memref<128x256xf32, #tpu.memory_space<vmem>>, vector<128x256xf32>,
    %c0_234 = arith.constant 0 : index
    %c0_235 = arith.constant 0 : index
    %732 = vector.load %arg5[%c0_234, %c0_235] : memref<64x128xf32, #tpu.memory_space<vmem>>, vector<64x128xf32>
    %733 = vector.extract_strided_slice %732 {offsets = [0, 0], sizes = [32, 128], strides = [1, 1]} : vector<64x128xf32> to vector<32x128xf32>
    %cst_236 = arith.constant 0.000000e+00 : f32
    %734 = vector.broadcast %cst_236 : f32 to vector<8x32xf32>
    %cst_237 = arith.constant 0.000000e+00 : f32
    %735 = vector.broadcast %cst_237 : f32 to vector<8x32xf32>
    %736 = vector.extract_strided_slice %732 {offsets = [32, 0], sizes = [32, 128], strides = [1, 1]} : vector<64x128xf32> to vector<32x128xf32>
    %cst_238 = arith.constant 0.000000e+00 : f32
    %737 = vector.broadcast %cst_238 : f32 to vector<8x32xf32>
    %cst_239 = arith.constant 0.000000e+00 : f32
    %738 = vector.broadcast %cst_239 : f32 to vector<8x32xf32>
    %c0_240 = arith.constant 0 : index
    %c0_241 = arith.constant 0 : index
    %739 = vector.load %arg8[%c0_240, %c0_241] : memref<128x256xf32, #tpu.memory_space<vmem>>, vector<8x128xf32>
    %cst_242 = arith.constant dense<0.000000e+00> : vector<8x128xf32>
    %740 = tpu.matmul %734, %733, %cst_242 {dimension_numbers = #tpu.dot_dimension_numbers<[1], [0], [0], [1], [0, 0, 1, 1], [], []>} : vector<8x32xf32>, vector<32x128xf32>, vector<8x128xf32> -> vector<8x128xf32>
    %741 = arith.addf %739, %740 : vector<8x128xf32>
    %742 = vector.extract_strided_slice %741 {offsets = [0, 0], sizes = [8, 96], strides = [1, 1]} : vector<8x128xf32> to vector<8x96xf32>
    %743 = arith.negf %742 : vector<8x96xf32>
    %744 = math.exp %743 : vector<8x96xf32>
    %cst_243 = arith.constant 1.000000e+00 : f32
    %745 = vector.broadcast %cst_243 : f32 to vector<8x96xf32>
    %746 = arith.addf %745, %744 : vector<8x96xf32>
    %747 = arith.divf %745, %746 : vector<8x96xf32>
    %748 = vector.extract_strided_slice %741 {offsets = [0, 96], sizes = [8, 32], strides = [1, 1]} : vector<8x128xf32> to vector<8x32xf32>
    %749 = math.tanh %748 : vector<8x32xf32>
    %750 = vector.extract_strided_slice %747 {offsets = [0, 32], sizes = [8, 32], strides = [1, 1]} : vector<8x96xf32> to vector<8x32xf32>
    %751 = arith.mulf %750, %735 : vector<8x32xf32>
    %752 = vector.extract_strided_slice %747 {offsets = [0, 0], sizes = [8, 32], strides = [1, 1]} : vector<8x96xf32> to vector<8x32xf32>
    %753 = arith.mulf %752, %749 : vector<8x32xf32>
    %754 = arith.addf %751, %753 : vector<8x32xf32>
    %755 = vector.extract_strided_slice %747 {offsets = [0, 64], sizes = [8, 32], strides = [1, 1]} : vector<8x96xf32> to vector<8x32xf32>
    %756 = math.tanh %754 : vector<8x32xf32>
    %757 = arith.mulf %755, %756 : vector<8x32xf32>
    %c0_244 = arith.constant 0 : index
    %c0_245 = arith.constant 0 : index
    %c0_246 = arith.constant 0 : index
    %758 = vector.load %arg7[%c0_244, %c0_245, %c0_246] : memref<2x128x32xf32, #tpu.memory_space<vmem>>, vector<1x8x32xf32>
    %759 = vector.shape_cast %758 : vector<1x8x32xf32> to vector<8x32xf32>
    %760 = vector.shape_cast %757 : vector<8x32xf32> to vector<1x8x32xf32>
    tpu.vector_store %arg7[%c0_244, %c0_245, %c0_246], %760 {strides = array<i32>} : memref<2x128x32xf32, #tpu.memory_space<vmem>>, vector<1x8x32xf32>,
    %c120_247 = arith.constant 120 : index
    %c128_248 = arith.constant 128 : index
    %761 = vector.load %arg8[%c120_247, %c128_248] : memref<128x256xf32, #tpu.memory_space<vmem>>, vector<8x128xf32>
    %cst_249 = arith.constant dense<0.000000e+00> : vector<8x128xf32>
    %762 = tpu.matmul %737, %736, %cst_249 {dimension_numbers = #tpu.dot_dimension_numbers<[1], [0], [0], [1], [0, 0, 1, 1], [], []>} : vector<8x32xf32>, vector<32x128xf32>, vector<8x128xf32> -> vector<8x128xf32>
    %763 = arith.addf %761, %762 : vector<8x128xf32>
    %764 = vector.extract_strided_slice %763 {offsets = [0, 0], sizes = [8, 96], strides = [1, 1]} : vector<8x128xf32> to vector<8x96xf32>
    %765 = arith.negf %764 : vector<8x96xf32>
    %766 = math.exp %765 : vector<8x96xf32>
    %cst_250 = arith.constant 1.000000e+00 : f32
    %767 = vector.broadcast %cst_250 : f32 to vector<8x96xf32>
    %768 = arith.addf %767, %766 : vector<8x96xf32>
    %769 = arith.divf %767, %768 : vector<8x96xf32>
    %770 = vector.extract_strided_slice %763 {offsets = [0, 96], sizes = [8, 32], strides = [1, 1]} : vector<8x128xf32> to vector<8x32xf32>
    %771 = math.tanh %770 : vector<8x32xf32>
    %772 = vector.extract_strided_slice %769 {offsets = [0, 32], sizes = [8, 32], strides = [1, 1]} : vector<8x96xf32> to vector<8x32xf32>
    %773 = arith.mulf %772, %738 : vector<8x32xf32>
    %774 = vector.extract_strided_slice %769 {offsets = [0, 0], sizes = [8, 32], strides = [1, 1]} : vector<8x96xf32> to vector<8x32xf32>
    %775 = arith.mulf %774, %771 : vector<8x32xf32>
    %776 = arith.addf %773, %775 : vector<8x32xf32>
    %777 = vector.extract_strided_slice %769 {offsets = [0, 64], sizes = [8, 32], strides = [1, 1]} : vector<8x96xf32> to vector<8x32xf32>
    %778 = math.tanh %776 : vector<8x32xf32>
    %779 = arith.mulf %777, %778 : vector<8x32xf32>
    %c1_251 = arith.constant 1 : index
    %c120_252 = arith.constant 120 : index
    %c0_253 = arith.constant 0 : index
    %780 = vector.load %arg7[%c1_251, %c120_252, %c0_253] : memref<2x128x32xf32, #tpu.memory_space<vmem>>, vector<1x8x32xf32>
    %781 = vector.shape_cast %780 : vector<1x8x32xf32> to vector<8x32xf32>
    %782 = vector.shape_cast %779 : vector<8x32xf32> to vector<1x8x32xf32>
    tpu.vector_store %arg7[%c1_251, %c120_252, %c0_253], %782 {strides = array<i32>} : memref<2x128x32xf32, #tpu.memory_space<vmem>>, vector<1x8x32xf32>,
    %c8_254 = arith.constant 8 : index
    %c0_255 = arith.constant 0 : index
    %783 = vector.load %arg8[%c8_254, %c0_255] : memref<128x256xf32, #tpu.memory_space<vmem>>, vector<8x128xf32>
    %cst_256 = arith.constant dense<0.000000e+00> : vector<8x128xf32>
    %784 = tpu.matmul %757, %733, %cst_256 {dimension_numbers = #tpu.dot_dimension_numbers<[1], [0], [0], [1], [0, 0, 1, 1], [], []>} : vector<8x32xf32>, vector<32x128xf32>, vector<8x128xf32> -> vector<8x128xf32>
    %785 = arith.addf %783, %784 : vector<8x128xf32>
    %786 = vector.extract_strided_slice %785 {offsets = [0, 0], sizes = [8, 96], strides = [1, 1]} : vector<8x128xf32> to vector<8x96xf32>
    %787 = arith.negf %786 : vector<8x96xf32>
    %788 = math.exp %787 : vector<8x96xf32>
    %cst_257 = arith.constant 1.000000e+00 : f32
    %789 = vector.broadcast %cst_257 : f32 to vector<8x96xf32>
    %790 = arith.addf %789, %788 : vector<8x96xf32>
    %791 = arith.divf %789, %790 : vector<8x96xf32>
    %792 = vector.extract_strided_slice %785 {offsets = [0, 96], sizes = [8, 32], strides = [1, 1]} : vector<8x128xf32> to vector<8x32xf32>
    %793 = math.tanh %792 : vector<8x32xf32>
    %794 = vector.extract_strided_slice %791 {offsets = [0, 32], sizes = [8, 32], strides = [1, 1]} : vector<8x96xf32> to vector<8x32xf32>
    %795 = arith.mulf %794, %754 : vector<8x32xf32>
    %796 = vector.extract_strided_slice %791 {offsets = [0, 0], sizes = [8, 32], strides = [1, 1]} : vector<8x96xf32> to vector<8x32xf32>
    %797 = arith.mulf %796, %793 : vector<8x32xf32>
    %798 = arith.addf %795, %797 : vector<8x32xf32>
    %799 = vector.extract_strided_slice %791 {offsets = [0, 64], sizes = [8, 32], strides = [1, 1]} : vector<8x96xf32> to vector<8x32xf32>
    %800 = math.tanh %798 : vector<8x32xf32>
    %801 = arith.mulf %799, %800 : vector<8x32xf32>
    %c0_258 = arith.constant 0 : index
    %c8_259 = arith.constant 8 : index
    %c0_260 = arith.constant 0 : index
    %802 = vector.load %arg7[%c0_258, %c8_259, %c0_260] : memref<2x128x32xf32, #tpu.memory_space<vmem>>, vector<1x8x32xf32>
    %803 = vector.shape_cast %802 : vector<1x8x32xf32> to vector<8x32xf32>
    %804 = vector.shape_cast %801 : vector<8x32xf32> to vector<1x8x32xf32>
    tpu.vector_store %arg7[%c0_258, %c8_259, %c0_260], %804 {strides = array<i32>} : memref<2x128x32xf32, #tpu.memory_space<vmem>>, vector<1x8x32xf32>,
    %c112_261 = arith.constant 112 : index
    %c128_262 = arith.constant 128 : index
    %805 = vector.load %arg8[%c112_261, %c128_262] : memref<128x256xf32, #tpu.memory_space<vmem>>, vector<8x128xf32>
    %cst_263 = arith.constant dense<0.000000e+00> : vector<8x128xf32>
    %806 = tpu.matmul %779, %736, %cst_263 {dimension_numbers = #tpu.dot_dimension_numbers<[1], [0], [0], [1], [0, 0, 1, 1], [], []>} : vector<8x32xf32>, vector<32x128xf32>, vector<8x128xf32> -> vector<8x128xf32>
    %807 = arith.addf %805, %806 : vector<8x128xf32>
    %808 = vector.extract_strided_slice %807 {offsets = [0, 0], sizes = [8, 96], strides = [1, 1]} : vector<8x128xf32> to vector<8x96xf32>
    %809 = arith.negf %808 : vector<8x96xf32>
    %810 = math.exp %809 : vector<8x96xf32>
    %cst_264 = arith.constant 1.000000e+00 : f32
    %811 = vector.broadcast %cst_264 : f32 to vector<8x96xf32>
    %812 = arith.addf %811, %810 : vector<8x96xf32>
    %813 = arith.divf %811, %812 : vector<8x96xf32>
    %814 = vector.extract_strided_slice %807 {offsets = [0, 96], sizes = [8, 32], strides = [1, 1]} : vector<8x128xf32> to vector<8x32xf32>
    %815 = math.tanh %814 : vector<8x32xf32>
    %816 = vector.extract_strided_slice %813 {offsets = [0, 32], sizes = [8, 32], strides = [1, 1]} : vector<8x96xf32> to vector<8x32xf32>
    %817 = arith.mulf %816, %776 : vector<8x32xf32>
    %818 = vector.extract_strided_slice %813 {offsets = [0, 0], sizes = [8, 32], strides = [1, 1]} : vector<8x96xf32> to vector<8x32xf32>
    %819 = arith.mulf %818, %815 : vector<8x32xf32>
    %820 = arith.addf %817, %819 : vector<8x32xf32>
    %821 = vector.extract_strided_slice %813 {offsets = [0, 64], sizes = [8, 32], strides = [1, 1]} : vector<8x96xf32> to vector<8x32xf32>
    %822 = math.tanh %820 : vector<8x32xf32>
    %823 = arith.mulf %821, %822 : vector<8x32xf32>
    %c1_265 = arith.constant 1 : index
    %c112_266 = arith.constant 112 : index
    %c0_267 = arith.constant 0 : index
    %824 = vector.load %arg7[%c1_265, %c112_266, %c0_267] : memref<2x128x32xf32, #tpu.memory_space<vmem>>, vector<1x8x32xf32>
    %825 = vector.shape_cast %824 : vector<1x8x32xf32> to vector<8x32xf32>
    %826 = vector.shape_cast %823 : vector<8x32xf32> to vector<1x8x32xf32>
    tpu.vector_store %arg7[%c1_265, %c112_266, %c0_267], %826 {strides = array<i32>} : memref<2x128x32xf32, #tpu.memory_space<vmem>>, vector<1x8x32xf32>,
    %c16_268 = arith.constant 16 : index
    %c0_269 = arith.constant 0 : index
    %827 = vector.load %arg8[%c16_268, %c0_269] : memref<128x256xf32, #tpu.memory_space<vmem>>, vector<8x128xf32>
    %cst_270 = arith.constant dense<0.000000e+00> : vector<8x128xf32>
    %828 = tpu.matmul %801, %733, %cst_270 {dimension_numbers = #tpu.dot_dimension_numbers<[1], [0], [0], [1], [0, 0, 1, 1], [], []>} : vector<8x32xf32>, vector<32x128xf32>, vector<8x128xf32> -> vector<8x128xf32>
    %829 = arith.addf %827, %828 : vector<8x128xf32>
    %830 = vector.extract_strided_slice %829 {offsets = [0, 0], sizes = [8, 96], strides = [1, 1]} : vector<8x128xf32> to vector<8x96xf32>
    %831 = arith.negf %830 : vector<8x96xf32>
    %832 = math.exp %831 : vector<8x96xf32>
    %cst_271 = arith.constant 1.000000e+00 : f32
    %833 = vector.broadcast %cst_271 : f32 to vector<8x96xf32>
    %834 = arith.addf %833, %832 : vector<8x96xf32>
    %835 = arith.divf %833, %834 : vector<8x96xf32>
    %836 = vector.extract_strided_slice %829 {offsets = [0, 96], sizes = [8, 32], strides = [1, 1]} : vector<8x128xf32> to vector<8x32xf32>
    %837 = math.tanh %836 : vector<8x32xf32>
    %838 = vector.extract_strided_slice %835 {offsets = [0, 32], sizes = [8, 32], strides = [1, 1]} : vector<8x96xf32> to vector<8x32xf32>
    %839 = arith.mulf %838, %798 : vector<8x32xf32>
    %840 = vector.extract_strided_slice %835 {offsets = [0, 0], sizes = [8, 32], strides = [1, 1]} : vector<8x96xf32> to vector<8x32xf32>
    %841 = arith.mulf %840, %837 : vector<8x32xf32>
    %842 = arith.addf %839, %841 : vector<8x32xf32>
    %843 = vector.extract_strided_slice %835 {offsets = [0, 64], sizes = [8, 32], strides = [1, 1]} : vector<8x96xf32> to vector<8x32xf32>
    %844 = math.tanh %842 : vector<8x32xf32>
    %845 = arith.mulf %843, %844 : vector<8x32xf32>
    %c0_272 = arith.constant 0 : index
    %c16_273 = arith.constant 16 : index
    %c0_274 = arith.constant 0 : index
    %846 = vector.load %arg7[%c0_272, %c16_273, %c0_274] : memref<2x128x32xf32, #tpu.memory_space<vmem>>, vector<1x8x32xf32>
    %847 = vector.shape_cast %846 : vector<1x8x32xf32> to vector<8x32xf32>
    %848 = vector.shape_cast %845 : vector<8x32xf32> to vector<1x8x32xf32>
    tpu.vector_store %arg7[%c0_272, %c16_273, %c0_274], %848 {strides = array<i32>} : memref<2x128x32xf32, #tpu.memory_space<vmem>>, vector<1x8x32xf32>,
    %c104_275 = arith.constant 104 : index
    %c128_276 = arith.constant 128 : index
    %849 = vector.load %arg8[%c104_275, %c128_276] : memref<128x256xf32, #tpu.memory_space<vmem>>, vector<8x128xf32>
    %cst_277 = arith.constant dense<0.000000e+00> : vector<8x128xf32>
    %850 = tpu.matmul %823, %736, %cst_277 {dimension_numbers = #tpu.dot_dimension_numbers<[1], [0], [0], [1], [0, 0, 1, 1], [], []>} : vector<8x32xf32>, vector<32x128xf32>, vector<8x128xf32> -> vector<8x128xf32>
    %851 = arith.addf %849, %850 : vector<8x128xf32>
    %852 = vector.extract_strided_slice %851 {offsets = [0, 0], sizes = [8, 96], strides = [1, 1]} : vector<8x128xf32> to vector<8x96xf32>
    %853 = arith.negf %852 : vector<8x96xf32>
    %854 = math.exp %853 : vector<8x96xf32>
    %cst_278 = arith.constant 1.000000e+00 : f32
    %855 = vector.broadcast %cst_278 : f32 to vector<8x96xf32>
    %856 = arith.addf %855, %854 : vector<8x96xf32>
    %857 = arith.divf %855, %856 : vector<8x96xf32>
    %858 = vector.extract_strided_slice %851 {offsets = [0, 96], sizes = [8, 32], strides = [1, 1]} : vector<8x128xf32> to vector<8x32xf32>
    %859 = math.tanh %858 : vector<8x32xf32>
    %860 = vector.extract_strided_slice %857 {offsets = [0, 32], sizes = [8, 32], strides = [1, 1]} : vector<8x96xf32> to vector<8x32xf32>
    %861 = arith.mulf %860, %820 : vector<8x32xf32>
    %862 = vector.extract_strided_slice %857 {offsets = [0, 0], sizes = [8, 32], strides = [1, 1]} : vector<8x96xf32> to vector<8x32xf32>
    %863 = arith.mulf %862, %859 : vector<8x32xf32>
    %864 = arith.addf %861, %863 : vector<8x32xf32>
    %865 = vector.extract_strided_slice %857 {offsets = [0, 64], sizes = [8, 32], strides = [1, 1]} : vector<8x96xf32> to vector<8x32xf32>
    %866 = math.tanh %864 : vector<8x32xf32>
    %867 = arith.mulf %865, %866 : vector<8x32xf32>
    %c1_279 = arith.constant 1 : index
    %c104_280 = arith.constant 104 : index
    %c0_281 = arith.constant 0 : index
    %868 = vector.load %arg7[%c1_279, %c104_280, %c0_281] : memref<2x128x32xf32, #tpu.memory_space<vmem>>, vector<1x8x32xf32>
    %869 = vector.shape_cast %868 : vector<1x8x32xf32> to vector<8x32xf32>
    %870 = vector.shape_cast %867 : vector<8x32xf32> to vector<1x8x32xf32>
    tpu.vector_store %arg7[%c1_279, %c104_280, %c0_281], %870 {strides = array<i32>} : memref<2x128x32xf32, #tpu.memory_space<vmem>>, vector<1x8x32xf32>,
    %c24_282 = arith.constant 24 : index
    %c0_283 = arith.constant 0 : index
    %871 = vector.load %arg8[%c24_282, %c0_283] : memref<128x256xf32, #tpu.memory_space<vmem>>, vector<8x128xf32>
    %cst_284 = arith.constant dense<0.000000e+00> : vector<8x128xf32>
    %872 = tpu.matmul %845, %733, %cst_284 {dimension_numbers = #tpu.dot_dimension_numbers<[1], [0], [0], [1], [0, 0, 1, 1], [], []>} : vector<8x32xf32>, vector<32x128xf32>, vector<8x128xf32> -> vector<8x128xf32>
    %873 = arith.addf %871, %872 : vector<8x128xf32>
    %874 = vector.extract_strided_slice %873 {offsets = [0, 0], sizes = [8, 96], strides = [1, 1]} : vector<8x128xf32> to vector<8x96xf32>
    %875 = arith.negf %874 : vector<8x96xf32>
    %876 = math.exp %875 : vector<8x96xf32>
    %cst_285 = arith.constant 1.000000e+00 : f32
    %877 = vector.broadcast %cst_285 : f32 to vector<8x96xf32>
    %878 = arith.addf %877, %876 : vector<8x96xf32>
    %879 = arith.divf %877, %878 : vector<8x96xf32>
    %880 = vector.extract_strided_slice %873 {offsets = [0, 96], sizes = [8, 32], strides = [1, 1]} : vector<8x128xf32> to vector<8x32xf32>
    %881 = math.tanh %880 : vector<8x32xf32>
    %882 = vector.extract_strided_slice %879 {offsets = [0, 32], sizes = [8, 32], strides = [1, 1]} : vector<8x96xf32> to vector<8x32xf32>
    %883 = arith.mulf %882, %842 : vector<8x32xf32>
    %884 = vector.extract_strided_slice %879 {offsets = [0, 0], sizes = [8, 32], strides = [1, 1]} : vector<8x96xf32> to vector<8x32xf32>
    %885 = arith.mulf %884, %881 : vector<8x32xf32>
    %886 = arith.addf %883, %885 : vector<8x32xf32>
    %887 = vector.extract_strided_slice %879 {offsets = [0, 64], sizes = [8, 32], strides = [1, 1]} : vector<8x96xf32> to vector<8x32xf32>
    %888 = math.tanh %886 : vector<8x32xf32>
    %889 = arith.mulf %887, %888 : vector<8x32xf32>
    %c0_286 = arith.constant 0 : index
    %c24_287 = arith.constant 24 : index
    %c0_288 = arith.constant 0 : index
    %890 = vector.load %arg7[%c0_286, %c24_287, %c0_288] : memref<2x128x32xf32, #tpu.memory_space<vmem>>, vector<1x8x32xf32>
    %891 = vector.shape_cast %890 : vector<1x8x32xf32> to vector<8x32xf32>
    %892 = vector.shape_cast %889 : vector<8x32xf32> to vector<1x8x32xf32>
    tpu.vector_store %arg7[%c0_286, %c24_287, %c0_288], %892 {strides = array<i32>} : memref<2x128x32xf32, #tpu.memory_space<vmem>>, vector<1x8x32xf32>,
    %c96_289 = arith.constant 96 : index
    %c128_290 = arith.constant 128 : index
    %893 = vector.load %arg8[%c96_289, %c128_290] : memref<128x256xf32, #tpu.memory_space<vmem>>, vector<8x128xf32>
    %cst_291 = arith.constant dense<0.000000e+00> : vector<8x128xf32>
    %894 = tpu.matmul %867, %736, %cst_291 {dimension_numbers = #tpu.dot_dimension_numbers<[1], [0], [0], [1], [0, 0, 1, 1], [], []>} : vector<8x32xf32>, vector<32x128xf32>, vector<8x128xf32> -> vector<8x128xf32>
    %895 = arith.addf %893, %894 : vector<8x128xf32>
    %896 = vector.extract_strided_slice %895 {offsets = [0, 0], sizes = [8, 96], strides = [1, 1]} : vector<8x128xf32> to vector<8x96xf32>
    %897 = arith.negf %896 : vector<8x96xf32>
    %898 = math.exp %897 : vector<8x96xf32>
    %cst_292 = arith.constant 1.000000e+00 : f32
    %899 = vector.broadcast %cst_292 : f32 to vector<8x96xf32>
    %900 = arith.addf %899, %898 : vector<8x96xf32>
    %901 = arith.divf %899, %900 : vector<8x96xf32>
    %902 = vector.extract_strided_slice %895 {offsets = [0, 96], sizes = [8, 32], strides = [1, 1]} : vector<8x128xf32> to vector<8x32xf32>
    %903 = math.tanh %902 : vector<8x32xf32>
    %904 = vector.extract_strided_slice %901 {offsets = [0, 32], sizes = [8, 32], strides = [1, 1]} : vector<8x96xf32> to vector<8x32xf32>
    %905 = arith.mulf %904, %864 : vector<8x32xf32>
    %906 = vector.extract_strided_slice %901 {offsets = [0, 0], sizes = [8, 32], strides = [1, 1]} : vector<8x96xf32> to vector<8x32xf32>
    %907 = arith.mulf %906, %903 : vector<8x32xf32>
    %908 = arith.addf %905, %907 : vector<8x32xf32>
    %909 = vector.extract_strided_slice %901 {offsets = [0, 64], sizes = [8, 32], strides = [1, 1]} : vector<8x96xf32> to vector<8x32xf32>
    %910 = math.tanh %908 : vector<8x32xf32>
    %911 = arith.mulf %909, %910 : vector<8x32xf32>
    %c1_293 = arith.constant 1 : index
    %c96_294 = arith.constant 96 : index
    %c0_295 = arith.constant 0 : index
    %912 = vector.load %arg7[%c1_293, %c96_294, %c0_295] : memref<2x128x32xf32, #tpu.memory_space<vmem>>, vector<1x8x32xf32>
    %913 = vector.shape_cast %912 : vector<1x8x32xf32> to vector<8x32xf32>
    %914 = vector.shape_cast %911 : vector<8x32xf32> to vector<1x8x32xf32>
    tpu.vector_store %arg7[%c1_293, %c96_294, %c0_295], %914 {strides = array<i32>} : memref<2x128x32xf32, #tpu.memory_space<vmem>>, vector<1x8x32xf32>,
    %c32_296 = arith.constant 32 : index
    %c0_297 = arith.constant 0 : index
    %915 = vector.load %arg8[%c32_296, %c0_297] : memref<128x256xf32, #tpu.memory_space<vmem>>, vector<8x128xf32>
    %cst_298 = arith.constant dense<0.000000e+00> : vector<8x128xf32>
    %916 = tpu.matmul %889, %733, %cst_298 {dimension_numbers = #tpu.dot_dimension_numbers<[1], [0], [0], [1], [0, 0, 1, 1], [], []>} : vector<8x32xf32>, vector<32x128xf32>, vector<8x128xf32> -> vector<8x128xf32>
    %917 = arith.addf %915, %916 : vector<8x128xf32>
    %918 = vector.extract_strided_slice %917 {offsets = [0, 0], sizes = [8, 96], strides = [1, 1]} : vector<8x128xf32> to vector<8x96xf32>
    %919 = arith.negf %918 : vector<8x96xf32>
    %920 = math.exp %919 : vector<8x96xf32>
    %cst_299 = arith.constant 1.000000e+00 : f32
    %921 = vector.broadcast %cst_299 : f32 to vector<8x96xf32>
    %922 = arith.addf %921, %920 : vector<8x96xf32>
    %923 = arith.divf %921, %922 : vector<8x96xf32>
    %924 = vector.extract_strided_slice %917 {offsets = [0, 96], sizes = [8, 32], strides = [1, 1]} : vector<8x128xf32> to vector<8x32xf32>
    %925 = math.tanh %924 : vector<8x32xf32>
    %926 = vector.extract_strided_slice %923 {offsets = [0, 32], sizes = [8, 32], strides = [1, 1]} : vector<8x96xf32> to vector<8x32xf32>
    %927 = arith.mulf %926, %886 : vector<8x32xf32>
    %928 = vector.extract_strided_slice %923 {offsets = [0, 0], sizes = [8, 32], strides = [1, 1]} : vector<8x96xf32> to vector<8x32xf32>
    %929 = arith.mulf %928, %925 : vector<8x32xf32>
    %930 = arith.addf %927, %929 : vector<8x32xf32>
    %931 = vector.extract_strided_slice %923 {offsets = [0, 64], sizes = [8, 32], strides = [1, 1]} : vector<8x96xf32> to vector<8x32xf32>
    %932 = math.tanh %930 : vector<8x32xf32>
    %933 = arith.mulf %931, %932 : vector<8x32xf32>
    %c0_300 = arith.constant 0 : index
    %c32_301 = arith.constant 32 : index
    %c0_302 = arith.constant 0 : index
    %934 = vector.load %arg7[%c0_300, %c32_301, %c0_302] : memref<2x128x32xf32, #tpu.memory_space<vmem>>, vector<1x8x32xf32>
    %935 = vector.shape_cast %934 : vector<1x8x32xf32> to vector<8x32xf32>
    %936 = vector.shape_cast %933 : vector<8x32xf32> to vector<1x8x32xf32>
    tpu.vector_store %arg7[%c0_300, %c32_301, %c0_302], %936 {strides = array<i32>} : memref<2x128x32xf32, #tpu.memory_space<vmem>>, vector<1x8x32xf32>,
    %c88_303 = arith.constant 88 : index
    %c128_304 = arith.constant 128 : index
    %937 = vector.load %arg8[%c88_303, %c128_304] : memref<128x256xf32, #tpu.memory_space<vmem>>, vector<8x128xf32>
    %cst_305 = arith.constant dense<0.000000e+00> : vector<8x128xf32>
    %938 = tpu.matmul %911, %736, %cst_305 {dimension_numbers = #tpu.dot_dimension_numbers<[1], [0], [0], [1], [0, 0, 1, 1], [], []>} : vector<8x32xf32>, vector<32x128xf32>, vector<8x128xf32> -> vector<8x128xf32>
    %939 = arith.addf %937, %938 : vector<8x128xf32>
    %940 = vector.extract_strided_slice %939 {offsets = [0, 0], sizes = [8, 96], strides = [1, 1]} : vector<8x128xf32> to vector<8x96xf32>
    %941 = arith.negf %940 : vector<8x96xf32>
    %942 = math.exp %941 : vector<8x96xf32>
    %cst_306 = arith.constant 1.000000e+00 : f32
    %943 = vector.broadcast %cst_306 : f32 to vector<8x96xf32>
    %944 = arith.addf %943, %942 : vector<8x96xf32>
    %945 = arith.divf %943, %944 : vector<8x96xf32>
    %946 = vector.extract_strided_slice %939 {offsets = [0, 96], sizes = [8, 32], strides = [1, 1]} : vector<8x128xf32> to vector<8x32xf32>
    %947 = math.tanh %946 : vector<8x32xf32>
    %948 = vector.extract_strided_slice %945 {offsets = [0, 32], sizes = [8, 32], strides = [1, 1]} : vector<8x96xf32> to vector<8x32xf32>
    %949 = arith.mulf %948, %908 : vector<8x32xf32>
    %950 = vector.extract_strided_slice %945 {offsets = [0, 0], sizes = [8, 32], strides = [1, 1]} : vector<8x96xf32> to vector<8x32xf32>
    %951 = arith.mulf %950, %947 : vector<8x32xf32>
    %952 = arith.addf %949, %951 : vector<8x32xf32>
    %953 = vector.extract_strided_slice %945 {offsets = [0, 64], sizes = [8, 32], strides = [1, 1]} : vector<8x96xf32> to vector<8x32xf32>
    %954 = math.tanh %952 : vector<8x32xf32>
    %955 = arith.mulf %953, %954 : vector<8x32xf32>
    %c1_307 = arith.constant 1 : index
    %c88_308 = arith.constant 88 : index
    %c0_309 = arith.constant 0 : index
    %956 = vector.load %arg7[%c1_307, %c88_308, %c0_309] : memref<2x128x32xf32, #tpu.memory_space<vmem>>, vector<1x8x32xf32>
    %957 = vector.shape_cast %956 : vector<1x8x32xf32> to vector<8x32xf32>
    %958 = vector.shape_cast %955 : vector<8x32xf32> to vector<1x8x32xf32>
    tpu.vector_store %arg7[%c1_307, %c88_308, %c0_309], %958 {strides = array<i32>} : memref<2x128x32xf32, #tpu.memory_space<vmem>>, vector<1x8x32xf32>,
    %c40_310 = arith.constant 40 : index
    %c0_311 = arith.constant 0 : index
    %959 = vector.load %arg8[%c40_310, %c0_311] : memref<128x256xf32, #tpu.memory_space<vmem>>, vector<8x128xf32>
    %cst_312 = arith.constant dense<0.000000e+00> : vector<8x128xf32>
    %960 = tpu.matmul %933, %733, %cst_312 {dimension_numbers = #tpu.dot_dimension_numbers<[1], [0], [0], [1], [0, 0, 1, 1], [], []>} : vector<8x32xf32>, vector<32x128xf32>, vector<8x128xf32> -> vector<8x128xf32>
    %961 = arith.addf %959, %960 : vector<8x128xf32>
    %962 = vector.extract_strided_slice %961 {offsets = [0, 0], sizes = [8, 96], strides = [1, 1]} : vector<8x128xf32> to vector<8x96xf32>
    %963 = arith.negf %962 : vector<8x96xf32>
    %964 = math.exp %963 : vector<8x96xf32>
    %cst_313 = arith.constant 1.000000e+00 : f32
    %965 = vector.broadcast %cst_313 : f32 to vector<8x96xf32>
    %966 = arith.addf %965, %964 : vector<8x96xf32>
    %967 = arith.divf %965, %966 : vector<8x96xf32>
    %968 = vector.extract_strided_slice %961 {offsets = [0, 96], sizes = [8, 32], strides = [1, 1]} : vector<8x128xf32> to vector<8x32xf32>
    %969 = math.tanh %968 : vector<8x32xf32>
    %970 = vector.extract_strided_slice %967 {offsets = [0, 32], sizes = [8, 32], strides = [1, 1]} : vector<8x96xf32> to vector<8x32xf32>
    %971 = arith.mulf %970, %930 : vector<8x32xf32>
    %972 = vector.extract_strided_slice %967 {offsets = [0, 0], sizes = [8, 32], strides = [1, 1]} : vector<8x96xf32> to vector<8x32xf32>
    %973 = arith.mulf %972, %969 : vector<8x32xf32>
    %974 = arith.addf %971, %973 : vector<8x32xf32>
    %975 = vector.extract_strided_slice %967 {offsets = [0, 64], sizes = [8, 32], strides = [1, 1]} : vector<8x96xf32> to vector<8x32xf32>
    %976 = math.tanh %974 : vector<8x32xf32>
    %977 = arith.mulf %975, %976 : vector<8x32xf32>
    %c0_314 = arith.constant 0 : index
    %c40_315 = arith.constant 40 : index
    %c0_316 = arith.constant 0 : index
    %978 = vector.load %arg7[%c0_314, %c40_315, %c0_316] : memref<2x128x32xf32, #tpu.memory_space<vmem>>, vector<1x8x32xf32>
    %979 = vector.shape_cast %978 : vector<1x8x32xf32> to vector<8x32xf32>
    %980 = vector.shape_cast %977 : vector<8x32xf32> to vector<1x8x32xf32>
    tpu.vector_store %arg7[%c0_314, %c40_315, %c0_316], %980 {strides = array<i32>} : memref<2x128x32xf32, #tpu.memory_space<vmem>>, vector<1x8x32xf32>,
    %c80_317 = arith.constant 80 : index
    %c128_318 = arith.constant 128 : index
    %981 = vector.load %arg8[%c80_317, %c128_318] : memref<128x256xf32, #tpu.memory_space<vmem>>, vector<8x128xf32>
    %cst_319 = arith.constant dense<0.000000e+00> : vector<8x128xf32>
    %982 = tpu.matmul %955, %736, %cst_319 {dimension_numbers = #tpu.dot_dimension_numbers<[1], [0], [0], [1], [0, 0, 1, 1], [], []>} : vector<8x32xf32>, vector<32x128xf32>, vector<8x128xf32> -> vector<8x128xf32>
    %983 = arith.addf %981, %982 : vector<8x128xf32>
    %984 = vector.extract_strided_slice %983 {offsets = [0, 0], sizes = [8, 96], strides = [1, 1]} : vector<8x128xf32> to vector<8x96xf32>
    %985 = arith.negf %984 : vector<8x96xf32>
    %986 = math.exp %985 : vector<8x96xf32>
    %cst_320 = arith.constant 1.000000e+00 : f32
    %987 = vector.broadcast %cst_320 : f32 to vector<8x96xf32>
    %988 = arith.addf %987, %986 : vector<8x96xf32>
    %989 = arith.divf %987, %988 : vector<8x96xf32>
    %990 = vector.extract_strided_slice %983 {offsets = [0, 96], sizes = [8, 32], strides = [1, 1]} : vector<8x128xf32> to vector<8x32xf32>
    %991 = math.tanh %990 : vector<8x32xf32>
    %992 = vector.extract_strided_slice %989 {offsets = [0, 32], sizes = [8, 32], strides = [1, 1]} : vector<8x96xf32> to vector<8x32xf32>
    %993 = arith.mulf %992, %952 : vector<8x32xf32>
    %994 = vector.extract_strided_slice %989 {offsets = [0, 0], sizes = [8, 32], strides = [1, 1]} : vector<8x96xf32> to vector<8x32xf32>
    %995 = arith.mulf %994, %991 : vector<8x32xf32>
    %996 = arith.addf %993, %995 : vector<8x32xf32>
    %997 = vector.extract_strided_slice %989 {offsets = [0, 64], sizes = [8, 32], strides = [1, 1]} : vector<8x96xf32> to vector<8x32xf32>
    %998 = math.tanh %996 : vector<8x32xf32>
    %999 = arith.mulf %997, %998 : vector<8x32xf32>
    %c1_321 = arith.constant 1 : index
    %c80_322 = arith.constant 80 : index
    %c0_323 = arith.constant 0 : index
    %1000 = vector.load %arg7[%c1_321, %c80_322, %c0_323] : memref<2x128x32xf32, #tpu.memory_space<vmem>>, vector<1x8x32xf32>
    %1001 = vector.shape_cast %1000 : vector<1x8x32xf32> to vector<8x32xf32>
    %1002 = vector.shape_cast %999 : vector<8x32xf32> to vector<1x8x32xf32>
    tpu.vector_store %arg7[%c1_321, %c80_322, %c0_323], %1002 {strides = array<i32>} : memref<2x128x32xf32, #tpu.memory_space<vmem>>, vector<1x8x32xf32>,
    %c48_324 = arith.constant 48 : index
    %c0_325 = arith.constant 0 : index
    %1003 = vector.load %arg8[%c48_324, %c0_325] : memref<128x256xf32, #tpu.memory_space<vmem>>, vector<8x128xf32>
    %cst_326 = arith.constant dense<0.000000e+00> : vector<8x128xf32>
    %1004 = tpu.matmul %977, %733, %cst_326 {dimension_numbers = #tpu.dot_dimension_numbers<[1], [0], [0], [1], [0, 0, 1, 1], [], []>} : vector<8x32xf32>, vector<32x128xf32>, vector<8x128xf32> -> vector<8x128xf32>
    %1005 = arith.addf %1003, %1004 : vector<8x128xf32>
    %1006 = vector.extract_strided_slice %1005 {offsets = [0, 0], sizes = [8, 96], strides = [1, 1]} : vector<8x128xf32> to vector<8x96xf32>
    %1007 = arith.negf %1006 : vector<8x96xf32>
    %1008 = math.exp %1007 : vector<8x96xf32>
    %cst_327 = arith.constant 1.000000e+00 : f32
    %1009 = vector.broadcast %cst_327 : f32 to vector<8x96xf32>
    %1010 = arith.addf %1009, %1008 : vector<8x96xf32>
    %1011 = arith.divf %1009, %1010 : vector<8x96xf32>
    %1012 = vector.extract_strided_slice %1005 {offsets = [0, 96], sizes = [8, 32], strides = [1, 1]} : vector<8x128xf32> to vector<8x32xf32>
    %1013 = math.tanh %1012 : vector<8x32xf32>
    %1014 = vector.extract_strided_slice %1011 {offsets = [0, 32], sizes = [8, 32], strides = [1, 1]} : vector<8x96xf32> to vector<8x32xf32>
    %1015 = arith.mulf %1014, %974 : vector<8x32xf32>
    %1016 = vector.extract_strided_slice %1011 {offsets = [0, 0], sizes = [8, 32], strides = [1, 1]} : vector<8x96xf32> to vector<8x32xf32>
    %1017 = arith.mulf %1016, %1013 : vector<8x32xf32>
    %1018 = arith.addf %1015, %1017 : vector<8x32xf32>
    %1019 = vector.extract_strided_slice %1011 {offsets = [0, 64], sizes = [8, 32], strides = [1, 1]} : vector<8x96xf32> to vector<8x32xf32>
    %1020 = math.tanh %1018 : vector<8x32xf32>
    %1021 = arith.mulf %1019, %1020 : vector<8x32xf32>
    %c0_328 = arith.constant 0 : index
    %c48_329 = arith.constant 48 : index
    %c0_330 = arith.constant 0 : index
    %1022 = vector.load %arg7[%c0_328, %c48_329, %c0_330] : memref<2x128x32xf32, #tpu.memory_space<vmem>>, vector<1x8x32xf32>
    %1023 = vector.shape_cast %1022 : vector<1x8x32xf32> to vector<8x32xf32>
    %1024 = vector.shape_cast %1021 : vector<8x32xf32> to vector<1x8x32xf32>
    tpu.vector_store %arg7[%c0_328, %c48_329, %c0_330], %1024 {strides = array<i32>} : memref<2x128x32xf32, #tpu.memory_space<vmem>>, vector<1x8x32xf32>,
    %c72_331 = arith.constant 72 : index
    %c128_332 = arith.constant 128 : index
    %1025 = vector.load %arg8[%c72_331, %c128_332] : memref<128x256xf32, #tpu.memory_space<vmem>>, vector<8x128xf32>
    %cst_333 = arith.constant dense<0.000000e+00> : vector<8x128xf32>
    %1026 = tpu.matmul %999, %736, %cst_333 {dimension_numbers = #tpu.dot_dimension_numbers<[1], [0], [0], [1], [0, 0, 1, 1], [], []>} : vector<8x32xf32>, vector<32x128xf32>, vector<8x128xf32> -> vector<8x128xf32>
    %1027 = arith.addf %1025, %1026 : vector<8x128xf32>
    %1028 = vector.extract_strided_slice %1027 {offsets = [0, 0], sizes = [8, 96], strides = [1, 1]} : vector<8x128xf32> to vector<8x96xf32>
    %1029 = arith.negf %1028 : vector<8x96xf32>
    %1030 = math.exp %1029 : vector<8x96xf32>
    %cst_334 = arith.constant 1.000000e+00 : f32
    %1031 = vector.broadcast %cst_334 : f32 to vector<8x96xf32>
    %1032 = arith.addf %1031, %1030 : vector<8x96xf32>
    %1033 = arith.divf %1031, %1032 : vector<8x96xf32>
    %1034 = vector.extract_strided_slice %1027 {offsets = [0, 96], sizes = [8, 32], strides = [1, 1]} : vector<8x128xf32> to vector<8x32xf32>
    %1035 = math.tanh %1034 : vector<8x32xf32>
    %1036 = vector.extract_strided_slice %1033 {offsets = [0, 32], sizes = [8, 32], strides = [1, 1]} : vector<8x96xf32> to vector<8x32xf32>
    %1037 = arith.mulf %1036, %996 : vector<8x32xf32>
    %1038 = vector.extract_strided_slice %1033 {offsets = [0, 0], sizes = [8, 32], strides = [1, 1]} : vector<8x96xf32> to vector<8x32xf32>
    %1039 = arith.mulf %1038, %1035 : vector<8x32xf32>
    %1040 = arith.addf %1037, %1039 : vector<8x32xf32>
    %1041 = vector.extract_strided_slice %1033 {offsets = [0, 64], sizes = [8, 32], strides = [1, 1]} : vector<8x96xf32> to vector<8x32xf32>
    %1042 = math.tanh %1040 : vector<8x32xf32>
    %1043 = arith.mulf %1041, %1042 : vector<8x32xf32>
    %c1_335 = arith.constant 1 : index
    %c72_336 = arith.constant 72 : index
    %c0_337 = arith.constant 0 : index
    %1044 = vector.load %arg7[%c1_335, %c72_336, %c0_337] : memref<2x128x32xf32, #tpu.memory_space<vmem>>, vector<1x8x32xf32>
    %1045 = vector.shape_cast %1044 : vector<1x8x32xf32> to vector<8x32xf32>
    %1046 = vector.shape_cast %1043 : vector<8x32xf32> to vector<1x8x32xf32>
    tpu.vector_store %arg7[%c1_335, %c72_336, %c0_337], %1046 {strides = array<i32>} : memref<2x128x32xf32, #tpu.memory_space<vmem>>, vector<1x8x32xf32>,
    %c56_338 = arith.constant 56 : index
    %c0_339 = arith.constant 0 : index
    %1047 = vector.load %arg8[%c56_338, %c0_339] : memref<128x256xf32, #tpu.memory_space<vmem>>, vector<8x128xf32>
    %cst_340 = arith.constant dense<0.000000e+00> : vector<8x128xf32>
    %1048 = tpu.matmul %1021, %733, %cst_340 {dimension_numbers = #tpu.dot_dimension_numbers<[1], [0], [0], [1], [0, 0, 1, 1], [], []>} : vector<8x32xf32>, vector<32x128xf32>, vector<8x128xf32> -> vector<8x128xf32>
    %1049 = arith.addf %1047, %1048 : vector<8x128xf32>
    %1050 = vector.extract_strided_slice %1049 {offsets = [0, 0], sizes = [8, 96], strides = [1, 1]} : vector<8x128xf32> to vector<8x96xf32>
    %1051 = arith.negf %1050 : vector<8x96xf32>
    %1052 = math.exp %1051 : vector<8x96xf32>
    %cst_341 = arith.constant 1.000000e+00 : f32
    %1053 = vector.broadcast %cst_341 : f32 to vector<8x96xf32>
    %1054 = arith.addf %1053, %1052 : vector<8x96xf32>
    %1055 = arith.divf %1053, %1054 : vector<8x96xf32>
    %1056 = vector.extract_strided_slice %1049 {offsets = [0, 96], sizes = [8, 32], strides = [1, 1]} : vector<8x128xf32> to vector<8x32xf32>
    %1057 = math.tanh %1056 : vector<8x32xf32>
    %1058 = vector.extract_strided_slice %1055 {offsets = [0, 32], sizes = [8, 32], strides = [1, 1]} : vector<8x96xf32> to vector<8x32xf32>
    %1059 = arith.mulf %1058, %1018 : vector<8x32xf32>
    %1060 = vector.extract_strided_slice %1055 {offsets = [0, 0], sizes = [8, 32], strides = [1, 1]} : vector<8x96xf32> to vector<8x32xf32>
    %1061 = arith.mulf %1060, %1057 : vector<8x32xf32>
    %1062 = arith.addf %1059, %1061 : vector<8x32xf32>
    %1063 = vector.extract_strided_slice %1055 {offsets = [0, 64], sizes = [8, 32], strides = [1, 1]} : vector<8x96xf32> to vector<8x32xf32>
    %1064 = math.tanh %1062 : vector<8x32xf32>
    %1065 = arith.mulf %1063, %1064 : vector<8x32xf32>
    %c0_342 = arith.constant 0 : index
    %c56_343 = arith.constant 56 : index
    %c0_344 = arith.constant 0 : index
    %1066 = vector.load %arg7[%c0_342, %c56_343, %c0_344] : memref<2x128x32xf32, #tpu.memory_space<vmem>>, vector<1x8x32xf32>
    %1067 = vector.shape_cast %1066 : vector<1x8x32xf32> to vector<8x32xf32>
    %1068 = vector.shape_cast %1065 : vector<8x32xf32> to vector<1x8x32xf32>
    tpu.vector_store %arg7[%c0_342, %c56_343, %c0_344], %1068 {strides = array<i32>} : memref<2x128x32xf32, #tpu.memory_space<vmem>>, vector<1x8x32xf32>,
    %c64_345 = arith.constant 64 : index
    %c128_346 = arith.constant 128 : index
    %1069 = vector.load %arg8[%c64_345, %c128_346] : memref<128x256xf32, #tpu.memory_space<vmem>>, vector<8x128xf32>
    %cst_347 = arith.constant dense<0.000000e+00> : vector<8x128xf32>
    %1070 = tpu.matmul %1043, %736, %cst_347 {dimension_numbers = #tpu.dot_dimension_numbers<[1], [0], [0], [1], [0, 0, 1, 1], [], []>} : vector<8x32xf32>, vector<32x128xf32>, vector<8x128xf32> -> vector<8x128xf32>
    %1071 = arith.addf %1069, %1070 : vector<8x128xf32>
    %1072 = vector.extract_strided_slice %1071 {offsets = [0, 0], sizes = [8, 96], strides = [1, 1]} : vector<8x128xf32> to vector<8x96xf32>
    %1073 = arith.negf %1072 : vector<8x96xf32>
    %1074 = math.exp %1073 : vector<8x96xf32>
    %cst_348 = arith.constant 1.000000e+00 : f32
    %1075 = vector.broadcast %cst_348 : f32 to vector<8x96xf32>
    %1076 = arith.addf %1075, %1074 : vector<8x96xf32>
    %1077 = arith.divf %1075, %1076 : vector<8x96xf32>
    %1078 = vector.extract_strided_slice %1071 {offsets = [0, 96], sizes = [8, 32], strides = [1, 1]} : vector<8x128xf32> to vector<8x32xf32>
    %1079 = math.tanh %1078 : vector<8x32xf32>
    %1080 = vector.extract_strided_slice %1077 {offsets = [0, 32], sizes = [8, 32], strides = [1, 1]} : vector<8x96xf32> to vector<8x32xf32>
    %1081 = arith.mulf %1080, %1040 : vector<8x32xf32>
    %1082 = vector.extract_strided_slice %1077 {offsets = [0, 0], sizes = [8, 32], strides = [1, 1]} : vector<8x96xf32> to vector<8x32xf32>
    %1083 = arith.mulf %1082, %1079 : vector<8x32xf32>
    %1084 = arith.addf %1081, %1083 : vector<8x32xf32>
    %1085 = vector.extract_strided_slice %1077 {offsets = [0, 64], sizes = [8, 32], strides = [1, 1]} : vector<8x96xf32> to vector<8x32xf32>
    %1086 = math.tanh %1084 : vector<8x32xf32>
    %1087 = arith.mulf %1085, %1086 : vector<8x32xf32>
    %c1_349 = arith.constant 1 : index
    %c64_350 = arith.constant 64 : index
    %c0_351 = arith.constant 0 : index
    %1088 = vector.load %arg7[%c1_349, %c64_350, %c0_351] : memref<2x128x32xf32, #tpu.memory_space<vmem>>, vector<1x8x32xf32>
    %1089 = vector.shape_cast %1088 : vector<1x8x32xf32> to vector<8x32xf32>
    %1090 = vector.shape_cast %1087 : vector<8x32xf32> to vector<1x8x32xf32>
    tpu.vector_store %arg7[%c1_349, %c64_350, %c0_351], %1090 {strides = array<i32>} : memref<2x128x32xf32, #tpu.memory_space<vmem>>, vector<1x8x32xf32>,
    %c64_352 = arith.constant 64 : index
    %c0_353 = arith.constant 0 : index
    %1091 = vector.load %arg8[%c64_352, %c0_353] : memref<128x256xf32, #tpu.memory_space<vmem>>, vector<8x128xf32>
    %cst_354 = arith.constant dense<0.000000e+00> : vector<8x128xf32>
    %1092 = tpu.matmul %1065, %733, %cst_354 {dimension_numbers = #tpu.dot_dimension_numbers<[1], [0], [0], [1], [0, 0, 1, 1], [], []>} : vector<8x32xf32>, vector<32x128xf32>, vector<8x128xf32> -> vector<8x128xf32>
    %1093 = arith.addf %1091, %1092 : vector<8x128xf32>
    %1094 = vector.extract_strided_slice %1093 {offsets = [0, 0], sizes = [8, 96], strides = [1, 1]} : vector<8x128xf32> to vector<8x96xf32>
    %1095 = arith.negf %1094 : vector<8x96xf32>
    %1096 = math.exp %1095 : vector<8x96xf32>
    %cst_355 = arith.constant 1.000000e+00 : f32
    %1097 = vector.broadcast %cst_355 : f32 to vector<8x96xf32>
    %1098 = arith.addf %1097, %1096 : vector<8x96xf32>
    %1099 = arith.divf %1097, %1098 : vector<8x96xf32>
    %1100 = vector.extract_strided_slice %1093 {offsets = [0, 96], sizes = [8, 32], strides = [1, 1]} : vector<8x128xf32> to vector<8x32xf32>
    %1101 = math.tanh %1100 : vector<8x32xf32>
    %1102 = vector.extract_strided_slice %1099 {offsets = [0, 32], sizes = [8, 32], strides = [1, 1]} : vector<8x96xf32> to vector<8x32xf32>
    %1103 = arith.mulf %1102, %1062 : vector<8x32xf32>
    %1104 = vector.extract_strided_slice %1099 {offsets = [0, 0], sizes = [8, 32], strides = [1, 1]} : vector<8x96xf32> to vector<8x32xf32>
    %1105 = arith.mulf %1104, %1101 : vector<8x32xf32>
    %1106 = arith.addf %1103, %1105 : vector<8x32xf32>
    %1107 = vector.extract_strided_slice %1099 {offsets = [0, 64], sizes = [8, 32], strides = [1, 1]} : vector<8x96xf32> to vector<8x32xf32>
    %1108 = math.tanh %1106 : vector<8x32xf32>
    %1109 = arith.mulf %1107, %1108 : vector<8x32xf32>
    %c0_356 = arith.constant 0 : index
    %c64_357 = arith.constant 64 : index
    %c0_358 = arith.constant 0 : index
    %1110 = vector.load %arg7[%c0_356, %c64_357, %c0_358] : memref<2x128x32xf32, #tpu.memory_space<vmem>>, vector<1x8x32xf32>
    %1111 = vector.shape_cast %1110 : vector<1x8x32xf32> to vector<8x32xf32>
    %1112 = vector.shape_cast %1109 : vector<8x32xf32> to vector<1x8x32xf32>
    tpu.vector_store %arg7[%c0_356, %c64_357, %c0_358], %1112 {strides = array<i32>} : memref<2x128x32xf32, #tpu.memory_space<vmem>>, vector<1x8x32xf32>,
    %c56_359 = arith.constant 56 : index
    %c128_360 = arith.constant 128 : index
    %1113 = vector.load %arg8[%c56_359, %c128_360] : memref<128x256xf32, #tpu.memory_space<vmem>>, vector<8x128xf32>
    %cst_361 = arith.constant dense<0.000000e+00> : vector<8x128xf32>
    %1114 = tpu.matmul %1087, %736, %cst_361 {dimension_numbers = #tpu.dot_dimension_numbers<[1], [0], [0], [1], [0, 0, 1, 1], [], []>} : vector<8x32xf32>, vector<32x128xf32>, vector<8x128xf32> -> vector<8x128xf32>
    %1115 = arith.addf %1113, %1114 : vector<8x128xf32>
    %1116 = vector.extract_strided_slice %1115 {offsets = [0, 0], sizes = [8, 96], strides = [1, 1]} : vector<8x128xf32> to vector<8x96xf32>
    %1117 = arith.negf %1116 : vector<8x96xf32>
    %1118 = math.exp %1117 : vector<8x96xf32>
    %cst_362 = arith.constant 1.000000e+00 : f32
    %1119 = vector.broadcast %cst_362 : f32 to vector<8x96xf32>
    %1120 = arith.addf %1119, %1118 : vector<8x96xf32>
    %1121 = arith.divf %1119, %1120 : vector<8x96xf32>
    %1122 = vector.extract_strided_slice %1115 {offsets = [0, 96], sizes = [8, 32], strides = [1, 1]} : vector<8x128xf32> to vector<8x32xf32>
    %1123 = math.tanh %1122 : vector<8x32xf32>
    %1124 = vector.extract_strided_slice %1121 {offsets = [0, 32], sizes = [8, 32], strides = [1, 1]} : vector<8x96xf32> to vector<8x32xf32>
    %1125 = arith.mulf %1124, %1084 : vector<8x32xf32>
    %1126 = vector.extract_strided_slice %1121 {offsets = [0, 0], sizes = [8, 32], strides = [1, 1]} : vector<8x96xf32> to vector<8x32xf32>
    %1127 = arith.mulf %1126, %1123 : vector<8x32xf32>
    %1128 = arith.addf %1125, %1127 : vector<8x32xf32>
    %1129 = vector.extract_strided_slice %1121 {offsets = [0, 64], sizes = [8, 32], strides = [1, 1]} : vector<8x96xf32> to vector<8x32xf32>
    %1130 = math.tanh %1128 : vector<8x32xf32>
    %1131 = arith.mulf %1129, %1130 : vector<8x32xf32>
    %c1_363 = arith.constant 1 : index
    %c56_364 = arith.constant 56 : index
    %c0_365 = arith.constant 0 : index
    %1132 = vector.load %arg7[%c1_363, %c56_364, %c0_365] : memref<2x128x32xf32, #tpu.memory_space<vmem>>, vector<1x8x32xf32>
    %1133 = vector.shape_cast %1132 : vector<1x8x32xf32> to vector<8x32xf32>
    %1134 = vector.shape_cast %1131 : vector<8x32xf32> to vector<1x8x32xf32>
    tpu.vector_store %arg7[%c1_363, %c56_364, %c0_365], %1134 {strides = array<i32>} : memref<2x128x32xf32, #tpu.memory_space<vmem>>, vector<1x8x32xf32>,
    %c72_366 = arith.constant 72 : index
    %c0_367 = arith.constant 0 : index
    %1135 = vector.load %arg8[%c72_366, %c0_367] : memref<128x256xf32, #tpu.memory_space<vmem>>, vector<8x128xf32>
    %cst_368 = arith.constant dense<0.000000e+00> : vector<8x128xf32>
    %1136 = tpu.matmul %1109, %733, %cst_368 {dimension_numbers = #tpu.dot_dimension_numbers<[1], [0], [0], [1], [0, 0, 1, 1], [], []>} : vector<8x32xf32>, vector<32x128xf32>, vector<8x128xf32> -> vector<8x128xf32>
    %1137 = arith.addf %1135, %1136 : vector<8x128xf32>
    %1138 = vector.extract_strided_slice %1137 {offsets = [0, 0], sizes = [8, 96], strides = [1, 1]} : vector<8x128xf32> to vector<8x96xf32>
    %1139 = arith.negf %1138 : vector<8x96xf32>
    %1140 = math.exp %1139 : vector<8x96xf32>
    %cst_369 = arith.constant 1.000000e+00 : f32
    %1141 = vector.broadcast %cst_369 : f32 to vector<8x96xf32>
    %1142 = arith.addf %1141, %1140 : vector<8x96xf32>
    %1143 = arith.divf %1141, %1142 : vector<8x96xf32>
    %1144 = vector.extract_strided_slice %1137 {offsets = [0, 96], sizes = [8, 32], strides = [1, 1]} : vector<8x128xf32> to vector<8x32xf32>
    %1145 = math.tanh %1144 : vector<8x32xf32>
    %1146 = vector.extract_strided_slice %1143 {offsets = [0, 32], sizes = [8, 32], strides = [1, 1]} : vector<8x96xf32> to vector<8x32xf32>
    %1147 = arith.mulf %1146, %1106 : vector<8x32xf32>
    %1148 = vector.extract_strided_slice %1143 {offsets = [0, 0], sizes = [8, 32], strides = [1, 1]} : vector<8x96xf32> to vector<8x32xf32>
    %1149 = arith.mulf %1148, %1145 : vector<8x32xf32>
    %1150 = arith.addf %1147, %1149 : vector<8x32xf32>
    %1151 = vector.extract_strided_slice %1143 {offsets = [0, 64], sizes = [8, 32], strides = [1, 1]} : vector<8x96xf32> to vector<8x32xf32>
    %1152 = math.tanh %1150 : vector<8x32xf32>
    %1153 = arith.mulf %1151, %1152 : vector<8x32xf32>
    %c0_370 = arith.constant 0 : index
    %c72_371 = arith.constant 72 : index
    %c0_372 = arith.constant 0 : index
    %1154 = vector.load %arg7[%c0_370, %c72_371, %c0_372] : memref<2x128x32xf32, #tpu.memory_space<vmem>>, vector<1x8x32xf32>
    %1155 = vector.shape_cast %1154 : vector<1x8x32xf32> to vector<8x32xf32>
    %1156 = vector.shape_cast %1153 : vector<8x32xf32> to vector<1x8x32xf32>
    tpu.vector_store %arg7[%c0_370, %c72_371, %c0_372], %1156 {strides = array<i32>} : memref<2x128x32xf32, #tpu.memory_space<vmem>>, vector<1x8x32xf32>,
    %c48_373 = arith.constant 48 : index
    %c128_374 = arith.constant 128 : index
    %1157 = vector.load %arg8[%c48_373, %c128_374] : memref<128x256xf32, #tpu.memory_space<vmem>>, vector<8x128xf32>
    %cst_375 = arith.constant dense<0.000000e+00> : vector<8x128xf32>
    %1158 = tpu.matmul %1131, %736, %cst_375 {dimension_numbers = #tpu.dot_dimension_numbers<[1], [0], [0], [1], [0, 0, 1, 1], [], []>} : vector<8x32xf32>, vector<32x128xf32>, vector<8x128xf32> -> vector<8x128xf32>
    %1159 = arith.addf %1157, %1158 : vector<8x128xf32>
    %1160 = vector.extract_strided_slice %1159 {offsets = [0, 0], sizes = [8, 96], strides = [1, 1]} : vector<8x128xf32> to vector<8x96xf32>
    %1161 = arith.negf %1160 : vector<8x96xf32>
    %1162 = math.exp %1161 : vector<8x96xf32>
    %cst_376 = arith.constant 1.000000e+00 : f32
    %1163 = vector.broadcast %cst_376 : f32 to vector<8x96xf32>
    %1164 = arith.addf %1163, %1162 : vector<8x96xf32>
    %1165 = arith.divf %1163, %1164 : vector<8x96xf32>
    %1166 = vector.extract_strided_slice %1159 {offsets = [0, 96], sizes = [8, 32], strides = [1, 1]} : vector<8x128xf32> to vector<8x32xf32>
    %1167 = math.tanh %1166 : vector<8x32xf32>
    %1168 = vector.extract_strided_slice %1165 {offsets = [0, 32], sizes = [8, 32], strides = [1, 1]} : vector<8x96xf32> to vector<8x32xf32>
    %1169 = arith.mulf %1168, %1128 : vector<8x32xf32>
    %1170 = vector.extract_strided_slice %1165 {offsets = [0, 0], sizes = [8, 32], strides = [1, 1]} : vector<8x96xf32> to vector<8x32xf32>
    %1171 = arith.mulf %1170, %1167 : vector<8x32xf32>
    %1172 = arith.addf %1169, %1171 : vector<8x32xf32>
    %1173 = vector.extract_strided_slice %1165 {offsets = [0, 64], sizes = [8, 32], strides = [1, 1]} : vector<8x96xf32> to vector<8x32xf32>
    %1174 = math.tanh %1172 : vector<8x32xf32>
    %1175 = arith.mulf %1173, %1174 : vector<8x32xf32>
    %c1_377 = arith.constant 1 : index
    %c48_378 = arith.constant 48 : index
    %c0_379 = arith.constant 0 : index
    %1176 = vector.load %arg7[%c1_377, %c48_378, %c0_379] : memref<2x128x32xf32, #tpu.memory_space<vmem>>, vector<1x8x32xf32>
    %1177 = vector.shape_cast %1176 : vector<1x8x32xf32> to vector<8x32xf32>
    %1178 = vector.shape_cast %1175 : vector<8x32xf32> to vector<1x8x32xf32>
    tpu.vector_store %arg7[%c1_377, %c48_378, %c0_379], %1178 {strides = array<i32>} : memref<2x128x32xf32, #tpu.memory_space<vmem>>, vector<1x8x32xf32>,
    %c80_380 = arith.constant 80 : index
    %c0_381 = arith.constant 0 : index
    %1179 = vector.load %arg8[%c80_380, %c0_381] : memref<128x256xf32, #tpu.memory_space<vmem>>, vector<8x128xf32>
    %cst_382 = arith.constant dense<0.000000e+00> : vector<8x128xf32>
    %1180 = tpu.matmul %1153, %733, %cst_382 {dimension_numbers = #tpu.dot_dimension_numbers<[1], [0], [0], [1], [0, 0, 1, 1], [], []>} : vector<8x32xf32>, vector<32x128xf32>, vector<8x128xf32> -> vector<8x128xf32>
    %1181 = arith.addf %1179, %1180 : vector<8x128xf32>
    %1182 = vector.extract_strided_slice %1181 {offsets = [0, 0], sizes = [8, 96], strides = [1, 1]} : vector<8x128xf32> to vector<8x96xf32>
    %1183 = arith.negf %1182 : vector<8x96xf32>
    %1184 = math.exp %1183 : vector<8x96xf32>
    %cst_383 = arith.constant 1.000000e+00 : f32
    %1185 = vector.broadcast %cst_383 : f32 to vector<8x96xf32>
    %1186 = arith.addf %1185, %1184 : vector<8x96xf32>
    %1187 = arith.divf %1185, %1186 : vector<8x96xf32>
    %1188 = vector.extract_strided_slice %1181 {offsets = [0, 96], sizes = [8, 32], strides = [1, 1]} : vector<8x128xf32> to vector<8x32xf32>
    %1189 = math.tanh %1188 : vector<8x32xf32>
    %1190 = vector.extract_strided_slice %1187 {offsets = [0, 32], sizes = [8, 32], strides = [1, 1]} : vector<8x96xf32> to vector<8x32xf32>
    %1191 = arith.mulf %1190, %1150 : vector<8x32xf32>
    %1192 = vector.extract_strided_slice %1187 {offsets = [0, 0], sizes = [8, 32], strides = [1, 1]} : vector<8x96xf32> to vector<8x32xf32>
    %1193 = arith.mulf %1192, %1189 : vector<8x32xf32>
    %1194 = arith.addf %1191, %1193 : vector<8x32xf32>
    %1195 = vector.extract_strided_slice %1187 {offsets = [0, 64], sizes = [8, 32], strides = [1, 1]} : vector<8x96xf32> to vector<8x32xf32>
    %1196 = math.tanh %1194 : vector<8x32xf32>
    %1197 = arith.mulf %1195, %1196 : vector<8x32xf32>
    %c0_384 = arith.constant 0 : index
    %c80_385 = arith.constant 80 : index
    %c0_386 = arith.constant 0 : index
    %1198 = vector.load %arg7[%c0_384, %c80_385, %c0_386] : memref<2x128x32xf32, #tpu.memory_space<vmem>>, vector<1x8x32xf32>
    %1199 = vector.shape_cast %1198 : vector<1x8x32xf32> to vector<8x32xf32>
    %1200 = vector.shape_cast %1197 : vector<8x32xf32> to vector<1x8x32xf32>
    tpu.vector_store %arg7[%c0_384, %c80_385, %c0_386], %1200 {strides = array<i32>} : memref<2x128x32xf32, #tpu.memory_space<vmem>>, vector<1x8x32xf32>,
    %c40_387 = arith.constant 40 : index
    %c128_388 = arith.constant 128 : index
    %1201 = vector.load %arg8[%c40_387, %c128_388] : memref<128x256xf32, #tpu.memory_space<vmem>>, vector<8x128xf32>
    %cst_389 = arith.constant dense<0.000000e+00> : vector<8x128xf32>
    %1202 = tpu.matmul %1175, %736, %cst_389 {dimension_numbers = #tpu.dot_dimension_numbers<[1], [0], [0], [1], [0, 0, 1, 1], [], []>} : vector<8x32xf32>, vector<32x128xf32>, vector<8x128xf32> -> vector<8x128xf32>
    %1203 = arith.addf %1201, %1202 : vector<8x128xf32>
    %1204 = vector.extract_strided_slice %1203 {offsets = [0, 0], sizes = [8, 96], strides = [1, 1]} : vector<8x128xf32> to vector<8x96xf32>
    %1205 = arith.negf %1204 : vector<8x96xf32>
    %1206 = math.exp %1205 : vector<8x96xf32>
    %cst_390 = arith.constant 1.000000e+00 : f32
    %1207 = vector.broadcast %cst_390 : f32 to vector<8x96xf32>
    %1208 = arith.addf %1207, %1206 : vector<8x96xf32>
    %1209 = arith.divf %1207, %1208 : vector<8x96xf32>
    %1210 = vector.extract_strided_slice %1203 {offsets = [0, 96], sizes = [8, 32], strides = [1, 1]} : vector<8x128xf32> to vector<8x32xf32>
    %1211 = math.tanh %1210 : vector<8x32xf32>
    %1212 = vector.extract_strided_slice %1209 {offsets = [0, 32], sizes = [8, 32], strides = [1, 1]} : vector<8x96xf32> to vector<8x32xf32>
    %1213 = arith.mulf %1212, %1172 : vector<8x32xf32>
    %1214 = vector.extract_strided_slice %1209 {offsets = [0, 0], sizes = [8, 32], strides = [1, 1]} : vector<8x96xf32> to vector<8x32xf32>
    %1215 = arith.mulf %1214, %1211 : vector<8x32xf32>
    %1216 = arith.addf %1213, %1215 : vector<8x32xf32>
    %1217 = vector.extract_strided_slice %1209 {offsets = [0, 64], sizes = [8, 32], strides = [1, 1]} : vector<8x96xf32> to vector<8x32xf32>
    %1218 = math.tanh %1216 : vector<8x32xf32>
    %1219 = arith.mulf %1217, %1218 : vector<8x32xf32>
    %c1_391 = arith.constant 1 : index
    %c40_392 = arith.constant 40 : index
    %c0_393 = arith.constant 0 : index
    %1220 = vector.load %arg7[%c1_391, %c40_392, %c0_393] : memref<2x128x32xf32, #tpu.memory_space<vmem>>, vector<1x8x32xf32>
    %1221 = vector.shape_cast %1220 : vector<1x8x32xf32> to vector<8x32xf32>
    %1222 = vector.shape_cast %1219 : vector<8x32xf32> to vector<1x8x32xf32>
    tpu.vector_store %arg7[%c1_391, %c40_392, %c0_393], %1222 {strides = array<i32>} : memref<2x128x32xf32, #tpu.memory_space<vmem>>, vector<1x8x32xf32>,
    %c88_394 = arith.constant 88 : index
    %c0_395 = arith.constant 0 : index
    %1223 = vector.load %arg8[%c88_394, %c0_395] : memref<128x256xf32, #tpu.memory_space<vmem>>, vector<8x128xf32>
    %cst_396 = arith.constant dense<0.000000e+00> : vector<8x128xf32>
    %1224 = tpu.matmul %1197, %733, %cst_396 {dimension_numbers = #tpu.dot_dimension_numbers<[1], [0], [0], [1], [0, 0, 1, 1], [], []>} : vector<8x32xf32>, vector<32x128xf32>, vector<8x128xf32> -> vector<8x128xf32>
    %1225 = arith.addf %1223, %1224 : vector<8x128xf32>
    %1226 = vector.extract_strided_slice %1225 {offsets = [0, 0], sizes = [8, 96], strides = [1, 1]} : vector<8x128xf32> to vector<8x96xf32>
    %1227 = arith.negf %1226 : vector<8x96xf32>
    %1228 = math.exp %1227 : vector<8x96xf32>
    %cst_397 = arith.constant 1.000000e+00 : f32
    %1229 = vector.broadcast %cst_397 : f32 to vector<8x96xf32>
    %1230 = arith.addf %1229, %1228 : vector<8x96xf32>
    %1231 = arith.divf %1229, %1230 : vector<8x96xf32>
    %1232 = vector.extract_strided_slice %1225 {offsets = [0, 96], sizes = [8, 32], strides = [1, 1]} : vector<8x128xf32> to vector<8x32xf32>
    %1233 = math.tanh %1232 : vector<8x32xf32>
    %1234 = vector.extract_strided_slice %1231 {offsets = [0, 32], sizes = [8, 32], strides = [1, 1]} : vector<8x96xf32> to vector<8x32xf32>
    %1235 = arith.mulf %1234, %1194 : vector<8x32xf32>
    %1236 = vector.extract_strided_slice %1231 {offsets = [0, 0], sizes = [8, 32], strides = [1, 1]} : vector<8x96xf32> to vector<8x32xf32>
    %1237 = arith.mulf %1236, %1233 : vector<8x32xf32>
    %1238 = arith.addf %1235, %1237 : vector<8x32xf32>
    %1239 = vector.extract_strided_slice %1231 {offsets = [0, 64], sizes = [8, 32], strides = [1, 1]} : vector<8x96xf32> to vector<8x32xf32>
    %1240 = math.tanh %1238 : vector<8x32xf32>
    %1241 = arith.mulf %1239, %1240 : vector<8x32xf32>
    %c0_398 = arith.constant 0 : index
    %c88_399 = arith.constant 88 : index
    %c0_400 = arith.constant 0 : index
    %1242 = vector.load %arg7[%c0_398, %c88_399, %c0_400] : memref<2x128x32xf32, #tpu.memory_space<vmem>>, vector<1x8x32xf32>
    %1243 = vector.shape_cast %1242 : vector<1x8x32xf32> to vector<8x32xf32>
    %1244 = vector.shape_cast %1241 : vector<8x32xf32> to vector<1x8x32xf32>
    tpu.vector_store %arg7[%c0_398, %c88_399, %c0_400], %1244 {strides = array<i32>} : memref<2x128x32xf32, #tpu.memory_space<vmem>>, vector<1x8x32xf32>,
    %c32_401 = arith.constant 32 : index
    %c128_402 = arith.constant 128 : index
    %1245 = vector.load %arg8[%c32_401, %c128_402] : memref<128x256xf32, #tpu.memory_space<vmem>>, vector<8x128xf32>
    %cst_403 = arith.constant dense<0.000000e+00> : vector<8x128xf32>
    %1246 = tpu.matmul %1219, %736, %cst_403 {dimension_numbers = #tpu.dot_dimension_numbers<[1], [0], [0], [1], [0, 0, 1, 1], [], []>} : vector<8x32xf32>, vector<32x128xf32>, vector<8x128xf32> -> vector<8x128xf32>
    %1247 = arith.addf %1245, %1246 : vector<8x128xf32>
    %1248 = vector.extract_strided_slice %1247 {offsets = [0, 0], sizes = [8, 96], strides = [1, 1]} : vector<8x128xf32> to vector<8x96xf32>
    %1249 = arith.negf %1248 : vector<8x96xf32>
    %1250 = math.exp %1249 : vector<8x96xf32>
    %cst_404 = arith.constant 1.000000e+00 : f32
    %1251 = vector.broadcast %cst_404 : f32 to vector<8x96xf32>
    %1252 = arith.addf %1251, %1250 : vector<8x96xf32>
    %1253 = arith.divf %1251, %1252 : vector<8x96xf32>
    %1254 = vector.extract_strided_slice %1247 {offsets = [0, 96], sizes = [8, 32], strides = [1, 1]} : vector<8x128xf32> to vector<8x32xf32>
    %1255 = math.tanh %1254 : vector<8x32xf32>
    %1256 = vector.extract_strided_slice %1253 {offsets = [0, 32], sizes = [8, 32], strides = [1, 1]} : vector<8x96xf32> to vector<8x32xf32>
    %1257 = arith.mulf %1256, %1216 : vector<8x32xf32>
    %1258 = vector.extract_strided_slice %1253 {offsets = [0, 0], sizes = [8, 32], strides = [1, 1]} : vector<8x96xf32> to vector<8x32xf32>
    %1259 = arith.mulf %1258, %1255 : vector<8x32xf32>
    %1260 = arith.addf %1257, %1259 : vector<8x32xf32>
    %1261 = vector.extract_strided_slice %1253 {offsets = [0, 64], sizes = [8, 32], strides = [1, 1]} : vector<8x96xf32> to vector<8x32xf32>
    %1262 = math.tanh %1260 : vector<8x32xf32>
    %1263 = arith.mulf %1261, %1262 : vector<8x32xf32>
    %c1_405 = arith.constant 1 : index
    %c32_406 = arith.constant 32 : index
    %c0_407 = arith.constant 0 : index
    %1264 = vector.load %arg7[%c1_405, %c32_406, %c0_407] : memref<2x128x32xf32, #tpu.memory_space<vmem>>, vector<1x8x32xf32>
    %1265 = vector.shape_cast %1264 : vector<1x8x32xf32> to vector<8x32xf32>
    %1266 = vector.shape_cast %1263 : vector<8x32xf32> to vector<1x8x32xf32>
    tpu.vector_store %arg7[%c1_405, %c32_406, %c0_407], %1266 {strides = array<i32>} : memref<2x128x32xf32, #tpu.memory_space<vmem>>, vector<1x8x32xf32>,
    %c96_408 = arith.constant 96 : index
    %c0_409 = arith.constant 0 : index
    %1267 = vector.load %arg8[%c96_408, %c0_409] : memref<128x256xf32, #tpu.memory_space<vmem>>, vector<8x128xf32>
    %cst_410 = arith.constant dense<0.000000e+00> : vector<8x128xf32>
    %1268 = tpu.matmul %1241, %733, %cst_410 {dimension_numbers = #tpu.dot_dimension_numbers<[1], [0], [0], [1], [0, 0, 1, 1], [], []>} : vector<8x32xf32>, vector<32x128xf32>, vector<8x128xf32> -> vector<8x128xf32>
    %1269 = arith.addf %1267, %1268 : vector<8x128xf32>
    %1270 = vector.extract_strided_slice %1269 {offsets = [0, 0], sizes = [8, 96], strides = [1, 1]} : vector<8x128xf32> to vector<8x96xf32>
    %1271 = arith.negf %1270 : vector<8x96xf32>
    %1272 = math.exp %1271 : vector<8x96xf32>
    %cst_411 = arith.constant 1.000000e+00 : f32
    %1273 = vector.broadcast %cst_411 : f32 to vector<8x96xf32>
    %1274 = arith.addf %1273, %1272 : vector<8x96xf32>
    %1275 = arith.divf %1273, %1274 : vector<8x96xf32>
    %1276 = vector.extract_strided_slice %1269 {offsets = [0, 96], sizes = [8, 32], strides = [1, 1]} : vector<8x128xf32> to vector<8x32xf32>
    %1277 = math.tanh %1276 : vector<8x32xf32>
    %1278 = vector.extract_strided_slice %1275 {offsets = [0, 32], sizes = [8, 32], strides = [1, 1]} : vector<8x96xf32> to vector<8x32xf32>
    %1279 = arith.mulf %1278, %1238 : vector<8x32xf32>
    %1280 = vector.extract_strided_slice %1275 {offsets = [0, 0], sizes = [8, 32], strides = [1, 1]} : vector<8x96xf32> to vector<8x32xf32>
    %1281 = arith.mulf %1280, %1277 : vector<8x32xf32>
    %1282 = arith.addf %1279, %1281 : vector<8x32xf32>
    %1283 = vector.extract_strided_slice %1275 {offsets = [0, 64], sizes = [8, 32], strides = [1, 1]} : vector<8x96xf32> to vector<8x32xf32>
    %1284 = math.tanh %1282 : vector<8x32xf32>
    %1285 = arith.mulf %1283, %1284 : vector<8x32xf32>
    %c0_412 = arith.constant 0 : index
    %c96_413 = arith.constant 96 : index
    %c0_414 = arith.constant 0 : index
    %1286 = vector.load %arg7[%c0_412, %c96_413, %c0_414] : memref<2x128x32xf32, #tpu.memory_space<vmem>>, vector<1x8x32xf32>
    %1287 = vector.shape_cast %1286 : vector<1x8x32xf32> to vector<8x32xf32>
    %1288 = vector.shape_cast %1285 : vector<8x32xf32> to vector<1x8x32xf32>
    tpu.vector_store %arg7[%c0_412, %c96_413, %c0_414], %1288 {strides = array<i32>} : memref<2x128x32xf32, #tpu.memory_space<vmem>>, vector<1x8x32xf32>,
    %c24_415 = arith.constant 24 : index
    %c128_416 = arith.constant 128 : index
    %1289 = vector.load %arg8[%c24_415, %c128_416] : memref<128x256xf32, #tpu.memory_space<vmem>>, vector<8x128xf32>
    %cst_417 = arith.constant dense<0.000000e+00> : vector<8x128xf32>
    %1290 = tpu.matmul %1263, %736, %cst_417 {dimension_numbers = #tpu.dot_dimension_numbers<[1], [0], [0], [1], [0, 0, 1, 1], [], []>} : vector<8x32xf32>, vector<32x128xf32>, vector<8x128xf32> -> vector<8x128xf32>
    %1291 = arith.addf %1289, %1290 : vector<8x128xf32>
    %1292 = vector.extract_strided_slice %1291 {offsets = [0, 0], sizes = [8, 96], strides = [1, 1]} : vector<8x128xf32> to vector<8x96xf32>
    %1293 = arith.negf %1292 : vector<8x96xf32>
    %1294 = math.exp %1293 : vector<8x96xf32>
    %cst_418 = arith.constant 1.000000e+00 : f32
    %1295 = vector.broadcast %cst_418 : f32 to vector<8x96xf32>
    %1296 = arith.addf %1295, %1294 : vector<8x96xf32>
    %1297 = arith.divf %1295, %1296 : vector<8x96xf32>
    %1298 = vector.extract_strided_slice %1291 {offsets = [0, 96], sizes = [8, 32], strides = [1, 1]} : vector<8x128xf32> to vector<8x32xf32>
    %1299 = math.tanh %1298 : vector<8x32xf32>
    %1300 = vector.extract_strided_slice %1297 {offsets = [0, 32], sizes = [8, 32], strides = [1, 1]} : vector<8x96xf32> to vector<8x32xf32>
    %1301 = arith.mulf %1300, %1260 : vector<8x32xf32>
    %1302 = vector.extract_strided_slice %1297 {offsets = [0, 0], sizes = [8, 32], strides = [1, 1]} : vector<8x96xf32> to vector<8x32xf32>
    %1303 = arith.mulf %1302, %1299 : vector<8x32xf32>
    %1304 = arith.addf %1301, %1303 : vector<8x32xf32>
    %1305 = vector.extract_strided_slice %1297 {offsets = [0, 64], sizes = [8, 32], strides = [1, 1]} : vector<8x96xf32> to vector<8x32xf32>
    %1306 = math.tanh %1304 : vector<8x32xf32>
    %1307 = arith.mulf %1305, %1306 : vector<8x32xf32>
    %c1_419 = arith.constant 1 : index
    %c24_420 = arith.constant 24 : index
    %c0_421 = arith.constant 0 : index
    %1308 = vector.load %arg7[%c1_419, %c24_420, %c0_421] : memref<2x128x32xf32, #tpu.memory_space<vmem>>, vector<1x8x32xf32>
    %1309 = vector.shape_cast %1308 : vector<1x8x32xf32> to vector<8x32xf32>
    %1310 = vector.shape_cast %1307 : vector<8x32xf32> to vector<1x8x32xf32>
    tpu.vector_store %arg7[%c1_419, %c24_420, %c0_421], %1310 {strides = array<i32>} : memref<2x128x32xf32, #tpu.memory_space<vmem>>, vector<1x8x32xf32>,
    %c104_422 = arith.constant 104 : index
    %c0_423 = arith.constant 0 : index
    %1311 = vector.load %arg8[%c104_422, %c0_423] : memref<128x256xf32, #tpu.memory_space<vmem>>, vector<8x128xf32>
    %cst_424 = arith.constant dense<0.000000e+00> : vector<8x128xf32>
    %1312 = tpu.matmul %1285, %733, %cst_424 {dimension_numbers = #tpu.dot_dimension_numbers<[1], [0], [0], [1], [0, 0, 1, 1], [], []>} : vector<8x32xf32>, vector<32x128xf32>, vector<8x128xf32> -> vector<8x128xf32>
    %1313 = arith.addf %1311, %1312 : vector<8x128xf32>
    %1314 = vector.extract_strided_slice %1313 {offsets = [0, 0], sizes = [8, 96], strides = [1, 1]} : vector<8x128xf32> to vector<8x96xf32>
    %1315 = arith.negf %1314 : vector<8x96xf32>
    %1316 = math.exp %1315 : vector<8x96xf32>
    %cst_425 = arith.constant 1.000000e+00 : f32
    %1317 = vector.broadcast %cst_425 : f32 to vector<8x96xf32>
    %1318 = arith.addf %1317, %1316 : vector<8x96xf32>
    %1319 = arith.divf %1317, %1318 : vector<8x96xf32>
    %1320 = vector.extract_strided_slice %1313 {offsets = [0, 96], sizes = [8, 32], strides = [1, 1]} : vector<8x128xf32> to vector<8x32xf32>
    %1321 = math.tanh %1320 : vector<8x32xf32>
    %1322 = vector.extract_strided_slice %1319 {offsets = [0, 32], sizes = [8, 32], strides = [1, 1]} : vector<8x96xf32> to vector<8x32xf32>
    %1323 = arith.mulf %1322, %1282 : vector<8x32xf32>
    %1324 = vector.extract_strided_slice %1319 {offsets = [0, 0], sizes = [8, 32], strides = [1, 1]} : vector<8x96xf32> to vector<8x32xf32>
    %1325 = arith.mulf %1324, %1321 : vector<8x32xf32>
    %1326 = arith.addf %1323, %1325 : vector<8x32xf32>
    %1327 = vector.extract_strided_slice %1319 {offsets = [0, 64], sizes = [8, 32], strides = [1, 1]} : vector<8x96xf32> to vector<8x32xf32>
    %1328 = math.tanh %1326 : vector<8x32xf32>
    %1329 = arith.mulf %1327, %1328 : vector<8x32xf32>
    %c0_426 = arith.constant 0 : index
    %c104_427 = arith.constant 104 : index
    %c0_428 = arith.constant 0 : index
    %1330 = vector.load %arg7[%c0_426, %c104_427, %c0_428] : memref<2x128x32xf32, #tpu.memory_space<vmem>>, vector<1x8x32xf32>
    %1331 = vector.shape_cast %1330 : vector<1x8x32xf32> to vector<8x32xf32>
    %1332 = vector.shape_cast %1329 : vector<8x32xf32> to vector<1x8x32xf32>
    tpu.vector_store %arg7[%c0_426, %c104_427, %c0_428], %1332 {strides = array<i32>} : memref<2x128x32xf32, #tpu.memory_space<vmem>>, vector<1x8x32xf32>,
    %c16_429 = arith.constant 16 : index
    %c128_430 = arith.constant 128 : index
    %1333 = vector.load %arg8[%c16_429, %c128_430] : memref<128x256xf32, #tpu.memory_space<vmem>>, vector<8x128xf32>
    %cst_431 = arith.constant dense<0.000000e+00> : vector<8x128xf32>
    %1334 = tpu.matmul %1307, %736, %cst_431 {dimension_numbers = #tpu.dot_dimension_numbers<[1], [0], [0], [1], [0, 0, 1, 1], [], []>} : vector<8x32xf32>, vector<32x128xf32>, vector<8x128xf32> -> vector<8x128xf32>
    %1335 = arith.addf %1333, %1334 : vector<8x128xf32>
    %1336 = vector.extract_strided_slice %1335 {offsets = [0, 0], sizes = [8, 96], strides = [1, 1]} : vector<8x128xf32> to vector<8x96xf32>
    %1337 = arith.negf %1336 : vector<8x96xf32>
    %1338 = math.exp %1337 : vector<8x96xf32>
    %cst_432 = arith.constant 1.000000e+00 : f32
    %1339 = vector.broadcast %cst_432 : f32 to vector<8x96xf32>
    %1340 = arith.addf %1339, %1338 : vector<8x96xf32>
    %1341 = arith.divf %1339, %1340 : vector<8x96xf32>
    %1342 = vector.extract_strided_slice %1335 {offsets = [0, 96], sizes = [8, 32], strides = [1, 1]} : vector<8x128xf32> to vector<8x32xf32>
    %1343 = math.tanh %1342 : vector<8x32xf32>
    %1344 = vector.extract_strided_slice %1341 {offsets = [0, 32], sizes = [8, 32], strides = [1, 1]} : vector<8x96xf32> to vector<8x32xf32>
    %1345 = arith.mulf %1344, %1304 : vector<8x32xf32>
    %1346 = vector.extract_strided_slice %1341 {offsets = [0, 0], sizes = [8, 32], strides = [1, 1]} : vector<8x96xf32> to vector<8x32xf32>
    %1347 = arith.mulf %1346, %1343 : vector<8x32xf32>
    %1348 = arith.addf %1345, %1347 : vector<8x32xf32>
    %1349 = vector.extract_strided_slice %1341 {offsets = [0, 64], sizes = [8, 32], strides = [1, 1]} : vector<8x96xf32> to vector<8x32xf32>
    %1350 = math.tanh %1348 : vector<8x32xf32>
    %1351 = arith.mulf %1349, %1350 : vector<8x32xf32>
    %c1_433 = arith.constant 1 : index
    %c16_434 = arith.constant 16 : index
    %c0_435 = arith.constant 0 : index
    %1352 = vector.load %arg7[%c1_433, %c16_434, %c0_435] : memref<2x128x32xf32, #tpu.memory_space<vmem>>, vector<1x8x32xf32>
    %1353 = vector.shape_cast %1352 : vector<1x8x32xf32> to vector<8x32xf32>
    %1354 = vector.shape_cast %1351 : vector<8x32xf32> to vector<1x8x32xf32>
    tpu.vector_store %arg7[%c1_433, %c16_434, %c0_435], %1354 {strides = array<i32>} : memref<2x128x32xf32, #tpu.memory_space<vmem>>, vector<1x8x32xf32>,
    %c112_436 = arith.constant 112 : index
    %c0_437 = arith.constant 0 : index
    %1355 = vector.load %arg8[%c112_436, %c0_437] : memref<128x256xf32, #tpu.memory_space<vmem>>, vector<8x128xf32>
    %cst_438 = arith.constant dense<0.000000e+00> : vector<8x128xf32>
    %1356 = tpu.matmul %1329, %733, %cst_438 {dimension_numbers = #tpu.dot_dimension_numbers<[1], [0], [0], [1], [0, 0, 1, 1], [], []>} : vector<8x32xf32>, vector<32x128xf32>, vector<8x128xf32> -> vector<8x128xf32>
    %1357 = arith.addf %1355, %1356 : vector<8x128xf32>
    %1358 = vector.extract_strided_slice %1357 {offsets = [0, 0], sizes = [8, 96], strides = [1, 1]} : vector<8x128xf32> to vector<8x96xf32>
    %1359 = arith.negf %1358 : vector<8x96xf32>
    %1360 = math.exp %1359 : vector<8x96xf32>
    %cst_439 = arith.constant 1.000000e+00 : f32
    %1361 = vector.broadcast %cst_439 : f32 to vector<8x96xf32>
    %1362 = arith.addf %1361, %1360 : vector<8x96xf32>
    %1363 = arith.divf %1361, %1362 : vector<8x96xf32>
    %1364 = vector.extract_strided_slice %1357 {offsets = [0, 96], sizes = [8, 32], strides = [1, 1]} : vector<8x128xf32> to vector<8x32xf32>
    %1365 = math.tanh %1364 : vector<8x32xf32>
    %1366 = vector.extract_strided_slice %1363 {offsets = [0, 32], sizes = [8, 32], strides = [1, 1]} : vector<8x96xf32> to vector<8x32xf32>
    %1367 = arith.mulf %1366, %1326 : vector<8x32xf32>
    %1368 = vector.extract_strided_slice %1363 {offsets = [0, 0], sizes = [8, 32], strides = [1, 1]} : vector<8x96xf32> to vector<8x32xf32>
    %1369 = arith.mulf %1368, %1365 : vector<8x32xf32>
    %1370 = arith.addf %1367, %1369 : vector<8x32xf32>
    %1371 = vector.extract_strided_slice %1363 {offsets = [0, 64], sizes = [8, 32], strides = [1, 1]} : vector<8x96xf32> to vector<8x32xf32>
    %1372 = math.tanh %1370 : vector<8x32xf32>
    %1373 = arith.mulf %1371, %1372 : vector<8x32xf32>
    %c0_440 = arith.constant 0 : index
    %c112_441 = arith.constant 112 : index
    %c0_442 = arith.constant 0 : index
    %1374 = vector.load %arg7[%c0_440, %c112_441, %c0_442] : memref<2x128x32xf32, #tpu.memory_space<vmem>>, vector<1x8x32xf32>
    %1375 = vector.shape_cast %1374 : vector<1x8x32xf32> to vector<8x32xf32>
    %1376 = vector.shape_cast %1373 : vector<8x32xf32> to vector<1x8x32xf32>
    tpu.vector_store %arg7[%c0_440, %c112_441, %c0_442], %1376 {strides = array<i32>} : memref<2x128x32xf32, #tpu.memory_space<vmem>>, vector<1x8x32xf32>,
    %c8_443 = arith.constant 8 : index
    %c128_444 = arith.constant 128 : index
    %1377 = vector.load %arg8[%c8_443, %c128_444] : memref<128x256xf32, #tpu.memory_space<vmem>>, vector<8x128xf32>
    %cst_445 = arith.constant dense<0.000000e+00> : vector<8x128xf32>
    %1378 = tpu.matmul %1351, %736, %cst_445 {dimension_numbers = #tpu.dot_dimension_numbers<[1], [0], [0], [1], [0, 0, 1, 1], [], []>} : vector<8x32xf32>, vector<32x128xf32>, vector<8x128xf32> -> vector<8x128xf32>
    %1379 = arith.addf %1377, %1378 : vector<8x128xf32>
    %1380 = vector.extract_strided_slice %1379 {offsets = [0, 0], sizes = [8, 96], strides = [1, 1]} : vector<8x128xf32> to vector<8x96xf32>
    %1381 = arith.negf %1380 : vector<8x96xf32>
    %1382 = math.exp %1381 : vector<8x96xf32>
    %cst_446 = arith.constant 1.000000e+00 : f32
    %1383 = vector.broadcast %cst_446 : f32 to vector<8x96xf32>
    %1384 = arith.addf %1383, %1382 : vector<8x96xf32>
    %1385 = arith.divf %1383, %1384 : vector<8x96xf32>
    %1386 = vector.extract_strided_slice %1379 {offsets = [0, 96], sizes = [8, 32], strides = [1, 1]} : vector<8x128xf32> to vector<8x32xf32>
    %1387 = math.tanh %1386 : vector<8x32xf32>
    %1388 = vector.extract_strided_slice %1385 {offsets = [0, 32], sizes = [8, 32], strides = [1, 1]} : vector<8x96xf32> to vector<8x32xf32>
    %1389 = arith.mulf %1388, %1348 : vector<8x32xf32>
    %1390 = vector.extract_strided_slice %1385 {offsets = [0, 0], sizes = [8, 32], strides = [1, 1]} : vector<8x96xf32> to vector<8x32xf32>
    %1391 = arith.mulf %1390, %1387 : vector<8x32xf32>
    %1392 = arith.addf %1389, %1391 : vector<8x32xf32>
    %1393 = vector.extract_strided_slice %1385 {offsets = [0, 64], sizes = [8, 32], strides = [1, 1]} : vector<8x96xf32> to vector<8x32xf32>
    %1394 = math.tanh %1392 : vector<8x32xf32>
    %1395 = arith.mulf %1393, %1394 : vector<8x32xf32>
    %c1_447 = arith.constant 1 : index
    %c8_448 = arith.constant 8 : index
    %c0_449 = arith.constant 0 : index
    %1396 = vector.load %arg7[%c1_447, %c8_448, %c0_449] : memref<2x128x32xf32, #tpu.memory_space<vmem>>, vector<1x8x32xf32>
    %1397 = vector.shape_cast %1396 : vector<1x8x32xf32> to vector<8x32xf32>
    %1398 = vector.shape_cast %1395 : vector<8x32xf32> to vector<1x8x32xf32>
    tpu.vector_store %arg7[%c1_447, %c8_448, %c0_449], %1398 {strides = array<i32>} : memref<2x128x32xf32, #tpu.memory_space<vmem>>, vector<1x8x32xf32>,
    %c120_450 = arith.constant 120 : index
    %c0_451 = arith.constant 0 : index
    %1399 = vector.load %arg8[%c120_450, %c0_451] : memref<128x256xf32, #tpu.memory_space<vmem>>, vector<8x128xf32>
    %cst_452 = arith.constant dense<0.000000e+00> : vector<8x128xf32>
    %1400 = tpu.matmul %1373, %733, %cst_452 {dimension_numbers = #tpu.dot_dimension_numbers<[1], [0], [0], [1], [0, 0, 1, 1], [], []>} : vector<8x32xf32>, vector<32x128xf32>, vector<8x128xf32> -> vector<8x128xf32>
    %1401 = arith.addf %1399, %1400 : vector<8x128xf32>
    %1402 = vector.extract_strided_slice %1401 {offsets = [0, 0], sizes = [8, 96], strides = [1, 1]} : vector<8x128xf32> to vector<8x96xf32>
    %1403 = arith.negf %1402 : vector<8x96xf32>
    %1404 = math.exp %1403 : vector<8x96xf32>
    %cst_453 = arith.constant 1.000000e+00 : f32
    %1405 = vector.broadcast %cst_453 : f32 to vector<8x96xf32>
    %1406 = arith.addf %1405, %1404 : vector<8x96xf32>
    %1407 = arith.divf %1405, %1406 : vector<8x96xf32>
    %1408 = vector.extract_strided_slice %1401 {offsets = [0, 96], sizes = [8, 32], strides = [1, 1]} : vector<8x128xf32> to vector<8x32xf32>
    %1409 = math.tanh %1408 : vector<8x32xf32>
    %1410 = vector.extract_strided_slice %1407 {offsets = [0, 32], sizes = [8, 32], strides = [1, 1]} : vector<8x96xf32> to vector<8x32xf32>
    %1411 = arith.mulf %1410, %1370 : vector<8x32xf32>
    %1412 = vector.extract_strided_slice %1407 {offsets = [0, 0], sizes = [8, 32], strides = [1, 1]} : vector<8x96xf32> to vector<8x32xf32>
    %1413 = arith.mulf %1412, %1409 : vector<8x32xf32>
    %1414 = arith.addf %1411, %1413 : vector<8x32xf32>
    %1415 = vector.extract_strided_slice %1407 {offsets = [0, 64], sizes = [8, 32], strides = [1, 1]} : vector<8x96xf32> to vector<8x32xf32>
    %1416 = math.tanh %1414 : vector<8x32xf32>
    %1417 = arith.mulf %1415, %1416 : vector<8x32xf32>
    %c0_454 = arith.constant 0 : index
    %c120_455 = arith.constant 120 : index
    %c0_456 = arith.constant 0 : index
    %1418 = vector.load %arg7[%c0_454, %c120_455, %c0_456] : memref<2x128x32xf32, #tpu.memory_space<vmem>>, vector<1x8x32xf32>
    %1419 = vector.shape_cast %1418 : vector<1x8x32xf32> to vector<8x32xf32>
    %1420 = vector.shape_cast %1417 : vector<8x32xf32> to vector<1x8x32xf32>
    tpu.vector_store %arg7[%c0_454, %c120_455, %c0_456], %1420 {strides = array<i32>} : memref<2x128x32xf32, #tpu.memory_space<vmem>>, vector<1x8x32xf32>,
    %c0_457 = arith.constant 0 : index
    %c128_458 = arith.constant 128 : index
    %1421 = vector.load %arg8[%c0_457, %c128_458] : memref<128x256xf32, #tpu.memory_space<vmem>>, vector<8x128xf32>
    %cst_459 = arith.constant dense<0.000000e+00> : vector<8x128xf32>
    %1422 = tpu.matmul %1395, %736, %cst_459 {dimension_numbers = #tpu.dot_dimension_numbers<[1], [0], [0], [1], [0, 0, 1, 1], [], []>} : vector<8x32xf32>, vector<32x128xf32>, vector<8x128xf32> -> vector<8x128xf32>
    %1423 = arith.addf %1421, %1422 : vector<8x128xf32>
    %1424 = vector.extract_strided_slice %1423 {offsets = [0, 0], sizes = [8, 96], strides = [1, 1]} : vector<8x128xf32> to vector<8x96xf32>
    %1425 = arith.negf %1424 : vector<8x96xf32>
    %1426 = math.exp %1425 : vector<8x96xf32>
    %cst_460 = arith.constant 1.000000e+00 : f32
    %1427 = vector.broadcast %cst_460 : f32 to vector<8x96xf32>
    %1428 = arith.addf %1427, %1426 : vector<8x96xf32>
    %1429 = arith.divf %1427, %1428 : vector<8x96xf32>
    %1430 = vector.extract_strided_slice %1423 {offsets = [0, 96], sizes = [8, 32], strides = [1, 1]} : vector<8x128xf32> to vector<8x32xf32>
    %1431 = math.tanh %1430 : vector<8x32xf32>
    %1432 = vector.extract_strided_slice %1429 {offsets = [0, 32], sizes = [8, 32], strides = [1, 1]} : vector<8x96xf32> to vector<8x32xf32>
    %1433 = arith.mulf %1432, %1392 : vector<8x32xf32>
    %1434 = vector.extract_strided_slice %1429 {offsets = [0, 0], sizes = [8, 32], strides = [1, 1]} : vector<8x96xf32> to vector<8x32xf32>
    %1435 = arith.mulf %1434, %1431 : vector<8x32xf32>
    %1436 = arith.addf %1433, %1435 : vector<8x32xf32>
    %1437 = vector.extract_strided_slice %1429 {offsets = [0, 64], sizes = [8, 32], strides = [1, 1]} : vector<8x96xf32> to vector<8x32xf32>
    %1438 = math.tanh %1436 : vector<8x32xf32>
    %1439 = arith.mulf %1437, %1438 : vector<8x32xf32>
    %c1_461 = arith.constant 1 : index
    %c0_462 = arith.constant 0 : index
    %c0_463 = arith.constant 0 : index
    %1440 = vector.load %arg7[%c1_461, %c0_462, %c0_463] : memref<2x128x32xf32, #tpu.memory_space<vmem>>, vector<1x8x32xf32>
    %1441 = vector.shape_cast %1440 : vector<1x8x32xf32> to vector<8x32xf32>
    %1442 = vector.shape_cast %1439 : vector<8x32xf32> to vector<1x8x32xf32>
    tpu.vector_store %arg7[%c1_461, %c0_462, %c0_463], %1442 {strides = array<i32>} : memref<2x128x32xf32, #tpu.memory_space<vmem>>, vector<1x8x32xf32>,
    return
  }
}

</mosaic_0001>

<bundles_post_ra>
// kernel: encoder_lstm_forward.1
= control target key start
LH: loop header
LB: loop body
LE: loop exit
PB: predicated region body
PF: predicated region fallthrough
CT: control target
= control target key end

     0   :  { %v9617_v0 = vmov 0.0|0.0   ;;  %v9618_v4 = vmov 0.0   ;;  %vm9619_vm0 = vmmov 0   ;;  %vm58_vm1 = vcmask 130048   ;;  %s11095_s1 = inlined_call_operand.vmem [shape: f32[16,256], index: 1, kind: input, shape index: {}]   ;;  %s11096_s2 = inlined_call_operand.vmem [shape: f32[64,128], index: 2, kind: input, shape index: {}]   ;;  %s11097_s0 = inlined_call_operand.vmem [shape: f32[128,16], index: 0, kind: input, shape index: {}]   ;;  %s11098_s3 = inlined_call_operand.vmem [shape: f32[1,256], index: 3, kind: input, shape index: {}]   ;;  %s11099_s4 = inlined_call_operand.vmem [shape: f32[64,256], index: 4, kind: input, shape index: {}]   ;;  %s11100_s5 = inlined_call_operand.vmem [shape: f32[64,128], index: 5, kind: input, shape index: {}]   ;;  %s11101_s6 = inlined_call_operand.vmem [shape: f32[1,256], index: 6, kind: input, shape index: {}]   ;;  %s11102_s7 = inlined_call_operand.vmem [shape: f32[2,128,32], index: 7, kind: output, shape index: {}]  }
   0x1   :  { %8668 = vmatprep.subr.bf16.mxu1 %v9617_v0  ;;  %v27_v1 = vld [vmem:[%s11095_s1 + $0x8] sm:$0xff]  ;;  %v29_v2 = vld [vmem:[%s11095_s1 + $0x18] sm:$0xff]  ;;  %v300_v3 = vld [vmem:[%s11096_s2] sm:$0xff]  ;;  %171 = vmatprep.mubr.f32.mxu0 %v9618_v4  ;;  %v48_v36 = vlaneseq  ;;  %vm309_vm2 = vcmask 261120  }
   0x2   :  { %v8664_v5 = vpack.c.bf16 %v29_v2, %v27_v1  ;;  %v301_v6 = vld [vmem:[%s11096_s2 + $0x8] sm:$0xff]  ;;  %v26_v7 = vld [vmem:[%s11095_s1] sm:$0xff]  ;;  %v28_v8 = vld [vmem:[%s11095_s1 + $0x10] sm:$0xff]  ;;  %7968 = vmatprep.mubr.msk.f32.mxu1 %vm9619_vm0, %v9618_v4 }
   0x3   :  { %v9684_v9 = vpack.c.bf16 %v301_v6, %v300_v3  ;;  %v8666_v10 = vpack.c.bf16 %v28_v8, %v26_v7  ;;  %v302_v11 = vld [vmem:[%s11096_s2 + $0x10] sm:$0xff]  ;;  %v303_v12 = vld [vmem:[%s11096_s2 + $0x18] sm:$0xff]  ;;  %v30_v13 = vld [vmem:[%s11097_s0] sm:$0xff]  ;;  %v9814_v37 = vshrl.u32 %v48_v36, 7 }
   0x4   :  { %8665 = vmatprep.subr.bf16.mxu0 %v8664_v5  ;;  %v9696_v14 = vpack.c.bf16 %v303_v12, %v302_v11  ;;  %v304_v15 = vld [vmem:[%s11096_s2 + $0x20] sm:$0xff]  ;;  %v305_v16 = vld [vmem:[%s11096_s2 + $0x28] sm:$0xff]  ;;  %v306_v19 = vld [vmem:[%s11096_s2 + $0x30] sm:$0xff] }
   0x5   :  { %8670 = vmatpush3.bf16.msra.mxu1 %v9684_v9  ;;  %8667 = vmatpush1.bf16.msra.mxu0 %v8666_v10  ;;  %v31_v17 = vld [vmem:[%s11097_s0 + $0x8] sm:$0xff]  ;;  %v9712_v18 = vpack.c.bf16 %v305_v16, %v304_v15  ;;  %v307_v20 = vld [vmem:[%s11096_s2 + $0x38] sm:$0xff]  ;;  %v32_v21 = vld [vmem:[%s11097_s0 + $0x10] sm:$0xff]  ;;  %v50_v38 = vsub.s32 0, %v9814_v37  ;;  %v54_v40 = vsub.s32 1, %v9814_v37 }
   0x6   :  { %8671 = vmatprep.subr.bf16.mxu1 %v9617_v0  ;;  %8716 = vmatprep.subr.bf16.mxu0 %v9617_v0  ;;  %v9730_v22 = vpack.c.bf16 %v307_v20, %v306_v19  ;;  %v33_v23 = vld [vmem:[%s11097_s0 + $0x18] sm:$0xff]  ;;  %v34_v24 = vld [vmem:[%s11097_s0 + $0x20] sm:$0xff]  ;;  %v35_v25 = vld [vmem:[%s11097_s0 + $0x28] sm:$0xff] }
   0x7   :  { %v36_v26 = vld [vmem:[%s11097_s0 + $0x30] sm:$0xff]  ;;  %v37_v27 = vld [vmem:[%s11097_s0 + $0x38] sm:$0xff]  ;;  %v38_v28 = vld [vmem:[%s11097_s0 + $0x40] sm:$0xff] }
   0x8   :  { %7452 = vmatmul.mubr.msk.f32.vlgmr.msra.gmra.mrb[0].mxu0 %vm58_vm1, %v30_v13  ;;  %v39_v29 = vld [vmem:[%s11097_s0 + $0x48] sm:$0xff]  ;;  %v40_v30 = vld [vmem:[%s11097_s0 + $0x50] sm:$0xff]  ;;  %v41_v31 = vld [vmem:[%s11097_s0 + $0x58] sm:$0xff] }
   0x9   :  { %8673 = vmatpush3.bf16.msra.mxu1 %v9696_v14  ;;  %177 = vmatprep.mubr.f32.mxu0 %v9618_v4  ;;  %v42_v32 = vld [vmem:[%s11097_s0 + $0x60] sm:$0xff]  ;;  %v43_v33 = vld [vmem:[%s11097_s0 + $0x68] sm:$0xff]  ;;  %v44_v34 = vld [vmem:[%s11097_s0 + $0x70] sm:$0xff] }
   0xa   :  { %8674 = vmatprep.subr.bf16.mxu1 %v9617_v0  ;;  %8718 = vmatpush3.bf16.msra.mxu0 %v9684_v9  ;;  %v45_v35 = vld [vmem:[%s11097_s0 + $0x78] sm:$0xff]  ;;  %v46_v39 = vld [vmem:[%s11098_s3] sm:$0x3]  ;;  %s9620_s0 = smov 32   ;;  %s9621_s3 = smov 64  }
   0xb   :  { %8719 = vmatprep.subr.bf16.mxu0 %v9617_v0  ;;  %v9823_v41 = vrot.slane %v46_v39, %v50_v38  ;;  %v9827_v42 = vrot.slane %v46_v39, %v54_v40 }
   0xc   :  { %7969 = vmatmul.mubr.f32.vlgmr.msra.gmra.mrb[0].mxu1 %v9618_v4  ;;  %7453 = vmatmul.mubr.msk.f32.gmra.mrb[2].mxu0 %vm58_vm1, %v31_v17 }
   0xd   :  { %183 = vmatprep.mubr.f32.mxu0 %v9618_v4  ;;  %8676 = vmatpush3.bf16.msra.mxu1 %v9712_v18 }
   0xe   :  { %8677 = vmatprep.subr.bf16.mxu1 %v9617_v0  ;;  %7979 = vmatprep.mubr.msk.f32.mxu1 %vm9619_vm0, %v9618_v4 }
   0xf   :  { %8721 = vmatpush3.bf16.msra.mxu0 %v9696_v14 }
  0x10   :  { %7454 = vmatmul.mubr.msk.f32.gmra.mrb[4].mxu0 %vm58_vm1, %v32_v21  ;;  %8728 = vmatprep.subr.bf16.mxu0 %v9617_v0 }
  0x11   :  { %189 = vmatprep.mubr.f32.mxu0 %v9618_v4  ;;  %8679 = vmatpush3.bf16.msra.mxu1 %v9730_v22 }
  0x12   :  { %8680 = vmatprep.subr.bf16.mxu1 %v9617_v0 }
  0x14   :  { %7455 = vmatmul.mubr.msk.f32.gmra.mrb[6].mxu0 %vm58_vm1, %v33_v23  ;;  %7980 = vmatmul.mubr.f32.vlgmr.msra.gmra.mrb[2].mxu1 %v9618_v4 }
  0x15   :  { %195 = vmatprep.mubr.f32.mxu0 %v9618_v4  ;;  %8682 = vmatpush3.bf16.msra.mxu1 %v9684_v9 }
  0x16   :  { %8683 = vmatprep.subr.bf16.mxu1 %v9617_v0  ;;  %7990 = vmatprep.mubr.msk.f32.mxu1 %vm9619_vm0, %v9618_v4 }
  0x18   :  { %7456 = vmatmul.mubr.msk.f32.gmra.mrb[8].mxu0 %vm58_vm1, %v34_v24 }
  0x19   :  { %201 = vmatprep.mubr.f32.mxu0 %v9618_v4  ;;  %8685 = vmatpush3.bf16.msra.mxu1 %v9696_v14 }
  0x1a   :  { %8686 = vmatprep.subr.bf16.mxu1 %v9617_v0 }
  0x1c   :  { %7457 = vmatmul.mubr.msk.f32.gmra.mrb[10].mxu0 %vm58_vm1, %v35_v25 }
  0x1d   :  { %207 = vmatprep.mubr.f32.mxu0 %v9618_v4 }
  0x20   :  { %7458 = vmatmul.mubr.msk.f32.gmra.mrb[12].mxu0 %vm58_vm1, %v36_v26 }
  0x21   :  { %213 = vmatprep.mubr.f32.mxu0 %v9618_v4 }
  0x24   :  { %7459 = vmatmul.mubr.msk.f32.gmra.mrb[14].mxu0 %vm58_vm1, %v37_v27 }
  0x25   :  { %219 = vmatprep.mubr.f32.mxu0 %v9618_v4 }
  0x28   :  { %7460 = vmatmul.mubr.msk.f32.gmra.mrb[16].mxu0 %vm58_vm1, %v38_v28 }
  0x29   :  { %225 = vmatprep.mubr.f32.mxu0 %v9618_v4 }
  0x2c   :  { %7461 = vmatmul.mubr.msk.f32.gmra.mrb[18].mxu0 %vm58_vm1, %v39_v29 }
  0x2d   :  { %231 = vmatprep.mubr.f32.mxu0 %v9618_v4 }
  0x30   :  { %7462 = vmatmul.mubr.msk.f32.gmra.mrb[20].mxu0 %vm58_vm1, %v40_v30 }
  0x31   :  { %237 = vmatprep.mubr.f32.mxu0 %v9618_v4 }
  0x34   :  { %7463 = vmatmul.mubr.msk.f32.gmra.mrb[22].mxu0 %vm58_vm1, %v41_v31 }
  0x35   :  { %243 = vmatprep.mubr.f32.mxu0 %v9618_v4 }
  0x38   :  { %7464 = vmatmul.mubr.msk.f32.gmra.mrb[24].mxu0 %vm58_vm1, %v42_v32 }
  0x39   :  { %249 = vmatprep.mubr.f32.mxu0 %v9618_v4 }
  0x3c   :  { %7465 = vmatmul.mubr.msk.f32.gmra.mrb[26].mxu0 %vm58_vm1, %v43_v33 }
  0x3d   :  { %255 = vmatprep.mubr.f32.mxu0 %v9618_v4 }
  0x40   :  { %7466 = vmatmul.mubr.msk.f32.gmra.mrb[28].mxu0 %vm58_vm1, %v44_v34 }
  0x41   :  { %261 = vmatprep.mubr.f32.mxu0 %v9618_v4 }
  0x44   :  { %7467 = vmatmul.mubr.msk.f32.gmra.mrb[30].mxu0 %vm58_vm1, %v45_v35 }
  0x45   :  { %8056 = vmatprep.mubr.msk.f32.mxu0 %vm9619_vm0, %v9618_v4 }
  0xdb   :  { %v173_v43 = vpop.f32.mrb[0].mxu0 }
  0xdc   :  { %v174_v44 = vadd.f32 %v173_v43, %v9823_v41  ;;  %v175_v45 = vpop.f32.mrb[1].mxu0 }
  0xdd   :  { %v9831_v46 = vadd.f32 %v175_v45, %v9827_v42 }
  0xdf   :  { %v379_v47 = vpop.f32.mrb[0].mxu1  ;;  %v179_v48 = vpop.f32.mrb[2].mxu0 }
  0xe0   :  { %v9833_v49 = vadd.f32 %v379_v47, %v174_v44  ;;  %v9836_v50 = vadd.f32 %v179_v48, %v9823_v41  ;;  %v181_v51 = vpop.f32.mrb[3].mxu0  ;;  %v7970_v52 = vpop.f32.mrb[1].mxu1 }
  0xe1   :  { %v9839_v53 = vadd.f32 %v181_v51, %v9827_v42 }
  0xe2   :  { %9105 = vtanh.f32 %v9833_v49 }
  0xe3   :  { %v185_v54 = vpop.f32.mrb[4].mxu0 }
  0xe4   :  { %v9843_v55 = vadd.f32 %v185_v54, %v9823_v41  ;;  %v187_v56 = vpop.f32.mrb[5].mxu0 }
  0xe5   :  { %v9846_v57 = vadd.f32 %v187_v56, %v9827_v42 }
  0xe7   :  { %v191_v58 = vpop.f32.mrb[6].mxu0  ;;  %v480_v59 = vpop.f32.mrb[2].mxu1 }
  0xe8   :  { %v9849_v60 = vadd.f32 %v191_v58, %v9823_v41  ;;  %v193_v61 = vpop.f32.mrb[7].mxu0  ;;  %v7981_v62 = vpop.f32.mrb[3].mxu1 }
  0xe9   :  { %v9852_v63 = vadd.f32 %v193_v61, %v9827_v42 }
  0xeb   :  { %v197_v1 = vpop.f32.mrb[8].mxu0 }
  0xec   :  { %v9106_v2 = vpop.eup %9105  ;;  %v9855_v3 = vadd.f32 %v197_v1, %v9823_v41  ;;  %v199_v5 = vpop.f32.mrb[9].mxu0 }
  0xed   :  { %v9858_v6 = vadd.f32 %v199_v5, %v9827_v42  ;;  %393 = vrot.lane.b32.xlu0 %v9106_v2, %s9620_s0 }
  0xef   :  { %v203_v7 = vpop.f32.mrb[10].mxu0 }
  0xf0   :  { %v9862_v8 = vadd.f32 %v203_v7, %v9823_v41  ;;  %v205_v10 = vpop.f32.mrb[11].mxu0 }
  0xf1   :  { %v9865_v11 = vadd.f32 %v205_v10, %v9827_v42 }
  0xf3   :  { %v209_v12 = vpop.f32.mrb[12].mxu0 }
  0xf4   :  { %v9868_v13 = vadd.f32 %v209_v12, %v9823_v41  ;;  %v211_v15 = vpop.f32.mrb[13].mxu0 }
  0xf5   :  { %v9871_v16 = vadd.f32 %v211_v15, %v9827_v42 }
  0xf7   :  { %v215_v17 = vpop.f32.mrb[14].mxu0 }
  0xf8   :  { %v9874_v19 = vadd.f32 %v215_v17, %v9823_v41  ;;  %v217_v20 = vpop.f32.mrb[15].mxu0  ;;  %v7468_v17 = vmul.f32 -1.442695, %v9833_v49 }
  0xf9   :  { %v9877_v21 = vadd.f32 %v217_v20, %v9827_v42 }
  0xfb   :  { %v221_v23 = vpop.f32.mrb[16].mxu0 }
  0xfc   :  { %v9880_v24 = vadd.f32 %v221_v23, %v9823_v41  ;;  %v223_v25 = vpop.f32.mrb[17].mxu0 }
  0xfd   :  { %v9883_v26 = vadd.f32 %v223_v25, %v9827_v42 }
  0xff   :  { %v227_v27 = vpop.f32.mrb[18].mxu0 }
 0x100   :  { %v9886_v28 = vadd.f32 %v227_v27, %v9823_v41  ;;  %v229_v29 = vpop.f32.mrb[19].mxu0 }
 0x101   :  { %v9889_v30 = vadd.f32 %v229_v29, %v9827_v42 }
 0x103   :  { %v233_v31 = vpop.f32.mrb[20].mxu0 }
 0x104   :  { %v9892_v32 = vadd.f32 %v233_v31, %v9823_v41  ;;  %v235_v33 = vpop.f32.mrb[21].mxu0 }
 0x105   :  { %v9895_v34 = vadd.f32 %v235_v33, %v9827_v42 }
 0x107   :  { %v239_v35 = vpop.f32.mrb[22].mxu0 }
 0x108   :  { %v9898_v36 = vadd.f32 %v239_v35, %v9823_v41  ;;  %v241_v39 = vpop.f32.mrb[23].mxu0 }
 0x109   :  { %v9901_v43 = vadd.f32 %v241_v39, %v9827_v42 }
 0x10b   :  { %v245_v44 = vpop.f32.mrb[24].mxu0 }
 0x10c   :  { %v9904_v45 = vadd.f32 %v245_v44, %v9823_v41  ;;  %v247_v47 = vpop.f32.mrb[25].mxu0 }
 0x10d   :  { %v9907_v48 = vadd.f32 %v247_v47, %v9827_v42 }
 0x10f   :  { %v251_v51 = vpop.f32.mrb[26].mxu0 }
 0x110   :  { %v9910_v52 = vadd.f32 %v251_v51, %v9823_v41  ;;  %v253_v54 = vpop.f32.mrb[27].mxu0 }
 0x111   :  { %v9913_v56 = vadd.f32 %v253_v54, %v9827_v42 }
 0x113   :  { %v257_v58 = vpop.f32.mrb[28].mxu0 }
 0x114   :  { %v9916_v61 = vadd.f32 %v257_v58, %v9823_v41  ;;  %v259_v62 = vpop.f32.mrb[29].mxu0 }
 0x115   :  { %v9919_v1 = vadd.f32 %v259_v62, %v9827_v42 }
 0x117   :  { %v263_v2 = vpop.f32.mrb[30].mxu0 }
 0x118   :  { %v9922_v5 = vadd.f32 %v263_v2, %v9823_v41  ;;  %v265_v7 = vpop.f32.mrb[31].mxu0 }
 0x119   :  { %v266_v10 = vadd.f32 %v265_v7, %v9827_v42 }
 0x11b   :  { %v484_v12 = vadd.f32 %v480_v59, %v266_v10 }
 0x11d   :  { %9107 = vtanh.f32 %v484_v12  ;;  %v7469_v41 = vmul.f32 -1.442695, %v484_v12 }
 0x11e   :  { %9109 = vpow2.f32 %v7468_v17 }
 0x127   :  { %v9108_v15 = vpop.eup %9107 }
 0x128   :  { %494 = vrot.lane.b32.xlu0 %v9108_v15, %s9620_s0  ;;  %v9110_v20 = vpop.eup %9109 }
 0x129   :  { %v387_v23 = vadd.f32 1.0, %v9110_v20 }
 0x12b   :  { %9111 = vrcp.f32 %v387_v23 }
 0x12c   :  { %9113 = vpow2.f32 %v7469_v41 }
 0x135   :  { %v9112_v25 = vpop.eup %9111 }
 0x136   :  { %v9114_v31 = vpop.eup %9113  ;;  %v391_v49 = vmul.f32 0.0, %v9112_v25 }
 0x137   :  { %v488_v42 = vadd.f32 1.0, %v9114_v31 }
 0x139   :  { %9115 = vrcp.f32 %v488_v42 }
 0x143   :  { %v9116_v59 = vpop.eup %9115 }
 0x144   :  { %v492_v51 = vmul.f32 0.0, %v9116_v59 }
 0x15f   :  { %v394_v27 = vpop.permute.xlu0 %393 }
 0x160   :  { %v396_v29 = vmul.f32 %v9112_v25, %v394_v27 }
 0x162   :  { %398 = vrot.lane.b32.xlu1 %v396_v29, %s9620_s0 }
 0x19a   :  { %v495_v33 = vpop.permute.xlu0 %494 }
 0x19b   :  { %v497_v35 = vmul.f32 %v9116_v59, %v495_v33 }
 0x19d   :  { %499 = vrot.lane.b32.xlu1 %v497_v35, %s9620_s0 }
 0x1d4   :  { %v399_v39 = vpop.permute.xlu1 %398 }
 0x1d5   :  { %v9929_v44 = vadd.f32 %v399_v39, %v391_v49 }
 0x1d7   :  { %9117 = vtanh.f32 %v9929_v44 }
 0x1e1   :  { %v9118_v47 = vpop.eup %9117 }
 0x1e2   :  { %404 = vrot.lane.b32.xlu0 %v9118_v47, %s9620_s0 }
 0x20f   :  { %v500_v54 = vpop.permute.xlu1 %499 }
 0x210   :  { %v9933_v58 = vadd.f32 %v500_v54, %v492_v51 }
 0x212   :  { %9119 = vtanh.f32 %v9933_v58 }
 0x21c   :  { %v9120_v62 = vpop.eup %9119 }
 0x21d   :  { %505 = vrot.lane.b32.xlu1 %v9120_v62, %s9620_s0 }
 0x254   :  { %v405_v2 = vpop.permute.xlu0 %404 }
 0x255   :  { %v407_v7 = vmul.f32 %v9112_v25, %v405_v2 }
 0x257   :  { %409 = vrot.lane.b32.xlu0 %v407_v7, %s9621_s3 }
 0x28f   :  { %v506_v10 = vpop.permute.xlu1 %505 }
 0x290   :  { %v508_v12 = vmul.f32 %v9116_v59, %v506_v10 }
 0x292   :  { %510 = vrot.lane.b32.xlu1 %v508_v12, %s9621_s3 }
 0x2c9   :  { %v410_v15 = vpop.permute.xlu0 %409 }
 0x2ca   :  { %412 = vst.msk [vmem:[#allocation3] sm:$0xff] %vm309_vm2, %v410_v15  ;;  %7991 = vmatmul.mubr.msk.f32.vlgmr.msra.gmra.mrb[4].mxu1 %vm309_vm2, %v410_v15 }
 0x2cb   :  { %8688 = vmatpush3.bf16.msra.mxu1 %v9712_v18  ;;  %8001 = vmatprep.mubr.msk.f32.mxu1 %vm9619_vm0, %v9618_v4 }
 0x2cc   :  { %8689 = vmatprep.subr.bf16.mxu1 %v9617_v0 }
 0x2cf   :  { %8691 = vmatpush3.bf16.msra.mxu1 %v9730_v22 }
 0x2d0   :  { %8692 = vmatprep.subr.bf16.mxu1 %v9617_v0 }
 0x304   :  { %v511_v17 = vpop.permute.xlu1 %510 }
 0x305   :  { %514 = vst.msk [vmem:[#allocation3 + $0xf8] sm:$0xff] %vm309_vm2, %v511_v17  ;;  %8002 = vmatmul.mubr.msk.f32.vlgmr.msra.gmra.mrb[6].mxu1 %vm309_vm2, %v511_v17 }
 0x306   :  { %8694 = vmatpush3.bf16.msra.mxu1 %v9684_v9  ;;  %8012 = vmatprep.mubr.msk.f32.mxu1 %vm9619_vm0, %v9618_v4 }
 0x307   :  { %8695 = vmatprep.subr.bf16.mxu1 %v9617_v0 }
 0x30a   :  { %8697 = vmatpush3.bf16.msra.mxu1 %v9696_v14 }
 0x30b   :  { %8698 = vmatprep.subr.bf16.mxu1 %v9617_v0 }
 0x39d   :  { %v584_v20 = vpop.f32.mrb[4].mxu1 }
 0x39e   :  { %v588_v23 = vadd.f32 %v584_v20, %v9836_v50  ;;  %v7992_v25 = vpop.f32.mrb[5].mxu1 }
 0x3a0   :  { %9121 = vtanh.f32 %v588_v23  ;;  %v7471_v59 = vmul.f32 -1.442695, %v588_v23 }
 0x3aa   :  { %v9122_v27 = vpop.eup %9121 }
 0x3ab   :  { %598 = vrot.lane.b32.xlu0 %v9122_v27, %s9620_s0 }
 0x3d8   :  { %v687_v29 = vpop.f32.mrb[6].mxu1 }
 0x3d9   :  { %v691_v41 = vadd.f32 %v687_v29, %v9919_v1  ;;  %v8003_v31 = vpop.f32.mrb[7].mxu1 }
 0x3db   :  { %9123 = vtanh.f32 %v691_v41  ;;  %v7473_v47 = vmul.f32 -1.442695, %v691_v41 }
 0x3dc   :  { %9125 = vpow2.f32 %v7471_v59 }
 0x3e5   :  { %v9124_v42 = vpop.eup %9123 }
 0x3e6   :  { %701 = vrot.lane.b32.xlu1 %v9124_v42, %s9620_s0  ;;  %v9126_v33 = vpop.eup %9125 }
 0x3e7   :  { %v592_v35 = vadd.f32 1.0, %v9126_v33 }
 0x3e9   :  { %9127 = vrcp.f32 %v592_v35 }
 0x3ea   :  { %9129 = vpow2.f32 %v7473_v47 }
 0x3f3   :  { %v9128_v49 = vpop.eup %9127 }
 0x3f4   :  { %v9130_v51 = vpop.eup %9129  ;;  %v596_v7 = vmul.f32 %v9128_v49, %v9929_v44 }
 0x3f5   :  { %v695_v54 = vadd.f32 1.0, %v9130_v51 }
 0x3f7   :  { %9131 = vrcp.f32 %v695_v54 }
 0x401   :  { %v9132_v1 = vpop.eup %9131 }
 0x402   :  { %v699_v17 = vmul.f32 %v9132_v1, %v9933_v58 }
 0x41d   :  { %v599_v50 = vpop.permute.xlu0 %598 }
 0x41e   :  { %v601_v39 = vmul.f32 %v9128_v49, %v599_v50 }
 0x420   :  { %603 = vrot.lane.b32.xlu0 %v601_v39, %s9620_s0 }
 0x458   :  { %v702_v62 = vpop.permute.xlu1 %701 }
 0x459   :  { %v704_v2 = vmul.f32 %v9132_v1, %v702_v62 }
 0x45b   :  { %706 = vrot.lane.b32.xlu1 %v704_v2, %s9620_s0 }
 0x492   :  { %v604_v10 = vpop.permute.xlu0 %603 }
 0x493   :  { %v606_v12 = vadd.f32 %v604_v10, %v596_v7 }
 0x495   :  { %9133 = vtanh.f32 %v606_v12 }
 0x49f   :  { %v9134_v15 = vpop.eup %9133 }
 0x4a0   :  { %609 = vrot.lane.b32.xlu0 %v9134_v15, %s9620_s0 }
 0x4cd   :  { %v707_v20 = vpop.permute.xlu1 %706 }
 0x4ce   :  { %v709_v23 = vadd.f32 %v707_v20, %v699_v17 }
 0x4d0   :  { %9135 = vtanh.f32 %v709_v23 }
 0x4da   :  { %v9136_v25 = vpop.eup %9135 }
 0x4db   :  { %712 = vrot.lane.b32.xlu1 %v9136_v25, %s9620_s0 }
 0x512   :  { %v610_v27 = vpop.permute.xlu0 %609 }
 0x513   :  { %v612_v29 = vmul.f32 %v9128_v49, %v610_v27 }
 0x515   :  { %614 = vrot.lane.b32.xlu0 %v612_v29, %s9621_s3 }
 0x54d   :  { %v713_v41 = vpop.permute.xlu1 %712 }
 0x54e   :  { %v715_v44 = vmul.f32 %v9132_v1, %v713_v41 }
 0x550   :  { %717 = vrot.lane.b32.xlu1 %v715_v44, %s9621_s3 }
 0x587   :  { %v615_v31 = vpop.permute.xlu0 %614 }
 0x588   :  { %617 = vst.msk [vmem:[#allocation3 + $0x8] sm:$0xff] %vm309_vm2, %v615_v31  ;;  %8013 = vmatmul.mubr.msk.f32.vlgmr.msra.gmra.mrb[8].mxu1 %vm309_vm2, %v615_v31 }
 0x589   :  { %8700 = vmatpush3.bf16.msra.mxu1 %v9712_v18  ;;  %8023 = vmatprep.mubr.msk.f32.mxu1 %vm9619_vm0, %v9618_v4 }
 0x58a   :  { %8701 = vmatprep.subr.bf16.mxu1 %v9617_v0 }
 0x58d   :  { %8703 = vmatpush3.bf16.msra.mxu1 %v9730_v22 }
 0x58e   :  { %8704 = vmatprep.subr.bf16.mxu1 %v9617_v0 }
 0x5c2   :  { %v718_v58 = vpop.permute.xlu1 %717 }
 0x5c3   :  { %720 = vst.msk [vmem:[#allocation3 + $0xf0] sm:$0xff] %vm309_vm2, %v718_v58  ;;  %8024 = vmatmul.mubr.msk.f32.vlgmr.msra.gmra.mrb[10].mxu1 %vm309_vm2, %v718_v58 }
 0x5c4   :  { %8706 = vmatpush3.bf16.msra.mxu1 %v9684_v9  ;;  %8034 = vmatprep.mubr.msk.f32.mxu1 %vm9619_vm0, %v9618_v4 }
 0x5c5   :  { %8707 = vmatprep.subr.bf16.mxu1 %v9617_v0 }
 0x5c8   :  { %8709 = vmatpush3.bf16.msra.mxu1 %v9696_v14 }
 0x5c9   :  { %8710 = vmatprep.subr.bf16.mxu1 %v9617_v0 }
 0x65b   :  { %v790_v42 = vpop.f32.mrb[8].mxu1 }
 0x65c   :  { %v794_v59 = vadd.f32 %v790_v42, %v9843_v55  ;;  %v8014_v33 = vpop.f32.mrb[9].mxu1 }
 0x65e   :  { %9137 = vtanh.f32 %v794_v59  ;;  %v7475_v51 = vmul.f32 -1.442695, %v794_v59 }
 0x668   :  { %v9138_v35 = vpop.eup %9137 }
 0x669   :  { %804 = vrot.lane.b32.xlu0 %v9138_v35, %s9620_s0 }
 0x696   :  { %v893_v49 = vpop.f32.mrb[10].mxu1 }
 0x697   :  { %v897_v50 = vadd.f32 %v893_v49, %v9913_v56  ;;  %v8025_v39 = vpop.f32.mrb[11].mxu1 }
 0x699   :  { %9139 = vtanh.f32 %v897_v50  ;;  %v7477_v7 = vmul.f32 -1.442695, %v897_v50 }
 0x69a   :  { %9141 = vpow2.f32 %v7475_v51 }
 0x6a3   :  { %v9140_v47 = vpop.eup %9139 }
 0x6a4   :  { %907 = vrot.lane.b32.xlu1 %v9140_v47, %s9620_s0  ;;  %v9142_v54 = vpop.eup %9141 }
 0x6a5   :  { %v798_v1 = vadd.f32 1.0, %v9142_v54 }
 0x6a7   :  { %9143 = vrcp.f32 %v798_v1 }
 0x6a8   :  { %9145 = vpow2.f32 %v7477_v7 }
 0x6b1   :  { %v9144_v62 = vpop.eup %9143 }
 0x6b2   :  { %v9146_v10 = vpop.eup %9145  ;;  %v802_v25 = vmul.f32 %v9144_v62, %v606_v12 }
 0x6b3   :  { %v901_v15 = vadd.f32 1.0, %v9146_v10 }
 0x6b5   :  { %9147 = vrcp.f32 %v901_v15 }
 0x6bf   :  { %v9148_v56 = vpop.eup %9147 }
 0x6c0   :  { %v905_v44 = vmul.f32 %v9148_v56, %v709_v23 }
 0x6db   :  { %v805_v55 = vpop.permute.xlu0 %804 }
 0x6dc   :  { %v807_v2 = vmul.f32 %v9144_v62, %v805_v55 }
 0x6de   :  { %809 = vrot.lane.b32.xlu0 %v807_v2, %s9620_s0 }
 0x716   :  { %v908_v17 = vpop.permute.xlu1 %907 }
 0x717   :  { %v910_v20 = vmul.f32 %v9148_v56, %v908_v17 }
 0x719   :  { %912 = vrot.lane.b32.xlu1 %v910_v20, %s9620_s0 }
 0x750   :  { %v810_v27 = vpop.permute.xlu0 %809 }
 0x751   :  { %v9989_v29 = vadd.f32 %v810_v27, %v802_v25 }
 0x753   :  { %9149 = vtanh.f32 %v9989_v29 }
 0x75d   :  { %v9150_v41 = vpop.eup %9149 }
 0x75e   :  { %815 = vrot.lane.b32.xlu0 %v9150_v41, %s9620_s0 }
 0x78b   :  { %v913_v31 = vpop.permute.xlu1 %912 }
 0x78c   :  { %v915_v58 = vadd.f32 %v913_v31, %v905_v44 }
 0x78e   :  { %9151 = vtanh.f32 %v915_v58 }
 0x798   :  { %v9152_v42 = vpop.eup %9151 }
 0x799   :  { %918 = vrot.lane.b32.xlu1 %v9152_v42, %s9620_s0 }
 0x7d0   :  { %v816_v59 = vpop.permute.xlu0 %815 }
 0x7d1   :  { %v818_v33 = vmul.f32 %v9144_v62, %v816_v59 }
 0x7d3   :  { %820 = vrot.lane.b32.xlu0 %v818_v33, %s9621_s3 }
 0x80b   :  { %v919_v12 = vpop.permute.xlu1 %918 }
 0x80c   :  { %v921_v35 = vmul.f32 %v9148_v56, %v919_v12 }
 0x80e   :  { %923 = vrot.lane.b32.xlu1 %v921_v35, %s9621_s3 }
 0x845   :  { %v821_v49 = vpop.permute.xlu0 %820 }
 0x846   :  { %823 = vst.msk [vmem:[#allocation3 + $0x10] sm:$0xff] %vm309_vm2, %v821_v49  ;;  %8035 = vmatmul.mubr.msk.f32.vlgmr.msra.gmra.mrb[12].mxu1 %vm309_vm2, %v821_v49 }
 0x847   :  { %8712 = vmatpush3.bf16.msra.mxu1 %v9712_v18  ;;  %8045 = vmatprep.mubr.msk.f32.mxu1 %vm9619_vm0, %v9618_v4 }
 0x848   :  { %8713 = vmatprep.subr.bf16.mxu1 %v9617_v0 }
 0x84b   :  { %8715 = vmatpush3.bf16.msra.mxu1 %v9730_v22 }
 0x84c   :  { %8722 = vmatprep.subr.bf16.mxu1 %v9617_v0 }
 0x880   :  { %v924_v23 = vpop.permute.xlu1 %923 }
 0x881   :  { %926 = vst.msk [vmem:[#allocation3 + $0xe8] sm:$0xff] %vm309_vm2, %v924_v23  ;;  %8046 = vmatmul.mubr.msk.f32.vlgmr.msra.gmra.mrb[14].mxu1 %vm309_vm2, %v924_v23 }
 0x882   :  { %8724 = vmatpush3.bf16.msra.mxu1 %v9712_v18  ;;  %8067 = vmatprep.mubr.msk.f32.mxu1 %vm9619_vm0, %v9618_v4 }
 0x883   :  { %8725 = vmatprep.subr.bf16.mxu1 %v9617_v0 }
 0x886   :  { %8727 = vmatpush3.bf16.msra.mxu1 %v9730_v22 }
 0x887   :  { %8734 = vmatprep.subr.bf16.mxu1 %v9617_v0 }
 0x919   :  { %v996_v50 = vpop.f32.mrb[12].mxu1 }
 0x91a   :  { %v1000_v39 = vadd.f32 %v996_v50, %v9849_v60  ;;  %v8036_v47 = vpop.f32.mrb[13].mxu1 }
 0x91c   :  { %v7479_v7 = vmul.f32 -1.442695, %v1000_v39 }
 0x954   :  { %v1099_v51 = vpop.f32.mrb[14].mxu1 }
 0x955   :  { %v1103_v54 = vadd.f32 %v1099_v51, %v9907_v48  ;;  %v8047_v1 = vpop.f32.mrb[15].mxu1 }
 0x957   :  { %9153 = vtanh.f32 %v1103_v54  ;;  %v7481_v2 = vmul.f32 -1.442695, %v1103_v54 }
 0x958   :  { %9155 = vtanh.f32 %v1000_v39 }
 0x959   :  { %9157 = vpow2.f32 %v7481_v2 }
 0x95a   :  { %9159 = vpow2.f32 %v7479_v7 }
 0x961   :  { %v9154_v62 = vpop.eup %9153 }
 0x962   :  { %1113 = vrot.lane.b32.xlu0 %v9154_v62, %s9620_s0  ;;  %v9156_v55 = vpop.eup %9155 }
 0x963   :  { %v9158_v10 = vpop.eup %9157 }
 0x964   :  { %v1107_v15 = vadd.f32 1.0, %v9158_v10  ;;  %v9160_v60 = vpop.eup %9159 }
 0x965   :  { %v1004_v56 = vadd.f32 1.0, %v9160_v60 }
 0x966   :  { %1010 = vrot.lane.b32.xlu0 %v9156_v55, %s9620_s0  ;;  %9161 = vrcp.f32 %v1107_v15 }
 0x967   :  { %9163 = vrcp.f32 %v1004_v56 }
 0x970   :  { %v9162_v48 = vpop.eup %9161 }
 0x971   :  { %v9164_v25 = vpop.eup %9163  ;;  %v1111_v44 = vmul.f32 %v9162_v48, %v915_v58 }
 0x972   :  { %v1008_v59 = vmul.f32 %v9164_v25, %v9989_v29 }
 0x9d4   :  { %v1114_v17 = vpop.permute.xlu0 %1113 }
 0x9d5   :  { %v1116_v20 = vmul.f32 %v9162_v48, %v1114_v17 }
 0x9d7   :  { %1118 = vrot.lane.b32.xlu1 %v1116_v20, %s9620_s0 }
 0x9d8   :  { %v1011_v27 = vpop.permute.xlu0 %1010 }
 0x9d9   :  { %v1013_v41 = vmul.f32 %v9164_v25, %v1011_v27 }
 0x9db   :  { %1015 = vrot.lane.b32.xlu0 %v1013_v41, %s9620_s0 }
 0xa49   :  { %v1119_v31 = vpop.permute.xlu1 %1118 }
 0xa4a   :  { %v1121_v42 = vadd.f32 %v1119_v31, %v1111_v44 }
 0xa4c   :  { %9165 = vtanh.f32 %v1121_v42 }
 0xa4d   :  { %v1016_v33 = vpop.permute.xlu0 %1015 }
 0xa4e   :  { %v1018_v12 = vadd.f32 %v1016_v33, %v1008_v59 }
 0xa50   :  { %9167 = vtanh.f32 %v1018_v12 }
 0xa56   :  { %v9166_v35 = vpop.eup %9165 }
 0xa57   :  { %1124 = vrot.lane.b32.xlu1 %v9166_v35, %s9620_s0 }
 0xa5a   :  { %v9168_v49 = vpop.eup %9167 }
 0xa5b   :  { %1021 = vrot.lane.b32.xlu0 %v9168_v49, %s9620_s0 }
 0xac9   :  { %v1125_v23 = vpop.permute.xlu1 %1124 }
 0xaca   :  { %v1127_v50 = vmul.f32 %v9162_v48, %v1125_v23 }
 0xacc   :  { %1129 = vrot.lane.b32.xlu1 %v1127_v50, %s9621_s3 }
 0xacd   :  { %v1022_v39 = vpop.permute.xlu0 %1021 }
 0xace   :  { %v1024_v58 = vmul.f32 %v9164_v25, %v1022_v39 }
 0xad0   :  { %1026 = vrot.lane.b32.xlu1 %v1024_v58, %s9621_s3 }
 0xb3e   :  { %v1130_v47 = vpop.permute.xlu1 %1129 }
 0xb3f   :  { %1132 = vst.msk [vmem:[#allocation3 + $0xe0] sm:$0xff] %vm309_vm2, %v1130_v47  ;;  %8068 = vmatmul.mubr.msk.f32.vlgmr.msra.gmra.mrb[16].mxu1 %vm309_vm2, %v1130_v47 }
 0xb40   :  { %8736 = vmatpush3.bf16.msra.mxu1 %v9712_v18  ;;  %8089 = vmatprep.mubr.msk.f32.mxu1 %vm9619_vm0, %v9618_v4 }
 0xb41   :  { %8737 = vmatprep.subr.bf16.mxu1 %v9617_v0 }
 0xb42   :  { %v1027_v29 = vpop.permute.xlu1 %1026 }
 0xb43   :  { %1029 = vst.msk [vmem:[#allocation3 + $0x18] sm:$0xff] %vm309_vm2, %v1027_v29  ;;  %8057 = vmatmul.mubr.msk.f32.vlgmr.msra.gmra.mrb[32].mxu0 %vm309_vm2, %v1027_v29 }
 0xb44   :  { %8730 = vmatpush3.bf16.msra.mxu0 %v9684_v9  ;;  %8739 = vmatpush3.bf16.msra.mxu1 %v9730_v22 }
 0xb45   :  { %8731 = vmatprep.subr.bf16.mxu0 %v9617_v0  ;;  %8078 = vmatprep.mubr.msk.f32.mxu0 %vm9619_vm0, %v9618_v4 }
 0xb46   :  { %8746 = vmatprep.subr.bf16.mxu1 %v9617_v0 }
 0xb48   :  { %8733 = vmatpush3.bf16.msra.mxu0 %v9696_v14 }
 0xb49   :  { %8740 = vmatprep.subr.bf16.mxu0 %v9617_v0 }
 0xc12   :  { %v1305_v51 = vpop.f32.mrb[16].mxu1 }
 0xc13   :  { %v1309_v54 = vadd.f32 %v1305_v51, %v9901_v43  ;;  %v8069_v1 = vpop.f32.mrb[17].mxu1 }
 0xc15   :  { %9169 = vtanh.f32 %v1309_v54  ;;  %v7485_v15 = vmul.f32 -1.442695, %v1309_v54 }
 0xc16   :  { %v1202_v62 = vpop.f32.mrb[32].mxu0 }
 0xc17   :  { %v1206_v55 = vadd.f32 %v1202_v62, %v9855_v3  ;;  %v8058_v2 = vpop.f32.mrb[33].mxu0 }
 0xc19   :  { %9171 = vtanh.f32 %v1206_v55  ;;  %v7483_v60 = vmul.f32 -1.442695, %v1206_v55 }
 0xc1a   :  { %9173 = vpow2.f32 %v7485_v15 }
 0xc1b   :  { %9175 = vpow2.f32 %v7483_v60 }
 0xc1f   :  { %v9170_v7 = vpop.eup %9169 }
 0xc20   :  { %1319 = vrot.lane.b32.xlu0 %v9170_v7, %s9620_s0 }
 0xc23   :  { %v9172_v10 = vpop.eup %9171 }
 0xc24   :  { %1216 = vrot.lane.b32.xlu0 %v9172_v10, %s9620_s0  ;;  %v9174_v56 = vpop.eup %9173 }
 0xc25   :  { %v1313_v48 = vadd.f32 1.0, %v9174_v56  ;;  %v9176_v43 = vpop.eup %9175 }
 0xc26   :  { %v1210_v17 = vadd.f32 1.0, %v9176_v43 }
 0xc27   :  { %9177 = vrcp.f32 %v1313_v48 }
 0xc28   :  { %9179 = vrcp.f32 %v1210_v17 }
 0xc31   :  { %v9178_v20 = vpop.eup %9177 }
 0xc32   :  { %v9180_v27 = vpop.eup %9179  ;;  %v1317_v31 = vmul.f32 %v9178_v20, %v1121_v42 }
 0xc33   :  { %v1214_v35 = vmul.f32 %v9180_v27, %v1018_v12 }
 0xc92   :  { %v1320_v3 = vpop.permute.xlu0 %1319 }
 0xc93   :  { %v1322_v25 = vmul.f32 %v9178_v20, %v1320_v3 }
 0xc95   :  { %1324 = vrot.lane.b32.xlu1 %v1322_v25, %s9620_s0 }
 0xc96   :  { %v1217_v41 = vpop.permute.xlu0 %1216 }
 0xc97   :  { %v1219_v44 = vmul.f32 %v9180_v27, %v1217_v41 }
 0xc99   :  { %1221 = vrot.lane.b32.xlu0 %v1219_v44, %s9620_s0 }
 0xd07   :  { %v1325_v59 = vpop.permute.xlu1 %1324 }
 0xd08   :  { %v1327_v33 = vadd.f32 %v1325_v59, %v1317_v31 }
 0xd0a   :  { %9181 = vtanh.f32 %v1327_v33 }
 0xd0b   :  { %v1222_v49 = vpop.permute.xlu0 %1221 }
 0xd0c   :  { %v1224_v23 = vadd.f32 %v1222_v49, %v1214_v35 }
 0xd0e   :  { %9183 = vtanh.f32 %v1224_v23 }
 0xd14   :  { %v9182_v50 = vpop.eup %9181 }
 0xd15   :  { %1330 = vrot.lane.b32.xlu1 %v9182_v50, %s9620_s0 }
 0xd18   :  { %v9184_v39 = vpop.eup %9183 }
 0xd19   :  { %1227 = vrot.lane.b32.xlu0 %v9184_v39, %s9620_s0 }
 0xd87   :  { %v1331_v58 = vpop.permute.xlu1 %1330 }
 0xd88   :  { %v1333_v47 = vmul.f32 %v9178_v20, %v1331_v58 }
 0xd8a   :  { %1335 = vrot.lane.b32.xlu1 %v1333_v47, %s9621_s3 }
 0xd8b   :  { %v1228_v29 = vpop.permute.xlu0 %1227 }
 0xd8c   :  { %v1230_v51 = vmul.f32 %v9180_v27, %v1228_v29 }
 0xd8e   :  { %1232 = vrot.lane.b32.xlu1 %v1230_v51, %s9621_s3 }
 0xdfc   :  { %v1336_v42 = vpop.permute.xlu1 %1335 }
 0xdfd   :  { %1338 = vst.msk [vmem:[#allocation3 + $0xd8] sm:$0xff] %vm309_vm2, %v1336_v42  ;;  %8090 = vmatmul.mubr.msk.f32.vlgmr.msra.gmra.mrb[18].mxu1 %vm309_vm2, %v1336_v42 }
 0xdfe   :  { %8748 = vmatpush3.bf16.msra.mxu1 %v9712_v18  ;;  %8111 = vmatprep.mubr.msk.f32.mxu1 %vm9619_vm0, %v9618_v4 }
 0xdff   :  { %8749 = vmatprep.subr.bf16.mxu1 %v9617_v0 }
 0xe00   :  { %v1233_v12 = vpop.permute.xlu1 %1232 }
 0xe01   :  { %1235 = vst.msk [vmem:[#allocation3 + $0x20] sm:$0xff] %vm309_vm2, %v1233_v12  ;;  %8079 = vmatmul.mubr.msk.f32.vlgmr.msra.gmra.mrb[34].mxu0 %vm309_vm2, %v1233_v12 }
 0xe02   :  { %8742 = vmatpush3.bf16.msra.mxu0 %v9684_v9  ;;  %8751 = vmatpush3.bf16.msra.mxu1 %v9730_v22 }
 0xe03   :  { %8743 = vmatprep.subr.bf16.mxu0 %v9617_v0  ;;  %8100 = vmatprep.mubr.msk.f32.mxu0 %vm9619_vm0, %v9618_v4 }
 0xe04   :  { %8758 = vmatprep.subr.bf16.mxu1 %v9617_v0 }
 0xe06   :  { %8745 = vmatpush3.bf16.msra.mxu0 %v9696_v14 }
 0xe07   :  { %8752 = vmatprep.subr.bf16.mxu0 %v9617_v0 }
 0xed0   :  { %v1511_v54 = vpop.f32.mrb[18].mxu1 }
 0xed1   :  { %v1515_v1 = vadd.f32 %v1511_v54, %v9895_v34  ;;  %v8091_v62 = vpop.f32.mrb[19].mxu1 }
 0xed3   :  { %9185 = vtanh.f32 %v1515_v1  ;;  %v7489_v60 = vmul.f32 -1.442695, %v1515_v1 }
 0xed4   :  { %v1408_v55 = vpop.f32.mrb[34].mxu0 }
 0xed5   :  { %v1412_v2 = vadd.f32 %v1408_v55, %v9862_v8  ;;  %v8080_v7 = vpop.f32.mrb[35].mxu0 }
 0xed7   :  { %9187 = vtanh.f32 %v1412_v2  ;;  %v7487_v56 = vmul.f32 -1.442695, %v1412_v2 }
 0xed8   :  { %9189 = vpow2.f32 %v7489_v60 }
 0xed9   :  { %9191 = vpow2.f32 %v7487_v56 }
 0xedd   :  { %v9186_v10 = vpop.eup %9185 }
 0xede   :  { %1525 = vrot.lane.b32.xlu0 %v9186_v10, %s9620_s0 }
 0xee1   :  { %v9188_v15 = vpop.eup %9187 }
 0xee2   :  { %1422 = vrot.lane.b32.xlu0 %v9188_v15, %s9620_s0  ;;  %v9190_v48 = vpop.eup %9189 }
 0xee3   :  { %v1519_v43 = vadd.f32 1.0, %v9190_v48  ;;  %v9192_v34 = vpop.eup %9191 }
 0xee4   :  { %v1416_v17 = vadd.f32 1.0, %v9192_v34 }
 0xee5   :  { %9193 = vrcp.f32 %v1519_v43 }
 0xee6   :  { %9195 = vrcp.f32 %v1416_v17 }
 0xeef   :  { %v9194_v20 = vpop.eup %9193 }
 0xef0   :  { %v9196_v25 = vpop.eup %9195  ;;  %v1523_v44 = vmul.f32 %v9194_v20, %v1327_v33 }
 0xef1   :  { %v1420_v35 = vmul.f32 %v9196_v25, %v1224_v23 }
 0xf50   :  { %v1526_v8 = vpop.permute.xlu0 %1525 }
 0xf51   :  { %v1528_v3 = vmul.f32 %v9194_v20, %v1526_v8 }
 0xf53   :  { %1530 = vrot.lane.b32.xlu1 %v1528_v3, %s9620_s0 }
 0xf54   :  { %v1423_v27 = vpop.permute.xlu0 %1422 }
 0xf55   :  { %v1425_v41 = vmul.f32 %v9196_v25, %v1423_v27 }
 0xf57   :  { %1427 = vrot.lane.b32.xlu0 %v1425_v41, %s9620_s0 }
 0xfc5   :  { %v1531_v31 = vpop.permute.xlu1 %1530 }
 0xfc6   :  { %v1533_v59 = vadd.f32 %v1531_v31, %v1523_v44 }
 0xfc8   :  { %9197 = vtanh.f32 %v1533_v59 }
 0xfc9   :  { %v1428_v49 = vpop.permute.xlu0 %1427 }
 0xfca   :  { %v1430_v50 = vadd.f32 %v1428_v49, %v1420_v35 }
 0xfcc   :  { %9199 = vtanh.f32 %v1430_v50 }
 0xfd2   :  { %v9198_v39 = vpop.eup %9197 }
 0xfd3   :  { %1536 = vrot.lane.b32.xlu1 %v9198_v39, %s9620_s0 }
 0xfd6   :  { %v9200_v58 = vpop.eup %9199 }
 0xfd7   :  { %1433 = vrot.lane.b32.xlu0 %v9200_v58, %s9620_s0 }
0x1045   :  { %v1537_v47 = vpop.permute.xlu1 %1536 }
0x1046   :  { %v1539_v29 = vmul.f32 %v9194_v20, %v1537_v47 }
0x1048   :  { %1541 = vrot.lane.b32.xlu1 %v1539_v29, %s9621_s3 }
0x1049   :  { %v1434_v51 = vpop.permute.xlu0 %1433 }
0x104a   :  { %v1436_v42 = vmul.f32 %v9196_v25, %v1434_v51 }
0x104c   :  { %1438 = vrot.lane.b32.xlu1 %v1436_v42, %s9621_s3 }
0x10ba   :  { %v1542_v33 = vpop.permute.xlu1 %1541 }
0x10bb   :  { %1544 = vst.msk [vmem:[#allocation3 + $0xd0] sm:$0xff] %vm309_vm2, %v1542_v33  ;;  %8112 = vmatmul.mubr.msk.f32.vlgmr.msra.gmra.mrb[20].mxu1 %vm309_vm2, %v1542_v33 }
0x10bc   :  { %8760 = vmatpush3.bf16.msra.mxu1 %v9712_v18  ;;  %8133 = vmatprep.mubr.msk.f32.mxu1 %vm9619_vm0, %v9618_v4 }
0x10bd   :  { %8761 = vmatprep.subr.bf16.mxu1 %v9617_v0 }
0x10be   :  { %v1439_v23 = vpop.permute.xlu1 %1438 }
0x10bf   :  { %1441 = vst.msk [vmem:[#allocation3 + $0x28] sm:$0xff] %vm309_vm2, %v1439_v23  ;;  %8101 = vmatmul.mubr.msk.f32.vlgmr.msra.gmra.mrb[36].mxu0 %vm309_vm2, %v1439_v23 }
0x10c0   :  { %8754 = vmatpush3.bf16.msra.mxu0 %v9684_v9  ;;  %8763 = vmatpush3.bf16.msra.mxu1 %v9730_v22 }
0x10c1   :  { %8755 = vmatprep.subr.bf16.mxu0 %v9617_v0  ;;  %8122 = vmatprep.mubr.msk.f32.mxu0 %vm9619_vm0, %v9618_v4 }
0x10c2   :  { %8770 = vmatprep.subr.bf16.mxu1 %v9617_v0 }
0x10c4   :  { %8757 = vmatpush3.bf16.msra.mxu0 %v9696_v14 }
0x10c5   :  { %8764 = vmatprep.subr.bf16.mxu0 %v9617_v0 }
0x118e   :  { %v1717_v12 = vpop.f32.mrb[20].mxu1 }
0x118f   :  { %v1721_v54 = vadd.f32 %v1717_v12, %v9889_v30  ;;  %v8113_v1 = vpop.f32.mrb[21].mxu1 }
0x1191   :  { %9201 = vtanh.f32 %v1721_v54  ;;  %v7493_v15 = vmul.f32 -1.442695, %v1721_v54 }
0x1192   :  { %v1614_v62 = vpop.f32.mrb[36].mxu0 }
0x1193   :  { %v1618_v55 = vadd.f32 %v1614_v62, %v9868_v13  ;;  %v8102_v2 = vpop.f32.mrb[37].mxu0 }
0x1195   :  { %9203 = vtanh.f32 %v1618_v55  ;;  %v7491_v60 = vmul.f32 -1.442695, %v1618_v55 }
0x1196   :  { %9205 = vpow2.f32 %v7493_v15 }
0x1197   :  { %9207 = vpow2.f32 %v7491_v60 }
0x119b   :  { %v9202_v7 = vpop.eup %9201 }
0x119c   :  { %1731 = vrot.lane.b32.xlu0 %v9202_v7, %s9620_s0 }
0x119f   :  { %v9204_v10 = vpop.eup %9203 }
0x11a0   :  { %1628 = vrot.lane.b32.xlu0 %v9204_v10, %s9620_s0  ;;  %v9206_v56 = vpop.eup %9205 }
0x11a1   :  { %v1725_v48 = vadd.f32 1.0, %v9206_v56  ;;  %v9208_v30 = vpop.eup %9207 }
0x11a2   :  { %v1622_v43 = vadd.f32 1.0, %v9208_v30 }
0x11a3   :  { %9209 = vrcp.f32 %v1725_v48 }
0x11a4   :  { %9211 = vrcp.f32 %v1622_v43 }
0x11ad   :  { %v9210_v34 = vpop.eup %9209 }
0x11ae   :  { %v9212_v20 = vpop.eup %9211  ;;  %v1729_v25 = vmul.f32 %v9210_v34, %v1533_v59 }
0x11af   :  { %v1626_v44 = vmul.f32 %v9212_v20, %v1430_v50 }
0x120e   :  { %v1732_v13 = vpop.permute.xlu0 %1731 }
0x120f   :  { %v1734_v17 = vmul.f32 %v9210_v34, %v1732_v13 }
0x1211   :  { %1736 = vrot.lane.b32.xlu1 %v1734_v17, %s9620_s0 }
0x1212   :  { %v1629_v8 = vpop.permute.xlu0 %1628 }
0x1213   :  { %v1631_v3 = vmul.f32 %v9212_v20, %v1629_v8 }
0x1215   :  { %1633 = vrot.lane.b32.xlu0 %v1631_v3, %s9620_s0 }
0x1283   :  { %v1737_v27 = vpop.permute.xlu1 %1736 }
0x1284   :  { %v1739_v41 = vadd.f32 %v1737_v27, %v1729_v25 }
0x1286   :  { %9213 = vtanh.f32 %v1739_v41 }
0x1287   :  { %v1634_v31 = vpop.permute.xlu0 %1633 }
0x1288   :  { %v1636_v35 = vadd.f32 %v1634_v31, %v1626_v44 }
0x128a   :  { %9215 = vtanh.f32 %v1636_v35 }
0x1290   :  { %v9214_v49 = vpop.eup %9213 }
0x1291   :  { %1742 = vrot.lane.b32.xlu1 %v9214_v49, %s9620_s0 }
0x1294   :  { %v9216_v39 = vpop.eup %9215 }
0x1295   :  { %1639 = vrot.lane.b32.xlu0 %v9216_v39, %s9620_s0 }
0x1303   :  { %v1743_v58 = vpop.permute.xlu1 %1742 }
0x1304   :  { %v1745_v47 = vmul.f32 %v9210_v34, %v1743_v58 }
0x1306   :  { %1747 = vrot.lane.b32.xlu1 %v1745_v47, %s9621_s3 }
0x1307   :  { %v1640_v29 = vpop.permute.xlu0 %1639 }
0x1308   :  { %v1642_v51 = vmul.f32 %v9212_v20, %v1640_v29 }
0x130a   :  { %1644 = vrot.lane.b32.xlu1 %v1642_v51, %s9621_s3 }
0x1378   :  { %v1748_v59 = vpop.permute.xlu1 %1747 }
0x1379   :  { %1750 = vst.msk [vmem:[#allocation3 + $0xc8] sm:$0xff] %vm309_vm2, %v1748_v59  ;;  %8134 = vmatmul.mubr.msk.f32.vlgmr.msra.gmra.mrb[22].mxu1 %vm309_vm2, %v1748_v59 }
0x137a   :  { %8772 = vmatpush3.bf16.msra.mxu1 %v9712_v18  ;;  %8155 = vmatprep.mubr.msk.f32.mxu1 %vm9619_vm0, %v9618_v4 }
0x137b   :  { %8773 = vmatprep.subr.bf16.mxu1 %v9617_v0 }
0x137c   :  { %v1645_v50 = vpop.permute.xlu1 %1644 }
0x137d   :  { %1647 = vst.msk [vmem:[#allocation3 + $0x30] sm:$0xff] %vm309_vm2, %v1645_v50  ;;  %8123 = vmatmul.mubr.msk.f32.vlgmr.msra.gmra.mrb[38].mxu0 %vm309_vm2, %v1645_v50 }
0x137e   :  { %8766 = vmatpush3.bf16.msra.mxu0 %v9684_v9  ;;  %8775 = vmatpush3.bf16.msra.mxu1 %v9730_v22 }
0x137f   :  { %8767 = vmatprep.subr.bf16.mxu0 %v9617_v0  ;;  %8144 = vmatprep.mubr.msk.f32.mxu0 %vm9619_vm0, %v9618_v4 }
0x1380   :  { %8782 = vmatprep.subr.bf16.mxu1 %v9617_v0 }
0x1382   :  { %8769 = vmatpush3.bf16.msra.mxu0 %v9696_v14 }
0x1383   :  { %8776 = vmatprep.subr.bf16.mxu0 %v9617_v0 }
0x144c   :  { %v1923_v42 = vpop.f32.mrb[22].mxu1 }
0x144d   :  { %v1927_v33 = vadd.f32 %v1923_v42, %v9883_v26  ;;  %v8135_v23 = vpop.f32.mrb[23].mxu1 }
0x144f   :  { %9217 = vtanh.f32 %v1927_v33  ;;  %v7497_v2 = vmul.f32 -1.442695, %v1927_v33 }
0x1450   :  { %v1820_v12 = vpop.f32.mrb[38].mxu0 }
0x1451   :  { %v1824_v54 = vadd.f32 %v1820_v12, %v9874_v19  ;;  %v8124_v1 = vpop.f32.mrb[39].mxu0 }
0x1453   :  { %9219 = vtanh.f32 %v1824_v54  ;;  %v7495_v7 = vmul.f32 -1.442695, %v1824_v54 }
0x1454   :  { %9221 = vpow2.f32 %v7497_v2 }
0x1455   :  { %9223 = vpow2.f32 %v7495_v7 }
0x1459   :  { %v9218_v62 = vpop.eup %9217 }
0x145a   :  { %1937 = vrot.lane.b32.xlu0 %v9218_v62, %s9620_s0 }
0x145d   :  { %v9220_v55 = vpop.eup %9219 }
0x145e   :  { %1834 = vrot.lane.b32.xlu0 %v9220_v55, %s9620_s0  ;;  %v9222_v10 = vpop.eup %9221 }
0x145f   :  { %v1931_v15 = vadd.f32 1.0, %v9222_v10  ;;  %v9224_v26 = vpop.eup %9223 }
0x1460   :  { %v1828_v60 = vadd.f32 1.0, %v9224_v26 }
0x1461   :  { %9225 = vrcp.f32 %v1931_v15 }
0x1462   :  { %9227 = vrcp.f32 %v1828_v60 }
0x146b   :  { %v9226_v56 = vpop.eup %9225 }
0x146c   :  { %v9228_v30 = vpop.eup %9227  ;;  %v1935_v13 = vmul.f32 %v9226_v56, %v1739_v41 }
0x146d   :  { %v1832_v8 = vmul.f32 %v9228_v30, %v1636_v35 }
0x14cc   :  { %v1938_v19 = vpop.permute.xlu0 %1937 }
0x14cd   :  { %v1940_v48 = vmul.f32 %v9226_v56, %v1938_v19 }
0x14cf   :  { %1942 = vrot.lane.b32.xlu1 %v1940_v48, %s9620_s0 }
0x14d0   :  { %v1835_v43 = vpop.permute.xlu0 %1834 }
0x14d1   :  { %v1837_v34 = vmul.f32 %v9228_v30, %v1835_v43 }
0x14d3   :  { %1839 = vrot.lane.b32.xlu0 %v1837_v34, %s9620_s0 }
0x1541   :  { %v1943_v17 = vpop.permute.xlu1 %1942 }
0x1542   :  { %v1945_v20 = vadd.f32 %v1943_v17, %v1935_v13 }
0x1544   :  { %9229 = vtanh.f32 %v1945_v20 }
0x1545   :  { %v1840_v3 = vpop.permute.xlu0 %1839 }
0x1546   :  { %v1842_v25 = vadd.f32 %v1840_v3, %v1832_v8 }
0x1548   :  { %9231 = vtanh.f32 %v1842_v25 }
0x154e   :  { %v9230_v27 = vpop.eup %9229 }
0x154f   :  { %1948 = vrot.lane.b32.xlu1 %v9230_v27, %s9620_s0 }
0x1552   :  { %v9232_v44 = vpop.eup %9231 }
0x1553   :  { %1845 = vrot.lane.b32.xlu0 %v9232_v44, %s9620_s0 }
0x15c1   :  { %v1949_v31 = vpop.permute.xlu1 %1948 }
0x15c2   :  { %v1951_v49 = vmul.f32 %v9226_v56, %v1949_v31 }
0x15c4   :  { %1953 = vrot.lane.b32.xlu1 %v1951_v49, %s9621_s3 }
0x15c5   :  { %v1846_v39 = vpop.permute.xlu0 %1845 }
0x15c6   :  { %v1848_v58 = vmul.f32 %v9228_v30, %v1846_v39 }
0x15c8   :  { %1850 = vrot.lane.b32.xlu1 %v1848_v58, %s9621_s3 }
0x1636   :  { %v1954_v41 = vpop.permute.xlu1 %1953 }
0x1637   :  { %1956 = vst.msk [vmem:[#allocation3 + $0xc0] sm:$0xff] %vm309_vm2, %v1954_v41  ;;  %8156 = vmatmul.mubr.msk.f32.vlgmr.msra.gmra.mrb[24].mxu1 %vm309_vm2, %v1954_v41 }
0x1638   :  { %8784 = vmatpush3.bf16.msra.mxu1 %v9712_v18  ;;  %8177 = vmatprep.mubr.msk.f32.mxu1 %vm9619_vm0, %v9618_v4 }
0x1639   :  { %8785 = vmatprep.subr.bf16.mxu1 %v9617_v0 }
0x163a   :  { %v1851_v35 = vpop.permute.xlu1 %1850 }
0x163b   :  { %1853 = vst.msk [vmem:[#allocation3 + $0x38] sm:$0xff] %vm309_vm2, %v1851_v35  ;;  %8145 = vmatmul.mubr.msk.f32.vlgmr.msra.gmra.mrb[40].mxu0 %vm309_vm2, %v1851_v35 }
0x163c   :  { %8778 = vmatpush3.bf16.msra.mxu0 %v9684_v9  ;;  %8787 = vmatpush3.bf16.msra.mxu1 %v9730_v22 }
0x163d   :  { %8779 = vmatprep.subr.bf16.mxu0 %v9617_v0  ;;  %8166 = vmatprep.mubr.msk.f32.mxu0 %vm9619_vm0, %v9618_v4 }
0x163e   :  { %8794 = vmatprep.subr.bf16.mxu1 %v9617_v0 }
0x1640   :  { %8781 = vmatpush3.bf16.msra.mxu0 %v9696_v14 }
0x1641   :  { %8788 = vmatprep.subr.bf16.mxu0 %v9617_v0 }
0x170a   :  { %v2129_v47 = vpop.f32.mrb[24].mxu1 }
0x170b   :  { %v2133_v29 = vadd.f32 %v2129_v47, %v9877_v21  ;;  %v8157_v51 = vpop.f32.mrb[25].mxu1 }
0x170d   :  { %9233 = vtanh.f32 %v2133_v29  ;;  %v7501_v12 = vmul.f32 -1.442695, %v2133_v29 }
0x170e   :  { %v2026_v59 = vpop.f32.mrb[40].mxu0 }
0x170f   :  { %v2030_v50 = vadd.f32 %v2026_v59, %v9880_v24  ;;  %v8146_v42 = vpop.f32.mrb[41].mxu0 }
0x1711   :  { %9235 = vtanh.f32 %v2030_v50  ;;  %v7499_v54 = vmul.f32 -1.442695, %v2030_v50 }
0x1712   :  { %9237 = vpow2.f32 %v7501_v12 }
0x1713   :  { %9239 = vpow2.f32 %v7499_v54 }
0x1717   :  { %v9234_v33 = vpop.eup %9233 }
0x1718   :  { %2143 = vrot.lane.b32.xlu0 %v9234_v33, %s9620_s0 }
0x171b   :  { %v9236_v23 = vpop.eup %9235 }
0x171c   :  { %2040 = vrot.lane.b32.xlu0 %v9236_v23, %s9620_s0  ;;  %v9238_v1 = vpop.eup %9237 }
0x171d   :  { %v2137_v62 = vadd.f32 1.0, %v9238_v1  ;;  %v9240_v21 = vpop.eup %9239 }
0x171e   :  { %v2034_v55 = vadd.f32 1.0, %v9240_v21 }
0x171f   :  { %9241 = vrcp.f32 %v2137_v62 }
0x1720   :  { %9243 = vrcp.f32 %v2034_v55 }
0x1729   :  { %v9242_v2 = vpop.eup %9241 }
0x172a   :  { %v9244_v10 = vpop.eup %9243  ;;  %v2141_v60 = vmul.f32 %v9242_v2, %v1945_v20 }
0x172b   :  { %v2038_v48 = vmul.f32 %v9244_v10, %v1842_v25 }
0x178a   :  { %v2144_v24 = vpop.permute.xlu0 %2143 }
0x178b   :  { %v2146_v7 = vmul.f32 %v9242_v2, %v2144_v24 }
0x178d   :  { %2148 = vrot.lane.b32.xlu1 %v2146_v7, %s9620_s0 }
0x178e   :  { %v2041_v15 = vpop.permute.xlu0 %2040 }
0x178f   :  { %v2043_v26 = vmul.f32 %v9244_v10, %v2041_v15 }
0x1791   :  { %2045 = vrot.lane.b32.xlu0 %v2043_v26, %s9620_s0 }
0x17ff   :  { %v2149_v56 = vpop.permute.xlu1 %2148 }
0x1800   :  { %v2151_v19 = vadd.f32 %v2149_v56, %v2141_v60 }
0x1802   :  { %9245 = vtanh.f32 %v2151_v19 }
0x1803   :  { %v2046_v30 = vpop.permute.xlu0 %2045 }
0x1804   :  { %v2048_v43 = vadd.f32 %v2046_v30, %v2038_v48 }
0x1806   :  { %9247 = vtanh.f32 %v2048_v43 }
0x180c   :  { %v9246_v34 = vpop.eup %9245 }
0x180d   :  { %2154 = vrot.lane.b32.xlu1 %v9246_v34, %s9620_s0 }
0x1810   :  { %v9248_v13 = vpop.eup %9247 }
0x1811   :  { %2051 = vrot.lane.b32.xlu0 %v9248_v13, %s9620_s0 }
0x187f   :  { %v2155_v17 = vpop.permute.xlu1 %2154 }
0x1880   :  { %v2157_v8 = vmul.f32 %v9242_v2, %v2155_v17 }
0x1882   :  { %2159 = vrot.lane.b32.xlu1 %v2157_v8, %s9621_s3 }
0x1883   :  { %v2052_v3 = vpop.permute.xlu0 %2051 }
0x1884   :  { %v2054_v27 = vmul.f32 %v9244_v10, %v2052_v3 }
0x1886   :  { %2056 = vrot.lane.b32.xlu1 %v2054_v27, %s9621_s3 }
0x18f4   :  { %v2160_v20 = vpop.permute.xlu1 %2159 }
0x18f5   :  { %2162 = vst.msk [vmem:[#allocation3 + $0xb8] sm:$0xff] %vm309_vm2, %v2160_v20  ;;  %8178 = vmatmul.mubr.msk.f32.vlgmr.msra.gmra.mrb[26].mxu1 %vm309_vm2, %v2160_v20 }
0x18f6   :  { %8796 = vmatpush3.bf16.msra.mxu1 %v9712_v18  ;;  %8199 = vmatprep.mubr.msk.f32.mxu1 %vm9619_vm0, %v9618_v4 }
0x18f7   :  { %8797 = vmatprep.subr.bf16.mxu1 %v9617_v0 }
0x18f8   :  { %v2057_v25 = vpop.permute.xlu1 %2056 }
0x18f9   :  { %2059 = vst.msk [vmem:[#allocation3 + $0x40] sm:$0xff] %vm309_vm2, %v2057_v25  ;;  %8167 = vmatmul.mubr.msk.f32.vlgmr.msra.gmra.mrb[42].mxu0 %vm309_vm2, %v2057_v25 }
0x18fa   :  { %8790 = vmatpush3.bf16.msra.mxu0 %v9684_v9  ;;  %8799 = vmatpush3.bf16.msra.mxu1 %v9730_v22 }
0x18fb   :  { %8791 = vmatprep.subr.bf16.mxu0 %v9617_v0  ;;  %8188 = vmatprep.mubr.msk.f32.mxu0 %vm9619_vm0, %v9618_v4 }
0x18fc   :  { %8806 = vmatprep.subr.bf16.mxu1 %v9617_v0 }
0x18fe   :  { %8793 = vmatpush3.bf16.msra.mxu0 %v9696_v14 }
0x18ff   :  { %8800 = vmatprep.subr.bf16.mxu0 %v9617_v0 }
0x19c8   :  { %v2335_v44 = vpop.f32.mrb[26].mxu1 }
0x19c9   :  { %v2339_v31 = vadd.f32 %v2335_v44, %v9871_v16  ;;  %v8179_v49 = vpop.f32.mrb[27].mxu1 }
0x19cb   :  { %9249 = vtanh.f32 %v2339_v31  ;;  %v7505_v29 = vmul.f32 -1.442695, %v2339_v31 }
0x19cc   :  { %v2232_v39 = vpop.f32.mrb[42].mxu0 }
0x19cd   :  { %v2236_v58 = vadd.f32 %v2232_v39, %v9886_v28  ;;  %v8168_v41 = vpop.f32.mrb[43].mxu0 }
0x19cf   :  { %9251 = vtanh.f32 %v2236_v58  ;;  %v7503_v51 = vmul.f32 -1.442695, %v2236_v58 }
0x19d0   :  { %9253 = vpow2.f32 %v7505_v29 }
0x19d1   :  { %9255 = vpow2.f32 %v7503_v51 }
0x19d5   :  { %v9250_v35 = vpop.eup %9249 }
0x19d6   :  { %2349 = vrot.lane.b32.xlu0 %v9250_v35, %s9620_s0 }
0x19d9   :  { %v9252_v47 = vpop.eup %9251 }
0x19da   :  { %2246 = vrot.lane.b32.xlu0 %v9252_v47, %s9620_s0  ;;  %v9254_v59 = vpop.eup %9253 }
0x19db   :  { %v2343_v50 = vadd.f32 1.0, %v9254_v59  ;;  %v9256_v16 = vpop.eup %9255 }
0x19dc   :  { %v2240_v42 = vadd.f32 1.0, %v9256_v16 }
0x19dd   :  { %9257 = vrcp.f32 %v2343_v50 }
0x19de   :  { %9259 = vrcp.f32 %v2240_v42 }
0x19e7   :  { %v9258_v33 = vpop.eup %9257 }
0x19e8   :  { %v9260_v12 = vpop.eup %9259  ;;  %v2347_v62 = vmul.f32 %v9258_v33, %v2151_v19 }
0x19e9   :  { %v2244_v2 = vmul.f32 %v9260_v12, %v2048_v43 }
0x1a48   :  { %v2350_v28 = vpop.permute.xlu0 %2349 }
0x1a49   :  { %v2352_v23 = vmul.f32 %v9258_v33, %v2350_v28 }
0x1a4b   :  { %2354 = vrot.lane.b32.xlu1 %v2352_v23, %s9620_s0 }
0x1a4c   :  { %v2247_v54 = vpop.permute.xlu0 %2246 }
0x1a4d   :  { %v2249_v1 = vmul.f32 %v9260_v12, %v2247_v54 }
0x1a4f   :  { %2251 = vrot.lane.b32.xlu0 %v2249_v1, %s9620_s0 }
0x1abd   :  { %v2355_v21 = vpop.permute.xlu1 %2354 }
0x1abe   :  { %v2357_v55 = vadd.f32 %v2355_v21, %v2347_v62 }
0x1ac0   :  { %9261 = vtanh.f32 %v2357_v55 }
0x1ac1   :  { %v2252_v24 = vpop.permute.xlu0 %2251 }
0x1ac2   :  { %v2254_v7 = vadd.f32 %v2252_v24, %v2244_v2 }
0x1ac4   :  { %9263 = vtanh.f32 %v2254_v7 }
0x1aca   :  { %v9262_v10 = vpop.eup %9261 }
0x1acb   :  { %2360 = vrot.lane.b32.xlu1 %v9262_v10, %s9620_s0 }
0x1ace   :  { %v9264_v15 = vpop.eup %9263 }
0x1acf   :  { %2257 = vrot.lane.b32.xlu0 %v9264_v15, %s9620_s0 }
0x1b3d   :  { %v2361_v26 = vpop.permute.xlu1 %2360 }
0x1b3e   :  { %v2363_v60 = vmul.f32 %v9258_v33, %v2361_v26 }
0x1b40   :  { %2365 = vrot.lane.b32.xlu1 %v2363_v60, %s9621_s3 }
0x1b41   :  { %v2258_v56 = vpop.permute.xlu0 %2257 }
0x1b42   :  { %v2260_v48 = vmul.f32 %v9260_v12, %v2258_v56 }
0x1b44   :  { %2262 = vrot.lane.b32.xlu1 %v2260_v48, %s9621_s3 }
0x1bb2   :  { %v2366_v19 = vpop.permute.xlu1 %2365 }
0x1bb3   :  { %2368 = vst.msk [vmem:[#allocation3 + $0xb0] sm:$0xff] %vm309_vm2, %v2366_v19  ;;  %8200 = vmatmul.mubr.msk.f32.vlgmr.msra.gmra.mrb[28].mxu1 %vm309_vm2, %v2366_v19 }
0x1bb4   :  { %8808 = vmatpush3.bf16.msra.mxu1 %v9712_v18  ;;  %8221 = vmatprep.mubr.msk.f32.mxu1 %vm9619_vm0, %v9618_v4 }
0x1bb5   :  { %8809 = vmatprep.subr.bf16.mxu1 %v9617_v0 }
0x1bb6   :  { %v2263_v30 = vpop.permute.xlu1 %2262 }
0x1bb7   :  { %2265 = vst.msk [vmem:[#allocation3 + $0x48] sm:$0xff] %vm309_vm2, %v2263_v30  ;;  %8189 = vmatmul.mubr.msk.f32.vlgmr.msra.gmra.mrb[44].mxu0 %vm309_vm2, %v2263_v30 }
0x1bb8   :  { %8802 = vmatpush3.bf16.msra.mxu0 %v9684_v9  ;;  %8811 = vmatpush3.bf16.msra.mxu1 %v9730_v22 }
0x1bb9   :  { %8803 = vmatprep.subr.bf16.mxu0 %v9617_v0  ;;  %8210 = vmatprep.mubr.msk.f32.mxu0 %vm9619_vm0, %v9618_v4 }
0x1bba   :  { %8818 = vmatprep.subr.bf16.mxu1 %v9617_v0 }
0x1bbc   :  { %8805 = vmatpush3.bf16.msra.mxu0 %v9696_v14 }
0x1bbd   :  { %8812 = vmatprep.subr.bf16.mxu0 %v9617_v0 }
0x1c86   :  { %v2541_v43 = vpop.f32.mrb[28].mxu1 }
0x1c87   :  { %v2545_v34 = vadd.f32 %v2541_v43, %v9865_v11  ;;  %v8201_v13 = vpop.f32.mrb[29].mxu1 }
0x1c89   :  { %9265 = vtanh.f32 %v2545_v34  ;;  %v7509_v25 = vmul.f32 -1.442695, %v2545_v34 }
0x1c8a   :  { %v2438_v17 = vpop.f32.mrb[44].mxu0 }
0x1c8b   :  { %v2442_v8 = vadd.f32 %v2438_v17, %v9892_v32  ;;  %v8190_v3 = vpop.f32.mrb[45].mxu0 }
0x1c8d   :  { %9267 = vtanh.f32 %v2442_v8  ;;  %v7507_v44 = vmul.f32 -1.442695, %v2442_v8 }
0x1c8e   :  { %9269 = vpow2.f32 %v7509_v25 }
0x1c8f   :  { %9271 = vpow2.f32 %v7507_v44 }
0x1c93   :  { %v9266_v27 = vpop.eup %9265 }
0x1c94   :  { %2555 = vrot.lane.b32.xlu0 %v9266_v27, %s9620_s0 }
0x1c97   :  { %v9268_v20 = vpop.eup %9267 }
0x1c98   :  { %2452 = vrot.lane.b32.xlu0 %v9268_v20, %s9620_s0  ;;  %v9270_v31 = vpop.eup %9269 }
0x1c99   :  { %v2549_v49 = vadd.f32 1.0, %v9270_v31  ;;  %v9272_v11 = vpop.eup %9271 }
0x1c9a   :  { %v2446_v39 = vadd.f32 1.0, %v9272_v11 }
0x1c9b   :  { %9273 = vrcp.f32 %v2549_v49 }
0x1c9c   :  { %9275 = vrcp.f32 %v2446_v39 }
0x1ca5   :  { %v9274_v58 = vpop.eup %9273 }
0x1ca6   :  { %v9276_v35 = vpop.eup %9275  ;;  %v2553_v51 = vmul.f32 %v9274_v58, %v2357_v55 }
0x1ca7   :  { %v2450_v16 = vmul.f32 %v9276_v35, %v2254_v7 }
0x1d06   :  { %v2556_v32 = vpop.permute.xlu0 %2555 }
0x1d07   :  { %v2558_v41 = vmul.f32 %v9274_v58, %v2556_v32 }
0x1d09   :  { %2560 = vrot.lane.b32.xlu1 %v2558_v41, %s9620_s0 }
0x1d0a   :  { %v2453_v47 = vpop.permute.xlu0 %2452 }
0x1d0b   :  { %v2455_v29 = vmul.f32 %v9276_v35, %v2453_v47 }
0x1d0d   :  { %2457 = vrot.lane.b32.xlu0 %v2455_v29, %s9620_s0 }
0x1d7b   :  { %v2561_v59 = vpop.permute.xlu1 %2560 }
0x1d7c   :  { %v2563_v50 = vadd.f32 %v2561_v59, %v2553_v51 }
0x1d7e   :  { %9277 = vtanh.f32 %v2563_v50 }
0x1d7f   :  { %v2458_v42 = vpop.permute.xlu0 %2457 }
0x1d80   :  { %v2460_v33 = vadd.f32 %v2458_v42, %v2450_v16 }
0x1d82   :  { %9279 = vtanh.f32 %v2460_v33 }
0x1d88   :  { %v9278_v28 = vpop.eup %9277 }
0x1d89   :  { %2566 = vrot.lane.b32.xlu1 %v9278_v28, %s9620_s0 }
0x1d8c   :  { %v9280_v23 = vpop.eup %9279 }
0x1d8d   :  { %2463 = vrot.lane.b32.xlu0 %v9280_v23, %s9620_s0 }
0x1dfb   :  { %v2567_v12 = vpop.permute.xlu1 %2566 }
0x1dfc   :  { %v2569_v54 = vmul.f32 %v9274_v58, %v2567_v12 }
0x1dfe   :  { %2571 = vrot.lane.b32.xlu1 %v2569_v54, %s9621_s3 }
0x1dff   :  { %v2464_v1 = vpop.permute.xlu0 %2463 }
0x1e00   :  { %v2466_v62 = vmul.f32 %v9276_v35, %v2464_v1 }
0x1e02   :  { %2468 = vrot.lane.b32.xlu1 %v2466_v62, %s9621_s3 }
0x1e70   :  { %v2572_v21 = vpop.permute.xlu1 %2571 }
0x1e71   :  { %2574 = vst.msk [vmem:[#allocation3 + $0xa8] sm:$0xff] %vm309_vm2, %v2572_v21  ;;  %8222 = vmatmul.mubr.msk.f32.vlgmr.msra.gmra.mrb[30].mxu1 %vm309_vm2, %v2572_v21 }
0x1e72   :  { %8820 = vmatpush3.bf16.msra.mxu1 %v9712_v18  ;;  %8243 = vmatprep.mubr.msk.f32.mxu1 %vm9619_vm0, %v9618_v4 }
0x1e73   :  { %8821 = vmatprep.subr.bf16.mxu1 %v9617_v0 }
0x1e74   :  { %v2469_v55 = vpop.permute.xlu1 %2468 }
0x1e75   :  { %2471 = vst.msk [vmem:[#allocation3 + $0x50] sm:$0xff] %vm309_vm2, %v2469_v55  ;;  %8211 = vmatmul.mubr.msk.f32.vlgmr.msra.gmra.mrb[46].mxu0 %vm309_vm2, %v2469_v55 }
0x1e76   :  { %8814 = vmatpush3.bf16.msra.mxu0 %v9684_v9  ;;  %8823 = vmatpush3.bf16.msra.mxu1 %v9730_v22 }
0x1e77   :  { %8815 = vmatprep.subr.bf16.mxu0 %v9617_v0  ;;  %8232 = vmatprep.mubr.msk.f32.mxu0 %vm9619_vm0, %v9618_v4 }
0x1e78   :  { %8830 = vmatprep.subr.bf16.mxu1 %v9617_v0 }
0x1e7a   :  { %8817 = vmatpush3.bf16.msra.mxu0 %v9696_v14 }
0x1e7b   :  { %8824 = vmatprep.subr.bf16.mxu0 %v9617_v0 }
0x1f44   :  { %v2747_v2 = vpop.f32.mrb[30].mxu1 }
0x1f45   :  { %v2751_v24 = vadd.f32 %v2747_v2, %v9858_v6  ;;  %v8223_v7 = vpop.f32.mrb[31].mxu1 }
0x1f47   :  { %9281 = vtanh.f32 %v2751_v24  ;;  %v7513_v48 = vmul.f32 -1.442695, %v2751_v24 }
0x1f48   :  { %v2644_v10 = vpop.f32.mrb[46].mxu0 }
0x1f49   :  { %v2648_v15 = vadd.f32 %v2644_v10, %v9898_v36  ;;  %v8212_v26 = vpop.f32.mrb[47].mxu0 }
0x1f4b   :  { %9283 = vtanh.f32 %v2648_v15  ;;  %v7511_v19 = vmul.f32 -1.442695, %v2648_v15 }
0x1f4c   :  { %9285 = vpow2.f32 %v7513_v48 }
0x1f4d   :  { %9287 = vpow2.f32 %v7511_v19 }
0x1f51   :  { %v9282_v60 = vpop.eup %9281 }
0x1f52   :  { %2761 = vrot.lane.b32.xlu0 %v9282_v60, %s9620_s0 }
0x1f55   :  { %v9284_v56 = vpop.eup %9283 }
0x1f56   :  { %2658 = vrot.lane.b32.xlu0 %v9284_v56, %s9620_s0  ;;  %v9286_v30 = vpop.eup %9285 }
0x1f57   :  { %v2755_v43 = vadd.f32 1.0, %v9286_v30  ;;  %v9288_v6 = vpop.eup %9287 }
0x1f58   :  { %v2652_v34 = vadd.f32 1.0, %v9288_v6 }
0x1f59   :  { %9289 = vrcp.f32 %v2755_v43 }
0x1f5a   :  { %9291 = vrcp.f32 %v2652_v34 }
0x1f63   :  { %v9290_v13 = vpop.eup %9289 }
0x1f64   :  { %v9292_v8 = vpop.eup %9291  ;;  %v2759_v20 = vmul.f32 %v9290_v13, %v2563_v50 }
0x1f65   :  { %v2656_v31 = vmul.f32 %v9292_v8, %v2460_v33 }
0x1fc4   :  { %v2762_v36 = vpop.permute.xlu0 %2761 }
0x1fc5   :  { %v2764_v17 = vmul.f32 %v9290_v13, %v2762_v36 }
0x1fc7   :  { %2766 = vrot.lane.b32.xlu1 %v2764_v17, %s9620_s0 }
0x1fc8   :  { %v2659_v3 = vpop.permute.xlu0 %2658 }
0x1fc9   :  { %v2661_v27 = vmul.f32 %v9292_v8, %v2659_v3 }
0x1fcb   :  { %2663 = vrot.lane.b32.xlu0 %v2661_v27, %s9620_s0 }
0x2039   :  { %v2767_v25 = vpop.permute.xlu1 %2766 }
0x203a   :  { %v2769_v44 = vadd.f32 %v2767_v25, %v2759_v20 }
0x203c   :  { %9293 = vtanh.f32 %v2769_v44 }
0x203d   :  { %v2664_v49 = vpop.permute.xlu0 %2663 }
0x203e   :  { %v2666_v11 = vadd.f32 %v2664_v49, %v2656_v31 }
0x2040   :  { %9295 = vtanh.f32 %v2666_v11 }
0x2046   :  { %v9294_v39 = vpop.eup %9293 }
0x2047   :  { %2772 = vrot.lane.b32.xlu1 %v9294_v39, %s9620_s0 }
0x204a   :  { %v9296_v58 = vpop.eup %9295 }
0x204b   :  { %2669 = vrot.lane.b32.xlu0 %v9296_v58, %s9620_s0 }
0x20b9   :  { %v2773_v32 = vpop.permute.xlu1 %2772 }
0x20ba   :  { %v2775_v41 = vmul.f32 %v9290_v13, %v2773_v32 }
0x20bc   :  { %2777 = vrot.lane.b32.xlu1 %v2775_v41, %s9621_s3 }
0x20bd   :  { %v2670_v35 = vpop.permute.xlu0 %2669 }
0x20be   :  { %v2672_v47 = vmul.f32 %v9292_v8, %v2670_v35 }
0x20c0   :  { %2674 = vrot.lane.b32.xlu1 %v2672_v47, %s9621_s3 }
0x212e   :  { %v2778_v29 = vpop.permute.xlu1 %2777 }
0x212f   :  { %2780 = vst.msk [vmem:[#allocation3 + $0xa0] sm:$0xff] %vm309_vm2, %v2778_v29  ;;  %8244 = vmatmul.mubr.msk.f32.vlgmr.msra.gmra.mrb[32].mxu1 %vm309_vm2, %v2778_v29 }
0x2130   :  { %8832 = vmatpush3.bf16.msra.mxu1 %v9712_v18  ;;  %8265 = vmatprep.mubr.msk.f32.mxu1 %vm9619_vm0, %v9618_v4 }
0x2131   :  { %8833 = vmatprep.subr.bf16.mxu1 %v9617_v0 }
0x2132   :  { %v2675_v51 = vpop.permute.xlu1 %2674 }
0x2133   :  { %2677 = vst.msk [vmem:[#allocation3 + $0x58] sm:$0xff] %vm309_vm2, %v2675_v51  ;;  %8233 = vmatmul.mubr.msk.f32.vlgmr.msra.gmra.mrb[48].mxu0 %vm309_vm2, %v2675_v51 }
0x2134   :  { %8826 = vmatpush3.bf16.msra.mxu0 %v9684_v9  ;;  %8835 = vmatpush3.bf16.msra.mxu1 %v9730_v22 }
0x2135   :  { %8827 = vmatprep.subr.bf16.mxu0 %v9617_v0  ;;  %8254 = vmatprep.mubr.msk.f32.mxu0 %vm9619_vm0, %v9618_v4 }
0x2136   :  { %8842 = vmatprep.subr.bf16.mxu1 %v9617_v0 }
0x2138   :  { %8829 = vmatpush3.bf16.msra.mxu0 %v9696_v14 }
0x2139   :  { %8836 = vmatprep.subr.bf16.mxu0 %v9617_v0 }
0x2202   :  { %v2953_v59 = vpop.f32.mrb[32].mxu1 }
0x2203   :  { %v2957_v50 = vadd.f32 %v2953_v59, %v9852_v63  ;;  %v8245_v16 = vpop.f32.mrb[33].mxu1 }
0x2205   :  { %9297 = vtanh.f32 %v2957_v50  ;;  %v7517_v54 = vmul.f32 -1.442695, %v2957_v50 }
0x2206   :  { %v2850_v42 = vpop.f32.mrb[48].mxu0 }
0x2207   :  { %v2854_v33 = vadd.f32 %v2850_v42, %v9904_v45  ;;  %v8234_v28 = vpop.f32.mrb[49].mxu0 }
0x2209   :  { %9299 = vtanh.f32 %v2854_v33  ;;  %v7515_v1 = vmul.f32 -1.442695, %v2854_v33 }
0x220a   :  { %9301 = vpow2.f32 %v7517_v54 }
0x220b   :  { %9303 = vpow2.f32 %v7515_v1 }
0x220f   :  { %v9298_v23 = vpop.eup %9297 }
0x2210   :  { %2967 = vrot.lane.b32.xlu0 %v9298_v23, %s9620_s0 }
0x2213   :  { %v9300_v12 = vpop.eup %9299 }
0x2214   :  { %2864 = vrot.lane.b32.xlu0 %v9300_v12, %s9620_s0  ;;  %v9302_v62 = vpop.eup %9301 }
0x2215   :  { %v2961_v21 = vadd.f32 1.0, %v9302_v62  ;;  %v9304_v63 = vpop.eup %9303 }
0x2216   :  { %v2858_v55 = vadd.f32 1.0, %v9304_v63 }
0x2217   :  { %9305 = vrcp.f32 %v2961_v21 }
0x2218   :  { %9307 = vrcp.f32 %v2858_v55 }
0x2221   :  { %v9306_v2 = vpop.eup %9305 }
0x2222   :  { %v9308_v7 = vpop.eup %9307  ;;  %v2965_v26 = vmul.f32 %v9306_v2, %v2769_v44 }
0x2223   :  { %v2862_v48 = vmul.f32 %v9308_v7, %v2666_v11 }
0x2282   :  { %v2968_v45 = vpop.permute.xlu0 %2967 }
0x2283   :  { %v2970_v24 = vmul.f32 %v9306_v2, %v2968_v45 }
0x2285   :  { %2972 = vrot.lane.b32.xlu1 %v2970_v24, %s9620_s0 }
0x2286   :  { %v2865_v10 = vpop.permute.xlu0 %2864 }
0x2287   :  { %v2867_v15 = vmul.f32 %v9308_v7, %v2865_v10 }
0x2289   :  { %2869 = vrot.lane.b32.xlu0 %v2867_v15, %s9620_s0 }
0x22f7   :  { %v2973_v60 = vpop.permute.xlu1 %2972 }
0x22f8   :  { %v2975_v56 = vadd.f32 %v2973_v60, %v2965_v26 }
0x22fa   :  { %9309 = vtanh.f32 %v2975_v56 }
0x22fb   :  { %v2870_v19 = vpop.permute.xlu0 %2869 }
0x22fc   :  { %v2872_v30 = vadd.f32 %v2870_v19, %v2862_v48 }
0x22fe   :  { %9311 = vtanh.f32 %v2872_v30 }
0x2304   :  { %v9310_v43 = vpop.eup %9309 }
0x2305   :  { %2978 = vrot.lane.b32.xlu1 %v9310_v43, %s9620_s0 }
0x2308   :  { %v9312_v6 = vpop.eup %9311 }
0x2309   :  { %2875 = vrot.lane.b32.xlu0 %v9312_v6, %s9620_s0 }
0x2377   :  { %v2979_v34 = vpop.permute.xlu1 %2978 }
0x2378   :  { %v2981_v13 = vmul.f32 %v9306_v2, %v2979_v34 }
0x237a   :  { %2983 = vrot.lane.b32.xlu1 %v2981_v13, %s9621_s3 }
0x237b   :  { %v2876_v36 = vpop.permute.xlu0 %2875 }
0x237c   :  { %v2878_v17 = vmul.f32 %v9308_v7, %v2876_v36 }
0x237e   :  { %2880 = vrot.lane.b32.xlu1 %v2878_v17, %s9621_s3 }
0x23ec   :  { %v2984_v8 = vpop.permute.xlu1 %2983 }
0x23ed   :  { %2986 = vst.msk [vmem:[#allocation3 + $0x98] sm:$0xff] %vm309_vm2, %v2984_v8  ;;  %8266 = vmatmul.mubr.msk.f32.vlgmr.msra.gmra.mrb[34].mxu1 %vm309_vm2, %v2984_v8 }
0x23ee   :  { %8844 = vmatpush3.bf16.msra.mxu1 %v9712_v18  ;;  %8287 = vmatprep.mubr.msk.f32.mxu1 %vm9619_vm0, %v9618_v4 }
0x23ef   :  { %8845 = vmatprep.subr.bf16.mxu1 %v9617_v0 }
0x23f0   :  { %v2881_v3 = vpop.permute.xlu1 %2880 }
0x23f1   :  { %2883 = vst.msk [vmem:[#allocation3 + $0x60] sm:$0xff] %vm309_vm2, %v2881_v3  ;;  %8255 = vmatmul.mubr.msk.f32.vlgmr.msra.gmra.mrb[50].mxu0 %vm309_vm2, %v2881_v3 }
0x23f2   :  { %8838 = vmatpush3.bf16.msra.mxu0 %v9684_v9  ;;  %8847 = vmatpush3.bf16.msra.mxu1 %v9730_v22 }
0x23f3   :  { %8839 = vmatprep.subr.bf16.mxu0 %v9617_v0  ;;  %8276 = vmatprep.mubr.msk.f32.mxu0 %vm9619_vm0, %v9618_v4 }
0x23f4   :  { %8854 = vmatprep.subr.bf16.mxu1 %v9617_v0 }
0x23f6   :  { %8841 = vmatpush3.bf16.msra.mxu0 %v9696_v14 }
0x23f7   :  { %8848 = vmatprep.subr.bf16.mxu0 %v9617_v0 }
0x24c0   :  { %v3159_v27 = vpop.f32.mrb[34].mxu1 }
0x24c1   :  { %v3163_v20 = vadd.f32 %v3159_v27, %v9846_v57  ;;  %v8267_v25 = vpop.f32.mrb[35].mxu1 }
0x24c3   :  { %9313 = vtanh.f32 %v3163_v20  ;;  %v7521_v58 = vmul.f32 -1.442695, %v3163_v20 }
0x24c4   :  { %v3056_v44 = vpop.f32.mrb[50].mxu0 }
0x24c5   :  { %v3060_v31 = vadd.f32 %v3056_v44, %v9910_v52  ;;  %v8256_v49 = vpop.f32.mrb[51].mxu0 }
0x24c7   :  { %9315 = vtanh.f32 %v3060_v31  ;;  %v7519_v32 = vmul.f32 -1.442695, %v3060_v31 }
0x24c8   :  { %9317 = vpow2.f32 %v7521_v58 }
0x24c9   :  { %9319 = vpow2.f32 %v7519_v32 }
0x24cd   :  { %v9314_v11 = vpop.eup %9313 }
0x24ce   :  { %3173 = vrot.lane.b32.xlu0 %v9314_v11, %s9620_s0 }
0x24d1   :  { %v9316_v39 = vpop.eup %9315 }
0x24d2   :  { %3070 = vrot.lane.b32.xlu0 %v9316_v39, %s9620_s0  ;;  %v9318_v41 = vpop.eup %9317 }
0x24d3   :  { %v3167_v35 = vadd.f32 1.0, %v9318_v41  ;;  %v9320_v57 = vpop.eup %9319 }
0x24d4   :  { %v3064_v47 = vadd.f32 1.0, %v9320_v57 }
0x24d5   :  { %9321 = vrcp.f32 %v3167_v35 }
0x24d6   :  { %9323 = vrcp.f32 %v3064_v47 }
0x24df   :  { %v9322_v29 = vpop.eup %9321 }
0x24e0   :  { %v9324_v59 = vpop.eup %9323  ;;  %v3171_v42 = vmul.f32 %v9322_v29, %v2975_v56 }
0x24e1   :  { %v3068_v23 = vmul.f32 %v9324_v59, %v2872_v30 }
0x2540   :  { %v3174_v52 = vpop.permute.xlu0 %3173 }
0x2541   :  { %v3176_v51 = vmul.f32 %v9322_v29, %v3174_v52 }
0x2543   :  { %3178 = vrot.lane.b32.xlu1 %v3176_v51, %s9620_s0 }
0x2544   :  { %v3071_v50 = vpop.permute.xlu0 %3070 }
0x2545   :  { %v3073_v16 = vmul.f32 %v9324_v59, %v3071_v50 }
0x2547   :  { %3075 = vrot.lane.b32.xlu0 %v3073_v16, %s9620_s0 }
0x25b5   :  { %v3179_v33 = vpop.permute.xlu1 %3178 }
0x25b6   :  { %v3181_v28 = vadd.f32 %v3179_v33, %v3171_v42 }
0x25b8   :  { %9325 = vtanh.f32 %v3181_v28 }
0x25b9   :  { %v3076_v12 = vpop.permute.xlu0 %3075 }
0x25ba   :  { %v3078_v54 = vadd.f32 %v3076_v12, %v3068_v23 }
0x25bc   :  { %9327 = vtanh.f32 %v3078_v54 }
0x25c2   :  { %v9326_v1 = vpop.eup %9325 }
0x25c3   :  { %3184 = vrot.lane.b32.xlu1 %v9326_v1, %s9620_s0 }
0x25c6   :  { %v9328_v62 = vpop.eup %9327 }
0x25c7   :  { %3081 = vrot.lane.b32.xlu0 %v9328_v62, %s9620_s0 }
0x2635   :  { %v3185_v21 = vpop.permute.xlu1 %3184 }
0x2636   :  { %v3187_v63 = vmul.f32 %v9322_v29, %v3185_v21 }
0x2638   :  { %3189 = vrot.lane.b32.xlu1 %v3187_v63, %s9621_s3 }
0x2639   :  { %v3082_v55 = vpop.permute.xlu0 %3081 }
0x263a   :  { %v3084_v2 = vmul.f32 %v9324_v59, %v3082_v55 }
0x263c   :  { %3086 = vrot.lane.b32.xlu1 %v3084_v2, %s9621_s3 }
0x26aa   :  { %v3190_v45 = vpop.permute.xlu1 %3189 }
0x26ab   :  { %3192 = vst.msk [vmem:[#allocation3 + $0x90] sm:$0xff] %vm309_vm2, %v3190_v45  ;;  %8288 = vmatmul.mubr.msk.f32.vlgmr.msra.gmra.mrb[36].mxu1 %vm309_vm2, %v3190_v45 }
0x26ac   :  { %8856 = vmatpush3.bf16.msra.mxu1 %v9712_v18  ;;  %8309 = vmatprep.mubr.msk.f32.mxu1 %vm9619_vm0, %v9618_v4 }
0x26ad   :  { %8857 = vmatprep.subr.bf16.mxu1 %v9617_v0 }
0x26ae   :  { %v3087_v24 = vpop.permute.xlu1 %3086 }
0x26af   :  { %3089 = vst.msk [vmem:[#allocation3 + $0x68] sm:$0xff] %vm309_vm2, %v3087_v24  ;;  %8277 = vmatmul.mubr.msk.f32.vlgmr.msra.gmra.mrb[52].mxu0 %vm309_vm2, %v3087_v24 }
0x26b0   :  { %8850 = vmatpush3.bf16.msra.mxu0 %v9684_v9  ;;  %8859 = vmatpush3.bf16.msra.mxu1 %v9730_v22 }
0x26b1   :  { %8851 = vmatprep.subr.bf16.mxu0 %v9617_v0  ;;  %8298 = vmatprep.mubr.msk.f32.mxu0 %vm9619_vm0, %v9618_v4 }
0x26b2   :  { %8876 = vmatprep.subr.bf16.mxu1 %v9617_v0 }
0x26b4   :  { %8853 = vmatpush3.bf16.msra.mxu0 %v9696_v14 }
0x277e   :  { %v3365_v18 = vpop.f32.mrb[36].mxu1 }
0x277f   :  { %v3369_v7 = vadd.f32 %v3365_v18, %v9839_v53  ;;  %v8289_v10 = vpop.f32.mrb[37].mxu1 }
0x2780   :  { %v3616_v10 = vld [vmem:[%s11099_s4 + $0x58] sm:$0xff] }
0x2781   :  { %9329 = vtanh.f32 %v3369_v7  ;;  %v7525_v56 = vmul.f32 -1.442695, %v3369_v7  ;;  %v3614_v7 = vld [vmem:[%s11099_s4 + $0x48] sm:$0xff] }
0x2782   :  { %v3262_v15 = vpop.f32.mrb[52].mxu0 }
0x2783   :  { %v3266_v26 = vadd.f32 %v3262_v15, %v9916_v61  ;;  %v8278_v9 = vpop.f32.mrb[53].mxu0  ;;  %v8860_v15 = vpack.c.bf16 %v3616_v10, %v3614_v7  ;;  %v3652_v7 = vld [vmem:[#allocation3 + $0xf8] sm:$0xff]  ;;  %v3621_v10 = vld [vmem:[#allocation3] sm:$0xff] }
0x2785   :  { %9331 = vtanh.f32 %v3266_v26  ;;  %v7523_v48 = vmul.f32 -1.442695, %v3266_v26  ;;  %8861 = vmatprep.subr.bf16.mxu0 %v8860_v15  ;;  %v3622_v15 = vld [vmem:[#allocation3 + $0x8] sm:$0xff] }
0x2786   :  { %9333 = vpow2.f32 %v7525_v56 }
0x2787   :  { %9335 = vpow2.f32 %v7523_v48  ;;  %v3618_v48 = vld [vmem:[%s11099_s4 + $0x68] sm:$0xff] }
0x278b   :  { %v9330_v22 = vpop.eup %9329 }
0x278c   :  { %3379 = vrot.lane.b32.xlu0 %v9330_v22, %s9620_s0  ;;  %v3613_v22 = vld [vmem:[%s11099_s4 + $0x40] sm:$0xff] }
0x278f   :  { %v9332_v60 = vpop.eup %9331 }
0x2790   :  { %3276 = vrot.lane.b32.xlu0 %v9332_v60, %s9620_s0  ;;  %v9334_v14 = vpop.eup %9333  ;;  %v3615_v60 = vld [vmem:[%s11099_s4 + $0x50] sm:$0xff] }
0x2791   :  { %v3373_v19 = vadd.f32 1.0, %v9334_v14  ;;  %v9336_v53 = vpop.eup %9335  ;;  %v8862_v56 = vpack.c.bf16 %v3615_v60, %v3613_v22  ;;  %v3620_v14 = vld [vmem:[%s11099_s4 + $0x78] sm:$0xff]  ;;  %v3625_v22 = vld [vmem:[#allocation3 + $0x20] sm:$0xff]  ;;  %v3626_v60 = vld [vmem:[#allocation3 + $0x28] sm:$0xff] }
0x2792   :  { %v3270_v30 = vadd.f32 1.0, %v9336_v53  ;;  %v3617_v53 = vld [vmem:[%s11099_s4 + $0x60] sm:$0xff] }
0x2793   :  { %9337 = vrcp.f32 %v3373_v19  ;;  %v8864_v19 = vpack.c.bf16 %v3620_v14, %v3618_v48  ;;  %v3628_v48 = vld [vmem:[#allocation3 + $0x38] sm:$0xff]  ;;  %v3629_v14 = vld [vmem:[#allocation3 + $0x40] sm:$0xff] }
0x2794   :  { %9339 = vrcp.f32 %v3270_v30  ;;  %v3619_v30 = vld [vmem:[%s11099_s4 + $0x70] sm:$0xff] }
0x279d   :  { %v9338_v43 = vpop.eup %9337 }
0x279e   :  { %v9340_v34 = vpop.eup %9339  ;;  %v3377_v17 = vmul.f32 %v9338_v43, %v3181_v28 }
0x279f   :  { %v3274_v27 = vmul.f32 %v9340_v34, %v3078_v54 }
0x27fe   :  { %v3380_v61 = vpop.permute.xlu0 %3379 }
0x27ff   :  { %v3382_v6 = vmul.f32 %v9338_v43, %v3380_v61  ;;  %v3606_v61 = vld [vmem:[%s11099_s4 + $0x8] sm:$0xff] }
0x2801   :  { %3384 = vrot.lane.b32.xlu1 %v3382_v6, %s9620_s0  ;;  %v3608_v6 = vld [vmem:[%s11099_s4 + $0x18] sm:$0xff] }
0x2802   :  { %v3277_v13 = vpop.permute.xlu0 %3276 }
0x2803   :  { %v3279_v36 = vmul.f32 %v9340_v34, %v3277_v13 }
0x2805   :  { %3281 = vrot.lane.b32.xlu0 %v3279_v36, %s9620_s0 }
0x2873   :  { %v3385_v8 = vpop.permute.xlu1 %3384 }
0x2874   :  { %v3387_v3 = vadd.f32 %v3385_v8, %v3377_v17 }
0x2876   :  { %9341 = vtanh.f32 %v3387_v3 }
0x2877   :  { %v3282_v20 = vpop.permute.xlu0 %3281 }
0x2878   :  { %v3284_v25 = vadd.f32 %v3282_v20, %v3274_v27  ;;  %v4148_v27 = vld [vmem:[%s11100_s5 + $0x8] sm:$0xff] }
0x287a   :  { %9343 = vtanh.f32 %v3284_v25 }
0x2880   :  { %v9342_v44 = vpop.eup %9341 }
0x2881   :  { %3390 = vrot.lane.b32.xlu1 %v9342_v44, %s9620_s0  ;;  %v4150_v44 = vld [vmem:[%s11100_s5 + $0x18] sm:$0xff] }
0x2884   :  { %v9344_v31 = vpop.eup %9343 }
0x2885   :  { %3287 = vrot.lane.b32.xlu0 %v9344_v31, %s9620_s0 }
0x28f3   :  { %v3391_v49 = vpop.permute.xlu1 %3390 }
0x28f4   :  { %v3393_v11 = vmul.f32 %v9338_v43, %v3391_v49  ;;  %v8866_v43 = vpack.c.bf16 %v3619_v30, %v3617_v53  ;;  %v4151_v49 = vld [vmem:[%s11100_s5 + $0x20] sm:$0xff]  ;;  %v3631_v53 = vld [vmem:[#allocation3 + $0x50] sm:$0xff]  ;;  %v3632_v30 = vld [vmem:[#allocation3 + $0x58] sm:$0xff] }
0x28f6   :  { %3395 = vrot.lane.b32.xlu1 %v3393_v11, %s9621_s3  ;;  %v4152_v11 = vld [vmem:[%s11100_s5 + $0x28] sm:$0xff] }
0x28f7   :  { %v3288_v39 = vpop.permute.xlu0 %3287 }
0x28f8   :  { %v3290_v58 = vmul.f32 %v9340_v34, %v3288_v39  ;;  %v8868_v34 = vpack.c.bf16 %v3608_v6, %v3606_v61  ;;  %v10384_v39 = vpack.c.bf16 %v4152_v11, %v4151_v49  ;;  %v3634_v61 = vld [vmem:[#allocation3 + $0x68] sm:$0xff] }
0x28fa   :  { %3292 = vrot.lane.b32.xlu1 %v3290_v58, %s9621_s3 }
0x2968   :  { %v3396_v32 = vpop.permute.xlu1 %3395 }
0x2969   :  { %3398 = vst.msk [vmem:[#allocation3 + $0x88] sm:$0xff] %vm309_vm2, %v3396_v32  ;;  %8310 = vmatmul.mubr.msk.f32.vlgmr.msra.gmra.mrb[38].mxu1 %vm309_vm2, %v3396_v32  ;;  %v4153_v32 = vld [vmem:[%s11100_s5 + $0x30] sm:$0xff] }
0x296a   :  { %8320 = vmatprep.mubr.msk.f32.mxu1 %vm9619_vm0, %v9618_v4 }
0x296c   :  { %v3293_v41 = vpop.permute.xlu1 %3292 }
0x296d   :  { %3295 = vst.msk [vmem:[#allocation3 + $0x70] sm:$0xff] %vm309_vm2, %v3293_v41  ;;  %8299 = vmatmul.mubr.msk.f32.vlgmr.msra.gmra.mrb[54].mxu0 %vm309_vm2, %v3293_v41  ;;  %v4154_v41 = vld [vmem:[%s11100_s5 + $0x38] sm:$0xff] }
0x296e   :  { %3765 = vmatprep.mubr.f32.mxu0 %v9618_v4  ;;  %8863 = vmatpush1.bf16.msra.mxu0 %v8862_v56  ;;  %v3627_v56 = vld [vmem:[#allocation3 + $0x30] sm:$0xff] }
0x296f   :  { %8865 = vmatprep.subr.bf16.mxu0 %v8864_v19  ;;  %v3630_v19 = vld [vmem:[#allocation3 + $0x48] sm:$0xff] }
0x2972   :  { %8867 = vmatpush1.bf16.msra.mxu0 %v8866_v43  ;;  %v3633_v43 = vld [vmem:[#allocation3 + $0x60] sm:$0xff] }
0x2973   :  { %8869 = vmatprep.subr.bf16.mxu0 %v8868_v34 }
0x2974   :  { %v3635_v6 = vld [vmem:[#allocation3 + $0x70] sm:$0xff] }
0x2a3c   :  { %v3571_v35 = vpop.f32.mrb[38].mxu1 }
0x2a3d   :  { %v3575_v57 = vadd.f32 %v3571_v35, %v9831_v46  ;;  %v8311_v47 = vpop.f32.mrb[39].mxu1  ;;  %v3605_v35 = vld [vmem:[%s11099_s4] sm:$0xff] }
0x2a3e   :  { %v10401_v47 = vpack.c.bf16 %v4154_v41, %v4153_v32 }
0x2a3f   :  { %9345 = vtanh.f32 %v3575_v57  ;;  %v7529_v16 = vmul.f32 -1.442695, %v3575_v57  ;;  %v3607_v57 = vld [vmem:[%s11099_s4 + $0x10] sm:$0xff] }
0x2a40   :  { %v3468_v29 = vpop.f32.mrb[54].mxu0 }
0x2a41   :  { %v3472_v52 = vadd.f32 %v3468_v29, %v9922_v5  ;;  %v8300_v51 = vpop.f32.mrb[55].mxu0 }
0x2a42   :  { %v3612_v51 = vld [vmem:[%s11099_s4 + $0x38] sm:$0xff] }
0x2a43   :  { %9347 = vtanh.f32 %v3472_v52  ;;  %v7527_v42 = vmul.f32 -1.442695, %v3472_v52  ;;  %v3610_v52 = vld [vmem:[%s11099_s4 + $0x28] sm:$0xff] }
0x2a44   :  { %9349 = vpow2.f32 %v7529_v16  ;;  %v3609_v16 = vld [vmem:[%s11099_s4 + $0x20] sm:$0xff] }
0x2a45   :  { %9351 = vpow2.f32 %v7527_v42  ;;  %v3611_v42 = vld [vmem:[%s11099_s4 + $0x30] sm:$0xff] }
0x2a49   :  { %v9346_v59 = vpop.eup %9345 }
0x2a4a   :  { %3585 = vrot.lane.b32.xlu0 %v9346_v59, %s9620_s0  ;;  %v8870_v59 = vpack.c.bf16 %v3607_v57, %v3605_v35 }
0x2a4d   :  { %v9348_v50 = vpop.eup %9347 }
0x2a4e   :  { %3482 = vrot.lane.b32.xlu0 %v9348_v50, %s9620_s0  ;;  %v9350_v33 = vpop.eup %9349  ;;  %v8872_v50 = vpack.c.bf16 %v3612_v51, %v3610_v52 }
0x2a4f   :  { %v3579_v28 = vadd.f32 1.0, %v9350_v33  ;;  %v9352_v46 = vpop.eup %9351 }
0x2a50   :  { %v3476_v23 = vadd.f32 1.0, %v9352_v46  ;;  %v3638_v46 = vld [vmem:[#allocation3 + $0x88] sm:$0xff] }
0x2a51   :  { %9353 = vrcp.f32 %v3579_v28  ;;  %v8874_v28 = vpack.c.bf16 %v3611_v42, %v3609_v16 }
0x2a52   :  { %9355 = vrcp.f32 %v3476_v23  ;;  %v3639_v23 = vld [vmem:[#allocation3 + $0x90] sm:$0xff] }
0x2a5b   :  { %v9354_v12 = vpop.eup %9353 }
0x2a5c   :  { %v9356_v1 = vpop.eup %9355  ;;  %v3583_v63 = vmul.f32 %v9354_v12, %v3387_v3  ;;  %v4147_v3 = vld [vmem:[%s11100_s5] sm:$0xff] }
0x2a5d   :  { %v3480_v45 = vmul.f32 %v9356_v1, %v3284_v25  ;;  %v10361_v20 = vpack.c.bf16 %v4148_v27, %v4147_v3  ;;  %v4149_v25 = vld [vmem:[%s11100_s5 + $0x10] sm:$0xff]  ;;  %v4071_v3 = vld [vmem:[%s11101_s6] sm:$0x3] }
0x2a5e   :  { %v10371_v31 = vpack.c.bf16 %v4150_v44, %v4149_v25  ;;  %v10502_v27 = vrot.slane %v4071_v3, %v50_v38  ;;  %v10506_v25 = vrot.slane %v4071_v3, %v54_v40 }
0x2a5f   :  { %8878 = vmatpush3.bf16.msra.mxu1 %v10361_v20 }
0x2a60   :  { %8879 = vmatprep.subr.bf16.mxu1 %v9617_v0 }
0x2a63   :  { %8881 = vmatpush3.bf16.msra.mxu1 %v10371_v31 }
0x2a64   :  { %8882 = vmatprep.subr.bf16.mxu1 %v9617_v0 }
0x2a66   :  { %8321 = vmatmul.mubr.f32.vlgmr.msra.gmra.mrb[40].mxu1 %v9618_v4 }
0x2a67   :  { %8331 = vmatprep.mubr.msk.f32.mxu1 %vm9619_vm0, %v9618_v4  ;;  %8884 = vmatpush3.bf16.msra.mxu1 %v10384_v39 }
0x2a68   :  { %8885 = vmatprep.subr.bf16.mxu1 %v9617_v0 }
0x2a6b   :  { %8887 = vmatpush3.bf16.msra.mxu1 %v10401_v47 }
0x2a6c   :  { %8888 = vmatprep.subr.bf16.mxu1 %v9617_v0 }
0x2a6e   :  { %8332 = vmatmul.mubr.f32.vlgmr.msra.gmra.mrb[42].mxu1 %v9618_v4 }
0x2a6f   :  { %8890 = vmatpush3.bf16.msra.mxu1 %v10361_v20  ;;  %8342 = vmatprep.mubr.msk.f32.mxu1 %vm9619_vm0, %v9618_v4 }
0x2a70   :  { %8891 = vmatprep.subr.bf16.mxu1 %v9617_v0 }
0x2a73   :  { %8893 = vmatpush3.bf16.msra.mxu1 %v10371_v31 }
0x2a74   :  { %8894 = vmatprep.subr.bf16.mxu1 %v9617_v0 }
0x2abc   :  { %v3586_v5 = vpop.permute.xlu0 %3585 }
0x2abd   :  { %v3588_v54 = vmul.f32 %v9354_v12, %v3586_v5  ;;  %v3641_v5 = vld [vmem:[#allocation3 + $0xa0] sm:$0xff] }
0x2abf   :  { %3590 = vrot.lane.b32.xlu1 %v3588_v54, %s9620_s0  ;;  %v3642_v54 = vld [vmem:[#allocation3 + $0xa8] sm:$0xff] }
0x2ac0   :  { %v3483_v62 = vpop.permute.xlu0 %3482 }
0x2ac1   :  { %v3485_v21 = vmul.f32 %v9356_v1, %v3483_v62  ;;  %v3644_v62 = vld [vmem:[#allocation3 + $0xb8] sm:$0xff] }
0x2ac3   :  { %3487 = vrot.lane.b32.xlu0 %v3485_v21, %s9620_s0  ;;  %v3645_v21 = vld [vmem:[#allocation3 + $0xc0] sm:$0xff] }
0x2b31   :  { %v3591_v55 = vpop.permute.xlu1 %3590 }
0x2b32   :  { %v3593_v2 = vadd.f32 %v3591_v55, %v3583_v63  ;;  %v3646_v63 = vld [vmem:[#allocation3 + $0xc8] sm:$0xff]  ;;  %v3647_v55 = vld [vmem:[#allocation3 + $0xd0] sm:$0xff] }
0x2b34   :  { %9357 = vtanh.f32 %v3593_v2  ;;  %v3648_v2 = vld [vmem:[#allocation3 + $0xd8] sm:$0xff] }
0x2b35   :  { %v3488_v24 = vpop.permute.xlu0 %3487 }
0x2b36   :  { %v3490_v18 = vadd.f32 %v3488_v24, %v3480_v45  ;;  %v3649_v45 = vld [vmem:[#allocation3 + $0xe0] sm:$0xff]  ;;  %v3650_v24 = vld [vmem:[#allocation3 + $0xe8] sm:$0xff] }
0x2b38   :  { %9359 = vtanh.f32 %v3490_v18  ;;  %v3651_v18 = vld [vmem:[#allocation3 + $0xf0] sm:$0xff] }
0x2b3e   :  { %v9358_v26 = vpop.eup %9357 }
0x2b3f   :  { %3596 = vrot.lane.b32.xlu1 %v9358_v26, %s9620_s0  ;;  %v3623_v26 = vld [vmem:[#allocation3 + $0x10] sm:$0xff] }
0x2b42   :  { %v9360_v9 = vpop.eup %9359 }
0x2b43   :  { %3493 = vrot.lane.b32.xlu0 %v9360_v9, %s9620_s0  ;;  %v3624_v9 = vld [vmem:[#allocation3 + $0x18] sm:$0xff] }
0x2bb1   :  { %v3597_v13 = vpop.permute.xlu1 %3596 }
0x2bb2   :  { %v3599_v36 = vmul.f32 %v9354_v12, %v3597_v13  ;;  %v3640_v12 = vld [vmem:[#allocation3 + $0x98] sm:$0xff]  ;;  %v4222_v13 = vpop.f32.mrb[40].mxu1 }
0x2bb4   :  { %3601 = vrot.lane.b32.xlu1 %v3599_v36, %s9621_s3  ;;  %v8322_v36 = vpop.f32.mrb[41].mxu1 }
0x2bb5   :  { %v3494_v17 = vpop.permute.xlu0 %3493 }
0x2bb6   :  { %v3496_v8 = vmul.f32 %v9356_v1, %v3494_v17  ;;  %v3643_v1 = vld [vmem:[#allocation3 + $0xb0] sm:$0xff]  ;;  %v10495_v17 = vpop.f32.mrb[42].mxu1 }
0x2bb8   :  { %3498 = vrot.lane.b32.xlu1 %v3496_v8, %s9621_s3  ;;  %v8333_v8 = vpop.f32.mrb[43].mxu1 }
0x2c26   :  { %v3602_v58 = vpop.permute.xlu1 %3601 }
0x2c27   :  { %3604 = vst.msk [vmem:[#allocation3 + $0x80] sm:$0xff] %vm309_vm2, %v3602_v58 }
0x2c2a   :  { %v3499_v29 = vpop.permute.xlu1 %3498 }
0x2c2b   :  { %3501 = vst.msk [vmem:[#allocation3 + $0x78] sm:$0xff] %vm309_vm2, %v3499_v29 }
0x2c2e   :  { %v3637_v33 = vld [vmem:[#allocation3 + $0x80] sm:$0xff] }
0x2c2f   :  { %7530 = vmatmul.mubr.msk.f32.vlgmr.msra.gmra.mrb[56].mxu0 %vm309_vm2, %v3637_v33 }
0x2c30   :  { %8871 = vmatpush1.bf16.msra.mxu0 %v8870_v59  ;;  %3771 = vmatprep.mubr.f32.mxu0 %v9618_v4 }
0x2c31   :  { %8873 = vmatprep.subr.bf16.mxu0 %v8872_v50 }
0x2c32   :  { %v3636_v34 = vld [vmem:[#allocation3 + $0x78] sm:$0xff] }
0x2c33   :  { %7531 = vmatmul.mubr.msk.f32.gmra.mrb[58].mxu0 %vm309_vm2, %v3638_v46 }
0x2c34   :  { %3777 = vmatprep.mubr.f32.mxu0 %v9618_v4  ;;  %8875 = vmatpush1.bf16.msra.mxu0 %v8874_v28 }
0x2c35   :  { %8972 = vmatprep.subr.bf16.mxu0 %v9617_v0 }
0x2c37   :  { %7532 = vmatmul.mubr.msk.f32.gmra.mrb[60].mxu0 %vm309_vm2, %v3639_v23 }
0x2c38   :  { %3783 = vmatprep.mubr.f32.mxu0 %v9618_v4 }
0x2c3b   :  { %7533 = vmatmul.mubr.msk.f32.gmra.mrb[62].mxu0 %vm309_vm2, %v3640_v12 }
0x2c3c   :  { %3789 = vmatprep.mubr.f32.mxu0 %v9618_v4 }
0x2c3f   :  { %7534 = vmatmul.mubr.msk.f32.gmra.mrb[64].mxu0 %vm309_vm2, %v3641_v5 }
0x2c40   :  { %3795 = vmatprep.mubr.f32.mxu0 %v9618_v4 }
0x2c43   :  { %7535 = vmatmul.mubr.msk.f32.gmra.mrb[66].mxu0 %vm309_vm2, %v3642_v54 }
0x2c44   :  { %3801 = vmatprep.mubr.f32.mxu0 %v9618_v4 }
0x2c47   :  { %7536 = vmatmul.mubr.msk.f32.gmra.mrb[68].mxu0 %vm309_vm2, %v3643_v1 }
0x2c48   :  { %3807 = vmatprep.mubr.f32.mxu0 %v9618_v4 }
0x2c4b   :  { %7537 = vmatmul.mubr.msk.f32.gmra.mrb[70].mxu0 %vm309_vm2, %v3644_v62 }
0x2c4c   :  { %3813 = vmatprep.mubr.f32.mxu0 %v9618_v4 }
0x2c4f   :  { %7538 = vmatmul.mubr.msk.f32.gmra.mrb[72].mxu0 %vm309_vm2, %v3645_v21 }
0x2c50   :  { %3819 = vmatprep.mubr.f32.mxu0 %v9618_v4 }
0x2c53   :  { %7539 = vmatmul.mubr.msk.f32.gmra.mrb[74].mxu0 %vm309_vm2, %v3646_v63 }
0x2c54   :  { %3825 = vmatprep.mubr.f32.mxu0 %v9618_v4 }
0x2c57   :  { %7540 = vmatmul.mubr.msk.f32.gmra.mrb[76].mxu0 %vm309_vm2, %v3647_v55 }
0x2c58   :  { %3831 = vmatprep.mubr.f32.mxu0 %v9618_v4 }
0x2c5b   :  { %7541 = vmatmul.mubr.msk.f32.gmra.mrb[78].mxu0 %vm309_vm2, %v3648_v2 }
0x2c5c   :  { %3837 = vmatprep.mubr.f32.mxu0 %v9618_v4 }
0x2c5f   :  { %7542 = vmatmul.mubr.msk.f32.gmra.mrb[80].mxu0 %vm309_vm2, %v3649_v45 }
0x2c60   :  { %3843 = vmatprep.mubr.f32.mxu0 %v9618_v4 }
0x2c63   :  { %7543 = vmatmul.mubr.msk.f32.gmra.mrb[82].mxu0 %vm309_vm2, %v3650_v24 }
0x2c64   :  { %3849 = vmatprep.mubr.f32.mxu0 %v9618_v4 }
0x2c67   :  { %7544 = vmatmul.mubr.msk.f32.gmra.mrb[84].mxu0 %vm309_vm2, %v3651_v18 }
0x2c68   :  { %3855 = vmatprep.mubr.f32.mxu0 %v9618_v4 }
0x2c6b   :  { %7545 = vmatmul.mubr.msk.f32.gmra.mrb[86].mxu0 %vm309_vm2, %v3652_v7 }
0x2c6c   :  { %3974 = vmatprep.mubr.f32.mxu0 %v9618_v4 }
0x2c6f   :  { %7546 = vmatmul.mubr.msk.f32.vlgmr.msra.gmra.mrb[56].mxu0 %vm309_vm2, %v3621_v10 }
0x2c70   :  { %3980 = vmatprep.mubr.f32.mxu0 %v9618_v4  ;;  %8974 = vmatpush3.bf16.msra.mxu0 %v10361_v20 }
0x2c71   :  { %8975 = vmatprep.subr.bf16.mxu0 %v9617_v0 }
0x2c73   :  { %7547 = vmatmul.mubr.msk.f32.gmra.mrb[58].mxu0 %vm309_vm2, %v3622_v15 }
0x2c74   :  { %3986 = vmatprep.mubr.f32.mxu0 %v9618_v4  ;;  %8977 = vmatpush3.bf16.msra.mxu0 %v10371_v31 }
0x2c75   :  { %8984 = vmatprep.subr.bf16.mxu0 %v9617_v0 }
0x2c77   :  { %7548 = vmatmul.mubr.msk.f32.gmra.mrb[60].mxu0 %vm309_vm2, %v3623_v26 }
0x2c78   :  { %3992 = vmatprep.mubr.f32.mxu0 %v9618_v4 }
0x2c7b   :  { %7549 = vmatmul.mubr.msk.f32.gmra.mrb[62].mxu0 %vm309_vm2, %v3624_v9 }
0x2c7c   :  { %3998 = vmatprep.mubr.f32.mxu0 %v9618_v4 }
0x2c7f   :  { %7550 = vmatmul.mubr.msk.f32.gmra.mrb[64].mxu0 %vm309_vm2, %v3625_v22 }
0x2c80   :  { %4004 = vmatprep.mubr.f32.mxu0 %v9618_v4 }
0x2c83   :  { %7551 = vmatmul.mubr.msk.f32.gmra.mrb[66].mxu0 %vm309_vm2, %v3626_v60 }
0x2c84   :  { %4010 = vmatprep.mubr.f32.mxu0 %v9618_v4 }
0x2c87   :  { %7552 = vmatmul.mubr.msk.f32.gmra.mrb[68].mxu0 %vm309_vm2, %v3627_v56 }
0x2c88   :  { %4016 = vmatprep.mubr.f32.mxu0 %v9618_v4 }
0x2c8b   :  { %7553 = vmatmul.mubr.msk.f32.gmra.mrb[70].mxu0 %vm309_vm2, %v3628_v48 }
0x2c8c   :  { %4022 = vmatprep.mubr.f32.mxu0 %v9618_v4 }
0x2c8f   :  { %7554 = vmatmul.mubr.msk.f32.gmra.mrb[72].mxu0 %vm309_vm2, %v3629_v14 }
0x2c90   :  { %4028 = vmatprep.mubr.f32.mxu0 %v9618_v4 }
0x2c93   :  { %7555 = vmatmul.mubr.msk.f32.gmra.mrb[74].mxu0 %vm309_vm2, %v3630_v19 }
0x2c94   :  { %4034 = vmatprep.mubr.f32.mxu0 %v9618_v4 }
0x2c97   :  { %7556 = vmatmul.mubr.msk.f32.gmra.mrb[76].mxu0 %vm309_vm2, %v3631_v53 }
0x2c98   :  { %4040 = vmatprep.mubr.f32.mxu0 %v9618_v4 }
0x2c9b   :  { %7557 = vmatmul.mubr.msk.f32.gmra.mrb[78].mxu0 %vm309_vm2, %v3632_v30 }
0x2c9c   :  { %4046 = vmatprep.mubr.f32.mxu0 %v9618_v4 }
0x2c9f   :  { %7558 = vmatmul.mubr.msk.f32.gmra.mrb[80].mxu0 %vm309_vm2, %v3633_v43 }
0x2ca0   :  { %4052 = vmatprep.mubr.f32.mxu0 %v9618_v4 }
0x2ca3   :  { %7559 = vmatmul.mubr.msk.f32.gmra.mrb[82].mxu0 %vm309_vm2, %v3634_v61 }
0x2ca4   :  { %4058 = vmatprep.mubr.f32.mxu0 %v9618_v4 }
0x2ca7   :  { %7560 = vmatmul.mubr.msk.f32.gmra.mrb[84].mxu0 %vm309_vm2, %v3635_v6 }
0x2ca8   :  { %4064 = vmatprep.mubr.f32.mxu0 %v9618_v4 }
0x2cab   :  { %7561 = vmatmul.mubr.msk.f32.gmra.mrb[86].mxu0 %vm309_vm2, %v3636_v34 }
0x2cac   :  { %8496 = vmatprep.mubr.msk.f32.mxu0 %vm9619_vm0, %v9618_v4 }
0x2d42   :  { %v3976_v44 = vpop.f32.mrb[56].mxu0 }
0x2d43   :  { %v4083_v49 = vadd.f32 %v10502_v27, %v3976_v44  ;;  %v3978_v11 = vpop.f32.mrb[57].mxu0 }
0x2d44   :  { %v10510_v58 = vadd.f32 %v10506_v25, %v3978_v11 }
0x2d45   :  { %v10512_v32 = vadd.f32 %v4222_v13, %v4083_v49 }
0x2d46   :  { %v3982_v41 = vpop.f32.mrb[58].mxu0 }
0x2d47   :  { %9361 = vtanh.f32 %v10512_v32  ;;  %v10516_v35 = vadd.f32 %v10502_v27, %v3982_v41  ;;  %v3984_v38 = vpop.f32.mrb[59].mxu0 }
0x2d48   :  { %v10519_v37 = vadd.f32 %v10506_v25, %v3984_v38 }
0x2d4a   :  { %v3988_v40 = vpop.f32.mrb[60].mxu0 }
0x2d4b   :  { %v10522_v57 = vadd.f32 %v10502_v27, %v3988_v40  ;;  %v3990_v29 = vpop.f32.mrb[61].mxu0 }
0x2d4c   :  { %v10525_v52 = vadd.f32 %v10506_v25, %v3990_v29 }
0x2d4e   :  { %v3994_v51 = vpop.f32.mrb[62].mxu0 }
0x2d4f   :  { %v10528_v59 = vadd.f32 %v10502_v27, %v3994_v51  ;;  %v3996_v50 = vpop.f32.mrb[63].mxu0 }
0x2d50   :  { %v10531_v16 = vadd.f32 %v10506_v25, %v3996_v50 }
0x2d51   :  { %v9362_v42 = vpop.eup %9361 }
0x2d52   :  { %4236 = vrot.lane.b32.xlu0 %v9362_v42, %s9620_s0  ;;  %v4000_v33 = vpop.f32.mrb[64].mxu0 }
0x2d53   :  { %v10535_v28 = vadd.f32 %v10502_v27, %v4000_v33  ;;  %v4002_v46 = vpop.f32.mrb[65].mxu0 }
0x2d54   :  { %v10538_v23 = vadd.f32 %v10506_v25, %v4002_v46 }
0x2d56   :  { %v4006_v12 = vpop.f32.mrb[66].mxu0 }
0x2d57   :  { %v10541_v5 = vadd.f32 %v10502_v27, %v4006_v12  ;;  %v4008_v54 = vpop.f32.mrb[67].mxu0 }
0x2d58   :  { %v10544_v1 = vadd.f32 %v10506_v25, %v4008_v54  ;;  %v7562_v54 = vmul.f32 -1.442695, %v10512_v32 }
0x2d5a   :  { %v4012_v62 = vpop.f32.mrb[68].mxu0 }
0x2d5b   :  { %v10547_v21 = vadd.f32 %v10502_v27, %v4012_v62  ;;  %v4014_v63 = vpop.f32.mrb[69].mxu0 }
0x2d5c   :  { %v10550_v55 = vadd.f32 %v10506_v25, %v4014_v63 }
0x2d5e   :  { %v4018_v2 = vpop.f32.mrb[70].mxu0 }
0x2d5f   :  { %v10553_v45 = vadd.f32 %v10502_v27, %v4018_v2  ;;  %v4020_v24 = vpop.f32.mrb[71].mxu0 }
0x2d60   :  { %v10556_v18 = vadd.f32 %v10506_v25, %v4020_v24 }
0x2d62   :  { %v4024_v7 = vpop.f32.mrb[72].mxu0 }
0x2d63   :  { %v10559_v10 = vadd.f32 %v10502_v27, %v4024_v7  ;;  %v4026_v15 = vpop.f32.mrb[73].mxu0 }
0x2d64   :  { %v10562_v26 = vadd.f32 %v10506_v25, %v4026_v15 }
0x2d66   :  { %v4030_v9 = vpop.f32.mrb[74].mxu0 }
0x2d67   :  { %v10565_v22 = vadd.f32 %v10502_v27, %v4030_v9  ;;  %v4032_v60 = vpop.f32.mrb[75].mxu0 }
0x2d68   :  { %v10568_v56 = vadd.f32 %v10506_v25, %v4032_v60 }
0x2d6a   :  { %v4036_v48 = vpop.f32.mrb[76].mxu0 }
0x2d6b   :  { %v10571_v14 = vadd.f32 %v10502_v27, %v4036_v48  ;;  %v4038_v19 = vpop.f32.mrb[77].mxu0 }
0x2d6c   :  { %v10574_v53 = vadd.f32 %v10506_v25, %v4038_v19 }
0x2d6e   :  { %v4042_v30 = vpop.f32.mrb[78].mxu0 }
0x2d6f   :  { %v10577_v43 = vadd.f32 %v10502_v27, %v4042_v30  ;;  %v4044_v61 = vpop.f32.mrb[79].mxu0 }
0x2d70   :  { %v10580_v6 = vadd.f32 %v10506_v25, %v4044_v61 }
0x2d72   :  { %v4048_v34 = vpop.f32.mrb[80].mxu0 }
0x2d73   :  { %v10583_v13 = vadd.f32 %v10502_v27, %v4048_v34  ;;  %v4050_v36 = vpop.f32.mrb[81].mxu0 }
0x2d74   :  { %v10586_v8 = vadd.f32 %v10506_v25, %v4050_v36 }
0x2d76   :  { %v4054_v3 = vpop.f32.mrb[82].mxu0 }
0x2d77   :  { %v10589_v44 = vadd.f32 %v10502_v27, %v4054_v3  ;;  %v4056_v49 = vpop.f32.mrb[83].mxu0 }
0x2d78   :  { %v10592_v11 = vadd.f32 %v10506_v25, %v4056_v49 }
0x2d7a   :  { %v4060_v41 = vpop.f32.mrb[84].mxu0 }
0x2d7b   :  { %v10595_v38 = vadd.f32 %v10502_v27, %v4060_v41  ;;  %v4062_v40 = vpop.f32.mrb[85].mxu0 }
0x2d7c   :  { %v10598_v29 = vadd.f32 %v10506_v25, %v4062_v40 }
0x2d7e   :  { %v4066_v51 = vpop.f32.mrb[86].mxu0 }
0x2d7f   :  { %v10601_v50 = vadd.f32 %v10502_v27, %v4066_v51  ;;  %v4068_v42 = vpop.f32.mrb[87].mxu0 }
0x2d80   :  { %v4114_v33 = vadd.f32 %v10506_v25, %v4068_v42 }
0x2d82   :  { %v4327_v46 = vadd.f32 %v10495_v17, %v4114_v33 }
0x2d84   :  { %9363 = vtanh.f32 %v4327_v46  ;;  %v7563_v27 = vmul.f32 -1.442695, %v4327_v46 }
0x2d85   :  { %9365 = vpow2.f32 %v7562_v54 }
0x2d8e   :  { %v9364_v12 = vpop.eup %9363 }
0x2d8f   :  { %4337 = vrot.lane.b32.xlu1 %v9364_v12, %s9620_s0  ;;  %v9366_v62 = vpop.eup %9365 }
0x2d90   :  { %v4230_v63 = vadd.f32 1.0, %v9366_v62 }
0x2d92   :  { %9367 = vrcp.f32 %v4230_v63 }
0x2d93   :  { %9369 = vpow2.f32 %v7563_v27 }
0x2d9c   :  { %v9368_v2 = vpop.eup %9367 }
0x2d9d   :  { %v9370_v25 = vpop.eup %9369  ;;  %v4234_v32 = vmul.f32 0.0, %v9368_v2 }
0x2d9e   :  { %v4331_v15 = vadd.f32 1.0, %v9370_v25 }
0x2da0   :  { %9371 = vrcp.f32 %v4331_v15 }
0x2daa   :  { %v9372_v17 = vpop.eup %9371 }
0x2dab   :  { %v4335_v61 = vmul.f32 0.0, %v9372_v17 }
0x2dc4   :  { %v4237_v24 = vpop.permute.xlu0 %4236 }
0x2dc5   :  { %v4239_v7 = vmul.f32 %v9368_v2, %v4237_v24 }
0x2dc7   :  { %4241 = vrot.lane.b32.xlu0 %v4239_v7, %s9620_s0 }
0x2e01   :  { %v4338_v9 = vpop.permute.xlu1 %4337 }
0x2e02   :  { %v4340_v60 = vmul.f32 %v9372_v17, %v4338_v9 }
0x2e04   :  { %4342 = vrot.lane.b32.xlu1 %v4340_v60, %s9620_s0 }
0x2e39   :  { %v4242_v48 = vpop.permute.xlu0 %4241 }
0x2e3a   :  { %v10609_v19 = vadd.f32 %v4242_v48, %v4234_v32 }
0x2e3c   :  { %9373 = vtanh.f32 %v10609_v19 }
0x2e46   :  { %v9374_v30 = vpop.eup %9373 }
0x2e47   :  { %4247 = vrot.lane.b32.xlu0 %v9374_v30, %s9620_s0 }
0x2e76   :  { %v4343_v34 = vpop.permute.xlu1 %4342 }
0x2e77   :  { %v10613_v36 = vadd.f32 %v4343_v34, %v4335_v61 }
0x2e79   :  { %9375 = vtanh.f32 %v10613_v36 }
0x2e83   :  { %v9376_v3 = vpop.eup %9375 }
0x2e84   :  { %4348 = vrot.lane.b32.xlu1 %v9376_v3, %s9620_s0 }
0x2eb9   :  { %v4248_v49 = vpop.permute.xlu0 %4247 }
0x2eba   :  { %v4250_v41 = vmul.f32 %v9368_v2, %v4248_v49 }
0x2ebc   :  { %4252 = vrot.lane.b32.xlu0 %v4250_v41, %s9621_s3 }
0x2ef6   :  { %v4349_v40 = vpop.permute.xlu1 %4348 }
0x2ef7   :  { %v4351_v51 = vmul.f32 %v9372_v17, %v4349_v40 }
0x2ef9   :  { %4353 = vrot.lane.b32.xlu1 %v4351_v51, %s9621_s3 }
0x2f2e   :  { %v4253_v42 = vpop.permute.xlu0 %4252 }
0x2f2f   :  { %4255 = vst.msk [vmem:[%s11102_s7] sm:$0xff] %vm309_vm2, %v4253_v42  ;;  %8343 = vmatmul.mubr.msk.f32.vlgmr.msra.gmra.mrb[44].mxu1 %vm309_vm2, %v4253_v42 }
0x2f30   :  { %8896 = vmatpush3.bf16.msra.mxu1 %v10384_v39  ;;  %8353 = vmatprep.mubr.msk.f32.mxu1 %vm9619_vm0, %v9618_v4 }
0x2f31   :  { %8897 = vmatprep.subr.bf16.mxu1 %v9617_v0 }
0x2f34   :  { %8899 = vmatpush3.bf16.msra.mxu1 %v10401_v47 }
0x2f35   :  { %8900 = vmatprep.subr.bf16.mxu1 %v9617_v0 }
0x2f6b   :  { %v4354_v33 = vpop.permute.xlu1 %4353 }
0x2f6c   :  { %7564 = vst.msk [vmem:[%s11102_s7 + $0xf8] sm:$0xff] %vm309_vm2, %v4354_v33  ;;  %8354 = vmatmul.mubr.msk.f32.vlgmr.msra.gmra.mrb[46].mxu1 %vm309_vm2, %v4354_v33 }
0x2f6d   :  { %8902 = vmatpush3.bf16.msra.mxu1 %v10361_v20  ;;  %8364 = vmatprep.mubr.msk.f32.mxu1 %vm9619_vm0, %v9618_v4 }
0x2f6e   :  { %8903 = vmatprep.subr.bf16.mxu1 %v9617_v0 }
0x2f71   :  { %8905 = vmatpush3.bf16.msra.mxu1 %v10371_v31 }
0x2f72   :  { %8906 = vmatprep.subr.bf16.mxu1 %v9617_v0 }
0x3002   :  { %v4427_v46 = vpop.f32.mrb[44].mxu1 }
0x3003   :  { %v4431_v12 = vadd.f32 %v4427_v46, %v10516_v35  ;;  %v8344_v54 = vpop.f32.mrb[45].mxu1 }
0x3005   :  { %9377 = vtanh.f32 %v4431_v12  ;;  %v7566_v27 = vmul.f32 -1.442695, %v4431_v12 }
0x300f   :  { %v9378_v62 = vpop.eup %9377 }
0x3010   :  { %4441 = vrot.lane.b32.xlu0 %v9378_v62, %s9620_s0 }
0x303f   :  { %v4530_v63 = vpop.f32.mrb[46].mxu1 }
0x3040   :  { %v4534_v2 = vadd.f32 %v4530_v63, %v10598_v29  ;;  %v8355_v24 = vpop.f32.mrb[47].mxu1 }
0x3042   :  { %9379 = vtanh.f32 %v4534_v2  ;;  %v7568_v60 = vmul.f32 -1.442695, %v4534_v2 }
0x3043   :  { %9381 = vpow2.f32 %v7566_v27 }
0x304c   :  { %v9380_v7 = vpop.eup %9379 }
0x304d   :  { %4544 = vrot.lane.b32.xlu1 %v9380_v7, %s9620_s0  ;;  %v9382_v25 = vpop.eup %9381 }
0x304e   :  { %v4435_v15 = vadd.f32 1.0, %v9382_v25 }
0x3050   :  { %9383 = vrcp.f32 %v4435_v15 }
0x3051   :  { %9385 = vpow2.f32 %v7568_v60 }
0x305a   :  { %v9384_v17 = vpop.eup %9383 }
0x305b   :  { %v9386_v32 = vpop.eup %9385  ;;  %v4439_v34 = vmul.f32 %v9384_v17, %v10609_v19 }
0x305c   :  { %v4538_v48 = vadd.f32 1.0, %v9386_v32 }
0x305e   :  { %9387 = vrcp.f32 %v4538_v48 }
0x3068   :  { %v9388_v29 = vpop.eup %9387 }
0x3069   :  { %v4542_v40 = vmul.f32 %v9388_v29, %v10613_v36 }
0x3082   :  { %v4442_v35 = vpop.permute.xlu0 %4441 }
0x3083   :  { %v4444_v9 = vmul.f32 %v9384_v17, %v4442_v35 }
0x3085   :  { %4446 = vrot.lane.b32.xlu0 %v4444_v9, %s9620_s0 }
0x30bf   :  { %v4545_v30 = vpop.permute.xlu1 %4544 }
0x30c0   :  { %v4547_v61 = vmul.f32 %v9388_v29, %v4545_v30 }
0x30c2   :  { %4549 = vrot.lane.b32.xlu1 %v4547_v61, %s9620_s0 }
0x30f7   :  { %v4447_v3 = vpop.permute.xlu0 %4446 }
0x30f8   :  { %v4449_v49 = vadd.f32 %v4447_v3, %v4439_v34 }
0x30fa   :  { %9389 = vtanh.f32 %v4449_v49 }
0x3104   :  { %v9390_v41 = vpop.eup %9389 }
0x3105   :  { %4452 = vrot.lane.b32.xlu0 %v9390_v41, %s9620_s0 }
0x3134   :  { %v4550_v51 = vpop.permute.xlu1 %4549 }
0x3135   :  { %v4552_v42 = vadd.f32 %v4550_v51, %v4542_v40 }
0x3137   :  { %9391 = vtanh.f32 %v4552_v42 }
0x3141   :  { %v9392_v33 = vpop.eup %9391 }
0x3142   :  { %4555 = vrot.lane.b32.xlu1 %v9392_v33, %s9620_s0 }
0x3177   :  { %v4453_v46 = vpop.permute.xlu0 %4452 }
0x3178   :  { %v4455_v12 = vmul.f32 %v9384_v17, %v4453_v46 }
0x317a   :  { %4457 = vrot.lane.b32.xlu0 %v4455_v12, %s9621_s3 }
0x31b4   :  { %v4556_v54 = vpop.permute.xlu1 %4555 }
0x31b5   :  { %v4558_v19 = vmul.f32 %v9388_v29, %v4556_v54 }
0x31b7   :  { %4560 = vrot.lane.b32.xlu1 %v4558_v19, %s9621_s3 }
0x31ec   :  { %v4458_v62 = vpop.permute.xlu0 %4457 }
0x31ed   :  { %4460 = vst.msk [vmem:[%s11102_s7 + $0x8] sm:$0xff] %vm309_vm2, %v4458_v62  ;;  %8365 = vmatmul.mubr.msk.f32.vlgmr.msra.gmra.mrb[48].mxu1 %vm309_vm2, %v4458_v62 }
0x31ee   :  { %8908 = vmatpush3.bf16.msra.mxu1 %v10384_v39  ;;  %8375 = vmatprep.mubr.msk.f32.mxu1 %vm9619_vm0, %v9618_v4 }
0x31ef   :  { %8909 = vmatprep.subr.bf16.mxu1 %v9617_v0 }
0x31f2   :  { %8911 = vmatpush3.bf16.msra.mxu1 %v10401_v47 }
0x31f3   :  { %8912 = vmatprep.subr.bf16.mxu1 %v9617_v0 }
0x3229   :  { %v4561_v36 = vpop.permute.xlu1 %4560 }
0x322a   :  { %7569 = vst.msk [vmem:[%s11102_s7 + $0xf0] sm:$0xff] %vm309_vm2, %v4561_v36  ;;  %8376 = vmatmul.mubr.msk.f32.vlgmr.msra.gmra.mrb[50].mxu1 %vm309_vm2, %v4561_v36 }
0x322b   :  { %8914 = vmatpush3.bf16.msra.mxu1 %v10361_v20  ;;  %8386 = vmatprep.mubr.msk.f32.mxu1 %vm9619_vm0, %v9618_v4 }
0x322c   :  { %8915 = vmatprep.subr.bf16.mxu1 %v9617_v0 }
0x322f   :  { %8917 = vmatpush3.bf16.msra.mxu1 %v10371_v31 }
0x3230   :  { %8918 = vmatprep.subr.bf16.mxu1 %v9617_v0 }
0x32c0   :  { %v4633_v63 = vpop.f32.mrb[48].mxu1 }
0x32c1   :  { %v4637_v2 = vadd.f32 %v4633_v63, %v10522_v57  ;;  %v8366_v24 = vpop.f32.mrb[49].mxu1 }
0x32c3   :  { %9393 = vtanh.f32 %v4637_v2  ;;  %v7571_v35 = vmul.f32 -1.442695, %v4637_v2 }
0x32cd   :  { %v9394_v7 = vpop.eup %9393 }
0x32ce   :  { %4647 = vrot.lane.b32.xlu0 %v9394_v7, %s9620_s0 }
0x32fd   :  { %v4736_v27 = vpop.f32.mrb[50].mxu1 }
0x32fe   :  { %v4740_v25 = vadd.f32 %v4736_v27, %v10592_v11  ;;  %v8377_v15 = vpop.f32.mrb[51].mxu1 }
0x3300   :  { %9395 = vtanh.f32 %v4740_v25  ;;  %v7573_v29 = vmul.f32 -1.442695, %v4740_v25 }
0x3301   :  { %9397 = vpow2.f32 %v7571_v35 }
0x330a   :  { %v9396_v17 = vpop.eup %9395 }
0x330b   :  { %4750 = vrot.lane.b32.xlu1 %v9396_v17, %s9620_s0  ;;  %v9398_v9 = vpop.eup %9397 }
0x330c   :  { %v4641_v60 = vadd.f32 1.0, %v9398_v9 }
0x330e   :  { %9399 = vrcp.f32 %v4641_v60 }
0x330f   :  { %9401 = vpow2.f32 %v7573_v29 }
0x3318   :  { %v9400_v32 = vpop.eup %9399 }
0x3319   :  { %v9402_v30 = vpop.eup %9401  ;;  %v4645_v41 = vmul.f32 %v9400_v32, %v4449_v49 }
0x331a   :  { %v4744_v61 = vadd.f32 1.0, %v9402_v30 }
0x331c   :  { %9403 = vrcp.f32 %v4744_v61 }
0x3326   :  { %v9404_v11 = vpop.eup %9403 }
0x3327   :  { %v4748_v46 = vmul.f32 %v9404_v11, %v4552_v42 }
0x3340   :  { %v4648_v57 = vpop.permute.xlu0 %4647 }
0x3341   :  { %v4650_v48 = vmul.f32 %v9400_v32, %v4648_v57 }
0x3343   :  { %4652 = vrot.lane.b32.xlu0 %v4650_v48, %s9620_s0 }
0x337d   :  { %v4751_v34 = vpop.permute.xlu1 %4750 }
0x337e   :  { %v4753_v3 = vmul.f32 %v9404_v11, %v4751_v34 }
0x3380   :  { %4755 = vrot.lane.b32.xlu1 %v4753_v3, %s9620_s0 }
0x33b5   :  { %v4653_v40 = vpop.permute.xlu0 %4652 }
0x33b6   :  { %v4655_v51 = vadd.f32 %v4653_v40, %v4645_v41 }
0x33b8   :  { %9405 = vtanh.f32 %v4655_v51 }
0x33c2   :  { %v9406_v33 = vpop.eup %9405 }
0x33c3   :  { %4658 = vrot.lane.b32.xlu0 %v9406_v33, %s9620_s0 }
0x33f2   :  { %v4756_v12 = vpop.permute.xlu1 %4755 }
0x33f3   :  { %v4758_v54 = vadd.f32 %v4756_v12, %v4748_v46 }
0x33f5   :  { %9407 = vtanh.f32 %v4758_v54 }
0x33ff   :  { %v9408_v19 = vpop.eup %9407 }
0x3400   :  { %4761 = vrot.lane.b32.xlu1 %v9408_v19, %s9620_s0 }
0x3435   :  { %v4659_v62 = vpop.permute.xlu0 %4658 }
0x3436   :  { %v4661_v36 = vmul.f32 %v9400_v32, %v4659_v62 }
0x3438   :  { %4663 = vrot.lane.b32.xlu0 %v4661_v36, %s9621_s3 }
0x3472   :  { %v4762_v63 = vpop.permute.xlu1 %4761 }
0x3473   :  { %v4764_v2 = vmul.f32 %v9404_v11, %v4762_v63 }
0x3475   :  { %4766 = vrot.lane.b32.xlu1 %v4764_v2, %s9621_s3 }
0x34aa   :  { %v4664_v49 = vpop.permute.xlu0 %4663 }
0x34ab   :  { %4666 = vst.msk [vmem:[%s11102_s7 + $0x10] sm:$0xff] %vm309_vm2, %v4664_v49  ;;  %8387 = vmatmul.mubr.msk.f32.vlgmr.msra.gmra.mrb[52].mxu1 %vm309_vm2, %v4664_v49 }
0x34ac   :  { %8920 = vmatpush3.bf16.msra.mxu1 %v10384_v39  ;;  %8397 = vmatprep.mubr.msk.f32.mxu1 %vm9619_vm0, %v9618_v4 }
0x34ad   :  { %8921 = vmatprep.subr.bf16.mxu1 %v9617_v0 }
0x34b0   :  { %8923 = vmatpush3.bf16.msra.mxu1 %v10401_v47 }
0x34b1   :  { %8924 = vmatprep.subr.bf16.mxu1 %v9617_v0 }
0x34e7   :  { %v4767_v42 = vpop.permute.xlu1 %4766 }
0x34e8   :  { %7574 = vst.msk [vmem:[%s11102_s7 + $0xe8] sm:$0xff] %vm309_vm2, %v4767_v42  ;;  %8398 = vmatmul.mubr.msk.f32.vlgmr.msra.gmra.mrb[54].mxu1 %vm309_vm2, %v4767_v42 }
0x34e9   :  { %8926 = vmatpush3.bf16.msra.mxu1 %v10361_v20  ;;  %8408 = vmatprep.mubr.msk.f32.mxu1 %vm9619_vm0, %v9618_v4 }
0x34ea   :  { %8927 = vmatprep.subr.bf16.mxu1 %v9617_v0 }
0x34ed   :  { %8929 = vmatpush3.bf16.msra.mxu1 %v10371_v31 }
0x34ee   :  { %8930 = vmatprep.subr.bf16.mxu1 %v9617_v0 }
0x357e   :  { %v4839_v24 = vpop.f32.mrb[52].mxu1 }
0x357f   :  { %v4843_v7 = vadd.f32 %v4839_v24, %v10528_v59  ;;  %v8388_v27 = vpop.f32.mrb[53].mxu1 }
0x3581   :  { %9409 = vtanh.f32 %v4843_v7  ;;  %v7576_v60 = vmul.f32 -1.442695, %v4843_v7 }
0x358b   :  { %v9410_v25 = vpop.eup %9409 }
0x358c   :  { %4853 = vrot.lane.b32.xlu0 %v9410_v25, %s9620_s0 }
0x35bb   :  { %v4942_v15 = vpop.f32.mrb[54].mxu1 }
0x35bc   :  { %v4946_v17 = vadd.f32 %v4942_v15, %v10586_v8  ;;  %v8399_v35 = vpop.f32.mrb[55].mxu1 }
0x35be   :  { %9411 = vtanh.f32 %v4946_v17  ;;  %v7578_v30 = vmul.f32 -1.442695, %v4946_v17 }
0x35bf   :  { %9413 = vpow2.f32 %v7576_v60 }
0x35c8   :  { %v9412_v9 = vpop.eup %9411 }
0x35c9   :  { %4956 = vrot.lane.b32.xlu1 %v9412_v9, %s9620_s0  ;;  %v9414_v32 = vpop.eup %9413 }
0x35ca   :  { %v4847_v57 = vadd.f32 1.0, %v9414_v32 }
0x35cc   :  { %9415 = vrcp.f32 %v4847_v57 }
0x35cd   :  { %9417 = vpow2.f32 %v7578_v30 }
0x35d6   :  { %v9416_v48 = vpop.eup %9415 }
0x35d7   :  { %v9418_v61 = vpop.eup %9417  ;;  %v4851_v41 = vmul.f32 %v9416_v48, %v4655_v51 }
0x35d8   :  { %v4950_v11 = vadd.f32 1.0, %v9418_v61 }
0x35da   :  { %9419 = vrcp.f32 %v4950_v11 }
0x35e4   :  { %v9420_v8 = vpop.eup %9419 }
0x35e5   :  { %v4954_v12 = vmul.f32 %v9420_v8, %v4758_v54 }
0x35fe   :  { %v4854_v59 = vpop.permute.xlu0 %4853 }
0x35ff   :  { %v4856_v29 = vmul.f32 %v9416_v48, %v4854_v59 }
0x3601   :  { %4858 = vrot.lane.b32.xlu0 %v4856_v29, %s9620_s0 }
0x363b   :  { %v4957_v34 = vpop.permute.xlu1 %4956 }
0x363c   :  { %v4959_v3 = vmul.f32 %v9420_v8, %v4957_v34 }
0x363e   :  { %4961 = vrot.lane.b32.xlu1 %v4959_v3, %s9620_s0 }
0x3673   :  { %v4859_v40 = vpop.permute.xlu0 %4858 }
0x3674   :  { %v4861_v33 = vadd.f32 %v4859_v40, %v4851_v41 }
0x3676   :  { %9421 = vtanh.f32 %v4861_v33 }
0x3680   :  { %v9422_v46 = vpop.eup %9421 }
0x3681   :  { %4864 = vrot.lane.b32.xlu0 %v9422_v46, %s9620_s0 }
0x36b0   :  { %v4962_v19 = vpop.permute.xlu1 %4961 }
0x36b1   :  { %v4964_v62 = vadd.f32 %v4962_v19, %v4954_v12 }
0x36b3   :  { %9423 = vtanh.f32 %v4964_v62 }
0x36bd   :  { %v9424_v36 = vpop.eup %9423 }
0x36be   :  { %4967 = vrot.lane.b32.xlu1 %v9424_v36, %s9620_s0 }
0x36f3   :  { %v4865_v63 = vpop.permute.xlu0 %4864 }
0x36f4   :  { %v4867_v2 = vmul.f32 %v9416_v48, %v4865_v63 }
0x36f6   :  { %4869 = vrot.lane.b32.xlu0 %v4867_v2, %s9621_s3 }
0x3730   :  { %v4968_v49 = vpop.permute.xlu1 %4967 }
0x3731   :  { %v4970_v42 = vmul.f32 %v9420_v8, %v4968_v49 }
0x3733   :  { %4972 = vrot.lane.b32.xlu1 %v4970_v42, %s9621_s3 }
0x3768   :  { %v4870_v51 = vpop.permute.xlu0 %4869 }
0x3769   :  { %4872 = vst.msk [vmem:[%s11102_s7 + $0x18] sm:$0xff] %vm309_vm2, %v4870_v51  ;;  %8409 = vmatmul.mubr.msk.f32.vlgmr.msra.gmra.mrb[56].mxu1 %vm309_vm2, %v4870_v51 }
0x376a   :  { %8932 = vmatpush3.bf16.msra.mxu1 %v10384_v39  ;;  %8419 = vmatprep.mubr.msk.f32.mxu1 %vm9619_vm0, %v9618_v4 }
0x376b   :  { %8933 = vmatprep.subr.bf16.mxu1 %v9617_v0 }
0x376e   :  { %8935 = vmatpush3.bf16.msra.mxu1 %v10401_v47 }
0x376f   :  { %8936 = vmatprep.subr.bf16.mxu1 %v9617_v0 }
0x37a5   :  { %v4973_v54 = vpop.permute.xlu1 %4972 }
0x37a6   :  { %7579 = vst.msk [vmem:[%s11102_s7 + $0xe0] sm:$0xff] %vm309_vm2, %v4973_v54  ;;  %8420 = vmatmul.mubr.msk.f32.vlgmr.msra.gmra.mrb[58].mxu1 %vm309_vm2, %v4973_v54 }
0x37a7   :  { %8938 = vmatpush3.bf16.msra.mxu1 %v10361_v20  ;;  %8430 = vmatprep.mubr.msk.f32.mxu1 %vm9619_vm0, %v9618_v4 }
0x37a8   :  { %8939 = vmatprep.subr.bf16.mxu1 %v9617_v0 }
0x37ab   :  { %8941 = vmatpush3.bf16.msra.mxu1 %v10371_v31 }
0x37ac   :  { %8942 = vmatprep.subr.bf16.mxu1 %v9617_v0 }
0x383c   :  { %v5045_v24 = vpop.f32.mrb[56].mxu1 }
0x383d   :  { %v5049_v7 = vadd.f32 %v5045_v24, %v10535_v28  ;;  %v8410_v27 = vpop.f32.mrb[57].mxu1 }
0x383f   :  { %9425 = vtanh.f32 %v5049_v7  ;;  %v7581_v60 = vmul.f32 -1.442695, %v5049_v7 }
0x3849   :  { %v9426_v25 = vpop.eup %9425 }
0x384a   :  { %5059 = vrot.lane.b32.xlu0 %v9426_v25, %s9620_s0 }
0x3879   :  { %v5148_v15 = vpop.f32.mrb[58].mxu1 }
0x387a   :  { %v5152_v17 = vadd.f32 %v5148_v15, %v10580_v6  ;;  %v8421_v35 = vpop.f32.mrb[59].mxu1 }
0x387c   :  { %9427 = vtanh.f32 %v5152_v17  ;;  %v7583_v29 = vmul.f32 -1.442695, %v5152_v17 }
0x387d   :  { %9429 = vpow2.f32 %v7581_v60 }
0x3886   :  { %v9428_v9 = vpop.eup %9427 }
0x3887   :  { %5162 = vrot.lane.b32.xlu1 %v9428_v9, %s9620_s0  ;;  %v9430_v32 = vpop.eup %9429 }
0x3888   :  { %v5053_v57 = vadd.f32 1.0, %v9430_v32 }
0x388a   :  { %9431 = vrcp.f32 %v5053_v57 }
0x388b   :  { %9433 = vpow2.f32 %v7583_v29 }
0x3894   :  { %v9432_v48 = vpop.eup %9431 }
0x3895   :  { %v9434_v30 = vpop.eup %9433  ;;  %v5057_v34 = vmul.f32 %v9432_v48, %v4861_v33 }
0x3896   :  { %v5156_v61 = vadd.f32 1.0, %v9434_v30 }
0x3898   :  { %9435 = vrcp.f32 %v5156_v61 }
0x38a2   :  { %v9436_v6 = vpop.eup %9435 }
0x38a3   :  { %v5160_v46 = vmul.f32 %v9436_v6, %v4964_v62 }
0x38bc   :  { %v5060_v28 = vpop.permute.xlu0 %5059 }
0x38bd   :  { %v5062_v59 = vmul.f32 %v9432_v48, %v5060_v28 }
0x38bf   :  { %5064 = vrot.lane.b32.xlu0 %v5062_v59, %s9620_s0 }
0x38f9   :  { %v5163_v11 = vpop.permute.xlu1 %5162 }
0x38fa   :  { %v5165_v8 = vmul.f32 %v9436_v6, %v5163_v11 }
0x38fc   :  { %5167 = vrot.lane.b32.xlu1 %v5165_v8, %s9620_s0 }
0x3931   :  { %v5065_v3 = vpop.permute.xlu0 %5064 }
0x3932   :  { %v5067_v41 = vadd.f32 %v5065_v3, %v5057_v34 }
0x3934   :  { %9437 = vtanh.f32 %v5067_v41 }
0x393e   :  { %v9438_v40 = vpop.eup %9437 }
0x393f   :  { %5070 = vrot.lane.b32.xlu0 %v9438_v40, %s9620_s0 }
0x396e   :  { %v5168_v12 = vpop.permute.xlu1 %5167 }
0x396f   :  { %v5170_v19 = vadd.f32 %v5168_v12, %v5160_v46 }
0x3971   :  { %9439 = vtanh.f32 %v5170_v19 }
0x397b   :  { %v9440_v36 = vpop.eup %9439 }
0x397c   :  { %5173 = vrot.lane.b32.xlu1 %v9440_v36, %s9620_s0 }
0x39b1   :  { %v5071_v63 = vpop.permute.xlu0 %5070 }
0x39b2   :  { %v5073_v2 = vmul.f32 %v9432_v48, %v5071_v63 }
0x39b4   :  { %5075 = vrot.lane.b32.xlu0 %v5073_v2, %s9621_s3 }
0x39ee   :  { %v5174_v49 = vpop.permute.xlu1 %5173 }
0x39ef   :  { %v5176_v42 = vmul.f32 %v9436_v6, %v5174_v49 }
0x39f1   :  { %5178 = vrot.lane.b32.xlu1 %v5176_v42, %s9621_s3 }
0x3a26   :  { %v5076_v33 = vpop.permute.xlu0 %5075 }
0x3a27   :  { %5078 = vst.msk [vmem:[%s11102_s7 + $0x20] sm:$0xff] %vm309_vm2, %v5076_v33  ;;  %8431 = vmatmul.mubr.msk.f32.vlgmr.msra.gmra.mrb[60].mxu1 %vm309_vm2, %v5076_v33 }
0x3a28   :  { %8944 = vmatpush3.bf16.msra.mxu1 %v10384_v39  ;;  %8441 = vmatprep.mubr.msk.f32.mxu1 %vm9619_vm0, %v9618_v4 }
0x3a29   :  { %8945 = vmatprep.subr.bf16.mxu1 %v9617_v0 }
0x3a2c   :  { %8947 = vmatpush3.bf16.msra.mxu1 %v10401_v47 }
0x3a2d   :  { %8948 = vmatprep.subr.bf16.mxu1 %v9617_v0 }
0x3a63   :  { %v5179_v62 = vpop.permute.xlu1 %5178 }
0x3a64   :  { %7584 = vst.msk [vmem:[%s11102_s7 + $0xd8] sm:$0xff] %vm309_vm2, %v5179_v62  ;;  %8442 = vmatmul.mubr.msk.f32.vlgmr.msra.gmra.mrb[62].mxu1 %vm309_vm2, %v5179_v62 }
0x3a65   :  { %8950 = vmatpush3.bf16.msra.mxu1 %v10361_v20  ;;  %8452 = vmatprep.mubr.msk.f32.mxu1 %vm9619_vm0, %v9618_v4 }
0x3a66   :  { %8951 = vmatprep.subr.bf16.mxu1 %v9617_v0 }
0x3a69   :  { %8953 = vmatpush3.bf16.msra.mxu1 %v10371_v31 }
0x3a6a   :  { %8954 = vmatprep.subr.bf16.mxu1 %v9617_v0 }
0x3afa   :  { %v5251_v51 = vpop.f32.mrb[60].mxu1 }
0x3afb   :  { %v5255_v54 = vadd.f32 %v5251_v51, %v10541_v5  ;;  %v8432_v24 = vpop.f32.mrb[61].mxu1 }
0x3afd   :  { %9441 = vtanh.f32 %v5255_v54  ;;  %v7586_v35 = vmul.f32 -1.442695, %v5255_v54 }
0x3b07   :  { %v9442_v7 = vpop.eup %9441 }
0x3b08   :  { %5265 = vrot.lane.b32.xlu0 %v9442_v7, %s9620_s0 }
0x3b37   :  { %v5354_v27 = vpop.f32.mrb[62].mxu1 }
0x3b38   :  { %v5358_v25 = vadd.f32 %v5354_v27, %v10574_v53  ;;  %v8443_v15 = vpop.f32.mrb[63].mxu1 }
0x3b3a   :  { %9443 = vtanh.f32 %v5358_v25  ;;  %v7588_v48 = vmul.f32 -1.442695, %v5358_v25 }
0x3b3b   :  { %9445 = vpow2.f32 %v7586_v35 }
0x3b44   :  { %v9444_v17 = vpop.eup %9443 }
0x3b45   :  { %5368 = vrot.lane.b32.xlu1 %v9444_v17, %s9620_s0  ;;  %v9446_v9 = vpop.eup %9445 }
0x3b46   :  { %v5259_v60 = vadd.f32 1.0, %v9446_v9 }
0x3b48   :  { %9447 = vrcp.f32 %v5259_v60 }
0x3b49   :  { %9449 = vpow2.f32 %v7588_v48 }
0x3b52   :  { %v9448_v32 = vpop.eup %9447 }
0x3b53   :  { %v9450_v28 = vpop.eup %9449  ;;  %v5263_v61 = vmul.f32 %v9448_v32, %v5067_v41 }
0x3b54   :  { %v5362_v59 = vadd.f32 1.0, %v9450_v28 }
0x3b56   :  { %9451 = vrcp.f32 %v5362_v59 }
0x3b60   :  { %v9452_v53 = vpop.eup %9451 }
0x3b61   :  { %v5366_v34 = vmul.f32 %v9452_v53, %v5170_v19 }
0x3b7a   :  { %v5266_v5 = vpop.permute.xlu0 %5265 }
0x3b7b   :  { %v5268_v57 = vmul.f32 %v9448_v32, %v5266_v5 }
0x3b7d   :  { %5270 = vrot.lane.b32.xlu0 %v5268_v57, %s9620_s0 }
0x3bb7   :  { %v5369_v29 = vpop.permute.xlu1 %5368 }
0x3bb8   :  { %v5371_v30 = vmul.f32 %v9452_v53, %v5369_v29 }
0x3bba   :  { %5373 = vrot.lane.b32.xlu1 %v5371_v30, %s9620_s0 }
0x3bef   :  { %v5271_v6 = vpop.permute.xlu0 %5270 }
0x3bf0   :  { %v5273_v11 = vadd.f32 %v5271_v6, %v5263_v61 }
0x3bf2   :  { %9453 = vtanh.f32 %v5273_v11 }
0x3bfc   :  { %v9454_v8 = vpop.eup %9453 }
0x3bfd   :  { %5276 = vrot.lane.b32.xlu0 %v9454_v8, %s9620_s0 }
0x3c2c   :  { %v5374_v3 = vpop.permute.xlu1 %5373 }
0x3c2d   :  { %v5376_v40 = vadd.f32 %v5374_v3, %v5366_v34 }
0x3c2f   :  { %9455 = vtanh.f32 %v5376_v40 }
0x3c39   :  { %v9456_v46 = vpop.eup %9455 }
0x3c3a   :  { %5379 = vrot.lane.b32.xlu1 %v9456_v46, %s9620_s0 }
0x3c6f   :  { %v5277_v12 = vpop.permute.xlu0 %5276 }
0x3c70   :  { %v5279_v36 = vmul.f32 %v9448_v32, %v5277_v12 }
0x3c72   :  { %5281 = vrot.lane.b32.xlu0 %v5279_v36, %s9621_s3 }
0x3cac   :  { %v5380_v63 = vpop.permute.xlu1 %5379 }
0x3cad   :  { %v5382_v2 = vmul.f32 %v9452_v53, %v5380_v63 }
0x3caf   :  { %5384 = vrot.lane.b32.xlu1 %v5382_v2, %s9621_s3 }
0x3ce4   :  { %v5282_v41 = vpop.permute.xlu0 %5281 }
0x3ce5   :  { %5284 = vst.msk [vmem:[%s11102_s7 + $0x28] sm:$0xff] %vm309_vm2, %v5282_v41  ;;  %8453 = vmatmul.mubr.msk.f32.vlgmr.msra.gmra.mrb[64].mxu1 %vm309_vm2, %v5282_v41 }
0x3ce6   :  { %8956 = vmatpush3.bf16.msra.mxu1 %v10384_v39  ;;  %8463 = vmatprep.mubr.msk.f32.mxu1 %vm9619_vm0, %v9618_v4 }
0x3ce7   :  { %8957 = vmatprep.subr.bf16.mxu1 %v9617_v0 }
0x3cea   :  { %8959 = vmatpush3.bf16.msra.mxu1 %v10401_v47 }
0x3ceb   :  { %8960 = vmatprep.subr.bf16.mxu1 %v9617_v0 }
0x3d21   :  { %v5385_v19 = vpop.permute.xlu1 %5384 }
0x3d22   :  { %7589 = vst.msk [vmem:[%s11102_s7 + $0xd0] sm:$0xff] %vm309_vm2, %v5385_v19  ;;  %8464 = vmatmul.mubr.msk.f32.vlgmr.msra.gmra.mrb[66].mxu1 %vm309_vm2, %v5385_v19 }
0x3d23   :  { %8962 = vmatpush3.bf16.msra.mxu1 %v10361_v20  ;;  %8474 = vmatprep.mubr.msk.f32.mxu1 %vm9619_vm0, %v9618_v4 }
0x3d24   :  { %8963 = vmatprep.subr.bf16.mxu1 %v9617_v0 }
0x3d27   :  { %8965 = vmatpush3.bf16.msra.mxu1 %v10371_v31 }
0x3d28   :  { %8966 = vmatprep.subr.bf16.mxu1 %v9617_v0 }
0x3db8   :  { %v5457_v49 = vpop.f32.mrb[64].mxu1 }
0x3db9   :  { %v5461_v42 = vadd.f32 %v5457_v49, %v10547_v21  ;;  %v8454_v33 = vpop.f32.mrb[65].mxu1 }
0x3dbb   :  { %9457 = vtanh.f32 %v5461_v42  ;;  %v7591_v27 = vmul.f32 -1.442695, %v5461_v42 }
0x3dc5   :  { %v9458_v62 = vpop.eup %9457 }
0x3dc6   :  { %5471 = vrot.lane.b32.xlu0 %v9458_v62, %s9620_s0 }
0x3df5   :  { %v5560_v51 = vpop.f32.mrb[66].mxu1 }
0x3df6   :  { %v5564_v54 = vadd.f32 %v5560_v51, %v10568_v56  ;;  %v8465_v24 = vpop.f32.mrb[67].mxu1 }
0x3df8   :  { %9459 = vtanh.f32 %v5564_v54  ;;  %v7593_v9 = vmul.f32 -1.442695, %v5564_v54 }
0x3df9   :  { %9461 = vpow2.f32 %v7591_v27 }
0x3e02   :  { %v9460_v7 = vpop.eup %9459 }
0x3e03   :  { %5574 = vrot.lane.b32.xlu1 %v9460_v7, %s9620_s0  ;;  %v9462_v25 = vpop.eup %9461 }
0x3e04   :  { %v5465_v15 = vadd.f32 1.0, %v9462_v25 }
0x3e06   :  { %9463 = vrcp.f32 %v5465_v15 }
0x3e07   :  { %9465 = vpow2.f32 %v7593_v9 }
0x3e10   :  { %v9464_v17 = vpop.eup %9463 }
0x3e11   :  { %v9466_v60 = vpop.eup %9465  ;;  %v5469_v48 = vmul.f32 %v9464_v17, %v5273_v11 }
0x3e12   :  { %v5568_v32 = vadd.f32 1.0, %v9466_v60 }
0x3e14   :  { %9467 = vrcp.f32 %v5568_v32 }
0x3e1e   :  { %v9468_v56 = vpop.eup %9467 }
0x3e1f   :  { %v5572_v29 = vmul.f32 %v9468_v56, %v5376_v40 }
0x3e38   :  { %v5472_v21 = vpop.permute.xlu0 %5471 }
0x3e39   :  { %v5474_v35 = vmul.f32 %v9464_v17, %v5472_v21 }
0x3e3b   :  { %5476 = vrot.lane.b32.xlu0 %v5474_v35, %s9620_s0 }
0x3e75   :  { %v5575_v5 = vpop.permute.xlu1 %5574 }
0x3e76   :  { %v5577_v57 = vmul.f32 %v9468_v56, %v5575_v5 }
0x3e78   :  { %5579 = vrot.lane.b32.xlu1 %v5577_v57, %s9620_s0 }
0x3ead   :  { %v5477_v28 = vpop.permute.xlu0 %5476 }
0x3eae   :  { %v5479_v59 = vadd.f32 %v5477_v28, %v5469_v48 }
0x3eb0   :  { %9469 = vtanh.f32 %v5479_v59 }
0x3eba   :  { %v9470_v53 = vpop.eup %9469 }
0x3ebb   :  { %5482 = vrot.lane.b32.xlu0 %v9470_v53, %s9620_s0 }
0x3eea   :  { %v5580_v30 = vpop.permute.xlu1 %5579 }
0x3eeb   :  { %v5582_v61 = vadd.f32 %v5580_v30, %v5572_v29 }
0x3eed   :  { %9471 = vtanh.f32 %v5582_v61 }
0x3ef7   :  { %v9472_v6 = vpop.eup %9471 }
0x3ef8   :  { %5585 = vrot.lane.b32.xlu1 %v9472_v6, %s9620_s0 }
0x3f2d   :  { %v5483_v8 = vpop.permute.xlu0 %5482 }
0x3f2e   :  { %v5485_v34 = vmul.f32 %v9464_v17, %v5483_v8 }
0x3f30   :  { %5487 = vrot.lane.b32.xlu0 %v5485_v34, %s9621_s3 }
0x3f6a   :  { %v5586_v3 = vpop.permute.xlu1 %5585 }
0x3f6b   :  { %v5588_v46 = vmul.f32 %v9468_v56, %v5586_v3 }
0x3f6d   :  { %5590 = vrot.lane.b32.xlu1 %v5588_v46, %s9621_s3 }
0x3fa2   :  { %v5488_v11 = vpop.permute.xlu0 %5487 }
0x3fa3   :  { %5490 = vst.msk [vmem:[%s11102_s7 + $0x30] sm:$0xff] %vm309_vm2, %v5488_v11  ;;  %8475 = vmatmul.mubr.msk.f32.vlgmr.msra.gmra.mrb[68].mxu1 %vm309_vm2, %v5488_v11 }
0x3fa4   :  { %8968 = vmatpush3.bf16.msra.mxu1 %v10384_v39  ;;  %8485 = vmatprep.mubr.msk.f32.mxu1 %vm9619_vm0, %v9618_v4 }
0x3fa5   :  { %8969 = vmatprep.subr.bf16.mxu1 %v9617_v0 }
0x3fa8   :  { %8971 = vmatpush3.bf16.msra.mxu1 %v10401_v47 }
0x3fa9   :  { %8978 = vmatprep.subr.bf16.mxu1 %v9617_v0 }
0x3fdf   :  { %v5591_v40 = vpop.permute.xlu1 %5590 }
0x3fe0   :  { %7594 = vst.msk [vmem:[%s11102_s7 + $0xc8] sm:$0xff] %vm309_vm2, %v5591_v40  ;;  %8486 = vmatmul.mubr.msk.f32.vlgmr.msra.gmra.mrb[70].mxu1 %vm309_vm2, %v5591_v40 }
0x3fe1   :  { %8980 = vmatpush3.bf16.msra.mxu1 %v10384_v39  ;;  %8507 = vmatprep.mubr.msk.f32.mxu1 %vm9619_vm0, %v9618_v4 }
0x3fe2   :  { %8981 = vmatprep.subr.bf16.mxu1 %v9617_v0 }
0x3fe5   :  { %8983 = vmatpush3.bf16.msra.mxu1 %v10401_v47 }
0x3fe6   :  { %8990 = vmatprep.subr.bf16.mxu1 %v9617_v0 }
0x4076   :  { %v5663_v12 = vpop.f32.mrb[68].mxu1 }
0x4077   :  { %v5667_v36 = vadd.f32 %v5663_v12, %v10553_v45  ;;  %v8476_v63 = vpop.f32.mrb[69].mxu1 }
0x4079   :  { %9473 = vtanh.f32 %v5667_v36  ;;  %v7596_v33 = vmul.f32 -1.442695, %v5667_v36 }
0x4083   :  { %v9474_v2 = vpop.eup %9473 }
0x4084   :  { %5677 = vrot.lane.b32.xlu0 %v9474_v2, %s9620_s0 }
0x40b3   :  { %v5766_v41 = vpop.f32.mrb[70].mxu1 }
0x40b4   :  { %v5770_v19 = vadd.f32 %v5766_v41, %v10562_v26  ;;  %v8487_v49 = vpop.f32.mrb[71].mxu1 }
0x40b6   :  { %9475 = vtanh.f32 %v5770_v19  ;;  %v7598_v7 = vmul.f32 -1.442695, %v5770_v19 }
0x40b7   :  { %9477 = vpow2.f32 %v7596_v33 }
0x40c0   :  { %v9476_v42 = vpop.eup %9475 }
0x40c1   :  { %5780 = vrot.lane.b32.xlu1 %v9476_v42, %s9620_s0  ;;  %v9478_v62 = vpop.eup %9477 }
0x40c2   :  { %v5671_v51 = vadd.f32 1.0, %v9478_v62 }
0x40c4   :  { %9479 = vrcp.f32 %v5671_v51 }
0x40c5   :  { %9481 = vpow2.f32 %v7598_v7 }
0x40ce   :  { %v9480_v54 = vpop.eup %9479 }
0x40cf   :  { %v9482_v27 = vpop.eup %9481  ;;  %v5675_v21 = vmul.f32 %v9480_v54, %v5479_v59 }
0x40d0   :  { %v5774_v25 = vadd.f32 1.0, %v9482_v27 }
0x40d2   :  { %9483 = vrcp.f32 %v5774_v25 }
0x40dc   :  { %v9484_v26 = vpop.eup %9483 }
0x40dd   :  { %v5778_v32 = vmul.f32 %v9484_v26, %v5582_v61 }
0x40f6   :  { %v5678_v45 = vpop.permute.xlu0 %5677 }
0x40f7   :  { %v5680_v24 = vmul.f32 %v9480_v54, %v5678_v45 }
0x40f9   :  { %5682 = vrot.lane.b32.xlu0 %v5680_v24, %s9620_s0 }
0x4133   :  { %v5781_v15 = vpop.permute.xlu1 %5780 }
0x4134   :  { %v5783_v17 = vmul.f32 %v9484_v26, %v5781_v15 }
0x4136   :  { %5785 = vrot.lane.b32.xlu1 %v5783_v17, %s9620_s0 }
0x416b   :  { %v5683_v35 = vpop.permute.xlu0 %5682 }
0x416c   :  { %v5685_v9 = vadd.f32 %v5683_v35, %v5675_v21 }
0x416e   :  { %9485 = vtanh.f32 %v5685_v9 }
0x4178   :  { %v9486_v60 = vpop.eup %9485 }
0x4179   :  { %5688 = vrot.lane.b32.xlu0 %v9486_v60, %s9620_s0 }
0x41a8   :  { %v5786_v56 = vpop.permute.xlu1 %5785 }
0x41a9   :  { %v5788_v5 = vadd.f32 %v5786_v56, %v5778_v32 }
0x41ab   :  { %9487 = vtanh.f32 %v5788_v5 }
0x41b5   :  { %v9488_v57 = vpop.eup %9487 }
0x41b6   :  { %5791 = vrot.lane.b32.xlu1 %v9488_v57, %s9620_s0 }
0x41eb   :  { %v5689_v48 = vpop.permute.xlu0 %5688 }
0x41ec   :  { %v5691_v28 = vmul.f32 %v9480_v54, %v5689_v48 }
0x41ee   :  { %5693 = vrot.lane.b32.xlu0 %v5691_v28, %s9621_s3 }
0x4228   :  { %v5792_v53 = vpop.permute.xlu1 %5791 }
0x4229   :  { %v5794_v29 = vmul.f32 %v9484_v26, %v5792_v53 }
0x422b   :  { %5796 = vrot.lane.b32.xlu1 %v5794_v29, %s9621_s3 }
0x4260   :  { %v5694_v59 = vpop.permute.xlu0 %5693 }
0x4261   :  { %5696 = vst.msk [vmem:[%s11102_s7 + $0x38] sm:$0xff] %vm309_vm2, %v5694_v59  ;;  %8497 = vmatmul.mubr.msk.f32.vlgmr.msra.gmra.mrb[88].mxu0 %vm309_vm2, %v5694_v59 }
0x4262   :  { %8986 = vmatpush3.bf16.msra.mxu0 %v10361_v20  ;;  %8518 = vmatprep.mubr.msk.f32.mxu0 %vm9619_vm0, %v9618_v4 }
0x4263   :  { %8987 = vmatprep.subr.bf16.mxu0 %v9617_v0 }
0x4266   :  { %8989 = vmatpush3.bf16.msra.mxu0 %v10371_v31 }
0x4267   :  { %8996 = vmatprep.subr.bf16.mxu0 %v9617_v0 }
0x429d   :  { %v5797_v30 = vpop.permute.xlu1 %5796 }
0x429e   :  { %7599 = vst.msk [vmem:[%s11102_s7 + $0xc0] sm:$0xff] %vm309_vm2, %v5797_v30  ;;  %8508 = vmatmul.mubr.msk.f32.vlgmr.msra.gmra.mrb[72].mxu1 %vm309_vm2, %v5797_v30 }
0x429f   :  { %8992 = vmatpush3.bf16.msra.mxu1 %v10384_v39  ;;  %8529 = vmatprep.mubr.msk.f32.mxu1 %vm9619_vm0, %v9618_v4 }
0x42a0   :  { %8993 = vmatprep.subr.bf16.mxu1 %v9617_v0 }
0x42a3   :  { %8995 = vmatpush3.bf16.msra.mxu1 %v10401_v47 }
0x42a4   :  { %9002 = vmatprep.subr.bf16.mxu1 %v9617_v0 }
0x4334   :  { %v5869_v61 = vpop.f32.mrb[88].mxu0 }
0x4335   :  { %v5873_v6 = vadd.f32 %v5869_v61, %v10559_v10  ;;  %v8498_v8 = vpop.f32.mrb[89].mxu0 }
0x4337   :  { %9489 = vtanh.f32 %v5873_v6  ;;  %v7601_v12 = vmul.f32 -1.442695, %v5873_v6 }
0x4341   :  { %v9490_v34 = vpop.eup %9489 }
0x4342   :  { %5883 = vrot.lane.b32.xlu0 %v9490_v34, %s9620_s0 }
0x4371   :  { %v5972_v3 = vpop.f32.mrb[72].mxu1 }
0x4372   :  { %v5976_v46 = vadd.f32 %v5972_v3, %v10556_v18  ;;  %v8509_v11 = vpop.f32.mrb[73].mxu1 }
0x4374   :  { %9491 = vtanh.f32 %v5976_v46  ;;  %v7603_v19 = vmul.f32 -1.442695, %v5976_v46 }
0x4375   :  { %9493 = vpow2.f32 %v7601_v12 }
0x437e   :  { %v9492_v40 = vpop.eup %9491 }
0x437f   :  { %5986 = vrot.lane.b32.xlu1 %v9492_v40, %s9620_s0  ;;  %v9494_v36 = vpop.eup %9493 }
0x4380   :  { %v5877_v63 = vadd.f32 1.0, %v9494_v36 }
0x4382   :  { %9495 = vrcp.f32 %v5877_v63 }
0x4383   :  { %9497 = vpow2.f32 %v7603_v19 }
0x438c   :  { %v9496_v2 = vpop.eup %9495 }
0x438d   :  { %v9498_v49 = vpop.eup %9497  ;;  %v5881_v51 = vmul.f32 %v9496_v2, %v5685_v9 }
0x438e   :  { %v5980_v42 = vadd.f32 1.0, %v9498_v49 }
0x4390   :  { %9499 = vrcp.f32 %v5980_v42 }
0x439a   :  { %v9500_v18 = vpop.eup %9499 }
0x439b   :  { %v5984_v7 = vmul.f32 %v9500_v18, %v5788_v5 }
0x43b4   :  { %v5884_v10 = vpop.permute.xlu0 %5883 }
0x43b5   :  { %v5886_v41 = vmul.f32 %v9496_v2, %v5884_v10 }
0x43b7   :  { %5888 = vrot.lane.b32.xlu0 %v5886_v41, %s9620_s0 }
0x43f1   :  { %v5987_v33 = vpop.permute.xlu1 %5986 }
0x43f2   :  { %v5989_v62 = vmul.f32 %v9500_v18, %v5987_v33 }
0x43f4   :  { %5991 = vrot.lane.b32.xlu1 %v5989_v62, %s9620_s0 }
0x4429   :  { %v5889_v54 = vpop.permute.xlu0 %5888 }
0x442a   :  { %v5891_v45 = vadd.f32 %v5889_v54, %v5881_v51 }
0x442c   :  { %9501 = vtanh.f32 %v5891_v45 }
0x4436   :  { %v9502_v24 = vpop.eup %9501 }
0x4437   :  { %5894 = vrot.lane.b32.xlu0 %v9502_v24, %s9620_s0 }
0x4466   :  { %v5992_v27 = vpop.permute.xlu1 %5991 }
0x4467   :  { %v5994_v25 = vadd.f32 %v5992_v27, %v5984_v7 }
0x4469   :  { %9503 = vtanh.f32 %v5994_v25 }
0x4473   :  { %v9504_v26 = vpop.eup %9503 }
0x4474   :  { %5997 = vrot.lane.b32.xlu1 %v9504_v26, %s9620_s0 }
0x44a9   :  { %v5895_v15 = vpop.permute.xlu0 %5894 }
0x44aa   :  { %v5897_v17 = vmul.f32 %v9496_v2, %v5895_v15 }
0x44ac   :  { %5899 = vrot.lane.b32.xlu0 %v5897_v17, %s9621_s3 }
0x44e6   :  { %v5998_v21 = vpop.permute.xlu1 %5997 }
0x44e7   :  { %v6000_v35 = vmul.f32 %v9500_v18, %v5998_v21 }
0x44e9   :  { %6002 = vrot.lane.b32.xlu1 %v6000_v35, %s9621_s3 }
0x451e   :  { %v5900_v9 = vpop.permute.xlu0 %5899 }
0x451f   :  { %5902 = vst.msk [vmem:[%s11102_s7 + $0x40] sm:$0xff] %vm309_vm2, %v5900_v9  ;;  %8519 = vmatmul.mubr.msk.f32.vlgmr.msra.gmra.mrb[90].mxu0 %vm309_vm2, %v5900_v9 }
0x4520   :  { %8998 = vmatpush3.bf16.msra.mxu0 %v10361_v20  ;;  %8540 = vmatprep.mubr.msk.f32.mxu0 %vm9619_vm0, %v9618_v4 }
0x4521   :  { %8999 = vmatprep.subr.bf16.mxu0 %v9617_v0 }
0x4524   :  { %9001 = vmatpush3.bf16.msra.mxu0 %v10371_v31 }
0x4525   :  { %9008 = vmatprep.subr.bf16.mxu0 %v9617_v0 }
0x455b   :  { %v6003_v60 = vpop.permute.xlu1 %6002 }
0x455c   :  { %7604 = vst.msk [vmem:[%s11102_s7 + $0xb8] sm:$0xff] %vm309_vm2, %v6003_v60  ;;  %8530 = vmatmul.mubr.msk.f32.vlgmr.msra.gmra.mrb[74].mxu1 %vm309_vm2, %v6003_v60 }
0x455d   :  { %9004 = vmatpush3.bf16.msra.mxu1 %v10384_v39  ;;  %8551 = vmatprep.mubr.msk.f32.mxu1 %vm9619_vm0, %v9618_v4 }
0x455e   :  { %9005 = vmatprep.subr.bf16.mxu1 %v9617_v0 }
0x4561   :  { %9007 = vmatpush3.bf16.msra.mxu1 %v10401_v47 }
0x4562   :  { %9014 = vmatprep.subr.bf16.mxu1 %v9617_v0 }
0x45f2   :  { %v6075_v32 = vpop.f32.mrb[90].mxu0 }
0x45f3   :  { %v6079_v56 = vadd.f32 %v6075_v32, %v10565_v22  ;;  %v8520_v5 = vpop.f32.mrb[91].mxu0 }
0x45f5   :  { %9505 = vtanh.f32 %v6079_v56  ;;  %v7606_v59 = vmul.f32 -1.442695, %v6079_v56 }
0x45ff   :  { %v9506_v57 = vpop.eup %9505 }
0x4600   :  { %6089 = vrot.lane.b32.xlu0 %v9506_v57, %s9620_s0 }
0x462f   :  { %v6178_v48 = vpop.f32.mrb[74].mxu1 }
0x4630   :  { %v6182_v28 = vadd.f32 %v6178_v48, %v10550_v55  ;;  %v8531_v53 = vpop.f32.mrb[75].mxu1 }
0x4632   :  { %9507 = vtanh.f32 %v6182_v28  ;;  %v7608_v34 = vmul.f32 -1.442695, %v6182_v28 }
0x4633   :  { %9509 = vpow2.f32 %v7606_v59 }
0x463c   :  { %v9508_v29 = vpop.eup %9507 }
0x463d   :  { %6192 = vrot.lane.b32.xlu1 %v9508_v29, %s9620_s0  ;;  %v9510_v30 = vpop.eup %9509 }
0x463e   :  { %v6083_v61 = vadd.f32 1.0, %v9510_v30 }
0x4640   :  { %9511 = vrcp.f32 %v6083_v61 }
0x4641   :  { %9513 = vpow2.f32 %v7608_v34 }
0x464a   :  { %v9512_v6 = vpop.eup %9511 }
0x464b   :  { %v9514_v3 = vpop.eup %9513  ;;  %v6087_v12 = vmul.f32 %v9512_v6, %v5891_v45 }
0x464c   :  { %v6186_v46 = vadd.f32 1.0, %v9514_v3 }
0x464e   :  { %9515 = vrcp.f32 %v6186_v46 }
0x4658   :  { %v9516_v55 = vpop.eup %9515 }
0x4659   :  { %v6190_v10 = vmul.f32 %v9516_v55, %v5994_v25 }
0x4672   :  { %v6090_v22 = vpop.permute.xlu0 %6089 }
0x4673   :  { %v6092_v8 = vmul.f32 %v9512_v6, %v6090_v22 }
0x4675   :  { %6094 = vrot.lane.b32.xlu0 %v6092_v8, %s9620_s0 }
0x46af   :  { %v6193_v11 = vpop.permute.xlu1 %6192 }
0x46b0   :  { %v6195_v40 = vmul.f32 %v9516_v55, %v6193_v11 }
0x46b2   :  { %6197 = vrot.lane.b32.xlu1 %v6195_v40, %s9620_s0 }
0x46e7   :  { %v6095_v36 = vpop.permute.xlu0 %6094 }
0x46e8   :  { %v6097_v63 = vadd.f32 %v6095_v36, %v6087_v12 }
0x46ea   :  { %9517 = vtanh.f32 %v6097_v63 }
0x46f4   :  { %v9518_v2 = vpop.eup %9517 }
0x46f5   :  { %6100 = vrot.lane.b32.xlu0 %v9518_v2, %s9620_s0 }
0x4724   :  { %v6198_v41 = vpop.permute.xlu1 %6197 }
0x4725   :  { %v6200_v19 = vadd.f32 %v6198_v41, %v6190_v10 }
0x4727   :  { %9519 = vtanh.f32 %v6200_v19 }
0x4731   :  { %v9520_v49 = vpop.eup %9519 }
0x4732   :  { %6203 = vrot.lane.b32.xlu1 %v9520_v49, %s9620_s0 }
0x4767   :  { %v6101_v42 = vpop.permute.xlu0 %6100 }
0x4768   :  { %v6103_v18 = vmul.f32 %v9512_v6, %v6101_v42 }
0x476a   :  { %6105 = vrot.lane.b32.xlu0 %v6103_v18, %s9621_s3 }
0x47a4   :  { %v6204_v33 = vpop.permute.xlu1 %6203 }
0x47a5   :  { %v6206_v62 = vmul.f32 %v9516_v55, %v6204_v33 }
0x47a7   :  { %6208 = vrot.lane.b32.xlu1 %v6206_v62, %s9621_s3 }
0x47dc   :  { %v6106_v51 = vpop.permute.xlu0 %6105 }
0x47dd   :  { %6108 = vst.msk [vmem:[%s11102_s7 + $0x48] sm:$0xff] %vm309_vm2, %v6106_v51  ;;  %8541 = vmatmul.mubr.msk.f32.vlgmr.msra.gmra.mrb[92].mxu0 %vm309_vm2, %v6106_v51 }
0x47de   :  { %9010 = vmatpush3.bf16.msra.mxu0 %v10361_v20  ;;  %8562 = vmatprep.mubr.msk.f32.mxu0 %vm9619_vm0, %v9618_v4 }
0x47df   :  { %9011 = vmatprep.subr.bf16.mxu0 %v9617_v0 }
0x47e2   :  { %9013 = vmatpush3.bf16.msra.mxu0 %v10371_v31 }
0x47e3   :  { %9020 = vmatprep.subr.bf16.mxu0 %v9617_v0 }
0x4819   :  { %v6209_v54 = vpop.permute.xlu1 %6208 }
0x481a   :  { %7609 = vst.msk [vmem:[%s11102_s7 + $0xb0] sm:$0xff] %vm309_vm2, %v6209_v54  ;;  %8552 = vmatmul.mubr.msk.f32.vlgmr.msra.gmra.mrb[76].mxu1 %vm309_vm2, %v6209_v54 }
0x481b   :  { %9016 = vmatpush3.bf16.msra.mxu1 %v10384_v39  ;;  %8573 = vmatprep.mubr.msk.f32.mxu1 %vm9619_vm0, %v9618_v4 }
0x481c   :  { %9017 = vmatprep.subr.bf16.mxu1 %v9617_v0 }
0x481f   :  { %9019 = vmatpush3.bf16.msra.mxu1 %v10401_v47 }
0x4820   :  { %9026 = vmatprep.subr.bf16.mxu1 %v9617_v0 }
0x48b0   :  { %v6281_v45 = vpop.f32.mrb[92].mxu0 }
0x48b1   :  { %v6285_v24 = vadd.f32 %v6281_v45, %v10571_v14  ;;  %v8542_v7 = vpop.f32.mrb[93].mxu0 }
0x48b3   :  { %9521 = vtanh.f32 %v6285_v24  ;;  %v7611_v21 = vmul.f32 -1.442695, %v6285_v24 }
0x48bd   :  { %v9522_v27 = vpop.eup %9521 }
0x48be   :  { %6295 = vrot.lane.b32.xlu0 %v9522_v27, %s9620_s0 }
0x48ed   :  { %v6384_v25 = vpop.f32.mrb[76].mxu1 }
0x48ee   :  { %v6388_v26 = vadd.f32 %v6384_v25, %v10544_v1  ;;  %v8553_v15 = vpop.f32.mrb[77].mxu1 }
0x48f0   :  { %9523 = vtanh.f32 %v6388_v26  ;;  %v7613_v56 = vmul.f32 -1.442695, %v6388_v26 }
0x48f1   :  { %9525 = vpow2.f32 %v7611_v21 }
0x48fa   :  { %v9524_v17 = vpop.eup %9523 }
0x48fb   :  { %6398 = vrot.lane.b32.xlu1 %v9524_v17, %s9620_s0  ;;  %v9526_v35 = vpop.eup %9525 }
0x48fc   :  { %v6289_v9 = vadd.f32 1.0, %v9526_v35 }
0x48fe   :  { %9527 = vrcp.f32 %v6289_v9 }
0x48ff   :  { %9529 = vpow2.f32 %v7613_v56 }
0x4908   :  { %v9528_v60 = vpop.eup %9527 }
0x4909   :  { %v9530_v5 = vpop.eup %9529  ;;  %v6293_v53 = vmul.f32 %v9528_v60, %v6097_v63 }
0x490a   :  { %v6392_v57 = vadd.f32 1.0, %v9530_v5 }
0x490c   :  { %9531 = vrcp.f32 %v6392_v57 }
0x4916   :  { %v9532_v1 = vpop.eup %9531 }
0x4917   :  { %v6396_v61 = vmul.f32 %v9532_v1, %v6200_v19 }
0x4930   :  { %v6296_v14 = vpop.permute.xlu0 %6295 }
0x4931   :  { %v6298_v32 = vmul.f32 %v9528_v60, %v6296_v14 }
0x4933   :  { %6300 = vrot.lane.b32.xlu0 %v6298_v32, %s9620_s0 }
0x496d   :  { %v6399_v48 = vpop.permute.xlu1 %6398 }
0x496e   :  { %v6401_v28 = vmul.f32 %v9532_v1, %v6399_v48 }
0x4970   :  { %6403 = vrot.lane.b32.xlu1 %v6401_v28, %s9620_s0 }
0x49a5   :  { %v6301_v29 = vpop.permute.xlu0 %6300 }
0x49a6   :  { %v6303_v59 = vadd.f32 %v6301_v29, %v6293_v53 }
0x49a8   :  { %9533 = vtanh.f32 %v6303_v59 }
0x49b2   :  { %v9534_v30 = vpop.eup %9533 }
0x49b3   :  { %6306 = vrot.lane.b32.xlu0 %v9534_v30, %s9620_s0 }
0x49e2   :  { %v6404_v6 = vpop.permute.xlu1 %6403 }
0x49e3   :  { %v6406_v22 = vadd.f32 %v6404_v6, %v6396_v61 }
0x49e5   :  { %9535 = vtanh.f32 %v6406_v22 }
0x49ef   :  { %v9536_v8 = vpop.eup %9535 }
0x49f0   :  { %6409 = vrot.lane.b32.xlu1 %v9536_v8, %s9620_s0 }
0x4a25   :  { %v6307_v34 = vpop.permute.xlu0 %6306 }
0x4a26   :  { %v6309_v3 = vmul.f32 %v9528_v60, %v6307_v34 }
0x4a28   :  { %6311 = vrot.lane.b32.xlu0 %v6309_v3, %s9621_s3 }
0x4a62   :  { %v6410_v46 = vpop.permute.xlu1 %6409 }
0x4a63   :  { %v6412_v55 = vmul.f32 %v9532_v1, %v6410_v46 }
0x4a65   :  { %6414 = vrot.lane.b32.xlu1 %v6412_v55, %s9621_s3 }
0x4a9a   :  { %v6312_v11 = vpop.permute.xlu0 %6311 }
0x4a9b   :  { %6314 = vst.msk [vmem:[%s11102_s7 + $0x50] sm:$0xff] %vm309_vm2, %v6312_v11  ;;  %8563 = vmatmul.mubr.msk.f32.vlgmr.msra.gmra.mrb[94].mxu0 %vm309_vm2, %v6312_v11 }
0x4a9c   :  { %9022 = vmatpush3.bf16.msra.mxu0 %v10361_v20  ;;  %8584 = vmatprep.mubr.msk.f32.mxu0 %vm9619_vm0, %v9618_v4 }
0x4a9d   :  { %9023 = vmatprep.subr.bf16.mxu0 %v9617_v0 }
0x4aa0   :  { %9025 = vmatpush3.bf16.msra.mxu0 %v10371_v31 }
0x4aa1   :  { %9032 = vmatprep.subr.bf16.mxu0 %v9617_v0 }
0x4ad7   :  { %v6415_v40 = vpop.permute.xlu1 %6414 }
0x4ad8   :  { %7614 = vst.msk [vmem:[%s11102_s7 + $0xa8] sm:$0xff] %vm309_vm2, %v6415_v40  ;;  %8574 = vmatmul.mubr.msk.f32.vlgmr.msra.gmra.mrb[78].mxu1 %vm309_vm2, %v6415_v40 }
0x4ad9   :  { %9028 = vmatpush3.bf16.msra.mxu1 %v10384_v39  ;;  %8595 = vmatprep.mubr.msk.f32.mxu1 %vm9619_vm0, %v9618_v4 }
0x4ada   :  { %9029 = vmatprep.subr.bf16.mxu1 %v9617_v0 }
0x4add   :  { %9031 = vmatpush3.bf16.msra.mxu1 %v10401_v47 }
0x4ade   :  { %9038 = vmatprep.subr.bf16.mxu1 %v9617_v0 }
0x4b6e   :  { %v6487_v12 = vpop.f32.mrb[94].mxu0 }
0x4b6f   :  { %v6491_v36 = vadd.f32 %v6487_v12, %v10577_v43  ;;  %v8564_v63 = vpop.f32.mrb[95].mxu0 }
0x4b71   :  { %9537 = vtanh.f32 %v6491_v36  ;;  %v7616_v42 = vmul.f32 -1.442695, %v6491_v36 }
0x4b7b   :  { %v9538_v2 = vpop.eup %9537 }
0x4b7c   :  { %6501 = vrot.lane.b32.xlu0 %v9538_v2, %s9620_s0 }
0x4bab   :  { %v6590_v10 = vpop.f32.mrb[78].mxu1 }
0x4bac   :  { %v6594_v41 = vadd.f32 %v6590_v10, %v10538_v23  ;;  %v8575_v19 = vpop.f32.mrb[79].mxu1 }
0x4bae   :  { %9539 = vtanh.f32 %v6594_v41  ;;  %v7618_v54 = vmul.f32 -1.442695, %v6594_v41 }
0x4baf   :  { %9541 = vpow2.f32 %v7616_v42 }
0x4bb8   :  { %v9540_v49 = vpop.eup %9539 }
0x4bb9   :  { %6604 = vrot.lane.b32.xlu1 %v9540_v49, %s9620_s0  ;;  %v9542_v18 = vpop.eup %9541 }
0x4bba   :  { %v6495_v33 = vadd.f32 1.0, %v9542_v18 }
0x4bbc   :  { %9543 = vrcp.f32 %v6495_v33 }
0x4bbd   :  { %9545 = vpow2.f32 %v7618_v54 }
0x4bc6   :  { %v9544_v62 = vpop.eup %9543 }
0x4bc7   :  { %v9546_v45 = vpop.eup %9545  ;;  %v6499_v25 = vmul.f32 %v9544_v62, %v6303_v59 }
0x4bc8   :  { %v6598_v24 = vadd.f32 1.0, %v9546_v45 }
0x4bca   :  { %9547 = vrcp.f32 %v6598_v24 }
0x4bd4   :  { %v9548_v23 = vpop.eup %9547 }
0x4bd5   :  { %v6602_v21 = vmul.f32 %v9548_v23, %v6406_v22 }
0x4bee   :  { %v6502_v43 = vpop.permute.xlu0 %6501 }
0x4bef   :  { %v6504_v51 = vmul.f32 %v9544_v62, %v6502_v43 }
0x4bf1   :  { %6506 = vrot.lane.b32.xlu0 %v6504_v51, %s9620_s0 }
0x4c2b   :  { %v6605_v7 = vpop.permute.xlu1 %6604 }
0x4c2c   :  { %v6607_v27 = vmul.f32 %v9548_v23, %v6605_v7 }
0x4c2e   :  { %6609 = vrot.lane.b32.xlu1 %v6607_v27, %s9620_s0 }
0x4c63   :  { %v6507_v26 = vpop.permute.xlu0 %6506 }
0x4c64   :  { %v6509_v15 = vadd.f32 %v6507_v26, %v6499_v25 }
0x4c66   :  { %9549 = vtanh.f32 %v6509_v15 }
0x4c70   :  { %v9550_v17 = vpop.eup %9549 }
0x4c71   :  { %6512 = vrot.lane.b32.xlu0 %v9550_v17, %s9620_s0 }
0x4ca0   :  { %v6610_v35 = vpop.permute.xlu1 %6609 }
0x4ca1   :  { %v6612_v9 = vadd.f32 %v6610_v35, %v6602_v21 }
0x4ca3   :  { %9551 = vtanh.f32 %v6612_v9 }
0x4cad   :  { %v9552_v60 = vpop.eup %9551 }
0x4cae   :  { %6615 = vrot.lane.b32.xlu1 %v9552_v60, %s9620_s0 }
0x4ce3   :  { %v6513_v14 = vpop.permute.xlu0 %6512 }
0x4ce4   :  { %v6515_v32 = vmul.f32 %v9544_v62, %v6513_v14 }
0x4ce6   :  { %6517 = vrot.lane.b32.xlu0 %v6515_v32, %s9621_s3 }
0x4d20   :  { %v6616_v56 = vpop.permute.xlu1 %6615 }
0x4d21   :  { %v6618_v5 = vmul.f32 %v9548_v23, %v6616_v56 }
0x4d23   :  { %6620 = vrot.lane.b32.xlu1 %v6618_v5, %s9621_s3 }
0x4d58   :  { %v6518_v57 = vpop.permute.xlu0 %6517 }
0x4d59   :  { %6520 = vst.msk [vmem:[%s11102_s7 + $0x58] sm:$0xff] %vm309_vm2, %v6518_v57  ;;  %8585 = vmatmul.mubr.msk.f32.vlgmr.msra.gmra.mrb[96].mxu0 %vm309_vm2, %v6518_v57 }
0x4d5a   :  { %9034 = vmatpush3.bf16.msra.mxu0 %v10361_v20  ;;  %8606 = vmatprep.mubr.msk.f32.mxu0 %vm9619_vm0, %v9618_v4 }
0x4d5b   :  { %9035 = vmatprep.subr.bf16.mxu0 %v9617_v0 }
0x4d5e   :  { %9037 = vmatpush3.bf16.msra.mxu0 %v10371_v31 }
0x4d5f   :  { %9044 = vmatprep.subr.bf16.mxu0 %v9617_v0 }
0x4d95   :  { %v6621_v1 = vpop.permute.xlu1 %6620 }
0x4d96   :  { %7619 = vst.msk [vmem:[%s11102_s7 + $0xa0] sm:$0xff] %vm309_vm2, %v6621_v1  ;;  %8596 = vmatmul.mubr.msk.f32.vlgmr.msra.gmra.mrb[80].mxu1 %vm309_vm2, %v6621_v1 }
0x4d97   :  { %9040 = vmatpush3.bf16.msra.mxu1 %v10384_v39  ;;  %8617 = vmatprep.mubr.msk.f32.mxu1 %vm9619_vm0, %v9618_v4 }
0x4d98   :  { %9041 = vmatprep.subr.bf16.mxu1 %v9617_v0 }
0x4d9b   :  { %9043 = vmatpush3.bf16.msra.mxu1 %v10401_v47 }
0x4d9c   :  { %9050 = vmatprep.subr.bf16.mxu1 %v9617_v0 }
0x4e2c   :  { %v6693_v48 = vpop.f32.mrb[96].mxu0 }
0x4e2d   :  { %v6697_v28 = vadd.f32 %v6693_v48, %v10583_v13  ;;  %v8586_v53 = vpop.f32.mrb[97].mxu0 }
0x4e2f   :  { %9553 = vtanh.f32 %v6697_v28  ;;  %v7621_v22 = vmul.f32 -1.442695, %v6697_v28 }
0x4e39   :  { %v9554_v29 = vpop.eup %9553 }
0x4e3a   :  { %6707 = vrot.lane.b32.xlu0 %v9554_v29, %s9620_s0 }
0x4e69   :  { %v6796_v59 = vpop.f32.mrb[80].mxu1 }
0x4e6a   :  { %v6800_v30 = vadd.f32 %v6796_v59, %v10531_v16  ;;  %v8597_v61 = vpop.f32.mrb[81].mxu1 }
0x4e6c   :  { %9555 = vtanh.f32 %v6800_v30  ;;  %v7623_v55 = vmul.f32 -1.442695, %v6800_v30 }
0x4e6d   :  { %9557 = vpow2.f32 %v7621_v22 }
0x4e76   :  { %v9556_v6 = vpop.eup %9555 }
0x4e77   :  { %6810 = vrot.lane.b32.xlu1 %v9556_v6, %s9620_s0  ;;  %v9558_v8 = vpop.eup %9557 }
0x4e78   :  { %v6701_v34 = vadd.f32 1.0, %v9558_v8 }
0x4e7a   :  { %9559 = vrcp.f32 %v6701_v34 }
0x4e7b   :  { %9561 = vpow2.f32 %v7623_v55 }
0x4e84   :  { %v9560_v3 = vpop.eup %9559 }
0x4e85   :  { %v9562_v11 = vpop.eup %9561  ;;  %v6705_v63 = vmul.f32 %v9560_v3, %v6509_v15 }
0x4e86   :  { %v6804_v40 = vadd.f32 1.0, %v9562_v11 }
0x4e88   :  { %9563 = vrcp.f32 %v6804_v40 }
0x4e92   :  { %v9564_v16 = vpop.eup %9563 }
0x4e93   :  { %v6808_v19 = vmul.f32 %v9564_v16, %v6612_v9 }
0x4eac   :  { %v6708_v13 = vpop.permute.xlu0 %6707 }
0x4ead   :  { %v6710_v46 = vmul.f32 %v9560_v3, %v6708_v13 }
0x4eaf   :  { %6712 = vrot.lane.b32.xlu0 %v6710_v46, %s9620_s0 }
0x4ee9   :  { %v6811_v12 = vpop.permute.xlu1 %6810 }
0x4eea   :  { %v6813_v36 = vmul.f32 %v9564_v16, %v6811_v12 }
0x4eec   :  { %6815 = vrot.lane.b32.xlu1 %v6813_v36, %s9620_s0 }
0x4f21   :  { %v6713_v2 = vpop.permute.xlu0 %6712 }
0x4f22   :  { %v6715_v10 = vadd.f32 %v6713_v2, %v6705_v63 }
0x4f24   :  { %9565 = vtanh.f32 %v6715_v10 }
0x4f2e   :  { %v9566_v41 = vpop.eup %9565 }
0x4f2f   :  { %6718 = vrot.lane.b32.xlu0 %v9566_v41, %s9620_s0 }
0x4f5e   :  { %v6816_v49 = vpop.permute.xlu1 %6815 }
0x4f5f   :  { %v6818_v42 = vadd.f32 %v6816_v49, %v6808_v19 }
0x4f61   :  { %9567 = vtanh.f32 %v6818_v42 }
0x4f6b   :  { %v9568_v18 = vpop.eup %9567 }
0x4f6c   :  { %6821 = vrot.lane.b32.xlu1 %v9568_v18, %s9620_s0 }
0x4fa1   :  { %v6719_v33 = vpop.permute.xlu0 %6718 }
0x4fa2   :  { %v6721_v62 = vmul.f32 %v9560_v3, %v6719_v33 }
0x4fa4   :  { %6723 = vrot.lane.b32.xlu0 %v6721_v62, %s9621_s3 }
0x4fde   :  { %v6822_v43 = vpop.permute.xlu1 %6821 }
0x4fdf   :  { %v6824_v51 = vmul.f32 %v9564_v16, %v6822_v43 }
0x4fe1   :  { %6826 = vrot.lane.b32.xlu1 %v6824_v51, %s9621_s3 }
0x5016   :  { %v6724_v54 = vpop.permute.xlu0 %6723 }
0x5017   :  { %6726 = vst.msk [vmem:[%s11102_s7 + $0x60] sm:$0xff] %vm309_vm2, %v6724_v54  ;;  %8607 = vmatmul.mubr.msk.f32.vlgmr.msra.gmra.mrb[98].mxu0 %vm309_vm2, %v6724_v54 }
0x5018   :  { %9046 = vmatpush3.bf16.msra.mxu0 %v10361_v20  ;;  %8628 = vmatprep.mubr.msk.f32.mxu0 %vm9619_vm0, %v9618_v4 }
0x5019   :  { %9047 = vmatprep.subr.bf16.mxu0 %v9617_v0 }
0x501c   :  { %9049 = vmatpush3.bf16.msra.mxu0 %v10371_v31 }
0x501d   :  { %9056 = vmatprep.subr.bf16.mxu0 %v9617_v0 }
0x5053   :  { %v6827_v45 = vpop.permute.xlu1 %6826 }
0x5054   :  { %7624 = vst.msk [vmem:[%s11102_s7 + $0x98] sm:$0xff] %vm309_vm2, %v6827_v45  ;;  %8618 = vmatmul.mubr.msk.f32.vlgmr.msra.gmra.mrb[82].mxu1 %vm309_vm2, %v6827_v45 }
0x5055   :  { %9052 = vmatpush3.bf16.msra.mxu1 %v10384_v39  ;;  %8639 = vmatprep.mubr.msk.f32.mxu1 %vm9619_vm0, %v9618_v4 }
0x5056   :  { %9053 = vmatprep.subr.bf16.mxu1 %v9617_v0 }
0x5059   :  { %9055 = vmatpush3.bf16.msra.mxu1 %v10401_v47 }
0x505a   :  { %9062 = vmatprep.subr.bf16.mxu1 %v9617_v0 }
0x50ea   :  { %v6899_v24 = vpop.f32.mrb[98].mxu0 }
0x50eb   :  { %v6903_v23 = vadd.f32 %v6899_v24, %v10589_v44  ;;  %v8608_v7 = vpop.f32.mrb[99].mxu0 }
0x50ed   :  { %9569 = vtanh.f32 %v6903_v23  ;;  %v7626_v21 = vmul.f32 -1.442695, %v6903_v23 }
0x50f7   :  { %v9570_v27 = vpop.eup %9569 }
0x50f8   :  { %6913 = vrot.lane.b32.xlu0 %v9570_v27, %s9620_s0 }
0x5127   :  { %v7002_v25 = vpop.f32.mrb[82].mxu1 }
0x5128   :  { %v7006_v26 = vadd.f32 %v7002_v25, %v10525_v52  ;;  %v8619_v15 = vpop.f32.mrb[83].mxu1 }
0x512a   :  { %9571 = vtanh.f32 %v7006_v26  ;;  %v7628_v32 = vmul.f32 -1.442695, %v7006_v26 }
0x512b   :  { %9573 = vpow2.f32 %v7626_v21 }
0x5134   :  { %v9572_v17 = vpop.eup %9571 }
0x5135   :  { %7016 = vrot.lane.b32.xlu1 %v9572_v17, %s9620_s0  ;;  %v9574_v35 = vpop.eup %9573 }
0x5136   :  { %v6907_v9 = vadd.f32 1.0, %v9574_v35 }
0x5138   :  { %9575 = vrcp.f32 %v6907_v9 }
0x5139   :  { %9577 = vpow2.f32 %v7628_v32 }
0x5142   :  { %v9576_v60 = vpop.eup %9575 }
0x5143   :  { %v9578_v56 = vpop.eup %9577  ;;  %v6911_v48 = vmul.f32 %v9576_v60, %v6715_v10 }
0x5144   :  { %v7010_v5 = vadd.f32 1.0, %v9578_v56 }
0x5146   :  { %9579 = vrcp.f32 %v7010_v5 }
0x5150   :  { %v9580_v52 = vpop.eup %9579 }
0x5151   :  { %v7014_v59 = vmul.f32 %v9580_v52, %v6818_v42 }
0x516a   :  { %v6914_v44 = vpop.permute.xlu0 %6913 }
0x516b   :  { %v6916_v14 = vmul.f32 %v9576_v60, %v6914_v44 }
0x516d   :  { %6918 = vrot.lane.b32.xlu0 %v6916_v14, %s9620_s0 }
0x51a7   :  { %v7017_v57 = vpop.permute.xlu1 %7016 }
0x51a8   :  { %v7019_v1 = vmul.f32 %v9580_v52, %v7017_v57 }
0x51aa   :  { %7021 = vrot.lane.b32.xlu1 %v7019_v1, %s9620_s0 }
0x51df   :  { %v6919_v28 = vpop.permute.xlu0 %6918 }
0x51e0   :  { %v6921_v53 = vadd.f32 %v6919_v28, %v6911_v48 }
0x51e2   :  { %9581 = vtanh.f32 %v6921_v53 }
0x51ec   :  { %v9582_v29 = vpop.eup %9581 }
0x51ed   :  { %6924 = vrot.lane.b32.xlu0 %v9582_v29, %s9620_s0 }
0x521c   :  { %v7022_v30 = vpop.permute.xlu1 %7021 }
0x521d   :  { %v7024_v61 = vadd.f32 %v7022_v30, %v7014_v59 }
0x521f   :  { %9583 = vtanh.f32 %v7024_v61 }
0x5229   :  { %v9584_v6 = vpop.eup %9583 }
0x522a   :  { %7027 = vrot.lane.b32.xlu1 %v9584_v6, %s9620_s0 }
0x525f   :  { %v6925_v22 = vpop.permute.xlu0 %6924 }
0x5260   :  { %v6927_v8 = vmul.f32 %v9576_v60, %v6925_v22 }
0x5262   :  { %6929 = vrot.lane.b32.xlu0 %v6927_v8, %s9621_s3 }
0x529c   :  { %v7028_v34 = vpop.permute.xlu1 %7027 }
0x529d   :  { %v7030_v3 = vmul.f32 %v9580_v52, %v7028_v34 }
0x529f   :  { %7032 = vrot.lane.b32.xlu1 %v7030_v3, %s9621_s3 }
0x52d4   :  { %v6930_v13 = vpop.permute.xlu0 %6929 }
0x52d5   :  { %6932 = vst.msk [vmem:[%s11102_s7 + $0x68] sm:$0xff] %vm309_vm2, %v6930_v13  ;;  %8629 = vmatmul.mubr.msk.f32.vlgmr.msra.gmra.mrb[100].mxu0 %vm309_vm2, %v6930_v13 }
0x52d6   :  { %9058 = vmatpush3.bf16.msra.mxu0 %v10361_v20  ;;  %8650 = vmatprep.mubr.msk.f32.mxu0 %vm9619_vm0, %v9618_v4 }
0x52d7   :  { %9059 = vmatprep.subr.bf16.mxu0 %v9617_v0 }
0x52da   :  { %9061 = vmatpush3.bf16.msra.mxu0 %v10371_v31 }
0x5311   :  { %v7033_v46 = vpop.permute.xlu1 %7032 }
0x5312   :  { %7629 = vst.msk [vmem:[%s11102_s7 + $0x90] sm:$0xff] %vm309_vm2, %v7033_v46  ;;  %8640 = vmatmul.mubr.msk.f32.vlgmr.msra.gmra.mrb[84].mxu1 %vm309_vm2, %v7033_v46 }
0x5313   :  { %9064 = vmatpush3.bf16.msra.mxu1 %v10384_v39  ;;  %8661 = vmatprep.mubr.msk.f32.mxu1 %vm9619_vm0, %v9618_v4 }
0x5314   :  { %9065 = vmatprep.subr.bf16.mxu1 %v9617_v0 }
0x5317   :  { %9067 = vmatpush3.bf16.msra.mxu1 %v10401_v47 }
0x53a8   :  { %v7105_v20 = vpop.f32.mrb[100].mxu0 }
0x53a9   :  { %v7109_v31 = vadd.f32 %v7105_v20, %v10595_v38  ;;  %v8630_v55 = vpop.f32.mrb[101].mxu0 }
0x53ab   :  { %9585 = vtanh.f32 %v7109_v31  ;;  %v7631_v4 = vmul.f32 -1.442695, %v7109_v31 }
0x53b5   :  { %v9586_v11 = vpop.eup %9585 }
0x53b6   :  { %7119 = vrot.lane.b32.xlu0 %v9586_v11, %s9620_s0 }
0x53e5   :  { %v7208_v40 = vpop.f32.mrb[84].mxu1 }
0x53e6   :  { %v7212_v16 = vadd.f32 %v7208_v40, %v10519_v37  ;;  %v8641_v12 = vpop.f32.mrb[85].mxu1 }
0x53e8   :  { %9587 = vtanh.f32 %v7212_v16  ;;  %v7633_v2 = vmul.f32 -1.442695, %v7212_v16 }
0x53e9   :  { %9589 = vpow2.f32 %v7631_v4 }
0x53f2   :  { %v9588_v39 = vpop.eup %9587 }
0x53f3   :  { %7222 = vrot.lane.b32.xlu1 %v9588_v39, %s9620_s0  ;;  %v9590_v0 = vpop.eup %9589 }
0x53f4   :  { %v7113_v47 = vadd.f32 1.0, %v9590_v0 }
0x53f6   :  { %9591 = vrcp.f32 %v7113_v47 }
0x53f7   :  { %9593 = vpow2.f32 %v7633_v2 }
0x5400   :  { %v9592_v36 = vpop.eup %9591 }
0x5401   :  { %v9594_v10 = vpop.eup %9593  ;;  %v7117_v42 = vmul.f32 %v9592_v36, %v6921_v53 }
0x5402   :  { %v7216_v41 = vadd.f32 1.0, %v9594_v10 }
0x5404   :  { %9595 = vrcp.f32 %v7216_v41 }
0x540e   :  { %v9596_v37 = vpop.eup %9595 }
0x540f   :  { %v7220_v43 = vmul.f32 %v9596_v37, %v7024_v61 }
0x5428   :  { %v7120_v38 = vpop.permute.xlu0 %7119 }
0x5429   :  { %v7122_v63 = vmul.f32 %v9592_v36, %v7120_v38 }
0x542b   :  { %7124 = vrot.lane.b32.xlu0 %v7122_v63, %s9620_s0 }
0x5465   :  { %v7223_v19 = vpop.permute.xlu1 %7222 }
0x5466   :  { %v7225_v49 = vmul.f32 %v9596_v37, %v7223_v19 }
0x5468   :  { %7227 = vrot.lane.b32.xlu1 %v7225_v49, %s9620_s0 }
0x549d   :  { %v7125_v18 = vpop.permute.xlu0 %7124 }
0x549e   :  { %v7127_v33 = vadd.f32 %v7125_v18, %v7117_v42 }
0x54a0   :  { %9597 = vtanh.f32 %v7127_v33 }
0x54aa   :  { %v9598_v62 = vpop.eup %9597 }
0x54ab   :  { %7130 = vrot.lane.b32.xlu0 %v9598_v62, %s9620_s0 }
0x54da   :  { %v7228_v51 = vpop.permute.xlu1 %7227 }
0x54db   :  { %v7230_v54 = vadd.f32 %v7228_v51, %v7220_v43 }
0x54dd   :  { %9599 = vtanh.f32 %v7230_v54 }
0x54e7   :  { %v9600_v45 = vpop.eup %9599 }
0x54e8   :  { %7233 = vrot.lane.b32.xlu1 %v9600_v45, %s9620_s0 }
0x551d   :  { %v7131_v24 = vpop.permute.xlu0 %7130 }
0x551e   :  { %v7133_v23 = vmul.f32 %v9592_v36, %v7131_v24 }
0x5520   :  { %7135 = vrot.lane.b32.xlu0 %v7133_v23, %s9621_s3 }
0x555a   :  { %v7234_v7 = vpop.permute.xlu1 %7233 }
0x555b   :  { %v7236_v27 = vmul.f32 %v9596_v37, %v7234_v7 }
0x555d   :  { %7238 = vrot.lane.b32.xlu1 %v7236_v27, %s9621_s3 }
0x5592   :  { %v7136_v25 = vpop.permute.xlu0 %7135 }
0x5593   :  { %7138 = vst.msk [vmem:[%s11102_s7 + $0x70] sm:$0xff] %vm309_vm2, %v7136_v25  ;;  %8651 = vmatmul.mubr.msk.f32.vlgmr.msra.gmra.mrb[102].mxu0 %vm309_vm2, %v7136_v25 }
0x55cf   :  { %v7239_v26 = vpop.permute.xlu1 %7238 }
0x55d0   :  { %7634 = vst.msk [vmem:[%s11102_s7 + $0x88] sm:$0xff] %vm309_vm2, %v7239_v26  ;;  %8662 = vmatmul.mubr.msk.f32.vlgmr.msra.gmra.mrb[86].mxu1 %vm309_vm2, %v7239_v26 }
0x5666   :  { %v7311_v15 = vpop.f32.mrb[102].mxu0 }
0x5667   :  { %v7315_v17 = vadd.f32 %v7311_v15, %v10601_v50  ;;  %v8652_v21 = vpop.f32.mrb[103].mxu0 }
0x5669   :  { %9601 = vtanh.f32 %v7315_v17  ;;  %v7636_v32 = vmul.f32 -1.442695, %v7315_v17 }
0x5673   :  { %v9602_v35 = vpop.eup %9601 }
0x5674   :  { %7325 = vrot.lane.b32.xlu0 %v9602_v35, %s9620_s0 }
0x56a3   :  { %v7414_v9 = vpop.f32.mrb[86].mxu1 }
0x56a4   :  { %v7418_v60 = vadd.f32 %v7414_v9, %v10510_v58  ;;  %v8663_v44 = vpop.f32.mrb[87].mxu1 }
0x56a6   :  { %9603 = vtanh.f32 %v7418_v60  ;;  %v7638_v1 = vmul.f32 -1.442695, %v7418_v60 }
0x56a7   :  { %9605 = vpow2.f32 %v7636_v32 }
0x56b0   :  { %v9604_v14 = vpop.eup %9603 }
0x56b1   :  { %7428 = vrot.lane.b32.xlu1 %v9604_v14, %s9620_s0  ;;  %v9606_v56 = vpop.eup %9605 }
0x56b2   :  { %v7319_v5 = vadd.f32 1.0, %v9606_v56 }
0x56b4   :  { %9607 = vrcp.f32 %v7319_v5 }
0x56b5   :  { %9609 = vpow2.f32 %v7638_v1 }
0x56be   :  { %v9608_v52 = vpop.eup %9607 }
0x56bf   :  { %v9610_v48 = vpop.eup %9609  ;;  %v7323_v59 = vmul.f32 %v9608_v52, %v7127_v33 }
0x56c0   :  { %v7422_v28 = vadd.f32 1.0, %v9610_v48 }
0x56c2   :  { %9611 = vrcp.f32 %v7422_v28 }
0x56cc   :  { %v9612_v58 = vpop.eup %9611 }
0x56cd   :  { %v7426_v22 = vmul.f32 %v9612_v58, %v7230_v54 }
0x56e6   :  { %v7326_v50 = vpop.permute.xlu0 %7325 }
0x56e7   :  { %v7328_v57 = vmul.f32 %v9608_v52, %v7326_v50 }
0x56e9   :  { %7330 = vrot.lane.b32.xlu0 %v7328_v57, %s9620_s0 }
0x5723   :  { %v7429_v53 = vpop.permute.xlu1 %7428 }
0x5724   :  { %v7431_v29 = vmul.f32 %v9612_v58, %v7429_v53 }
0x5726   :  { %7433 = vrot.lane.b32.xlu1 %v7431_v29, %s9620_s0 }
0x575b   :  { %v7331_v30 = vpop.permute.xlu0 %7330 }
0x575c   :  { %v7333_v61 = vadd.f32 %v7331_v30, %v7323_v59 }
0x575e   :  { %9613 = vtanh.f32 %v7333_v61 }
0x5768   :  { %v9614_v6 = vpop.eup %9613 }
0x5769   :  { %7336 = vrot.lane.b32.xlu0 %v9614_v6, %s9620_s0 }
0x5798   :  { %v7434_v8 = vpop.permute.xlu1 %7433 }
0x5799   :  { %v7436_v34 = vadd.f32 %v7434_v8, %v7426_v22 }
0x579b   :  { %9615 = vtanh.f32 %v7436_v34 }
0x57a5   :  { %v9616_v3 = vpop.eup %9615 }
0x57a6   :  { %7439 = vrot.lane.b32.xlu1 %v9616_v3, %s9620_s0 }
0x57db   :  { %v7337_v13 = vpop.permute.xlu0 %7336 }
0x57dc   :  { %v7339_v46 = vmul.f32 %v9608_v52, %v7337_v13 }
0x57de   :  { %7341 = vrot.lane.b32.xlu0 %v7339_v46, %s9621_s3 }
0x5818   :  { %v7440_v20 = vpop.permute.xlu1 %7439 }
0x5819   :  { %v7442_v31 = vmul.f32 %v9612_v58, %v7440_v20 }
0x581b   :  { %7444 = vrot.lane.b32.xlu1 %v7442_v31, %s9621_s3 }
0x5850   :  { %v7342_v55 = vpop.permute.xlu0 %7341 }
0x5851   :  { %7344 = vst.msk [vmem:[%s11102_s7 + $0x78] sm:$0xff] %vm309_vm2, %v7342_v55 }
0x588d   :  { %v7445_v11 = vpop.permute.xlu1 %7444 }
0x588e   :  { %7639 = vst.msk [vmem:[%s11102_s7 + $0x80] sm:$0xff] %vm309_vm2, %v7445_v11 }

</bundles_post_ra>
